<compile_context>
chip_gen: v5e
topology: v5e:2x2
jax: 0.10.0
libtpu: 0.0.40
codegen_flags: <defaults>
</compile_context>

<pallas_src>
import functools

import jax
import jax.numpy as jnp
import numpy as np
from jax.experimental import pallas as pl
from jax.experimental.pallas import tpu as pltpu

BN_EPS = 1e-5
LEAKY_SLOPE = 0.1
STAT_ROWS = 8  # stats rows padded to a full sublane tile (rows 0/1 used)


def _conv_stats_halfpool_kernel(x_ref, w_ref, hp_ref, stats_ref, *scratch,
                                H, W, Cin, fold):
    # x_ref:    (1, H*Wp, Cin)  bf16  width-padded image rows, flat
    # w_ref:    (9*Cin, Cp)     bf16  conv1 taps, row k = (dy*3+dx)*Cin + ci
    # hp_ref:   (1, Hf, Cp)     f32   width-direction 2x2-pool partial sums
    # stats_ref:(STAT_ROWS, Cp) f32   per-core running [sum, sum_sq] (grid-resident)
    # scratch:  xl (S, Cin) bf16, [col (R, fold*Cin) bf16 when fold > 1], acc (R, Cp) f32
    if fold > 1:
        xl_ref, col_ref, acc_ref = scratch
    else:
        xl_ref, acc_ref = scratch
        col_ref = None
    Wp = W + 2
    R = H * Wp
    Hf = R // 2
    S = (H + 2) * Wp + 2
    j = pl.program_id(1)

    # Preactivation LeakyReLU(0.1), applied exactly once to the Cin-wide slab.
    # The wrapper only pads width, so the top pad row, bottom pad row and the
    # two tail helper rows are zeroed here (garbage there would poison the tap
    # matmuls / global stats). Zero padding stays zero under LeakyReLU.
    x = x_ref[0]
    xl_ref[0:Wp, :] = jnp.zeros((Wp, Cin), xl_ref.dtype)
    xl_ref[Wp:Wp + R, :] = jnp.where(x >= 0, x, LEAKY_SLOPE * x).astype(xl_ref.dtype)
    xl_ref[Wp + R:S, :] = jnp.zeros((Wp + 2, Cin), xl_ref.dtype)

    # 3x3 conv (pad=1): taps grouped `fold` at a time along the matmul K dim.
    # Each folded operand is a VMEM-only im2col built from contiguous
    # row-shifted slices of the slab. The accumulator stays a value and is
    # written to VMEM exactly once (no per-tap read-modify-write passes).
    acc = None
    for g in range(9 // fold):
        tap = None
        for u in range(fold):
            dy, dx = divmod(g * fold + u, 3)
            start = dy * Wp + dx
            tap = xl_ref[start:start + R, :]                   # (R, Cin), contiguous
            if fold > 1:
                col_ref[:, u * Cin:(u + 1) * Cin] = tap
        lhs = col_ref[...] if fold > 1 else tap                # (R, fold*Cin)
        rhs = w_ref[g * fold * Cin:(g + 1) * fold * Cin, :]    # (fold*Cin, Cp)
        part = jnp.dot(lhs, rhs, preferred_element_type=jnp.float32)
        acc = part if acc is None else acc + part
    acc_ref[...] = acc                                         # single store

    # Global (training-mode) BatchNorm statistics over all N*H*W positions.
    # Wrap/garbage columns of the extended-width layout are masked with an
    # in-kernel iota (no HBM mask stream). Per-core partial sums.
    rows = jax.lax.broadcasted_iota(jnp.int32, (R, 1), 0)
    mask = ((rows % Wp) < W).astype(jnp.float32)               # (R, 1)
    accm = acc * mask

    @pl.when(j == 0)
    def _init():
        stats_ref[...] = jnp.zeros_like(stats_ref)

    stats_ref[0:1, :] += jnp.sum(accm, axis=0, keepdims=True)
    stats_ref[1:2, :] += jnp.sum(accm * accm, axis=0, keepdims=True)

    # First half of AvgPool2d(2,2): sum adjacent width pairs (Wp is even, so
    # pairs never straddle an image row).
    hp = acc_ref[pl.ds(0, Hf, 2), :] + acc_ref[pl.ds(1, Hf, 2), :]
    hp_ref[0] = hp.astype(hp_ref.dtype)


def _pool_affine_kernel(hp_ref, fscale_ref, fshift_ref, out_ref, *, Wo):
    # hp_ref:   (1, Ho, 2, Wo+1, Cp) f32  width-paired conv sums (wrapper-reshaped)
    # fscale/fshift: (1, Cp) f32         fused BN affine (0.25 pool factor folded in)
    # out_ref:  (1, Ho, Wo, Cp) f32
    Cp = out_ref.shape[-1]
    a0 = hp_ref[0, :, 0, 0:Wo, :]                              # (Ho, Wo, Cp)
    a1 = hp_ref[0, :, 1, 0:Wo, :]
    fs = fscale_ref[...].reshape(1, 1, Cp)
    fb = fshift_ref[...].reshape(1, 1, Cp)
    out_ref[0] = ((a0 + a1) * fs + fb).astype(out_ref.dtype)


def _lane_bytes(shape, itemsize):
    lead = 1
    for d in shape[:-1]:
        lead *= d
    return lead * (-(-shape[-1] // 128) * 128) * itemsize


def _vmem_limit(est_bytes):
    # 2x headroom over the estimated resident footprint, clamped to [32, 100] MiB.
    # On v7x (64 MiB physical) very large images need H-tiling with a 1-row halo
    # before this clamp matters; the footprint here is tiny.
    return int(min(max(2 * est_bytes, 32 * 1024 * 1024), 100 * 1024 * 1024))


@jax.jit
def dblock_forward(x_nchw, conv_w, conv_b, bn_gamma, bn_beta):
    """DBlock.forward with defaults (wide=True, preactivation=True, AvgPool2d(2,2))."""
    N, Cin, H, W = x_nchw.shape
    Cout = conv_w.shape[0]
    assert H % 2 == 0 and W % 2 == 0  # torch AvgPool2d(2,2) floors odd sizes
    Ho, Wo = H // 2, W // 2
    Wp = W + 2
    R = H * Wp                       # extended-width conv rows per image
    Hf = R // 2                      # rows after width-direction pairing
    S = (H + 2) * Wp + 2             # flat padded slab rows per image
    Cp = ((Cout + 127) // 128) * 128
    inv_count = 1.0 / float(N * H * W)

    # Fold as many conv taps as possible into the matmul K dimension.
    fold = 9 if 9 * Cin <= 128 else (3 if 3 * Cin <= 128 else 1)

    # Split the batch across two TensorCores (v7x) when N is even; each core
    # keeps its own partial stats block. Neutral on single-TC v5e/v6e.
    C = 2 if N % 2 == 0 else 1
    J = N // C

    # ---- glue: NCHW -> width-padded flat NHWC rows (H/tail pads done in-kernel)
    x = jnp.transpose(x_nchw, (0, 2, 3, 1))                 # (N, H, W, Cin)
    x = jnp.pad(x, ((0, 0), (0, 0), (1, 1), (0, 0)))        # width pad only
    x = x.reshape(N, H * Wp, Cin).astype(jnp.bfloat16)

    # conv1 weight (Cout, Cin, 3, 3) -> (9*Cin, Cp), row k = (dy*3+dx)*Cin + ci.
    w9 = jnp.transpose(conv_w, (2, 3, 1, 0)).reshape(9 * Cin, Cout)
    w9 = jnp.pad(w9, ((0, 0), (0, Cp - Cout))).astype(jnp.bfloat16)

    est1 = (2 * _lane_bytes((H * Wp, Cin), 2) + 2 * _lane_bytes((9 * Cin, Cp), 2)
            + 2 * _lane_bytes((Hf, Cp), 4) + 2 * _lane_bytes((STAT_ROWS, Cp), 4)
            + _lane_bytes((S, Cin), 2)
            + (_lane_bytes((R, fold * Cin), 2) if fold > 1 else 0)
            + _lane_bytes((R, Cp), 4))

    scratch_shapes = [pltpu.VMEM((S, Cin), jnp.bfloat16)]
    if fold > 1:
        scratch_shapes.append(pltpu.VMEM((R, fold * Cin), jnp.bfloat16))
    scratch_shapes.append(pltpu.VMEM((R, Cp), jnp.float32))

    # ---- pass 1: conv (K-folded) + per-core BN stats + width-direction pool ----
    k1 = functools.partial(_conv_stats_halfpool_kernel, H=H, W=W, Cin=Cin, fold=fold)
    hp, stats_parts = pl.pallas_call(
        k1,
        grid=(C, J),
        in_specs=[
            pl.BlockSpec((1, H * Wp, Cin), lambda c, j: (c * J + j, 0, 0)),
            # Constant block index: the pipeline fetches this block only once.
            pl.BlockSpec((9 * Cin, Cp), lambda c, j: (0, 0)),
        ],
        out_specs=(
            pl.BlockSpec((1, Hf, Cp), lambda c, j: (c * J + j, 0, 0)),
            pl.BlockSpec((STAT_ROWS, Cp), lambda c, j: (c, 0)),
        ),
        out_shape=(
            jax.ShapeDtypeStruct((N, Hf, Cp), jnp.float32),
            jax.ShapeDtypeStruct((C * STAT_ROWS, Cp), jnp.float32),
        ),
        scratch_shapes=scratch_shapes,
        compiler_params=pltpu.CompilerParams(
            dimension_semantics=("parallel", "arbitrary"),
            vmem_limit_bytes=_vmem_limit(est1),
        ),
    )(x, w9)

    # ---- fused BN affine computed ONCE from the global batch stats (XLA) ----
    stats = stats_parts.reshape(C, STAT_ROWS, Cp)[:, :2, :].sum(axis=0)  # (2, Cp)

    def pad_c(v):
        return jnp.pad(v.astype(jnp.float32), (0, Cp - Cout))

    gamma, beta = pad_c(bn_gamma), pad_c(bn_beta)
    mean_nb = stats[0] * inv_count                          # E[conv1(h)] w/o bias
    var = jnp.maximum(stats[1] * inv_count - mean_nb * mean_nb, 0.0)
    scale = gamma * jax.lax.rsqrt(var + BN_EPS)
    # The conv bias shifts the batch mean by exactly itself, so it cancels in
    # training-mode BN; conv_b is accepted for API parity but drops out here.
    _ = conv_b
    fscale = (0.25 * scale).reshape(1, Cp)                  # 0.25 = AvgPool2d(2,2)
    fshift = (beta - mean_nb * scale).reshape(1, Cp)

    # Free metadata reshape so pass 2 finishes the pool with pure indexing.
    hp5 = hp.reshape(N, Ho, 2, Wo + 1, Cp)

    est2 = (2 * _lane_bytes((Ho * 2 * (Wo + 1), Cp), 4)
            + 4 * _lane_bytes((1, Cp), 4)
            + 2 * _lane_bytes((Ho * Wo, Cp), 4))

    # ---- pass 2: finish pool + fused BN affine on the 4x-smaller tensor ----
    k2 = functools.partial(_pool_affine_kernel, Wo=Wo)
    out = pl.pallas_call(
        k2,
        grid=(N,),
        in_specs=[
            pl.BlockSpec((1, Ho, 2, Wo + 1, Cp), lambda n: (n, 0, 0, 0, 0)),
            pl.BlockSpec((1, Cp), lambda n: (0, 0)),
            pl.BlockSpec((1, Cp), lambda n: (0, 0)),
        ],
        out_specs=pl.BlockSpec((1, Ho, Wo, Cp), lambda n: (n, 0, 0, 0)),
        out_shape=jax.ShapeDtypeStruct((N, Ho, Wo, Cp), jnp.float32),
        compiler_params=pltpu.CompilerParams(
            dimension_semantics=("parallel",),
            vmem_limit_bytes=_vmem_limit(est2),
        ),
    )(hp5, fscale, fshift)

    # Lane-padded NHWC -> NCHW (kept for parity with the PyTorch module; skip
    # this transpose if the downstream consumer accepts NHWC).
    return jnp.transpose(out[..., :Cout], (0, 3, 1, 2))


def ref_forward(x_nchw, conv_w, conv_b, bn_gamma, bn_beta):
    """Pure-JAX f32 reference matching PyTorch DBlock.forward (training-mode BN)."""
    N, Cin, H, W = x_nchw.shape
    Cout = conv_w.shape[0]
    h = jnp.where(x_nchw >= 0, x_nchw, LEAKY_SLOPE * x_nchw)
    y = jax.lax.conv_general_dilated(
        h, conv_w, window_strides=(1, 1), padding=((1, 1), (1, 1)),
        dimension_numbers=("NCHW", "OIHW", "NCHW"))
    y = y + conv_b[None, :, None, None]
    mean = jnp.mean(y, axis=(0, 2, 3), keepdims=True)
    var = jnp.mean(jnp.square(y - mean), axis=(0, 2, 3), keepdims=True)
    yn = (y - mean) / jnp.sqrt(var + BN_EPS)
    yn = yn * bn_gamma[None, :, None, None] + bn_beta[None, :, None, None]
    return yn.reshape(N, Cout, H // 2, 2, W // 2, 2).mean(axis=(3, 5))


if __name__ == "__main__":
    N, Cin, H, W = 2, 4, 16, 16
    Cout = 8  # wide=True -> hidden_channels == out_channels

    key = jax.random.PRNGKey(0)
    k1, k2, k3, k4, k5 = jax.random.split(key, 5)
    x = jax.random.normal(k1, (N, Cin, H, W), dtype=jnp.float32)
    conv_w = jax.random.normal(k2, (Cout, Cin, 3, 3), dtype=jnp.float32) * 0.1
    conv_b = jax.random.normal(k3, (Cout,), dtype=jnp.float32) * 0.1
    bn_gamma = 1.0 + 0.1 * jax.random.normal(k4, (Cout,), dtype=jnp.float32)
    bn_beta = 0.1 * jax.random.normal(k5, (Cout,), dtype=jnp.float32)

    out = dblock_forward(x, conv_w, conv_b, bn_gamma, bn_beta)
    jax.block_until_ready(out)
    assert out.shape == (N, Cout, H // 2, W // 2), out.shape

    ref = ref_forward(x, conv_w, conv_b, bn_gamma, bn_beta)
    # bf16 MXU operands vs f32 reference -> loosened tolerance.
    np.testing.assert_allclose(np.asarray(out), np.asarray(ref),
                               atol=3e-2, rtol=3e-2)
    print("KERNEL_OK")
</pallas_src>

<mosaic_0001>
module attributes {stable_mosaic.version = 11 : i64} {
  func.func @_conv_stats_halfpool_kernel(%arg0: i32, %arg1: i32, %arg2: memref<1x288x4xbf16, #tpu.memory_space<vmem>>, %arg3: memref<36x128xbf16, #tpu.memory_space<vmem>>, %arg4: memref<1x144x128xf32, #tpu.memory_space<vmem>>, %arg5: memref<8x128xf32, #tpu.memory_space<vmem>>, %arg6: memref<326x4xbf16, #tpu.memory_space<vmem>>, %arg7: memref<288x36xbf16, #tpu.memory_space<vmem>>, %arg8: memref<288x128xf32, #tpu.memory_space<vmem>>) attributes {dimension_semantics = [#tpu.dimension_semantics<parallel>, #tpu.dimension_semantics<arbitrary>], iteration_bounds = array<i64: 2, 1>, scalar_prefetch = 0 : i64, scratch_operands = 3 : i64, tpu.core_type = #tpu.core_type<tc>, window_params = [{transform_indices = @transform_0, window_bounds = array<i64: 1, 288, 4>}, {pipeline_mode = #tpu.pipeline_mode<synchronous>, transform_indices = @transform_1, window_bounds = array<i64: 36, 128>}, {transform_indices = @transform_2, window_bounds = array<i64: 1, 144, 128>}, {transform_indices = @transform_3, window_bounds = array<i64: 8, 128>}]} {
    %c0 = arith.constant 0 : index
    %c0_0 = arith.constant 0 : index
    %c0_1 = arith.constant 0 : index
    %0 = vector.load %arg2[%c0, %c0_0, %c0_1] : memref<1x288x4xbf16, #tpu.memory_space<vmem>>, vector<1x288x4xbf16>
    %1 = vector.shape_cast %0 : vector<1x288x4xbf16> to vector<288x4xbf16>
    %cst = arith.constant 0.000000e+00 : bf16
    %2 = vector.broadcast %cst : bf16 to vector<18x4xbf16>
    %c0_2 = arith.constant 0 : index
    %c0_3 = arith.constant 0 : index
    %3 = vector.load %arg6[%c0_2, %c0_3] : memref<326x4xbf16, #tpu.memory_space<vmem>>, vector<18x4xbf16>
    tpu.vector_store %arg6[%c0_2, %c0_3], %2 {strides = array<i32>} : memref<326x4xbf16, #tpu.memory_space<vmem>>, vector<18x4xbf16>,
    %cst_4 = arith.constant 0.000000e+00 : bf16
    %4 = vector.broadcast %cst_4 : bf16 to vector<288x4xbf16>
    %5 = arith.cmpf oge, %1, %4 : vector<288x4xbf16>
    %cst_5 = arith.constant 1.000980e-01 : bf16
    %6 = vector.broadcast %cst_5 : bf16 to vector<288x4xbf16>
    %7 = arith.mulf %6, %1 : vector<288x4xbf16>
    %8 = arith.select %5, %1, %7 : vector<288x4xi1>, vector<288x4xbf16>
    %c18 = arith.constant 18 : index
    %c0_6 = arith.constant 0 : index
    %9 = vector.load %arg6[%c18, %c0_6] : memref<326x4xbf16, #tpu.memory_space<vmem>>, vector<288x4xbf16>
    tpu.vector_store %arg6[%c18, %c0_6], %8 {strides = array<i32>} : memref<326x4xbf16, #tpu.memory_space<vmem>>, vector<288x4xbf16>,
    %cst_7 = arith.constant 0.000000e+00 : bf16
    %10 = vector.broadcast %cst_7 : bf16 to vector<20x4xbf16>
    %c306 = arith.constant 306 : index
    %c0_8 = arith.constant 0 : index
    %11 = vector.load %arg6[%c306, %c0_8] : memref<326x4xbf16, #tpu.memory_space<vmem>>, vector<20x4xbf16>
    tpu.vector_store %arg6[%c306, %c0_8], %10 {strides = array<i32>} : memref<326x4xbf16, #tpu.memory_space<vmem>>, vector<20x4xbf16>,
    %c0_9 = arith.constant 0 : index
    %c0_10 = arith.constant 0 : index
    %12 = vector.load %arg6[%c0_9, %c0_10] : memref<326x4xbf16, #tpu.memory_space<vmem>>, vector<288x4xbf16>
    %c0_11 = arith.constant 0 : index
    %c0_12 = arith.constant 0 : index
    %13 = vector.load %arg7[%c0_11, %c0_12] : memref<288x36xbf16, #tpu.memory_space<vmem>>, vector<288x4xbf16>
    tpu.vector_store %arg7[%c0_11, %c0_12], %12 {strides = array<i32>} : memref<288x36xbf16, #tpu.memory_space<vmem>>, vector<288x4xbf16>,
    %c1 = arith.constant 1 : index
    %c0_13 = arith.constant 0 : index
    %14 = vector.load %arg6[%c1, %c0_13] : memref<326x4xbf16, #tpu.memory_space<vmem>>, vector<288x4xbf16>
    %c0_14 = arith.constant 0 : index
    %c4 = arith.constant 4 : index
    %15 = vector.load %arg7[%c0_14, %c4] : memref<288x36xbf16, #tpu.memory_space<vmem>>, vector<288x4xbf16>
    tpu.vector_store %arg7[%c0_14, %c4], %14 {strides = array<i32>} : memref<288x36xbf16, #tpu.memory_space<vmem>>, vector<288x4xbf16>,
    %c2 = arith.constant 2 : index
    %c0_15 = arith.constant 0 : index
    %16 = vector.load %arg6[%c2, %c0_15] : memref<326x4xbf16, #tpu.memory_space<vmem>>, vector<288x4xbf16>
    %c0_16 = arith.constant 0 : index
    %c8 = arith.constant 8 : index
    %17 = vector.load %arg7[%c0_16, %c8] : memref<288x36xbf16, #tpu.memory_space<vmem>>, vector<288x4xbf16>
    tpu.vector_store %arg7[%c0_16, %c8], %16 {strides = array<i32>} : memref<288x36xbf16, #tpu.memory_space<vmem>>, vector<288x4xbf16>,
    %c18_17 = arith.constant 18 : index
    %c0_18 = arith.constant 0 : index
    %18 = vector.load %arg6[%c18_17, %c0_18] : memref<326x4xbf16, #tpu.memory_space<vmem>>, vector<288x4xbf16>
    %c0_19 = arith.constant 0 : index
    %c12 = arith.constant 12 : index
    %19 = vector.load %arg7[%c0_19, %c12] : memref<288x36xbf16, #tpu.memory_space<vmem>>, vector<288x4xbf16>
    tpu.vector_store %arg7[%c0_19, %c12], %18 {strides = array<i32>} : memref<288x36xbf16, #tpu.memory_space<vmem>>, vector<288x4xbf16>,
    %c19 = arith.constant 19 : index
    %c0_20 = arith.constant 0 : index
    %20 = vector.load %arg6[%c19, %c0_20] : memref<326x4xbf16, #tpu.memory_space<vmem>>, vector<288x4xbf16>
    %c0_21 = arith.constant 0 : index
    %c16 = arith.constant 16 : index
    %21 = vector.load %arg7[%c0_21, %c16] : memref<288x36xbf16, #tpu.memory_space<vmem>>, vector<288x4xbf16>
    tpu.vector_store %arg7[%c0_21, %c16], %20 {strides = array<i32>} : memref<288x36xbf16, #tpu.memory_space<vmem>>, vector<288x4xbf16>,
    %c20 = arith.constant 20 : index
    %c0_22 = arith.constant 0 : index
    %22 = vector.load %arg6[%c20, %c0_22] : memref<326x4xbf16, #tpu.memory_space<vmem>>, vector<288x4xbf16>
    %c0_23 = arith.constant 0 : index
    %c20_24 = arith.constant 20 : index
    %23 = vector.load %arg7[%c0_23, %c20_24] : memref<288x36xbf16, #tpu.memory_space<vmem>>, vector<288x4xbf16>
    tpu.vector_store %arg7[%c0_23, %c20_24], %22 {strides = array<i32>} : memref<288x36xbf16, #tpu.memory_space<vmem>>, vector<288x4xbf16>,
    %c36 = arith.constant 36 : index
    %c0_25 = arith.constant 0 : index
    %24 = vector.load %arg6[%c36, %c0_25] : memref<326x4xbf16, #tpu.memory_space<vmem>>, vector<288x4xbf16>
    %c0_26 = arith.constant 0 : index
    %c24 = arith.constant 24 : index
    %25 = vector.load %arg7[%c0_26, %c24] : memref<288x36xbf16, #tpu.memory_space<vmem>>, vector<288x4xbf16>
    tpu.vector_store %arg7[%c0_26, %c24], %24 {strides = array<i32>} : memref<288x36xbf16, #tpu.memory_space<vmem>>, vector<288x4xbf16>,
    %c37 = arith.constant 37 : index
    %c0_27 = arith.constant 0 : index
    %26 = vector.load %arg6[%c37, %c0_27] : memref<326x4xbf16, #tpu.memory_space<vmem>>, vector<288x4xbf16>
    %c0_28 = arith.constant 0 : index
    %c28 = arith.constant 28 : index
    %27 = vector.load %arg7[%c0_28, %c28] : memref<288x36xbf16, #tpu.memory_space<vmem>>, vector<288x4xbf16>
    tpu.vector_store %arg7[%c0_28, %c28], %26 {strides = array<i32>} : memref<288x36xbf16, #tpu.memory_space<vmem>>, vector<288x4xbf16>,
    %c38 = arith.constant 38 : index
    %c0_29 = arith.constant 0 : index
    %28 = vector.load %arg6[%c38, %c0_29] : memref<326x4xbf16, #tpu.memory_space<vmem>>, vector<288x4xbf16>
    %c0_30 = arith.constant 0 : index
    %c32 = arith.constant 32 : index
    %29 = vector.load %arg7[%c0_30, %c32] : memref<288x36xbf16, #tpu.memory_space<vmem>>, vector<288x4xbf16>
    tpu.vector_store %arg7[%c0_30, %c32], %28 {strides = array<i32>} : memref<288x36xbf16, #tpu.memory_space<vmem>>, vector<288x4xbf16>,
    %c0_31 = arith.constant 0 : index
    %c0_32 = arith.constant 0 : index
    %30 = vector.load %arg7[%c0_31, %c0_32] : memref<288x36xbf16, #tpu.memory_space<vmem>>, vector<288x36xbf16>
    %c0_33 = arith.constant 0 : index
    %c0_34 = arith.constant 0 : index
    %31 = vector.load %arg3[%c0_33, %c0_34] : memref<36x128xbf16, #tpu.memory_space<vmem>>, vector<36x128xbf16>
    %cst_35 = arith.constant dense<0.000000e+00> : vector<288x128xf32>
    %32 = tpu.matmul %30, %31, %cst_35 {dimension_numbers = #tpu.dot_dimension_numbers<[1], [0], [0], [1], [0, 0, 1, 1], [], []>} : vector<288x36xbf16>, vector<36x128xbf16>, vector<288x128xf32> -> vector<288x128xf32>
    %c0_36 = arith.constant 0 : index
    %c0_37 = arith.constant 0 : index
    %33 = vector.load %arg8[%c0_36, %c0_37] : memref<288x128xf32, #tpu.memory_space<vmem>>, vector<288x128xf32>
    tpu.vector_store %arg8[%c0_36, %c0_37], %32 {strides = array<i32>} : memref<288x128xf32, #tpu.memory_space<vmem>>, vector<288x128xf32>,
    %34 = tpu.iota {dimensions = array<i32: 0>} : vector<288x1xi32>
    %c18_i32 = arith.constant 18 : i32
    %c0_i32 = arith.constant 0 : i32
    %35 = arith.cmpi eq, %c18_i32, %c0_i32 : i32
    %c1_i32 = arith.constant 1 : i32
    %36 = arith.select %35, %c1_i32, %c18_i32 : i32
    %37 = vector.broadcast %36 : i32 to vector<288x1xi32>
    %38 = arith.remsi %34, %37 : vector<288x1xi32>
    %c0_i32_38 = arith.constant 0 : i32
    %39 = vector.broadcast %c0_i32_38 : i32 to vector<288x1xi32>
    %40 = arith.cmpi ne, %38, %39 : vector<288x1xi32>
    %c0_i32_39 = arith.constant 0 : i32
    %41 = vector.broadcast %c0_i32_39 : i32 to vector<288x1xi32>
    %42 = arith.cmpi slt, %38, %41 : vector<288x1xi32>
    %c0_i32_40 = arith.constant 0 : i32
    %43 = arith.cmpi slt, %36, %c0_i32_40 : i32
    %44 = vector.broadcast %43 : i1 to vector<288x1xi1>
    %45 = vector.broadcast %44 : vector<288x1xi1> to vector<288x1xi1>
    %46 = arith.xori %42, %45 : vector<288x1xi1>
    %47 = arith.andi %46, %40 : vector<288x1xi1>
    %48 = vector.broadcast %36 : i32 to vector<288x1xi32>
    %49 = arith.addi %38, %48 : vector<288x1xi32>
    %50 = arith.select %47, %49, %38 : vector<288x1xi1>, vector<288x1xi32>
    %c16_i32 = arith.constant 16 : i32
    %51 = vector.broadcast %c16_i32 : i32 to vector<288x1xi32>
    %52 = arith.cmpi slt, %50, %51 : vector<288x1xi32>
    %53 = arith.extui %52 : vector<288x1xi1> to vector<288x1xi32>
    %54 = arith.sitofp %53 : vector<288x1xi32> to vector<288x1xf32>
    %55 = vector.broadcast %54 : vector<288x1xf32> to vector<288x128xf32>
    %56 = arith.mulf %32, %55 : vector<288x128xf32>
    %c0_i32_41 = arith.constant 0 : i32
    %57 = arith.cmpi eq, %arg1, %c0_i32_41 : i32
    %58 = arith.extui %57 : i1 to i32
    %c0_i32_42 = arith.constant 0 : i32
    %59 = arith.cmpi ne, %58, %c0_i32_42 : i32
    scf.if %59 {
      %cst_60 = arith.constant 0.000000e+00 : f32
      %77 = vector.broadcast %cst_60 : f32 to vector<8x128xf32>
      %c0_61 = arith.constant 0 : index
      %c0_62 = arith.constant 0 : index
      %78 = vector.load %arg5[%c0_61, %c0_62] : memref<8x128xf32, #tpu.memory_space<vmem>>, vector<8x128xf32>
      tpu.vector_store %arg5[%c0_61, %c0_62], %77 {strides = array<i32>} : memref<8x128xf32, #tpu.memory_space<vmem>>, vector<8x128xf32>,
    } else {
    }
    %c0_43 = arith.constant 0 : index
    %c0_44 = arith.constant 0 : index
    %60 = vector.load %arg5[%c0_43, %c0_44] : memref<8x128xf32, #tpu.memory_space<vmem>>, vector<1x128xf32>
    %cst_45 = arith.constant dense<0.000000e+00> : vector<128xf32>
    %61 = vector.multi_reduction <add>, %56, %cst_45 [0] : vector<288x128xf32> to vector<128xf32>
    %62 = vector.shape_cast %61 : vector<128xf32> to vector<1x128xf32>
    %63 = arith.addf %60, %62 : vector<1x128xf32>
    %c0_46 = arith.constant 0 : index
    %c0_47 = arith.constant 0 : index
    %64 = vector.load %arg5[%c0_46, %c0_47] : memref<8x128xf32, #tpu.memory_space<vmem>>, vector<1x128xf32>
    tpu.vector_store %arg5[%c0_46, %c0_47], %63 {strides = array<i32>} : memref<8x128xf32, #tpu.memory_space<vmem>>, vector<1x128xf32>,
    %c1_48 = arith.constant 1 : index
    %c0_49 = arith.constant 0 : index
    %65 = vector.load %arg5[%c1_48, %c0_49] : memref<8x128xf32, #tpu.memory_space<vmem>>, vector<1x128xf32>
    %66 = arith.mulf %56, %56 : vector<288x128xf32>
    %cst_50 = arith.constant dense<0.000000e+00> : vector<128xf32>
    %67 = vector.multi_reduction <add>, %66, %cst_50 [0] : vector<288x128xf32> to vector<128xf32>
    %68 = vector.shape_cast %67 : vector<128xf32> to vector<1x128xf32>
    %69 = arith.addf %65, %68 : vector<1x128xf32>
    %c1_51 = arith.constant 1 : index
    %c0_52 = arith.constant 0 : index
    %70 = vector.load %arg5[%c1_51, %c0_52] : memref<8x128xf32, #tpu.memory_space<vmem>>, vector<1x128xf32>
    tpu.vector_store %arg5[%c1_51, %c0_52], %69 {strides = array<i32>} : memref<8x128xf32, #tpu.memory_space<vmem>>, vector<1x128xf32>,
    %c0_53 = arith.constant 0 : index
    %c0_54 = arith.constant 0 : index
    %71 = tpu.strided_load %arg8[%c0_53, %c0_54] {strides = array<i32: 2, 1>} : memref<288x128xf32, #tpu.memory_space<vmem>>, vector<144x128xf32>
    %c1_55 = arith.constant 1 : index
    %c0_56 = arith.constant 0 : index
    %72 = tpu.strided_load %arg8[%c1_55, %c0_56] {strides = array<i32: 2, 1>} : memref<288x128xf32, #tpu.memory_space<vmem>>, vector<144x128xf32>
    %73 = arith.addf %71, %72 : vector<144x128xf32>
    %c0_57 = arith.constant 0 : index
    %c0_58 = arith.constant 0 : index
    %c0_59 = arith.constant 0 : index
    %74 = vector.load %arg4[%c0_57, %c0_58, %c0_59] : memref<1x144x128xf32, #tpu.memory_space<vmem>>, vector<1x144x128xf32>
    %75 = vector.shape_cast %74 : vector<1x144x128xf32> to vector<144x128xf32>
    %76 = vector.shape_cast %73 : vector<144x128xf32> to vector<1x144x128xf32>
    tpu.vector_store %arg4[%c0_57, %c0_58, %c0_59], %76 {strides = array<i32>} : memref<1x144x128xf32, #tpu.memory_space<vmem>>, vector<1x144x128xf32>,
    return
  }
  func.func @transform_0(%arg0: i32, %arg1: i32) -> (i32, i32, i32) {
    %c1_i32 = arith.constant 1 : i32
    %0 = arith.muli %arg0, %c1_i32 : i32
    %1 = arith.addi %0, %arg1 : i32
    %c0_i32 = arith.constant 0 : i32
    %c0_i32_0 = arith.constant 0 : i32
    %c0_i32_1 = arith.constant 0 : i32
    return %1, %c0_i32, %c0_i32_0 : i32, i32, i32
  }
  func.func @transform_1(%arg0: i32, %arg1: i32) -> (i32, i32) {
    %c0_i32 = arith.constant 0 : i32
    %c0_i32_0 = arith.constant 0 : i32
    %c0_i32_1 = arith.constant 0 : i32
    return %c0_i32, %c0_i32_0 : i32, i32
  }
  func.func @transform_2(%arg0: i32, %arg1: i32) -> (i32, i32, i32) {
    %c1_i32 = arith.constant 1 : i32
    %0 = arith.muli %arg0, %c1_i32 : i32
    %1 = arith.addi %0, %arg1 : i32
    %c0_i32 = arith.constant 0 : i32
    %c0_i32_0 = arith.constant 0 : i32
    %c0_i32_1 = arith.constant 0 : i32
    return %1, %c0_i32, %c0_i32_0 : i32, i32, i32
  }
  func.func @transform_3(%arg0: i32, %arg1: i32) -> (i32, i32) {
    %c0_i32 = arith.constant 0 : i32
    %c0_i32_0 = arith.constant 0 : i32
    return %arg0, %c0_i32 : i32, i32
  }
}

module attributes {stable_mosaic.version = 11 : i64} {
  func.func @_pool_affine_kernel(%arg0: i32, %arg1: memref<1x8x2x9x128xf32, #tpu.memory_space<vmem>>, %arg2: memref<1x128xf32, #tpu.memory_space<vmem>>, %arg3: memref<1x128xf32, #tpu.memory_space<vmem>>, %arg4: memref<1x8x8x128xf32, #tpu.memory_space<vmem>>) attributes {dimension_semantics = [#tpu.dimension_semantics<parallel>], iteration_bounds = array<i64: 2>, scalar_prefetch = 0 : i64, scratch_operands = 0 : i64, tpu.core_type = #tpu.core_type<tc>, window_params = [{transform_indices = @transform_0, window_bounds = array<i64: 1, 8, 2, 9, 128>}, {pipeline_mode = #tpu.pipeline_mode<synchronous>, transform_indices = @transform_1, window_bounds = array<i64: 1, 128>}, {pipeline_mode = #tpu.pipeline_mode<synchronous>, transform_indices = @transform_2, window_bounds = array<i64: 1, 128>}, {transform_indices = @transform_3, window_bounds = array<i64: 1, 8, 8, 128>}]} {
    %c0 = arith.constant 0 : index
    %c0_0 = arith.constant 0 : index
    %c0_1 = arith.constant 0 : index
    %c0_2 = arith.constant 0 : index
    %c0_3 = arith.constant 0 : index
    %0 = vector.load %arg1[%c0, %c0_0, %c0_1, %c0_2, %c0_3] : memref<1x8x2x9x128xf32, #tpu.memory_space<vmem>>, vector<1x8x1x8x128xf32>
    %1 = vector.shape_cast %0 : vector<1x8x1x8x128xf32> to vector<8x8x128xf32>
    %c0_4 = arith.constant 0 : index
    %c0_5 = arith.constant 0 : index
    %c1 = arith.constant 1 : index
    %c0_6 = arith.constant 0 : index
    %c0_7 = arith.constant 0 : index
    %2 = vector.load %arg1[%c0_4, %c0_5, %c1, %c0_6, %c0_7] : memref<1x8x2x9x128xf32, #tpu.memory_space<vmem>>, vector<1x8x1x8x128xf32>
    %3 = vector.shape_cast %2 : vector<1x8x1x8x128xf32> to vector<8x8x128xf32>
    %c0_8 = arith.constant 0 : index
    %c0_9 = arith.constant 0 : index
    %4 = vector.load %arg2[%c0_8, %c0_9] : memref<1x128xf32, #tpu.memory_space<vmem>>, vector<1x128xf32>
    %5 = vector.shape_cast %4 : vector<1x128xf32> to vector<1x1x128xf32>
    %c0_10 = arith.constant 0 : index
    %c0_11 = arith.constant 0 : index
    %6 = vector.load %arg3[%c0_10, %c0_11] : memref<1x128xf32, #tpu.memory_space<vmem>>, vector<1x128xf32>
    %7 = vector.shape_cast %6 : vector<1x128xf32> to vector<1x1x128xf32>
    %8 = arith.addf %1, %3 : vector<8x8x128xf32>
    %9 = vector.broadcast %5 : vector<1x1x128xf32> to vector<8x8x128xf32>
    %10 = arith.mulf %8, %9 : vector<8x8x128xf32>
    %11 = vector.broadcast %7 : vector<1x1x128xf32> to vector<8x8x128xf32>
    %12 = arith.addf %10, %11 : vector<8x8x128xf32>
    %c0_12 = arith.constant 0 : index
    %c0_13 = arith.constant 0 : index
    %c0_14 = arith.constant 0 : index
    %c0_15 = arith.constant 0 : index
    %13 = vector.load %arg4[%c0_12, %c0_13, %c0_14, %c0_15] : memref<1x8x8x128xf32, #tpu.memory_space<vmem>>, vector<1x8x8x128xf32>
    %14 = vector.shape_cast %13 : vector<1x8x8x128xf32> to vector<8x8x128xf32>
    %15 = vector.shape_cast %12 : vector<8x8x128xf32> to vector<1x8x8x128xf32>
    tpu.vector_store %arg4[%c0_12, %c0_13, %c0_14, %c0_15], %15 {strides = array<i32>} : memref<1x8x8x128xf32, #tpu.memory_space<vmem>>, vector<1x8x8x128xf32>,
    return
  }
  func.func @transform_0(%arg0: i32) -> (i32, i32, i32, i32, i32) {
    %c0_i32 = arith.constant 0 : i32
    %c0_i32_0 = arith.constant 0 : i32
    %c0_i32_1 = arith.constant 0 : i32
    %c0_i32_2 = arith.constant 0 : i32
    %c0_i32_3 = arith.constant 0 : i32
    return %arg0, %c0_i32, %c0_i32_0, %c0_i32_1, %c0_i32_2 : i32, i32, i32, i32, i32
  }
  func.func @transform_1(%arg0: i32) -> (i32, i32) {
    %c0_i32 = arith.constant 0 : i32
    %c0_i32_0 = arith.constant 0 : i32
    %c0_i32_1 = arith.constant 0 : i32
    return %c0_i32, %c0_i32_0 : i32, i32
  }
  func.func @transform_2(%arg0: i32) -> (i32, i32) {
    %c0_i32 = arith.constant 0 : i32
    %c0_i32_0 = arith.constant 0 : i32
    %c0_i32_1 = arith.constant 0 : i32
    return %c0_i32, %c0_i32_0 : i32, i32
  }
  func.func @transform_3(%arg0: i32) -> (i32, i32, i32, i32) {
    %c0_i32 = arith.constant 0 : i32
    %c0_i32_0 = arith.constant 0 : i32
    %c0_i32_1 = arith.constant 0 : i32
    %c0_i32_2 = arith.constant 0 : i32
    return %arg0, %c0_i32, %c0_i32_0, %c0_i32_1 : i32, i32, i32, i32
  }
}

</mosaic_0001>

<bundles_post_ra>
// kernel: dblock_forward.3
= control target key start
LH: loop header
LB: loop body
LE: loop exit
PB: predicated region body
PF: predicated region fallthrough
CT: control target
= control target key end

     0   :  { %s342_s12 = smov 0   ;;  %s393_s0 = inlined_call_operand.vmem [shape: f32[2,8,2,9,128], index: 0, kind: input, shape index: {}]   ;;  %s394_s1 = inlined_call_operand.vmem [shape: f32[1,128], index: 1, kind: input, shape index: {}]   ;;  %s395_s2 = inlined_call_operand.vmem [shape: f32[1,128], index: 2, kind: input, shape index: {}]   ;;  %s396_s3 = inlined_call_operand.vmem [shape: f32[2,8,8,128], index: 3, kind: output, shape index: {}]  }
   0x1 LB: > { %s283_s13 = sadd.s32 4294967295, %s320_s12   ;;  %p287_p0 = scmp.ge.s32.totalorder %s320_s12, 1  ;;  %s320_s12 = sphi %s342_s12, %s13_s12  }
   0x2   : > { %p137_p1 = scmp.lt.s32.totalorder %s320_s12, 3 }
   0x4   : > { %p138_p2 = pnand %p287_p0, %p137_p1 }
   0x5   : > { %p161_p3 = scmp.lt.s32.totalorder (!%p138_p2), %s283_s13, 1 }
   0x6   : > { %141 = sbr.rel (%p138_p2) target bundleno = 29 (0x1d), region = 32 }
   0xb   : > { %s398_s13 = smov (!%p161_p3, %s283_s13), 1  ;;  %v312_v0 = vld [vmem:[%s394_s1] ss:$0 sm:$0xff] }
   0xc   : > { %s302_s14 = sshll.u32 %s398_s13, 8  ;;  %v313_v1 = vld [vmem:[%s395_s2] ss:$0 sm:$0xff]  ;;  %s303_s22 = sshll.u32 %s398_s13, 6 }
   0xd   : > { %s353_s17 = scalar_lea.vmem %s393_s0, %s302_s14  ;;  %s376_s25 = scalar_lea.vmem %s396_s3, %s303_s22 }
   0xe   : > { %v171_v2 = vld [vmem:[%s353_s17] sm:$0xff]  ;;  %v292_v3 = vld [vmem:[%s353_s17 + $0x10] sm:$0xff] }
   0xf   : > { %v172_v4 = vld [vmem:[%s353_s17 + $0x20] sm:$0xff]  ;;  %v190_v5 = vadd.f32 %v292_v3, %v171_v2  ;;  %v293_v6 = vld [vmem:[%s353_s17 + $0x30] sm:$0xff] }
  0x10   : > { %v173_v7 = vld [vmem:[%s353_s17 + $0x40] sm:$0xff]  ;;  %v294_v8 = vld [vmem:[%s353_s17 + $0x50] sm:$0xff]  ;;  %v191_v9 = vadd.f32 %v293_v6, %v172_v4 }
  0x11   : > { %v192_v10 = vadd.f32 %v294_v8, %v173_v7  ;;  %v174_v11 = vld [vmem:[%s353_s17 + $0x60] sm:$0xff]  ;;  %v295_v12 = vld [vmem:[%s353_s17 + $0x70] sm:$0xff]  ;;  %v201_v14 = vmul.f32 %v312_v0, %v190_v5 }
  0x12   : > { %v175_v13 = vld [vmem:[%s353_s17 + $0x80] sm:$0xff]  ;;  %v193_v15 = vadd.f32 %v295_v12, %v174_v11  ;;  %v296_v16 = vld [vmem:[%s353_s17 + $0x90] sm:$0xff]  ;;  %v202_v19 = vmul.f32 %v312_v0, %v191_v9 }
  0x13   : > { %v176_v17 = vld [vmem:[%s353_s17 + $0xa0] sm:$0xff]  ;;  %v297_v18 = vld [vmem:[%s353_s17 + $0xb0] sm:$0xff]  ;;  %v203_v20 = vmul.f32 %v312_v0, %v192_v10  ;;  %v194_v21 = vadd.f32 %v296_v16, %v175_v13  ;;  %v212_v26 = vadd.f32 %v313_v1, %v201_v14 }
  0x14   : > { %v195_v22 = vadd.f32 %v297_v18, %v176_v17  ;;  %v177_v23 = vld [vmem:[%s353_s17 + $0xc0] sm:$0xff]  ;;  %v298_v24 = vld [vmem:[%s353_s17 + $0xd0] sm:$0xff]  ;;  %v204_v27 = vmul.f32 %v312_v0, %v193_v15  ;;  %v213_v30 = vadd.f32 %v313_v1, %v202_v19 }
  0x15   : > { %v178_v25 = vld [vmem:[%s353_s17 + $0xe0] sm:$0xff]  ;;  %v196_v28 = vadd.f32 %v298_v24, %v177_v23  ;;  %v299_v29 = vld [vmem:[%s353_s17 + $0xf0] sm:$0xff]  ;;  %v214_v31 = vadd.f32 %v313_v1, %v203_v20  ;;  %v205_v32 = vmul.f32 %v312_v0, %v194_v21  ;;  %220 = vst [vmem:[%s376_s25] sm:$0xff] %v212_v26 }
  0x16   : > { %v206_v33 = vmul.f32 %v312_v0, %v195_v22  ;;  %v215_v34 = vadd.f32 %v313_v1, %v204_v27  ;;  %v197_v36 = vadd.f32 %v299_v29, %v178_v25  ;;  %221 = vst [vmem:[%s376_s25 + $0x8] sm:$0xff] %v213_v30 }
  0x17   : > { %v207_v35 = vmul.f32 %v312_v0, %v196_v28  ;;  %v216_v37 = vadd.f32 %v313_v1, %v205_v32  ;;  %222 = vst [vmem:[%s376_s25 + $0x10] sm:$0xff] %v214_v31 }
  0x18   : > { %v217_v38 = vadd.f32 %v313_v1, %v206_v33  ;;  %v208_v40 = vmul.f32 %v312_v0, %v197_v36  ;;  %223 = vst [vmem:[%s376_s25 + $0x18] sm:$0xff] %v215_v34 }
  0x19   : > { %v218_v39 = vadd.f32 %v313_v1, %v207_v35  ;;  %224 = vst [vmem:[%s376_s25 + $0x20] sm:$0xff] %v216_v37 }
  0x1a   : > { %v219_v41 = vadd.f32 %v313_v1, %v208_v40  ;;  %225 = vst [vmem:[%s376_s25 + $0x28] sm:$0xff] %v217_v38 }
  0x1b   : > { %226 = vst [vmem:[%s376_s25 + $0x30] sm:$0xff] %v218_v39 }
  0x1c   : > { %227 = vst [vmem:[%s376_s25 + $0x38] sm:$0xff] %v219_v41 }
  0x1d PF: > { %s13_s12 = sadd.s32 1, %s320_s12  }
  0x1e   : > { %p10_p4 = scmp.ge.s32.totalorder %s13_s12, 4  }
  0x20   :  { %12 = sbr.rel (!%p10_p4) target bundleno = 1 (0x1), region = 63 }

// kernel: dblock_forward.2
= control target key start
LH: loop header
LB: loop body
LE: loop exit
PB: predicated region body
PF: predicated region fallthrough
CT: control target
= control target key end

     0   :  { %s6409_s12 = smov 0   ;;  %s6411_s13 = smov 0   ;;  %s10417_s0 = inlined_call_operand.vmem [shape: bf16[2,288,4], index: 0, kind: input, shape index: {}]   ;;  %s10418_s1 = inlined_call_operand.vmem [shape: bf16[36,128], index: 1, kind: input, shape index: {}]   ;;  %s10419_s2 = inlined_call_operand.vmem [shape: f32[2,144,128], index: 2, kind: output, shape index: {0}]   ;;  %s10420_s3 = inlined_call_operand.vmem [shape: f32[16,128], index: 3, kind: output, shape index: {1}]  }
   0x1   :  { %s6413_s14 = smov 0  }
   0x2 LB: > { %s26_s15 = sadd.s32 1, %s6373_s13  ;;  %p6145_p0 = scmp.ge.s32.totalorder %s6377_s14, 1  ;;  %s6377_s14 = sphi %s6413_s14, %s14_s14   ;;  %s6373_s13 = sphi %s6411_s13, %s10653_s13   ;;  %s6369_s12 = sphi %s6409_s12, %s10652_s12  }
   0x3   : > { %p28_p1 = scmp.ge.s32.totalorder %s26_s15, 2  ;;  %p158_p2 = scmp.lt.s32.totalorder %s6377_s14, 3 }
   0x5   : > { %s10655_s15 = smov (%p28_p1, %s26_s15), 0  ;;  %p159_p3 = pnand %p6145_p0, %p158_p2 }
   0x6   : > { %p189_p4 = scmp.lt.s32.totalorder (!%p159_p3), %s6369_s12, 1  ;;  %s6380_s20 = smov (!%p159_p3), 4  }
   0x7   : > { %162 = sbr.rel (%p159_p3) target bundleno = 1114 (0x45a), region = 28  ;;  %s6381_s21 = smov (!%p159_p3), 8  }
   0x8   : > { %s6382_s22 = smov (!%p159_p3), 12   ;;  %s6383_s23 = smov (!%p159_p3), 16  }
   0x9   : > { %s6384_s24 = smov (!%p159_p3), 20   ;;  %s6385_s25 = smov (!%p159_p3), 24  }
   0xa   : > { %s6386_s26 = smov (!%p159_p3), 28   ;;  %s6387_s27 = smov (!%p159_p3), 32  }
   0xc   : > { %vm243_vm0 = vcmask 27648   ;;  %v6379_v0 = vmov 0   ;;  %vm246_vm1 = vcmask 24576   ;;  %s10657_s12 = smov (!%p189_p4, %s6369_s12), 1  ;;  %vm647_vm2 = vcmask 27649  }
   0xd   : > { %244 = vst.msk [vmem:[#allocation2] sm:$0xf] %vm243_vm0, %v6379_v0  ;;  %s6319_s16 = smul.u32 144, %s10657_s12  ;;  %vm798_vm3 = vsmask.f32 3328  ;;  %vm500_vm5 = vcmask 1040384  }
   0xe   : > { %245 = vst.msk [vmem:[#allocation2 + $0x4] sm:$0xf] %vm243_vm0, %v6379_v0  ;;  %vm799_vm4 = vsmask.f32 7440  ;;  %vm501_vm6 = vcmask 1044484   ;;  %s6148_s10 = sshll.u32 %s10657_s12, 3 }
   0xf   : > { %686 = vst.msk [vmem:[#allocation2 + $0x9c] sm:$0xf] %vm243_vm0, %v6379_v0  ;;  %s6445_s19 = scalar_lea.vmem %s10417_s0, %s6319_s16  ;;  %vm6455_vm7 = vmor %vm798_vm3, %vm799_vm4  ;;  %s8991_s9 = scalar_lea.vmem %s10419_s2, %s6319_s16 }
  0x10   : > { %247 = vst.msk [vmem:[#allocation2 + $0x8] sm:$0x1] %vm246_vm1, %v6379_v0  ;;  %v207_v2 = vld [vmem:[%s6445_s19] sm:$0xf]  ;;  %v208_v3 = vld [vmem:[%s6445_s19 + $0x4] sm:$0xf]  ;;  %vm6503_vm3 = vmor %vm500_vm5, %vm501_vm6  ;;  %s9861_s17 = scalar_lea.vmem %s10420_s3, %s6148_s10 }
  0x11   : > { %685 = vst.msk [vmem:[#allocation2 + $0x98] sm:$0xe] %vm647_vm2, %v6379_v0  ;;  %v248_v7 = vunpack.c.l.bf16 %v207_v2  ;;  %v249_v8 = vunpack.c.l.bf16 %v208_v3  ;;  %v209_v9 = vld [vmem:[%s6445_s19 + $0x8] sm:$0xf]  ;;  %v6451_v13 = vld [vmem:[%s6445_s19 + $0xc] sm:$0xf] }
  0x12   : > { %v250_v12 = vunpack.c.l.bf16 %v209_v9  ;;  %v211_v19 = vld [vmem:[%s6445_s19 + $0x10] sm:$0xf]  ;;  %v212_v24 = vld [vmem:[%s6445_s19 + $0x14] sm:$0xf]  ;;  %v251_v28 = vunpack.c.l.bf16 %v6451_v13  ;;  %v213_v41 = vld [vmem:[%s6445_s19 + $0x18] sm:$0xf] }
  0x13   : > { %vm6459_vm8 = vcmp.ge.f32.partialorder %v248_v7, 0.0  ;;  %vm6463_vm9 = vcmp.ge.f32.partialorder %v249_v8, 0.0  ;;  %v320_v22 = vmul.f32 0.100097656, %v248_v7  ;;  %v321_v23 = vmul.f32 0.100097656, %v249_v8  ;;  %v214_v47 = vld [vmem:[%s6445_s19 + $0x1c] sm:$0xf] }
  0x14   : > { %v761_v1 = vld [vmem:[#allocation2] sm:$0xf]  ;;  %vm392_vm10 = vmpackc.low %vm6459_vm8, %vm6459_vm8  ;;  %vm6475_vm12 = vcmp.ge.f32.partialorder %v250_v12, 0.0  ;;  %v322_v27 = vmul.f32 0.100097656, %v250_v12  ;;  %v252_v32 = vunpack.c.l.bf16 %v211_v19  ;;  %v253_v35 = vunpack.c.l.bf16 %v212_v24  ;;  %v6565_v26 = vld [vmem:[%s6445_s19 + $0x2c] sm:$0xf] }
  0x15   : > { %v762_v4 = vld [vmem:[#allocation2 + $0x4] sm:$0xf]  ;;  %v802_v5 = vshrl.u32 %v761_v1, 16  ;;  %v805_v6 = vshll.u32 %v761_v1, 16  ;;  %vm393_vm11 = vmpackc.low %vm6463_vm9, %vm6463_vm9  ;;  %v356_v29 = vpack.c.bf16 %v320_v22, %v320_v22  ;;  %v357_v30 = vpack.c.bf16 %v321_v23, %v321_v23  ;;  %v215_v48 = vld [vmem:[%s6445_s19 + $0x20] sm:$0xf] }
  0x16   : > { %v811_v10 = vshll.u32 %v762_v4, 16  ;;  %v815_v11 = vshrl.u32 %v762_v4, 16  ;;  %vm394_vm13 = vmpackc.low %vm6475_vm12, %vm6475_vm12  ;;  %v358_v34 = vpack.c.bf16 %v322_v27, %v322_v27  ;;  %vm6483_vm14 = vcmp.ge.f32.partialorder %v251_v28, 0.0 }
  0x17   : > { %v804_v15 = vrot.slane %v802_v5, 4  ;;  %v807_v16 = vrot.slane %v805_v6, 5  ;;  %v428_v37 = vsel %vm392_vm10, %v207_v2, %v356_v29  ;;  %v429_v38 = vsel %vm393_vm11, %v208_v3, %v357_v30  ;;  %vm395_vm5 = vmpackc.low %vm6483_vm14, %vm6483_vm14  ;;  %v6544_v6 = vld [vmem:[%s6445_s19 + $0x24] sm:$0xf] }
  0x18   : > { %v813_v20 = vrot.slane %v811_v10, 5  ;;  %v817_v21 = vrot.slane %v815_v11, 4  ;;  %vm6494_vm15 = vcmp.ge.f32.partialorder %v252_v32, 0.0  ;;  %v503_v44 = vrot.slane %v428_v37, 7 }
  0x19   : > { %v808_v25 = vor.u32 %v807_v16, %v804_v15  ;;  %v505_v45 = vrot.slane %v429_v38, 7  ;;  %v430_v46 = vsel %vm394_vm13, %v209_v9, %v358_v34  ;;  %vm6510_vm4 = vcmp.ge.f32.partialorder %v253_v35, 0.0  ;;  %vm396_vm6 = vmpackc.low %vm6494_vm15, %vm6494_vm15 }
  0x1a   : > { %v818_v31 = vor.u32 %v817_v21, %v813_v20  ;;  %v508_v49 = vrot.slane %v430_v46, 7  ;;  %v323_v51 = vmul.f32 0.100097656, %v251_v28  ;;  %v324_v52 = vmul.f32 0.100097656, %v252_v32  ;;  %648 = vst.msk [vmem:[#allocation2 + $0x8] sm:$0xe] %vm647_vm2, %v503_v44  ;;  %vm397_vm8 = vmpackc.low %vm6510_vm4, %vm6510_vm4 }
  0x1b   : > { %v809_v33 = vrot.slane %v808_v25, 4  ;;  %v504_v53 = vrot.slane %v503_v44, 4  ;;  %v507_v54 = vrot.slane %v505_v45, 4  ;;  %v325_v55 = vmul.f32 0.100097656, %v253_v35 }
  0x1c   : > { %v6492_v39 = vrot.slane %v818_v31, 4  ;;  %v254_v56 = vunpack.c.l.bf16 %v213_v41  ;;  %v359_v57 = vpack.c.bf16 %v323_v51, %v323_v51  ;;  %v360_v58 = vpack.c.bf16 %v324_v52, %v324_v52 }
  0x1d   : > { %v814_v42 = vsel %vm6455_vm7, %v809_v33, %v813_v20  ;;  %v255_v59 = vunpack.c.l.bf16 %v214_v47  ;;  %v256_v60 = vunpack.c.l.bf16 %v215_v48  ;;  %v506_v61 = vsel %vm6503_vm3, %v504_v53, %v505_v45  ;;  %v6562_v20 = vld [vmem:[%s6445_s19 + $0x28] sm:$0xf] }
  0x1e   : > { %1165 = vrot.lane.b32.xlu0 %v814_v42, %s6380_s20  ;;  %v509_v62 = vsel %vm6503_vm3, %v507_v54, %v508_v49  ;;  %v361_v63 = vpack.c.bf16 %v325_v55, %v325_v55  ;;  %vm6528_vm2 = vcmp.ge.f32.partialorder %v254_v56, 0.0  ;;  %649 = vst.msk [vmem:[#allocation2 + $0xc] sm:$0xf] %vm243_vm0, %v506_v61  ;;  %v431_v2 = vsel %vm395_vm5, %v6451_v13, %v359_v57 }
  0x1f   : > { %v432_v3 = vsel %vm396_vm6, %v211_v19, %v360_v58  ;;  %v326_v4 = vmul.f32 0.100097656, %v254_v56  ;;  %vm6539_vm9 = vcmp.ge.f32.partialorder %v255_v59, 0.0  ;;  %650 = vst.msk [vmem:[#allocation2 + $0x10] sm:$0xf] %vm243_vm0, %v509_v62  ;;  %v511_v8 = vrot.slane %v431_v2, 7  ;;  %vm398_vm10 = vmpackc.low %vm6528_vm2, %vm6528_vm2 }
  0x20   : > { %v433_v7 = vsel %vm397_vm8, %v212_v24, %v361_v63  ;;  %v514_v9 = vrot.slane %v432_v3, 7  ;;  %vm6550_vm11 = vcmp.ge.f32.partialorder %v256_v60, 0.0  ;;  %v327_v13 = vmul.f32 0.100097656, %v255_v59  ;;  %vm399_vm12 = vmpackc.low %vm6539_vm9, %vm6539_vm9 }
  0x21   : > { %v517_v11 = vrot.slane %v433_v7, 7  ;;  %v362_v12 = vpack.c.bf16 %v326_v4, %v326_v4  ;;  %v328_v15 = vmul.f32 0.100097656, %v256_v60  ;;  %v513_v16 = vrot.slane %v511_v8, 4  ;;  %vm400_vm13 = vmpackc.low %vm6550_vm11, %vm6550_vm11  ;;  %v763_v21 = vld [vmem:[#allocation2 + $0x8] sm:$0xf] }
  0x22   : > { %v516_v17 = vrot.slane %v514_v9, 4  ;;  %v510_v18 = vrot.slane %v508_v49, 4  ;;  %v257_v19 = vunpack.c.l.bf16 %v6544_v6  ;;  %v363_v24 = vpack.c.bf16 %v327_v13, %v327_v13  ;;  %v222_v13 = vld [vmem:[%s6445_s19 + $0x3c] sm:$0xf] }
  0x23   : > { %v434_v22 = vsel %vm398_vm10, %v213_v41, %v362_v12  ;;  %v519_v23 = vrot.slane %v517_v11, 4  ;;  %v364_v25 = vpack.c.bf16 %v328_v15, %v328_v15  ;;  %v821_v27 = vshll.u32 %v763_v21, 16 }
  0x24   : > { %v825_v28 = vshrl.u32 %v763_v21, 16  ;;  %v515_v29 = vsel %vm6503_vm3, %v513_v16, %v514_v9  ;;  %v518_v30 = vsel %vm6503_vm3, %v516_v17, %v517_v11  ;;  %v520_v31 = vrot.slane %v434_v22, 7 }
  0x25   : > { %652 = vst.msk [vmem:[#allocation2 + $0x18] sm:$0xf] %vm243_vm0, %v515_v29  ;;  %v435_v32 = vsel %vm399_vm12, %v214_v47, %v363_v24  ;;  %v436_v33 = vsel %vm400_vm13, %v215_v48, %v364_v25  ;;  %v512_v34 = vsel %vm6503_vm3, %v510_v18, %v511_v8  ;;  %v764_v35 = vld [vmem:[#allocation2 + $0xc] sm:$0xf]  ;;  %v823_v36 = vrot.slane %v821_v27, 5 }
  0x26   : > { %v827_v37 = vrot.slane %v825_v28, 4  ;;  %653 = vst.msk [vmem:[#allocation2 + $0x1c] sm:$0xf] %vm243_vm0, %v518_v30  ;;  %v258_v38 = vunpack.c.l.bf16 %v6562_v20  ;;  %v259_v40 = vunpack.c.l.bf16 %v6565_v26  ;;  %v831_v41 = vshll.u32 %v764_v35, 16  ;;  %v765_v44 = vld [vmem:[#allocation2 + $0x10] sm:$0xf] }
  0x27   : > { %v835_v42 = vshrl.u32 %v764_v35, 16  ;;  %v521_v45 = vsel %vm6503_vm3, %v519_v23, %v520_v31  ;;  %v522_v46 = vrot.slane %v520_v31, 4  ;;  %v824_v48 = vsel %vm6455_vm7, %v6492_v39, %v823_v36  ;;  %651 = vst.msk [vmem:[#allocation2 + $0x14] sm:$0xf] %vm243_vm0, %v512_v34 }
  0x28   : > { %v828_v47 = vor.u32 %v827_v37, %v823_v36  ;;  %v841_v49 = vshll.u32 %v765_v44, 16  ;;  %654 = vst.msk [vmem:[#allocation2 + $0x20] sm:$0xf] %vm243_vm0, %v521_v45  ;;  %v523_v50 = vrot.slane %v435_v32, 7  ;;  %v833_v51 = vrot.slane %v831_v41, 5  ;;  %1167 = vrot.lane.b32.xlu0 %v824_v48, %s6380_s20 }
  0x29   : > { %v837_v52 = vrot.slane %v835_v42, 4  ;;  %v526_v53 = vrot.slane %v436_v33, 7  ;;  %v845_v54 = vshrl.u32 %v765_v44, 16  ;;  %vm6598_vm14 = vcmp.ge.f32.partialorder %v257_v19, 0.0  ;;  %v219_v44 = vld [vmem:[%s6445_s19 + $0x30] sm:$0xf] }
  0x2a   : > { %v829_v55 = vrot.slane %v828_v47, 4  ;;  %v843_v56 = vrot.slane %v841_v49, 5  ;;  %v524_v57 = vsel %vm6503_vm3, %v522_v46, %v523_v50  ;;  %v525_v58 = vrot.slane %v523_v50, 4  ;;  %vm401_vm4 = vmpackc.low %vm6598_vm14, %vm6598_vm14  ;;  %v6637_v49 = vld [vmem:[%s6445_s19 + $0x34] sm:$0xf] }
  0x2b   : > { %v838_v59 = vor.u32 %v837_v52, %v833_v51  ;;  %655 = vst.msk [vmem:[#allocation2 + $0x24] sm:$0xf] %vm243_vm0, %v524_v57  ;;  %v847_v39 = vrot.slane %v845_v54, 4  ;;  %v329_v61 = vmul.f32 0.100097656, %v257_v19  ;;  %v528_v2 = vrot.slane %v526_v53, 4 }
  0x2c   : > { %v834_v62 = vsel %vm6455_vm7, %v829_v55, %v833_v51  ;;  %v767_v63 = vld [vmem:[#allocation2 + $0x18] sm:$0xf]  ;;  %v527_v1 = vsel %vm6503_vm3, %v525_v58, %v526_v53  ;;  %vm6606_vm15 = vcmp.ge.f32.partialorder %v258_v38, 0.0  ;;  %vm6617_vm5 = vcmp.ge.f32.partialorder %v259_v40, 0.0 }
  0x2d   : > { %1169 = vrot.lane.b32.xlu1 %v834_v62, %s6380_s20  ;;  %v839_v4 = vrot.slane %v838_v59, 4  ;;  %v768_v5 = vld [vmem:[#allocation2 + $0x1c] sm:$0xf]  ;;  %v861_v7 = vshll.u32 %v767_v63, 16  ;;  %v865_v8 = vshrl.u32 %v767_v63, 16  ;;  %v848_v9 = vor.u32 %v847_v39, %v843_v56  ;;  %vm402_vm6 = vmpackc.low %vm6606_vm15, %vm6606_vm15 }
  0x2e   : > { %v871_v10 = vshll.u32 %v768_v5, 16  ;;  %v875_v11 = vshrl.u32 %v768_v5, 16  ;;  %656 = vst.msk [vmem:[#allocation2 + $0x28] sm:$0xf] %vm243_vm0, %v527_v1  ;;  %v365_v12 = vpack.c.bf16 %v329_v61, %v329_v61  ;;  %v766_v25 = vld [vmem:[#allocation2 + $0x14] sm:$0xf]  ;;  %vm403_vm8 = vmpackc.low %vm6617_vm5, %vm6617_vm5  ;;  %v260_v39 = vunpack.c.l.bf16 %v219_v44 }
  0x2f   : > { %v844_v15 = vsel %vm6455_vm7, %v839_v4, %v843_v56  ;;  %v6623_v16 = vrot.slane %v861_v7, 5  ;;  %v867_v17 = vrot.slane %v865_v8, 4  ;;  %v6625_v18 = vld [vmem:[#allocation2 + $0x20] sm:$0xf]  ;;  %v849_v19 = vrot.slane %v848_v9, 4 }
  0x30   : > { %v873_v21 = vrot.slane %v871_v10, 5  ;;  %v877_v22 = vrot.slane %v875_v11, 4  ;;  %v881_v23 = vshll.u32 %v6625_v18, 16  ;;  %v885_v24 = vshrl.u32 %v6625_v18, 16  ;;  %v221_v63 = vld [vmem:[%s6445_s19 + $0x38] sm:$0xf] }
  0x31   : > { %v868_v27 = vor.u32 %v867_v17, %v6623_v16  ;;  %v851_v28 = vshll.u32 %v766_v25, 16  ;;  %v855_v29 = vshrl.u32 %v766_v25, 16  ;;  %v437_v30 = vsel %vm401_vm4, %v6544_v6, %v365_v12 }
  0x32   : > { %v878_v31 = vor.u32 %v877_v22, %v873_v21  ;;  %v6631_v32 = vrot.slane %v881_v23, 5  ;;  %v770_v33 = vld [vmem:[#allocation2 + $0x24] sm:$0xf]  ;;  %v529_v34 = vrot.slane %v437_v30, 7  ;;  %v330_v35 = vmul.f32 0.100097656, %v258_v38 }
  0x33   : > { %v869_v36 = vrot.slane %v868_v27, 4  ;;  %v891_v37 = vshll.u32 %v770_v33, 16  ;;  %v895_v41 = vshrl.u32 %v770_v33, 16  ;;  %v853_v42 = vrot.slane %v851_v28, 5  ;;  %v6686_v23 = vld [vmem:[%s6445_s19 + $0x44] sm:$0xf] }
  0x34   : > { %v879_v45 = vrot.slane %v878_v31, 4  ;;  %v857_v46 = vrot.slane %v855_v29, 4  ;;  %v530_v47 = vsel %vm6503_vm3, %v528_v2, %v529_v34  ;;  %v531_v48 = vrot.slane %v529_v34, 4 }
  0x35   : > { %1171 = vrot.lane.b32.xlu1 %v844_v15, %s6380_s20  ;;  %v874_v6 = vsel %vm6455_vm7, %v869_v36, %v873_v21  ;;  %v771_v50 = vld [vmem:[#allocation2 + $0x28] sm:$0xf]  ;;  %v6642_v38 = vrot.slane %v891_v37, 5  ;;  %v897_v51 = vrot.slane %v895_v41, 4  ;;  %v854_v52 = vsel %vm6455_vm7, %v849_v19, %v853_v42  ;;  %657 = vst.msk [vmem:[#allocation2 + $0x2c] sm:$0xf] %vm243_vm0, %v530_v47 }
  0x36   : > { %1177 = vrot.lane.b32.xlu0 %v874_v6, %s6380_s20  ;;  %v884_v53 = vsel %vm6455_vm7, %v879_v45, %v6631_v32  ;;  %v901_v54 = vshll.u32 %v771_v50, 16  ;;  %v905_v55 = vshrl.u32 %v771_v50, 16  ;;  %1173 = vrot.lane.b32.xlu2 %v854_v52, %s6380_s20  ;;  %v331_v56 = vmul.f32 0.100097656, %v259_v40  ;;  %v6679_v15 = vld [vmem:[%s6445_s19 + $0x40] sm:$0xf] }
  0x37   : > { %v898_v57 = vor.u32 %v897_v51, %v6642_v38  ;;  %v366_v58 = vpack.c.bf16 %v330_v35, %v330_v35  ;;  %v858_v59 = vor.u32 %v857_v46, %v853_v42  ;;  %v261_v40 = vunpack.c.l.bf16 %v6637_v49  ;;  %v227_v50 = vld [vmem:[%s6445_s19 + $0x50] sm:$0xf] }
  0x38   : > { %v903_v60 = vrot.slane %v901_v54, 5  ;;  %v907_v61 = vrot.slane %v905_v55, 4  ;;  %v367_v62 = vpack.c.bf16 %v331_v56, %v331_v56  ;;  %vm6664_vm2 = vcmp.ge.f32.partialorder %v260_v39, 0.0 }
  0x39   : > { %v899_v1 = vrot.slane %v898_v57, 4  ;;  %v438_v2 = vsel %vm402_vm6, %v6562_v20, %v366_v58  ;;  %v859_v3 = vrot.slane %v858_v59, 4  ;;  %v332_v9 = vmul.f32 0.100097656, %v260_v39  ;;  %vm404_vm9 = vmpackc.low %vm6664_vm2, %vm6664_vm2 }
  0x3a   : > { %v908_v5 = vor.u32 %v907_v61, %v903_v60  ;;  %v439_v7 = vsel %vm403_vm8, %v6565_v26, %v367_v62  ;;  %v532_v8 = vrot.slane %v438_v2, 7  ;;  %v262_v20 = vunpack.c.l.bf16 %v221_v63  ;;  %v6749_v62 = vld [vmem:[%s6445_s19 + $0x48] sm:$0xf] }
  0x3b   : > { %v904_v10 = vsel %vm6455_vm7, %v899_v1, %v903_v60  ;;  %v535_v11 = vrot.slane %v439_v7, 7  ;;  %v864_v12 = vsel %vm6455_vm7, %v859_v3, %v6623_v16  ;;  %v368_v22 = vpack.c.bf16 %v332_v9, %v332_v9 }
  0x3c   : > { %v6681_v17 = vld [vmem:[#allocation2 + $0x2c] sm:$0xf]  ;;  %v909_v26 = vrot.slane %v908_v5, 4  ;;  %v533_v19 = vsel %vm6503_vm3, %v531_v48, %v532_v8  ;;  %v534_v21 = vrot.slane %v532_v8, 4  ;;  %vm6692_vm10 = vcmp.ge.f32.partialorder %v261_v40, 0.0 }
  0x3d   : > { %1179 = vrot.lane.b32.xlu1 %v884_v53, %s6380_s20  ;;  %v911_v16 = vshll.u32 %v6681_v17, 16  ;;  %v915_v25 = vshrl.u32 %v6681_v17, 16  ;;  %658 = vst.msk [vmem:[#allocation2 + $0x30] sm:$0xf] %vm243_vm0, %v533_v19  ;;  %v537_v27 = vrot.slane %v535_v11, 4  ;;  %v440_v30 = vsel %vm404_vm9, %v219_v44, %v368_v22  ;;  %vm405_vm12 = vmpackc.low %vm6692_vm10, %vm6692_vm10 }
  0x3e   : > { %1183 = vrot.lane.b32.xlu0 %v904_v10, %s6380_s20  ;;  %v536_v29 = vsel %vm6503_vm3, %v534_v21, %v535_v11  ;;  %1175 = vrot.lane.b32.xlu2 %v864_v12, %s6380_s20  ;;  %vm6705_vm11 = vcmp.ge.f32.partialorder %v262_v20, 0.0  ;;  %v333_v33 = vmul.f32 0.100097656, %v261_v40  ;;  %v538_v35 = vrot.slane %v440_v30, 7 }
  0x3f   : > { %v6709_v34 = vrot.slane %v911_v16, 5  ;;  %659 = vst.msk [vmem:[#allocation2 + $0x34] sm:$0xf] %vm243_vm0, %v536_v29  ;;  %v334_v36 = vmul.f32 0.100097656, %v262_v20  ;;  %v887_v37 = vrot.slane %v885_v24, 4  ;;  %vm406_vm13 = vmpackc.low %vm6705_vm11, %vm6705_vm11  ;;  %v263_v42 = vunpack.c.l.bf16 %v222_v13 }
  0x40   : > { %v369_v41 = vpack.c.bf16 %v333_v33, %v333_v33  ;;  %v264_v44 = vunpack.c.l.bf16 %v6679_v15  ;;  %v265_v45 = vunpack.c.l.bf16 %v6686_v23  ;;  %v539_v47 = vsel %vm6503_vm3, %v537_v27, %v538_v35 }
  0x41   : > { %v914_v46 = vsel %vm6455_vm7, %v909_v26, %v6709_v34  ;;  %v540_v48 = vrot.slane %v538_v35, 4  ;;  %v370_v18 = vpack.c.bf16 %v334_v36, %v334_v36  ;;  %660 = vst.msk [vmem:[#allocation2 + $0x38] sm:$0xf] %vm243_vm0, %v539_v47  ;;  %v888_v6 = vor.u32 %v887_v37, %v6631_v32 }
  0x42   : > { %v441_v24 = vsel %vm405_vm12, %v6637_v49, %v369_v41  ;;  %vm6730_vm14 = vcmp.ge.f32.partialorder %v263_v42, 0.0  ;;  %v335_v51 = vmul.f32 0.100097656, %v263_v42  ;;  %vm6737_vm4 = vcmp.ge.f32.partialorder %v264_v44, 0.0  ;;  %v6793_v41 = vld [vmem:[%s6445_s19 + $0x4c] sm:$0xf] }
  0x43   : > { %v442_v52 = vsel %vm406_vm13, %v221_v63, %v370_v18  ;;  %v541_v53 = vrot.slane %v441_v24, 7  ;;  %vm407_vm15 = vmpackc.low %vm6730_vm14, %vm6730_vm14  ;;  %vm6741_vm5 = vcmp.ge.f32.partialorder %v265_v45, 0.0  ;;  %v889_v56 = vrot.slane %v888_v6, 4 }
  0x44   : > { %v773_v32 = vld [vmem:[#allocation2 + $0x30] sm:$0xf]  ;;  %v544_v55 = vrot.slane %v442_v52, 7  ;;  %v371_v57 = vpack.c.bf16 %v335_v51, %v335_v51  ;;  %v336_v58 = vmul.f32 0.100097656, %v264_v44  ;;  %v337_v3 = vmul.f32 0.100097656, %v265_v45  ;;  %vm408_vm6 = vmpackc.low %vm6737_vm4, %vm6737_vm4 }
  0x45   : > { %1185 = vrot.lane.b32.xlu1 %v914_v46, %s6380_s20  ;;  %v921_v59 = vshll.u32 %v773_v32, 16  ;;  %v925_v39 = vshrl.u32 %v773_v32, 16  ;;  %v542_v60 = vsel %vm6503_vm3, %v540_v48, %v541_v53  ;;  %v543_v61 = vrot.slane %v541_v53, 4  ;;  %vm409_vm8 = vmpackc.low %vm6741_vm5, %vm6741_vm5 }
  0x46   : > { %v774_v63 = vld [vmem:[#allocation2 + $0x34] sm:$0xf]  ;;  %661 = vst.msk [vmem:[#allocation2 + $0x3c] sm:$0xf] %vm243_vm0, %v542_v60  ;;  %v894_v40 = vsel %vm6455_vm7, %v889_v56, %v6642_v38  ;;  %v443_v1 = vsel %vm407_vm15, %v222_v13, %v371_v57  ;;  %v546_v2 = vrot.slane %v544_v55, 4  ;;  %v372_v10 = vpack.c.bf16 %v336_v58, %v336_v58 }
  0x47   : > { %v6760_v4 = vrot.slane %v921_v59, 5  ;;  %v927_v5 = vrot.slane %v925_v39, 4  ;;  %v931_v7 = vshll.u32 %v774_v63, 16  ;;  %v935_v8 = vshrl.u32 %v774_v63, 16  ;;  %1181 = vrot.lane.b32.xlu2 %v894_v40, %s6380_s20  ;;  %v6896_v60 = vld [vmem:[%s6445_s19 + $0x64] sm:$0xf] }
  0x48   : > { %v545_v38 = vsel %vm6503_vm3, %v543_v61, %v544_v55  ;;  %v547_v9 = vrot.slane %v443_v1, 7  ;;  %v373_v11 = vpack.c.bf16 %v337_v3, %v337_v3  ;;  %v6772_v13 = vld [vmem:[#allocation2 + $0x38] sm:$0xf]  ;;  %v266_v19 = vunpack.c.l.bf16 %v6749_v62 }
  0x49   : > { %v928_v12 = vor.u32 %v927_v5, %v6760_v4  ;;  %v933_v20 = vrot.slane %v931_v7, 5  ;;  %v937_v26 = vrot.slane %v935_v8, 4  ;;  %662 = vst.msk [vmem:[#allocation2 + $0x40] sm:$0xf] %vm243_vm0, %v545_v38  ;;  %v941_v21 = vshll.u32 %v6772_v13, 16 }
  0x4a   : > { %v945_v22 = vshrl.u32 %v6772_v13, 16  ;;  %v548_v16 = vsel %vm6503_vm3, %v546_v2, %v547_v9  ;;  %v549_v27 = vrot.slane %v547_v9, 4  ;;  %v444_v30 = vsel %vm408_vm6, %v6679_v15, %v372_v10  ;;  %v228_v2 = vld [vmem:[%s6445_s19 + $0x54] sm:$0xf] }
  0x4b   : > { %v929_v28 = vrot.slane %v928_v12, 4  ;;  %v938_v29 = vor.u32 %v937_v26, %v933_v20  ;;  %663 = vst.msk [vmem:[#allocation2 + $0x44] sm:$0xf] %vm243_vm0, %v548_v16  ;;  %v445_v31 = vsel %vm409_vm8, %v6686_v23, %v373_v11  ;;  %v6788_v33 = vrot.slane %v941_v21, 5 }
  0x4c   : > { %v550_v35 = vrot.slane %v444_v30, 7  ;;  %v553_v36 = vrot.slane %v445_v31, 7  ;;  %v917_v37 = vrot.slane %v915_v25, 4  ;;  %vm6797_vm2 = vcmp.ge.f32.partialorder %v266_v19, 0.0 }
  0x4d   : > { %v934_v42 = vsel %vm6455_vm7, %v929_v28, %v933_v20  ;;  %v939_v44 = vrot.slane %v938_v29, 4  ;;  %v776_v45 = vld [vmem:[#allocation2 + $0x3c] sm:$0xf]  ;;  %v338_v15 = vmul.f32 0.100097656, %v266_v19  ;;  %vm410_vm9 = vmpackc.low %vm6797_vm2, %vm6797_vm2  ;;  %v267_v49 = vunpack.c.l.bf16 %v6793_v41 }
  0x4e   : > { %1189 = vrot.lane.b32.xlu0 %v934_v42, %s6380_s20  ;;  %v951_v23 = vshll.u32 %v776_v45, 16  ;;  %v955_v47 = vshrl.u32 %v776_v45, 16  ;;  %v551_v17 = vsel %vm6503_vm3, %v549_v27, %v550_v35  ;;  %v552_v25 = vrot.slane %v550_v35, 4  ;;  %v229_v42 = vld [vmem:[%s6445_s19 + $0x58] sm:$0xf] }
  0x4f   : > { %v944_v48 = vsel %vm6455_vm7, %v939_v44, %v6788_v33  ;;  %664 = vst.msk [vmem:[#allocation2 + $0x48] sm:$0xf] %vm243_vm0, %v551_v17  ;;  %v918_v18 = vor.u32 %v917_v37, %v6709_v34  ;;  %v374_v24 = vpack.c.bf16 %v338_v15, %v338_v15  ;;  %v555_v6 = vrot.slane %v553_v36, 4 }
  0x50   : > { %1191 = vrot.lane.b32.xlu1 %v944_v48, %s6380_s20  ;;  %v777_v51 = vld [vmem:[#allocation2 + $0x40] sm:$0xf]  ;;  %v6814_v52 = vrot.slane %v951_v23, 5  ;;  %v957_v53 = vrot.slane %v955_v47, 4  ;;  %v554_v54 = vsel %vm6503_vm3, %v552_v25, %v553_v36  ;;  %v268_v39 = vunpack.c.l.bf16 %v227_v50 }
  0x51   : > { %v961_v32 = vshll.u32 %v777_v51, 16  ;;  %v965_v55 = vshrl.u32 %v777_v51, 16  ;;  %665 = vst.msk [vmem:[#allocation2 + $0x4c] sm:$0xf] %vm243_vm0, %v554_v54  ;;  %v919_v34 = vrot.slane %v918_v18, 4  ;;  %v446_v56 = vsel %vm410_vm9, %v6749_v62, %v374_v24 }
  0x52   : > { %v958_v57 = vor.u32 %v957_v53, %v6814_v52  ;;  %v6827_v58 = vld [vmem:[#allocation2 + $0x44] sm:$0xf]  ;;  %v556_v59 = vrot.slane %v446_v56, 7  ;;  %vm6829_vm10 = vcmp.ge.f32.partialorder %v267_v49, 0.0  ;;  %vm6845_vm11 = vcmp.ge.f32.partialorder %v268_v39, 0.0 }
  0x53   : > { %v963_v61 = vrot.slane %v961_v32, 5  ;;  %v967_v63 = vrot.slane %v965_v55, 4  ;;  %v971_v40 = vshll.u32 %v6827_v58, 16  ;;  %v975_v1 = vshrl.u32 %v6827_v58, 16  ;;  %vm411_vm12 = vmpackc.low %vm6829_vm10, %vm6829_vm10 }
  0x54   : > { %v959_v3 = vrot.slane %v958_v57, 4  ;;  %v924_v62 = vsel %vm6455_vm7, %v919_v34, %v6760_v4  ;;  %v557_v5 = vsel %vm6503_vm3, %v555_v6, %v556_v59  ;;  %v558_v7 = vrot.slane %v556_v59, 4  ;;  %vm412_vm13 = vmpackc.low %vm6845_vm11, %vm6845_vm11  ;;  %v230_v6 = vld [vmem:[%s6445_s19 + $0x5c] sm:$0xf] }
  0x55   : > { %v968_v8 = vor.u32 %v967_v63, %v963_v61  ;;  %v6841_v38 = vrot.slane %v971_v40, 5  ;;  %1187 = vrot.lane.b32.xlu2 %v924_v62, %s6380_s20  ;;  %666 = vst.msk [vmem:[#allocation2 + $0x50] sm:$0xf] %vm243_vm0, %v557_v5  ;;  %v339_v10 = vmul.f32 0.100097656, %v267_v49  ;;  %v340_v12 = vmul.f32 0.100097656, %v268_v39 }
  0x56   : > { %v964_v11 = vsel %vm6455_vm7, %v959_v3, %v963_v61  ;;  %v779_v4 = vld [vmem:[#allocation2 + $0x48] sm:$0xf]  ;;  %v947_v20 = vrot.slane %v945_v22, 4  ;;  %v269_v26 = vunpack.c.l.bf16 %v228_v2  ;;  %v271_v59 = vunpack.c.l.bf16 %v230_v6  ;;  %v231_v39 = vld [vmem:[%s6445_s19 + $0x60] sm:$0xf] }
  0x57   : > { %1195 = vrot.lane.b32.xlu0 %v964_v11, %s6380_s20  ;;  %v969_v19 = vrot.slane %v968_v8, 4  ;;  %v981_v21 = vshll.u32 %v779_v4, 16  ;;  %v985_v16 = vshrl.u32 %v779_v4, 16  ;;  %v375_v27 = vpack.c.bf16 %v339_v10, %v339_v10  ;;  %v6906_v3 = vld [vmem:[%s6445_s19 + $0x68] sm:$0xf] }
  0x58   : > { %v780_v28 = vld [vmem:[#allocation2 + $0x4c] sm:$0xf]  ;;  %v376_v29 = vpack.c.bf16 %v340_v12, %v340_v12  ;;  %v948_v30 = vor.u32 %v947_v20, %v6788_v33  ;;  %vm6861_vm14 = vcmp.ge.f32.partialorder %v269_v26, 0.0  ;;  %v341_v13 = vmul.f32 0.100097656, %v269_v26 }
  0x59   : > { %v974_v22 = vsel %vm6455_vm7, %v969_v19, %v6841_v38  ;;  %v6868_v35 = vrot.slane %v981_v21, 5  ;;  %v987_v36 = vrot.slane %v985_v16, 4  ;;  %v991_v37 = vshll.u32 %v780_v28, 16  ;;  %vm413_vm15 = vmpackc.low %vm6861_vm14, %vm6861_vm14 }
  0x5a   : > { %1197 = vrot.lane.b32.xlu1 %v974_v22, %s6380_s20  ;;  %v995_v44 = vshrl.u32 %v780_v28, 16  ;;  %v447_v33 = vsel %vm411_vm12, %v6793_v41, %v375_v27  ;;  %v448_v45 = vsel %vm412_vm13, %v227_v50, %v376_v29  ;;  %v949_v46 = vrot.slane %v948_v30, 4 }
  0x5b   : > { %v988_v15 = vor.u32 %v987_v36, %v6868_v35  ;;  %v993_v23 = vrot.slane %v991_v37, 5  ;;  %v559_v47 = vrot.slane %v447_v33, 7  ;;  %v562_v17 = vrot.slane %v448_v45, 7 }
  0x5c   : > { %v781_v25 = vld [vmem:[#allocation2 + $0x50] sm:$0xf]  ;;  %v997_v48 = vrot.slane %v995_v44, 4  ;;  %v954_v18 = vsel %vm6455_vm7, %v949_v46, %v6814_v52  ;;  %v377_v24 = vpack.c.bf16 %v341_v13, %v341_v13  ;;  %v270_v41 = vunpack.c.l.bf16 %v229_v42 }
  0x5d   : > { %v989_v50 = vrot.slane %v988_v15, 4  ;;  %v1001_v51 = vshll.u32 %v781_v25, 16  ;;  %v1005_v53 = vshrl.u32 %v781_v25, 16  ;;  %v560_v54 = vsel %vm6503_vm3, %v558_v7, %v559_v47  ;;  %1193 = vrot.lane.b32.xlu2 %v954_v18, %s6380_s20 }
  0x5e   : > { %v998_v49 = vor.u32 %v997_v48, %v993_v23  ;;  %v561_v32 = vrot.slane %v559_v47, 4  ;;  %667 = vst.msk [vmem:[#allocation2 + $0x54] sm:$0xf] %vm243_vm0, %v560_v54  ;;  %v449_v55 = vsel %vm413_vm15, %v228_v2, %v377_v24  ;;  %v564_v52 = vrot.slane %v562_v17, 4 }
  0x5f   : > { %v994_v34 = vsel %vm6455_vm7, %v989_v50, %v993_v23  ;;  %v6892_v56 = vrot.slane %v1001_v51, 5  ;;  %v565_v57 = vrot.slane %v449_v55, 7  ;;  %vm6901_vm4 = vcmp.ge.f32.partialorder %v270_v41, 0.0 }
  0x60   : > { %1201 = vrot.lane.b32.xlu0 %v994_v34, %s6380_s20  ;;  %v999_v61 = vrot.slane %v998_v49, 4  ;;  %v563_v63 = vsel %vm6503_vm3, %v561_v32, %v562_v17  ;;  %v342_v2 = vmul.f32 0.100097656, %v270_v41  ;;  %vm6911_vm5 = vcmp.ge.f32.partialorder %v271_v59, 0.0  ;;  %vm414_vm6 = vmpackc.low %vm6901_vm4, %vm6901_vm4  ;;  %v234_v32 = vld [vmem:[%s6445_s19 + $0x6c] sm:$0xf] }
  0x61   : > { %668 = vst.msk [vmem:[#allocation2 + $0x58] sm:$0xf] %vm243_vm0, %v563_v63  ;;  %v566_v62 = vsel %vm6503_vm3, %v564_v52, %v565_v57  ;;  %v567_v5 = vrot.slane %v565_v57, 4  ;;  %v343_v8 = vmul.f32 0.100097656, %v271_v59  ;;  %vm415_vm8 = vmpackc.low %vm6911_vm5, %vm6911_vm5  ;;  %v977_v11 = vrot.slane %v975_v1, 4 }
  0x62   : > { %v1004_v9 = vsel %vm6455_vm7, %v999_v61, %v6892_v56  ;;  %669 = vst.msk [vmem:[#allocation2 + $0x5c] sm:$0xf] %vm243_vm0, %v566_v62  ;;  %v378_v10 = vpack.c.bf16 %v342_v2, %v342_v2  ;;  %v272_v4 = vunpack.c.l.bf16 %v231_v39  ;;  %v273_v20 = vunpack.c.l.bf16 %v6896_v60  ;;  %v6976_v57 = vld [vmem:[%s6445_s19 + $0x70] sm:$0xf] }
  0x63   : > { %1203 = vrot.lane.b32.xlu1 %v1004_v9, %s6380_s20  ;;  %v379_v12 = vpack.c.bf16 %v343_v8, %v343_v8  ;;  %v274_v26 = vunpack.c.l.bf16 %v6906_v3  ;;  %v1007_v19 = vrot.slane %v1005_v53, 4  ;;  %v978_v16 = vor.u32 %v977_v11, %v6841_v38 }
  0x64   : > { %v450_v21 = vsel %vm414_vm6, %v229_v42, %v378_v10  ;;  %vm6931_vm2 = vcmp.ge.f32.partialorder %v272_v4, 0.0  ;;  %v344_v28 = vmul.f32 0.100097656, %v272_v4  ;;  %vm6935_vm9 = vcmp.ge.f32.partialorder %v273_v20, 0.0 }
  0x65   : > { %v782_v29 = vld [vmem:[#allocation2 + $0x54] sm:$0xf]  ;;  %v451_v58 = vsel %vm415_vm8, %v230_v6, %v379_v12  ;;  %v568_v1 = vrot.slane %v450_v21, 7  ;;  %vm6939_vm10 = vcmp.ge.f32.partialorder %v274_v26, 0.0  ;;  %v979_v38 = vrot.slane %v978_v16, 4  ;;  %vm416_vm11 = vmpackc.low %vm6931_vm2, %vm6931_vm2 }
  0x66   : > { %v1011_v13 = vshll.u32 %v782_v29, 16  ;;  %v1015_v22 = vshrl.u32 %v782_v29, 16  ;;  %v571_v36 = vrot.slane %v451_v58, 7  ;;  %v380_v44 = vpack.c.bf16 %v344_v28, %v344_v28  ;;  %vm417_vm12 = vmpackc.low %vm6935_vm9, %vm6935_vm9 }
  0x67   : > { %v569_v37 = vsel %vm6503_vm3, %v567_v5, %v568_v1  ;;  %v570_v42 = vrot.slane %v568_v1, 4  ;;  %v345_v33 = vmul.f32 0.100097656, %v273_v20  ;;  %v984_v23 = vsel %vm6455_vm7, %v979_v38, %v6868_v35  ;;  %vm418_vm13 = vmpackc.low %vm6939_vm10, %vm6939_vm10 }
  0x68   : > { %v783_v45 = vld [vmem:[#allocation2 + $0x58] sm:$0xf]  ;;  %v1013_v46 = vrot.slane %v1011_v13, 5  ;;  %v1017_v15 = vrot.slane %v1015_v22, 4  ;;  %670 = vst.msk [vmem:[#allocation2 + $0x60] sm:$0xf] %vm243_vm0, %v569_v37  ;;  %v1008_v47 = vor.u32 %v1007_v19, %v6892_v56  ;;  %1199 = vrot.lane.b32.xlu2 %v984_v23, %s6380_s20  ;;  %v452_v24 = vsel %vm416_vm11, %v231_v39, %v380_v44 }
  0x69   : > { %v1021_v17 = vshll.u32 %v783_v45, 16  ;;  %v1025_v25 = vshrl.u32 %v783_v45, 16  ;;  %v6953_v48 = vld [vmem:[#allocation2 + $0x5c] sm:$0xf]  ;;  %v572_v18 = vsel %vm6503_vm3, %v570_v42, %v571_v36  ;;  %v573_v50 = vrot.slane %v571_v36, 4 }
  0x6a   : > { %v1018_v6 = vor.u32 %v1017_v15, %v1013_v46  ;;  %v1031_v35 = vshll.u32 %v6953_v48, 16  ;;  %v1035_v41 = vshrl.u32 %v6953_v48, 16  ;;  %671 = vst.msk [vmem:[#allocation2 + $0x64] sm:$0xf] %vm243_vm0, %v572_v18  ;;  %v574_v54 = vrot.slane %v452_v24, 7 }
  0x6b   : > { %v1023_v51 = vrot.slane %v1021_v17, 5  ;;  %v1027_v53 = vrot.slane %v1025_v25, 4  ;;  %v346_v49 = vmul.f32 0.100097656, %v274_v26  ;;  %v381_v34 = vpack.c.bf16 %v345_v33, %v345_v33  ;;  %v237_v36 = vld [vmem:[%s6445_s19 + $0x78] sm:$0xf] }
  0x6c   : > { %v1019_v55 = vrot.slane %v1018_v6, 4  ;;  %v6970_v52 = vrot.slane %v1031_v35, 5  ;;  %v1009_v56 = vrot.slane %v1008_v47, 4  ;;  %v575_v39 = vsel %vm6503_vm3, %v573_v50, %v574_v54  ;;  %v7065_v26 = vld [vmem:[%s6445_s19 + $0x84] sm:$0xf] }
  0x6d   : > { %v1028_v59 = vor.u32 %v1027_v53, %v1023_v51  ;;  %v576_v61 = vrot.slane %v574_v54, 4  ;;  %v382_v63 = vpack.c.bf16 %v346_v49, %v346_v49  ;;  %672 = vst.msk [vmem:[#allocation2 + $0x68] sm:$0xf] %vm243_vm0, %v575_v39  ;;  %v453_v2 = vsel %vm417_vm12, %v6896_v60, %v381_v34  ;;  %v236_v60 = vld [vmem:[%s6445_s19 + $0x74] sm:$0xf] }
  0x6e   : > { %v1024_v40 = vsel %vm6455_vm7, %v1019_v55, %v1023_v51  ;;  %v1014_v62 = vsel %vm6455_vm7, %v1009_v56, %v1013_v46  ;;  %v275_v5 = vunpack.c.l.bf16 %v234_v32  ;;  %v577_v10 = vrot.slane %v453_v2, 7 }
  0x6f   : > { %1207 = vrot.lane.b32.xlu0 %v1024_v40, %s6380_s20  ;;  %v1029_v7 = vrot.slane %v1028_v59, 4  ;;  %v785_v8 = vld [vmem:[#allocation2 + $0x60] sm:$0xf]  ;;  %v454_v9 = vsel %vm418_vm13, %v6906_v3, %v382_v63  ;;  %v276_v11 = vunpack.c.l.bf16 %v6976_v57  ;;  %v277_v22 = vunpack.c.l.bf16 %v236_v60 }
  0x70   : > { %v1041_v4 = vshll.u32 %v785_v8, 16  ;;  %v1045_v12 = vshrl.u32 %v785_v8, 16  ;;  %v580_v20 = vrot.slane %v454_v9, 7  ;;  %vm6989_vm14 = vcmp.ge.f32.partialorder %v275_v5, 0.0  ;;  %1205 = vrot.lane.b32.xlu2 %v1014_v62, %s6380_s20 }
  0x71   : > { %v1034_v19 = vsel %vm6455_vm7, %v1029_v7, %v6970_v52  ;;  %v786_v21 = vld [vmem:[#allocation2 + $0x64] sm:$0xf]  ;;  %v578_v3 = vsel %vm6503_vm3, %v576_v61, %v577_v10  ;;  %v579_v16 = vrot.slane %v577_v10, 4  ;;  %v347_v27 = vmul.f32 0.100097656, %v275_v5  ;;  %vm419_vm15 = vmpackc.low %vm6989_vm14, %vm6989_vm14  ;;  %v238_v10 = vld [vmem:[%s6445_s19 + $0x7c] sm:$0xf] }
  0x72   : > { %1209 = vrot.lane.b32.xlu1 %v1034_v19, %s6380_s20  ;;  %v7001_v28 = vrot.slane %v1041_v4, 5  ;;  %v1047_v29 = vrot.slane %v1045_v12, 4  ;;  %v1051_v58 = vshll.u32 %v786_v21, 16  ;;  %v1055_v1 = vshrl.u32 %v786_v21, 16  ;;  %673 = vst.msk [vmem:[#allocation2 + $0x6c] sm:$0xf] %vm243_vm0, %v578_v3 }
  0x73   : > { %v581_v30 = vsel %vm6503_vm3, %v579_v16, %v580_v20  ;;  %v383_v31 = vpack.c.bf16 %v347_v27, %v347_v27  ;;  %v582_v13 = vrot.slane %v580_v20, 4  ;;  %vm7012_vm4 = vcmp.ge.f32.partialorder %v276_v11, 0.0  ;;  %v239_v20 = vld [vmem:[%s6445_s19 + $0x80] sm:$0xf] }
  0x74   : > { %v1048_v38 = vor.u32 %v1047_v29, %v7001_v28  ;;  %v1053_v37 = vrot.slane %v1051_v58, 5  ;;  %v1057_v42 = vrot.slane %v1055_v1, 4  ;;  %674 = vst.msk [vmem:[#allocation2 + $0x70] sm:$0xf] %vm243_vm0, %v581_v30  ;;  %v7016_v33 = vld [vmem:[#allocation2 + $0x68] sm:$0xf]  ;;  %vm420_vm6 = vmpackc.low %vm7012_vm4, %vm7012_vm4  ;;  %v278_v49 = vunpack.c.l.bf16 %v237_v36 }
  0x75   : > { %v455_v45 = vsel %vm419_vm15, %v234_v32, %v383_v31  ;;  %vm7018_vm5 = vcmp.ge.f32.partialorder %v277_v22, 0.0  ;;  %v348_v15 = vmul.f32 0.100097656, %v276_v11  ;;  %v349_v23 = vmul.f32 0.100097656, %v277_v22 }
  0x76   : > { %v1049_v47 = vrot.slane %v1048_v38, 4  ;;  %v1058_v17 = vor.u32 %v1057_v42, %v1053_v37  ;;  %v1061_v25 = vshll.u32 %v7016_v33, 16  ;;  %v1065_v18 = vshrl.u32 %v7016_v33, 16  ;;  %vm421_vm8 = vmpackc.low %vm7018_vm5, %vm7018_vm5  ;;  %v241_v38 = vld [vmem:[%s6445_s19 + $0x88] sm:$0xf] }
  0x77   : > { %v583_v24 = vrot.slane %v455_v45, 7  ;;  %v384_v6 = vpack.c.bf16 %v348_v15, %v348_v15  ;;  %v385_v35 = vpack.c.bf16 %v349_v23, %v349_v23  ;;  %v1037_v50 = vrot.slane %v1035_v41, 4 }
  0x78   : > { %v1054_v51 = vsel %vm6455_vm7, %v1049_v47, %v1053_v37  ;;  %v1059_v53 = vrot.slane %v1058_v17, 4  ;;  %v7034_v54 = vrot.slane %v1061_v25, 5  ;;  %vm7051_vm2 = vcmp.ge.f32.partialorder %v278_v49, 0.0 }
  0x79   : > { %1213 = vrot.lane.b32.xlu0 %v1054_v51, %s6380_s20  ;;  %v788_v32 = vld [vmem:[#allocation2 + $0x6c] sm:$0xf]  ;;  %v584_v55 = vsel %vm6503_vm3, %v582_v13, %v583_v24  ;;  %v585_v34 = vrot.slane %v583_v24, 4  ;;  %v456_v48 = vsel %vm420_vm6, %v6976_v57, %v384_v6  ;;  %v457_v41 = vsel %vm421_vm8, %v236_v60, %v385_v35  ;;  %vm422_vm9 = vmpackc.low %vm7051_vm2, %vm7051_vm2 }
  0x7a   : > { %v1064_v56 = vsel %vm6455_vm7, %v1059_v53, %v7034_v54  ;;  %v1071_v59 = vshll.u32 %v788_v32, 16  ;;  %v1075_v39 = vshrl.u32 %v788_v32, 16  ;;  %675 = vst.msk [vmem:[#allocation2 + $0x74] sm:$0xf] %vm243_vm0, %v584_v55  ;;  %v586_v61 = vrot.slane %v456_v48, 7 }
  0x7b   : > { %1215 = vrot.lane.b32.xlu1 %v1064_v56, %s6380_s20  ;;  %v789_v63 = vld [vmem:[#allocation2 + $0x70] sm:$0xf]  ;;  %v589_v40 = vrot.slane %v457_v41, 7  ;;  %v1038_v2 = vor.u32 %v1037_v50, %v6970_v52  ;;  %v350_v62 = vmul.f32 0.100097656, %v278_v49  ;;  %v279_v58 = vunpack.c.l.bf16 %v238_v10 }
  0x7c   : > { %v7055_v5 = vrot.slane %v1071_v59, 5  ;;  %v1077_v7 = vrot.slane %v1075_v39, 4  ;;  %v1081_v8 = vshll.u32 %v789_v63, 16  ;;  %v1085_v9 = vshrl.u32 %v789_v63, 16 }
  0x7d   : > { %v587_v11 = vsel %vm6503_vm3, %v585_v34, %v586_v61  ;;  %v588_v4 = vrot.slane %v586_v61, 4  ;;  %v1039_v52 = vrot.slane %v1038_v2, 4  ;;  %v386_v12 = vpack.c.bf16 %v350_v62, %v350_v62 }
  0x7e   : > { %v1078_v60 = vor.u32 %v1077_v7, %v7055_v5  ;;  %v1083_v19 = vrot.slane %v1081_v8, 5  ;;  %v1087_v21 = vrot.slane %v1085_v9, 4  ;;  %676 = vst.msk [vmem:[#allocation2 + $0x78] sm:$0xf] %vm243_vm0, %v587_v11  ;;  %v591_v3 = vrot.slane %v589_v40, 4 }
  0x7f   : > { %v590_v16 = vsel %vm6503_vm3, %v588_v4, %v589_v40  ;;  %v1044_v27 = vsel %vm6455_vm7, %v1039_v52, %v7001_v28  ;;  %v458_v29 = vsel %vm422_vm9, %v237_v36, %v386_v12  ;;  %v280_v13 = vunpack.c.l.bf16 %v239_v20 }
  0x80   : > { %v1079_v1 = vrot.slane %v1078_v60, 4  ;;  %v1088_v30 = vor.u32 %v1087_v21, %v1083_v19  ;;  %677 = vst.msk [vmem:[#allocation2 + $0x7c] sm:$0xf] %vm243_vm0, %v590_v16  ;;  %1211 = vrot.lane.b32.xlu2 %v1044_v27, %s6380_s20  ;;  %v592_v31 = vrot.slane %v458_v29, 7  ;;  %vm7076_vm10 = vcmp.ge.f32.partialorder %v279_v58, 0.0 }
  0x81   : > { %v790_v22 = vld [vmem:[#allocation2 + $0x74] sm:$0xf]  ;;  %v351_v37 = vmul.f32 0.100097656, %v279_v58  ;;  %v1067_v42 = vrot.slane %v1065_v18, 4  ;;  %v281_v44 = vunpack.c.l.bf16 %v7065_v26  ;;  %vm7086_vm11 = vcmp.ge.f32.partialorder %v280_v13, 0.0  ;;  %vm423_vm12 = vmpackc.low %vm7076_vm10, %vm7076_vm10 }
  0x82   : > { %v1084_v28 = vsel %vm6455_vm7, %v1079_v1, %v1083_v19  ;;  %v1089_v36 = vrot.slane %v1088_v30, 4  ;;  %v1091_v33 = vshll.u32 %v790_v22, 16  ;;  %v593_v45 = vsel %vm6503_vm3, %v591_v3, %v592_v31  ;;  %vm424_vm13 = vmpackc.low %vm7086_vm11, %vm7086_vm11 }
  0x83   : > { %1219 = vrot.lane.b32.xlu0 %v1084_v28, %s6380_s20  ;;  %v352_v15 = vmul.f32 0.100097656, %v280_v13  ;;  %678 = vst.msk [vmem:[#allocation2 + $0x80] sm:$0xf] %vm243_vm0, %v593_v45  ;;  %v387_v47 = vpack.c.bf16 %v351_v37, %v351_v37  ;;  %v1068_v17 = vor.u32 %v1067_v42, %v7034_v54  ;;  %vm7098_vm14 = vcmp.ge.f32.partialorder %v281_v44, 0.0 }
  0x84   : > { %v1093_v23 = vrot.slane %v1091_v33, 5  ;;  %v1095_v18 = vshrl.u32 %v790_v22, 16  ;;  %v594_v6 = vrot.slane %v592_v31, 4  ;;  %v353_v50 = vmul.f32 0.100097656, %v281_v44  ;;  %vm425_vm15 = vmpackc.low %vm7098_vm14, %vm7098_vm14 }
  0x85   : > { %v791_v24 = vld [vmem:[#allocation2 + $0x78] sm:$0xf]  ;;  %v388_v35 = vpack.c.bf16 %v352_v15, %v352_v15  ;;  %v459_v32 = vsel %vm423_vm12, %v238_v10, %v387_v47  ;;  %v1069_v48 = vrot.slane %v1068_v17, 4  ;;  %v282_v15 = vunpack.c.l.bf16 %v241_v38  ;;  %v689_v47 = vld [vmem:[#allocation2] sm:$0xf] }
  0x86   : > { %v1094_v51 = vsel %vm6455_vm7, %v1089_v36, %v1093_v23  ;;  %v1101_v53 = vshll.u32 %v791_v24, 16  ;;  %v1105_v49 = vshrl.u32 %v791_v24, 16  ;;  %v595_v54 = vrot.slane %v459_v32, 7  ;;  %725 = vst.msk [vmem:[#allocation3] sm:$0xf] %vm243_vm0, %v689_v47 }
  0x87   : > { %1221 = vrot.lane.b32.xlu1 %v1094_v51, %s6380_s20  ;;  %v792_v55 = vld [vmem:[#allocation2 + $0x7c] sm:$0xf]  ;;  %v460_v34 = vsel %vm424_vm13, %v239_v20, %v388_v35  ;;  %v389_v41 = vpack.c.bf16 %v353_v50, %v353_v50  ;;  %v1074_v57 = vsel %vm6455_vm7, %v1069_v48, %v7055_v5  ;;  %v1097_v21 = vrot.slane %v1095_v18, 4  ;;  %v1311_v35 = vld [vmem:[#allocation2 + $0x4] sm:$0xf] }
  0x88   : > { %v1103_v56 = vrot.slane %v1101_v53, 5  ;;  %v1107_v59 = vrot.slane %v1105_v49, 4  ;;  %v1111_v39 = vshll.u32 %v792_v55, 16  ;;  %v1115_v61 = vshrl.u32 %v792_v55, 16  ;;  %1217 = vrot.lane.b32.xlu2 %v1074_v57, %s6380_s20  ;;  %v693_v53 = vld [vmem:[#allocation2 + $0x10] sm:$0xf] }
  0x89   : > { %v596_v63 = vsel %vm6503_vm3, %v594_v6, %v595_v54  ;;  %v597_v40 = vrot.slane %v595_v54, 4  ;;  %v598_v2 = vrot.slane %v460_v34, 7  ;;  %v7116_v9 = vsel %vm425_vm15, %v7065_v26, %v389_v41  ;;  %729 = vst.msk [vmem:[#allocation3 + $0x10] sm:$0xf] %vm243_vm0, %v693_v53  ;;  %v1310_v34 = vld [vmem:[#allocation2] sm:$0xe] }
  0x8a   : > { %v1108_v62 = vor.u32 %v1107_v59, %v1103_v56  ;;  %v1113_v7 = vrot.slane %v1111_v39, 5  ;;  %v1117_v8 = vrot.slane %v1115_v61, 4  ;;  %679 = vst.msk [vmem:[#allocation2 + $0x84] sm:$0xf] %vm243_vm0, %v596_v63  ;;  %v793_v10 = vld [vmem:[#allocation2 + $0x80] sm:$0xf]  ;;  %v1098_v27 = vor.u32 %v1097_v21, %v1093_v23 }
  0x8b   : > { %v599_v11 = vsel %vm6503_vm3, %v597_v40, %v598_v2  ;;  %v600_v4 = vrot.slane %v598_v2, 4  ;;  %v601_v52 = vrot.slane %v7116_v9, 7  ;;  %v1121_v5 = vshll.u32 %v793_v10, 16  ;;  %v691_v41 = vld [vmem:[#allocation2 + $0x8] sm:$0xf] }
  0x8c   : > { %v1109_v12 = vrot.slane %v1108_v62, 4  ;;  %v1118_v20 = vor.u32 %v1117_v8, %v1113_v7  ;;  %v1125_v60 = vshrl.u32 %v793_v10, 16  ;;  %680 = vst.msk [vmem:[#allocation2 + $0x88] sm:$0xf] %vm243_vm0, %v599_v11  ;;  %v1099_v30 = vrot.slane %v1098_v27, 4 }
  0x8d   : > { %v602_v19 = vsel %vm6503_vm3, %v600_v4, %v601_v52  ;;  %v1123_v16 = vrot.slane %v1121_v5, 5  ;;  %vm7136_vm4 = vcmp.ge.f32.partialorder %v282_v15, 0.0  ;;  %v354_v51 = vmul.f32 0.100097656, %v282_v15  ;;  %v7152_v40 = vld [vmem:[#allocation2 + $0x8] sm:$0xf] }
  0x8e   : > { %v1114_v26 = vsel %vm6455_vm7, %v1109_v12, %v1113_v7  ;;  %v1119_v3 = vrot.slane %v1118_v20, 4  ;;  %681 = vst.msk [vmem:[#allocation2 + $0x8c] sm:$0xf] %vm243_vm0, %v602_v19  ;;  %v1127_v58 = vrot.slane %v1125_v60, 4  ;;  %v1104_v42 = vsel %vm6455_vm7, %v1099_v30, %v1103_v56  ;;  %vm426_vm6 = vmpackc.low %vm7136_vm4, %vm7136_vm4  ;;  %v7175_v9 = vld [vmem:[#allocation2 + $0xc] sm:$0xf] }
  0x8f   : > { %1225 = vrot.lane.b32.xlu0 %v1114_v26, %s6380_s20  ;;  %vm1384_vm5 = vcmask 1042432   ;;  %vm1385_vm8 = vcmask 1046532   ;;  %v390_v48 = vpack.c.bf16 %v354_v51, %v354_v51  ;;  %vm1273_vm2 = vcmask 60448   ;;  %727 = vst.msk [vmem:[#allocation3 + $0x8] sm:$0xf] %vm243_vm0, %v691_v41 }
  0x90   : > { %v1124_v29 = vsel %vm6455_vm7, %v1119_v3, %v1123_v16  ;;  %v1128_v22 = vor.u32 %v1127_v58, %v1123_v16  ;;  %1223 = vrot.lane.b32.xlu2 %v1104_v42, %s6380_s20  ;;  %v1166_v23 = vpop.permute.xlu0 %1165  ;;  %v1174_v17 = vpop.permute.xlu2 %1173  ;;  %v1389_v39 = vrot.slane %v1311_v35, 5  ;;  %v603_v61 = vrot.slane %v601_v52, 4  ;;  %vm7171_vm9 = vmor %vm1384_vm5, %vm1385_vm8  ;;  %v690_v10 = vld [vmem:[#allocation2 + $0x4] sm:$0xf]  ;;  %v1314_v12 = vld [vmem:[#allocation2 + $0x10] sm:$0xf] }
  0x91   : > { %1227 = vrot.lane.b32.xlu1 %v1124_v29, %s6380_s20  ;;  %v794_v1 = vld [vmem:[#allocation2 + $0x84] sm:$0xf]  ;;  %1274 = vst.msk [vmem:[#allocation3] sm:$0xf] %vm1273_vm2, %v1166_v23  ;;  %v7159_v2 = vsel %vm426_vm6, %v241_v38, %v390_v48  ;;  %v6149_v62 = vrot.slane %v1310_v34, 9  ;;  %v1392_v52 = vrot.slane %v7152_v40, 5 }
  0x92   : > { %v1131_v31 = vshll.u32 %v794_v1, 16  ;;  %v1135_v13 = vshrl.u32 %v794_v1, 16  ;;  %v1129_v46 = vrot.slane %v1128_v22, 4  ;;  %1278 = vst.msk [vmem:[#allocation3 + $0x10] sm:$0xf] %vm1273_vm2, %v1174_v17  ;;  %v604_v7 = vrot.slane %v7159_v2, 7 }
  0x93   : > { %v795_v37 = vld [vmem:[#allocation2 + $0x88] sm:$0xf]  ;;  %v1391_v4 = vrot.slane %v1389_v39, 4  ;;  %726 = vst.msk [vmem:[#allocation3 + $0x4] sm:$0xf] %vm243_vm0, %v690_v10  ;;  %v1390_v26 = vsel %vm7171_vm9, %v6149_v62, %v1389_v39  ;;  %v1395_v3 = vrot.slane %v7175_v9, 5 }
  0x94   : > { %v1133_v44 = vrot.slane %v1131_v31, 5  ;;  %v1137_v28 = vrot.slane %v1135_v13, 4  ;;  %v1141_v36 = vshll.u32 %v795_v37, 16  ;;  %v1145_v33 = vshrl.u32 %v795_v37, 16  ;;  %v694_v21 = vld [vmem:[#allocation2 + $0x14] sm:$0xf] }
  0x95   : > { %v796_v45 = vld [vmem:[#allocation2 + $0x8c] sm:$0xf]  ;;  %v605_v20 = vsel %vm6503_vm3, %v603_v61, %v604_v7  ;;  %v1393_v27 = vsel %vm7171_vm9, %v1391_v4, %v1392_v52  ;;  %v1398_v29 = vrot.slane %v1314_v12, 5  ;;  %730 = vst.msk [vmem:[#allocation3 + $0x14] sm:$0xf] %vm243_vm0, %v694_v21  ;;  %v1397_v30 = vrot.slane %v1395_v3, 4 }
  0x96   : > { %v1138_v25 = vor.u32 %v1137_v28, %v1133_v44  ;;  %v1143_v18 = vrot.slane %v1141_v36, 5  ;;  %v1147_v24 = vrot.slane %v1145_v33, 4  ;;  %v1151_v6 = vshll.u32 %v796_v45, 16  ;;  %682 = vst.msk [vmem:[#allocation2 + $0x90] sm:$0xf] %vm243_vm0, %v605_v20 }
  0x97   : > { %v1134_v54 = vsel %vm6455_vm7, %v1129_v46, %v1133_v44  ;;  %v1155_v63 = vshrl.u32 %v796_v45, 16  ;;  %v692_v16 = vld [vmem:[#allocation2 + $0xc] sm:$0xf]  ;;  %v7193_v58 = vld [vmem:[#allocation2 + $0x14] sm:$0xf]  ;;  %v1400_v37 = vrot.slane %v1398_v29, 4  ;;  %v1399_v46 = vsel %vm7171_vm9, %v1397_v30, %v1398_v29 }
  0x98   : > { %v1139_v49 = vrot.slane %v1138_v25, 4  ;;  %v1148_v32 = vor.u32 %v1147_v24, %v1143_v18  ;;  %v7140_v55 = vrot.slane %v1151_v6, 5  ;;  %1229 = vrot.lane.b32.xlu2 %v1134_v54, %s6380_s20  ;;  %v1176_v11 = vpop.permute.xlu2 %1175  ;;  %728 = vst.msk [vmem:[#allocation3 + $0xc] sm:$0xf] %vm243_vm0, %v692_v16  ;;  %v7199_v31 = vld [vmem:[#allocation2 + $0x18] sm:$0xf] }
  0x99   : > { %v1157_v60 = vrot.slane %v1155_v63, 4  ;;  %1279 = vst.msk [vmem:[#allocation3 + $0x14] sm:$0xf] %vm1273_vm2, %v1176_v11  ;;  %v695_v13 = vld [vmem:[#allocation2 + $0x18] sm:$0xf]  ;;  %v1401_v42 = vrot.slane %v7193_v58, 5 }
  0x9a   : > { %v1144_v56 = vsel %vm6455_vm7, %v1139_v49, %v1143_v18  ;;  %v1149_v59 = vrot.slane %v1148_v32, 4  ;;  %v1168_v5 = vpop.permute.xlu0 %1167  ;;  %v697_v22 = vld [vmem:[#allocation2 + $0x20] sm:$0xf]  ;;  %731 = vst.msk [vmem:[#allocation3 + $0x18] sm:$0xf] %vm243_vm0, %v695_v13  ;;  %v1404_v15 = vrot.slane %v7199_v31, 5 }
  0x9b   : > { %1231 = vrot.lane.b32.xlu0 %v1144_v56, %s6380_s20  ;;  %1275 = vst.msk [vmem:[#allocation3 + $0x4] sm:$0xf] %vm1273_vm2, %v1168_v5  ;;  %v1158_v1 = vor.u32 %v1157_v60, %v7140_v55  ;;  %v1317_v28 = vld [vmem:[#allocation2 + $0x1c] sm:$0xf]  ;;  %v1402_v25 = vsel %vm7171_vm9, %v1400_v37, %v1401_v42  ;;  %v1318_v6 = vld [vmem:[#allocation2 + $0x20] sm:$0xf] }
  0x9c   : > { %v1154_v57 = vsel %vm6455_vm7, %v1149_v59, %v7140_v55  ;;  %733 = vst.msk [vmem:[#allocation3 + $0x20] sm:$0xf] %vm243_vm0, %v697_v22  ;;  %v696_v47 = vld [vmem:[#allocation2 + $0x1c] sm:$0xf]  ;;  %v1407_v18 = vrot.slane %v1317_v28, 5  ;;  %v1406_v35 = vrot.slane %v1404_v15, 4 }
  0x9d   : > { %1233 = vrot.lane.b32.xlu1 %v1154_v57, %s6380_s20  ;;  %v797_v44 = vld [vmem:[#allocation2 + $0x90] sm:$0x1]  ;;  %v1159_v36 = vrot.slane %v1158_v1, 4  ;;  %732 = vst.msk [vmem:[#allocation3 + $0x1c] sm:$0xf] %vm243_vm0, %v696_v47  ;;  %v1394_v51 = vrot.slane %v1392_v52, 4 }
  0x9e   : > { %v1161_v33 = vshll.u32 %v797_v44, 16  ;;  %v7217_v50 = vld [vmem:[#allocation2 + $0x24] sm:$0xf]  ;;  %v700_v49 = vld [vmem:[#allocation2 + $0x2c] sm:$0xf]  ;;  %v1409_v32 = vrot.slane %v1407_v18, 4  ;;  %v1408_v48 = vsel %vm7171_vm9, %v1406_v35, %v1407_v18 }
  0x9f   : > { %v1170_v19 = vpop.permute.xlu1 %1169  ;;  %v698_v53 = vld [vmem:[#allocation2 + $0x24] sm:$0xf]  ;;  %v1410_v55 = vrot.slane %v1318_v6, 5  ;;  %v1320_v34 = vld [vmem:[#allocation2 + $0x28] sm:$0xf]  ;;  %v1413_v41 = vrot.slane %v7217_v50, 5  ;;  %v1396_v39 = vsel %vm7171_vm9, %v1394_v51, %v1395_v3 }
  0xa0   : > { %1276 = vst.msk [vmem:[#allocation3 + $0x8] sm:$0xf] %vm1273_vm2, %v1170_v19  ;;  %v1163_v17 = vrot.slane %v1161_v33, 5  ;;  %v699_v59 = vld [vmem:[#allocation2 + $0x28] sm:$0xf]  ;;  %v1416_v63 = vrot.slane %v1320_v34, 5 }
  0xa1   : > { %v1182_v38 = vpop.permute.xlu2 %1181  ;;  %734 = vst.msk [vmem:[#allocation3 + $0x24] sm:$0xf] %vm243_vm0, %v698_v53  ;;  %v1411_v61 = vsel %vm7171_vm9, %v1409_v32, %v1410_v55  ;;  %v1321_v40 = vld [vmem:[#allocation2 + $0x2c] sm:$0xf]  ;;  %v1415_v57 = vrot.slane %v1413_v41, 4  ;;  %v1403_v9 = vrot.slane %v1401_v42, 4 }
  0xa2   : > { %1282 = vst.msk [vmem:[#allocation3 + $0x20] sm:$0xf] %vm1273_vm2, %v1182_v38  ;;  %v1164_v24 = vsel %vm6455_vm7, %v1159_v36, %v1163_v17  ;;  %v7235_v62 = vld [vmem:[#allocation2 + $0x30] sm:$0xf]  ;;  %v703_v11 = vld [vmem:[#allocation2 + $0x38] sm:$0xf] }
  0xa3   : > { %1496 = vrot.lane.b32.xlu0 %v1390_v26, %s6381_s21  ;;  %1235 = vrot.lane.b32.xlu2 %v1164_v24, %s6380_s20  ;;  %736 = vst.msk [vmem:[#allocation3 + $0x2c] sm:$0xf] %vm243_vm0, %v700_v49  ;;  %v701_v10 = vld [vmem:[#allocation2 + $0x30] sm:$0xf]  ;;  %v1418_v4 = vrot.slane %v1416_v63, 4  ;;  %v1419_v52 = vrot.slane %v1321_v40, 5  ;;  %v1417_v19 = vsel %vm7171_vm9, %v1415_v57, %v1416_v63  ;;  %v1405_v26 = vsel %vm7171_vm9, %v1403_v9, %v1404_v15 }
  0xa4   : > { %735 = vst.msk [vmem:[#allocation3 + $0x28] sm:$0xf] %vm243_vm0, %v699_v59  ;;  %v1323_v12 = vld [vmem:[#allocation2 + $0x34] sm:$0xf]  ;;  %v1422_v21 = vrot.slane %v7235_v62, 5  ;;  %v1412_v1 = vrot.slane %v1410_v55, 4 }
  0xa5   : > { %1498 = vrot.lane.b32.xlu1 %v1393_v27, %s6381_s21  ;;  %737 = vst.msk [vmem:[#allocation3 + $0x30] sm:$0xf] %vm243_vm0, %v701_v10  ;;  %v702_v60 = vld [vmem:[#allocation2 + $0x34] sm:$0xf]  ;;  %v1420_v3 = vsel %vm7171_vm9, %v1418_v4, %v1419_v52  ;;  %v1425_v16 = vrot.slane %v1323_v12, 5  ;;  %vm1604_vm7 = vcmask 93248  }
  0xa6   : > { %739 = vst.msk [vmem:[#allocation3 + $0x38] sm:$0xf] %vm243_vm0, %v703_v11  ;;  %v1324_v27 = vld [vmem:[#allocation2 + $0x38] sm:$0xf]  ;;  %v1424_v29 = vrot.slane %v1422_v21, 4  ;;  %v1414_v36 = vsel %vm7171_vm9, %v1412_v1, %v1413_v41  ;;  %vm1932_vm13 = vcmask 126048  }
  0xa7   : > { %v1172_v45 = vpop.permute.xlu1 %1171  ;;  %738 = vst.msk [vmem:[#allocation3 + $0x34] sm:$0xf] %vm243_vm0, %v702_v60  ;;  %v7252_v58 = vld [vmem:[#allocation2 + $0x3c] sm:$0xf]  ;;  %v706_v31 = vld [vmem:[#allocation2 + $0x44] sm:$0xf] }
  0xa8   : > { %1277 = vst.msk [vmem:[#allocation3 + $0xc] sm:$0xf] %vm1273_vm2, %v1172_v45  ;;  %v1178_v23 = vpop.permute.xlu0 %1177  ;;  %v704_v30 = vld [vmem:[#allocation2 + $0x3c] sm:$0xf]  ;;  %v705_v13 = vld [vmem:[#allocation2 + $0x40] sm:$0xf]  ;;  %v1426_v42 = vsel %vm7171_vm9, %v1424_v29, %v1425_v16 }
  0xa9   : > { %1280 = vst.msk [vmem:[#allocation3 + $0x18] sm:$0xf] %vm1273_vm2, %v1178_v23  ;;  %v1427_v22 = vrot.slane %v1425_v16, 4  ;;  %v1428_v38 = vrot.slane %v1324_v27, 5  ;;  %v1326_v37 = vld [vmem:[#allocation2 + $0x40] sm:$0xf] }
  0xaa   : > { %740 = vst.msk [vmem:[#allocation3 + $0x3c] sm:$0xf] %vm243_vm0, %v704_v30  ;;  %v1431_v44 = vrot.slane %v7252_v58, 5  ;;  %v1434_v45 = vrot.slane %v1326_v37, 5  ;;  %v1327_v15 = vld [vmem:[#allocation2 + $0x44] sm:$0xf] }
  0xab   : > { %1502 = vrot.lane.b32.xlu0 %v1399_v46, %s6381_s21  ;;  %1500 = vrot.lane.b32.xlu2 %v1396_v39, %s6381_s21  ;;  %742 = vst.msk [vmem:[#allocation3 + $0x44] sm:$0xf] %vm243_vm0, %v706_v31  ;;  %v1429_v33 = vsel %vm7171_vm9, %v1427_v22, %v1428_v38  ;;  %v7269_v17 = vld [vmem:[#allocation2 + $0x48] sm:$0xf]  ;;  %v709_v24 = vld [vmem:[#allocation2 + $0x50] sm:$0xf] }
  0xac   : > { %741 = vst.msk [vmem:[#allocation3 + $0x40] sm:$0xf] %vm243_vm0, %v705_v13  ;;  %v1433_v47 = vrot.slane %v1431_v44, 4  ;;  %v707_v18 = vld [vmem:[#allocation2 + $0x48] sm:$0xf]  ;;  %v1436_v35 = vrot.slane %v1434_v45, 4 }
  0xad   : > { %1504 = vrot.lane.b32.xlu1 %v1402_v25, %s6381_s21  ;;  %v1421_v25 = vrot.slane %v1419_v52, 4  ;;  %v708_v6 = vld [vmem:[#allocation2 + $0x4c] sm:$0xf]  ;;  %v1437_v50 = vrot.slane %v1327_v15, 5  ;;  %743 = vst.msk [vmem:[#allocation3 + $0x48] sm:$0xf] %vm243_vm0, %v707_v18 }
  0xae   : > { %v1329_v51 = vld [vmem:[#allocation2 + $0x4c] sm:$0xf]  ;;  %745 = vst.msk [vmem:[#allocation3 + $0x50] sm:$0xf] %vm243_vm0, %v709_v24  ;;  %v1435_v53 = vsel %vm7171_vm9, %v1433_v47, %v1434_v45  ;;  %v1440_v49 = vrot.slane %v7269_v17, 5  ;;  %v1430_v59 = vrot.slane %v1428_v38, 4 }
  0xaf   : > { %v1180_v14 = vpop.permute.xlu1 %1179  ;;  %v1188_v54 = vpop.permute.xlu2 %1187  ;;  %744 = vst.msk [vmem:[#allocation3 + $0x4c] sm:$0xf] %vm243_vm0, %v708_v6  ;;  %v1423_v32 = vsel %vm7171_vm9, %v1421_v25, %v1422_v21  ;;  %v1438_v34 = vsel %vm7171_vm9, %v1436_v35, %v1437_v50  ;;  %v712_v63 = vld [vmem:[#allocation2 + $0x5c] sm:$0xf]  ;;  %v711_v62 = vld [vmem:[#allocation2 + $0x58] sm:$0xf] }
  0xb0   : > { %1281 = vst.msk [vmem:[#allocation3 + $0x1c] sm:$0xf] %vm1273_vm2, %v1180_v14  ;;  %v1184_v56 = vpop.permute.xlu0 %1183  ;;  %v1443_v14 = vrot.slane %v1329_v51, 5  ;;  %v1442_v41 = vrot.slane %v1440_v49, 4  ;;  %v1332_v9 = vld [vmem:[#allocation2 + $0x58] sm:$0xf]  ;;  %v1432_v4 = vsel %vm7171_vm9, %v1430_v59, %v1431_v44 }
  0xb1   : > { %1283 = vst.msk [vmem:[#allocation3 + $0x24] sm:$0xf] %vm1273_vm2, %v1184_v56  ;;  %v7286_v56 = vld [vmem:[#allocation2 + $0x54] sm:$0xf]  ;;  %v1452_v12 = vrot.slane %v1332_v9, 5  ;;  %v1439_v21 = vrot.slane %v1437_v50, 4 }
  0xb2   : > { %1285 = vst.msk [vmem:[#allocation3 + $0x2c] sm:$0xf] %vm1273_vm2, %v1188_v54  ;;  %v1330_v54 = vld [vmem:[#allocation2 + $0x50] sm:$0xf]  ;;  %v1445_v40 = vrot.slane %v1443_v14, 4  ;;  %v1444_v10 = vsel %vm7171_vm9, %v1442_v41, %v1443_v14  ;;  %v1449_v11 = vrot.slane %v7286_v56, 5 }
  0xb3   : > { %1508 = vrot.lane.b32.xlu0 %v1408_v48, %s6381_s21  ;;  %1506 = vrot.lane.b32.xlu2 %v1405_v26, %s6381_s21  ;;  %v1446_v57 = vrot.slane %v1330_v54, 5  ;;  %748 = vst.msk [vmem:[#allocation3 + $0x5c] sm:$0xf] %vm243_vm0, %v712_v63  ;;  %v715_v16 = vld [vmem:[#allocation2 + $0x68] sm:$0xf]  ;;  %v1454_v27 = vrot.slane %v1452_v12, 4  ;;  %v1441_v13 = vsel %vm7171_vm9, %v1439_v21, %v1440_v49 }
  0xb4   : > { %747 = vst.msk [vmem:[#allocation3 + $0x58] sm:$0xf] %vm243_vm0, %v711_v62  ;;  %v1451_v60 = vrot.slane %v1449_v11, 4  ;;  %v714_v58 = vld [vmem:[#allocation2 + $0x64] sm:$0xf]  ;;  %vm2596_vm14 = vcmask 1041408  }
  0xb5   : > { %1510 = vrot.lane.b32.xlu1 %v1411_v61, %s6381_s21  ;;  %v710_v61 = vld [vmem:[#allocation2 + $0x54] sm:$0xf]  ;;  %v1447_v52 = vsel %vm7171_vm9, %v1445_v40, %v1446_v57  ;;  %v1335_v1 = vld [vmem:[#allocation2 + $0x64] sm:$0xf]  ;;  %751 = vst.msk [vmem:[#allocation3 + $0x68] sm:$0xf] %vm243_vm0, %v715_v16 }
  0xb6   : > { %746 = vst.msk [vmem:[#allocation3 + $0x54] sm:$0xf] %vm243_vm0, %v710_v61  ;;  %v1453_v30 = vsel %vm7171_vm9, %v1451_v60, %v1452_v12  ;;  %v1461_v38 = vrot.slane %v1335_v1, 5  ;;  %v718_v45 = vld [vmem:[#allocation2 + $0x74] sm:$0xf]  ;;  %vm2597_vm15 = vcmask 1045508  }
  0xb7   : > { %v1186_v20 = vpop.permute.xlu1 %1185  ;;  %v1194_v5 = vpop.permute.xlu2 %1193  ;;  %750 = vst.msk [vmem:[#allocation3 + $0x64] sm:$0xf] %vm243_vm0, %v714_v58  ;;  %v1338_v47 = vld [vmem:[#allocation2 + $0x70] sm:$0xf]  ;;  %v1339_v50 = vld [vmem:[#allocation2 + $0x74] sm:$0xf]  ;;  %vm7797_vm4 = vmor %vm2596_vm14, %vm2597_vm15 }
  0xb8   : > { %1284 = vst.msk [vmem:[#allocation3 + $0x28] sm:$0xf] %vm1273_vm2, %v1186_v20  ;;  %v1463_v15 = vrot.slane %v1461_v38, 4  ;;  %v1470_v35 = vrot.slane %v1338_v47, 5  ;;  %v7337_v49 = vld [vmem:[#allocation2 + $0x78] sm:$0xf] }
  0xb9   : > { %1288 = vst.msk [vmem:[#allocation3 + $0x38] sm:$0xf] %vm1273_vm2, %v1194_v5  ;;  %v1333_v5 = vld [vmem:[#allocation2 + $0x5c] sm:$0xf]  ;;  %v721_v14 = vld [vmem:[#allocation2 + $0x80] sm:$0xf] }
  0xba   : > { %v1455_v29 = vrot.slane %v1333_v5, 5  ;;  %754 = vst.msk [vmem:[#allocation3 + $0x74] sm:$0xf] %vm243_vm0, %v718_v45  ;;  %v1472_v54 = vrot.slane %v1470_v35, 4  ;;  %v720_v41 = vld [vmem:[#allocation2 + $0x7c] sm:$0xf] }
  0xbb   : > { %1514 = vrot.lane.b32.xlu0 %v1417_v19, %s6381_s21  ;;  %1512 = vrot.lane.b32.xlu2 %v1414_v36, %s6381_s21  ;;  %v7304_v19 = vld [vmem:[#allocation2 + $0x60] sm:$0xf]  ;;  %v1448_v36 = vrot.slane %v1446_v57, 4  ;;  %v1341_v56 = vld [vmem:[#allocation2 + $0x7c] sm:$0xf]  ;;  %vm2485_vm5 = vcmask 158848  }
  0xbc   : > { %v1458_v31 = vrot.slane %v7304_v19, 5  ;;  %v1456_v22 = vsel %vm7171_vm9, %v1454_v27, %v1455_v29  ;;  %757 = vst.msk [vmem:[#allocation3 + $0x80] sm:$0xf] %vm243_vm0, %v721_v14  ;;  %v1479_v40 = vrot.slane %v1341_v56, 5  ;;  %v1342_v57 = vld [vmem:[#allocation2 + $0x80] sm:$0xf] }
  0xbd   : > { %1516 = vrot.lane.b32.xlu1 %v1420_v3, %s6381_s21  ;;  %v713_v3 = vld [vmem:[#allocation2 + $0x60] sm:$0xf]  ;;  %v1450_v18 = vsel %vm7171_vm9, %v1448_v36, %v1449_v11  ;;  %756 = vst.msk [vmem:[#allocation3 + $0x7c] sm:$0xf] %vm243_vm0, %v720_v41  ;;  %v1343_v11 = vld [vmem:[#allocation2 + $0x84] sm:$0xf] }
  0xbe   : > { %749 = vst.msk [vmem:[#allocation3 + $0x60] sm:$0xf] %vm243_vm0, %v713_v3  ;;  %v1460_v44 = vrot.slane %v1458_v31, 4  ;;  %v1481_v12 = vrot.slane %v1479_v40, 4  ;;  %v724_v60 = vld [vmem:[#allocation2 + $0x8c] sm:$0xf] }
  0xbf   : > { %v1344_v19 = vld [vmem:[#allocation2 + $0x88] sm:$0xf]  ;;  %v1485_v3 = vrot.slane %v1343_v11, 5  ;;  %760 = vst.msk [vmem:[#allocation3 + $0x8c] sm:$0xf] %vm243_vm0, %v724_v60 }
  0xc0   : > { %v1190_v28 = vpop.permute.xlu0 %1189  ;;  %v1462_v17 = vsel %vm7171_vm9, %v1460_v44, %v1461_v38  ;;  %v723_v21 = vld [vmem:[#allocation2 + $0x88] sm:$0xf]  ;;  %v1345_v58 = vld [vmem:[#allocation2 + $0x8c] sm:$0xf]  ;;  %v1647_v14 = vld [vmem:[#allocation2 + $0x20] sm:$0xf] }
  0xc1   : > { %1286 = vst.msk [vmem:[#allocation3 + $0x30] sm:$0xf] %vm1273_vm2, %v1190_v28  ;;  %v7321_v28 = vld [vmem:[#allocation2 + $0x6c] sm:$0xf]  ;;  %v1487_v1 = vrot.slane %v1485_v3, 4 }
  0xc2   : > { %v1192_v46 = vpop.permute.xlu1 %1191  ;;  %v1200_v23 = vpop.permute.xlu2 %1199  ;;  %v1467_v25 = vrot.slane %v7321_v28, 5  ;;  %759 = vst.msk [vmem:[#allocation3 + $0x88] sm:$0xf] %vm243_vm0, %v723_v21  ;;  %v1641_v28 = vld [vmem:[#allocation2 + $0x8] sm:$0xe] }
  0xc3   : > { %1520 = vrot.lane.b32.xlu0 %v1426_v42, %s6381_s21  ;;  %1287 = vst.msk [vmem:[#allocation3 + $0x34] sm:$0xf] %vm1273_vm2, %v1192_v46  ;;  %1518 = vrot.lane.b32.xlu2 %v1423_v32, %s6381_s21  ;;  %v1336_v42 = vld [vmem:[#allocation2 + $0x68] sm:$0xf]  ;;  %v717_v46 = vld [vmem:[#allocation2 + $0x70] sm:$0xf] }
  0xc4   : > { %1291 = vst.msk [vmem:[#allocation3 + $0x44] sm:$0xf] %vm1273_vm2, %v1200_v23  ;;  %v1464_v23 = vrot.slane %v1336_v42, 5  ;;  %v1469_v51 = vrot.slane %v1467_v25, 4  ;;  %v1457_v32 = vrot.slane %v1455_v29, 4  ;;  %v1488_v29 = vrot.slane %v1344_v19, 5 }
  0xc5   : > { %1522 = vrot.lane.b32.xlu1 %v1429_v33, %s6381_s21  ;;  %v716_v33 = vld [vmem:[#allocation2 + $0x6c] sm:$0xf]  ;;  %753 = vst.msk [vmem:[#allocation3 + $0x70] sm:$0xf] %vm243_vm0, %v717_v46  ;;  %v1643_v46 = vld [vmem:[#allocation2 + $0x10] sm:$0xf] }
  0xc6   : > { %752 = vst.msk [vmem:[#allocation3 + $0x6c] sm:$0xf] %vm243_vm0, %v716_v33  ;;  %v1465_v6 = vsel %vm7171_vm9, %v1463_v15, %v1464_v23  ;;  %v1471_v59 = vsel %vm7171_vm9, %v1469_v51, %v1470_v35  ;;  %v1459_v61 = vsel %vm7171_vm9, %v1457_v32, %v1458_v31  ;;  %v1489_v42 = vsel %vm7171_vm9, %v1487_v1, %v1488_v29  ;;  %v1651_v19 = vld [vmem:[#allocation2 + $0x30] sm:$0xf]  ;;  %v1981_v8 = vld [vmem:[#allocation2 + $0x38] sm:$0xf] }
  0xc7   : > { %v6150_v15 = vrot.slane %v1641_v28, 9  ;;  %vm3218_vm6 = vsmask.f32 1280  ;;  %vm3219_vm8 = vsmask.f32 5392 }
  0xc9   : > { %v1196_v55 = vpop.permute.xlu0 %1195 }
  0xca   : > { %1289 = vst.msk [vmem:[#allocation3 + $0x3c] sm:$0xf] %vm1273_vm2, %v1196_v55  ;;  %v1206_v48 = vpop.permute.xlu2 %1205 }
  0xcb   : > { %1526 = vrot.lane.b32.xlu0 %v1435_v53, %s6381_s21  ;;  %1294 = vst.msk [vmem:[#allocation3 + $0x50] sm:$0xf] %vm1273_vm2, %v1206_v48  ;;  %1524 = vrot.lane.b32.xlu2 %v1432_v4, %s6381_s21  ;;  %v1473_v48 = vrot.slane %v1339_v50, 5  ;;  %v1466_v4 = vrot.slane %v1464_v23, 4  ;;  %v1644_v23 = vld [vmem:[#allocation2 + $0x14] sm:$0xf] }
  0xcc   : > { %v1198_v39 = vpop.permute.xlu1 %1197 }
  0xcd   : > { %1528 = vrot.lane.b32.xlu1 %v1438_v34, %s6381_s21  ;;  %1290 = vst.msk [vmem:[#allocation3 + $0x40] sm:$0xf] %vm1273_vm2, %v1198_v39  ;;  %v719_v34 = vld [vmem:[#allocation2 + $0x78] sm:$0xf]  ;;  %v1476_v39 = vrot.slane %v7337_v49, 5  ;;  %v1474_v63 = vsel %vm7171_vm9, %v1472_v54, %v1473_v48  ;;  %v1468_v16 = vsel %vm7171_vm9, %v1466_v4, %v1467_v25  ;;  %v1475_v31 = vrot.slane %v1473_v48, 4 }
  0xce   : > { %755 = vst.msk [vmem:[#allocation3 + $0x78] sm:$0xf] %vm243_vm0, %v719_v34  ;;  %v1720_v25 = vrot.slane %v1643_v46, 5  ;;  %v1346_v49 = vld [vmem:[#allocation2 + $0x90] sm:$0x1] }
  0xcf   : > { %v1478_v9 = vrot.slane %v1476_v39, 4  ;;  %v1477_v36 = vsel %vm7171_vm9, %v1475_v31, %v1476_v39  ;;  %v1494_v48 = vrot.slane %v1346_v49, 5  ;;  %v1648_v39 = vld [vmem:[#allocation2 + $0x24] sm:$0xf]  ;;  %v1650_v4 = vld [vmem:[#allocation2 + $0x2c] sm:$0xf] }
  0xd0   : > { %v1655_v46 = vld [vmem:[#allocation2 + $0x40] sm:$0xf] }
  0xd2   : > { %v1202_v20 = vpop.permute.xlu0 %1201 }
  0xd3   : > { %1532 = vrot.lane.b32.xlu0 %v1444_v10, %s6381_s21  ;;  %1292 = vst.msk [vmem:[#allocation3 + $0x48] sm:$0xf] %vm1273_vm2, %v1202_v20  ;;  %1530 = vrot.lane.b32.xlu2 %v1441_v13, %s6381_s21  ;;  %v1482_v20 = vrot.slane %v1342_v57, 5  ;;  %v1490_v13 = vrot.slane %v1488_v29, 4  ;;  %v1652_v29 = vld [vmem:[#allocation2 + $0x34] sm:$0xf] }
  0xd5   : > { %1534 = vrot.lane.b32.xlu1 %v1447_v52, %s6381_s21  ;;  %v1204_v26 = vpop.permute.xlu1 %1203  ;;  %v722_v52 = vld [vmem:[#allocation2 + $0x84] sm:$0xf]  ;;  %v1483_v27 = vsel %vm7171_vm9, %v1481_v12, %v1482_v20  ;;  %v1484_v47 = vrot.slane %v1482_v20, 4 }
  0xd6   : > { %1293 = vst.msk [vmem:[#allocation3 + $0x4c] sm:$0xf] %vm1273_vm2, %v1204_v26  ;;  %v1480_v26 = vsel %vm7171_vm9, %v1478_v9, %v1479_v40  ;;  %v1649_v9 = vld [vmem:[#allocation2 + $0x28] sm:$0xf] }
  0xd7   : > { %758 = vst.msk [vmem:[#allocation3 + $0x84] sm:$0xf] %vm243_vm0, %v722_v52  ;;  %v1486_v50 = vsel %vm7171_vm9, %v1484_v47, %v1485_v3  ;;  %v1722_v52 = vrot.slane %v1720_v25, 4  ;;  %v1738_v20 = vrot.slane %v1649_v9, 5  ;;  %v7427_v47 = vld [vmem:[#allocation2 + $0x44] sm:$0xf] }
  0xda   : > { %v1212_v37 = vpop.permute.xlu2 %1211 }
  0xdb   : > { %1538 = vrot.lane.b32.xlu0 %v1453_v30, %s6381_s21  ;;  %1297 = vst.msk [vmem:[#allocation3 + $0x5c] sm:$0xf] %vm1273_vm2, %v1212_v37  ;;  %1536 = vrot.lane.b32.xlu2 %v1450_v18, %s6381_s21  ;;  %v1642_v37 = vld [vmem:[#allocation2 + $0xc] sm:$0xf]  ;;  %v1645_v18 = vld [vmem:[#allocation2 + $0x18] sm:$0xf] }
  0xdc   : > { %v1717_v45 = vrot.slane %v1642_v37, 5 }
  0xdd   : > { %1540 = vrot.lane.b32.xlu1 %v1456_v22, %s6381_s21  ;;  %v1491_v22 = vrot.slane %v1345_v58, 5 }
  0xdf   : > { %v1492_v33 = vsel %vm7171_vm9, %v1490_v13, %v1491_v22  ;;  %v1493_v54 = vrot.slane %v1491_v22, 4  ;;  %v1747_v22 = vrot.slane %v1652_v29, 5 }
  0xe1   : > { %v1208_v24 = vpop.permute.xlu0 %1207  ;;  %v1495_v40 = vsel %vm7171_vm9, %v1493_v54, %v1494_v48  ;;  %v7442_v54 = vld [vmem:[#allocation2 + $0x50] sm:$0xf]  ;;  %v1749_v48 = vrot.slane %v1747_v22, 4 }
  0xe2   : > { %1295 = vst.msk [vmem:[#allocation3 + $0x54] sm:$0xf] %vm1273_vm2, %v1208_v24  ;;  %v1218_v55 = vpop.permute.xlu2 %1217  ;;  %v1718_v24 = vsel %vm7171_vm9, %v6150_v15, %v1717_v45 }
  0xe3   : > { %1544 = vrot.lane.b32.xlu0 %v1462_v17, %s6381_s21  ;;  %1300 = vst.msk [vmem:[#allocation3 + $0x68] sm:$0xf] %vm1273_vm2, %v1218_v55  ;;  %1542 = vrot.lane.b32.xlu2 %v1459_v61, %s6381_s21  ;;  %v1719_v17 = vrot.slane %v1717_v45, 4  ;;  %v1646_v55 = vld [vmem:[#allocation2 + $0x1c] sm:$0xf] }
  0xe4   : > { %v1210_v53 = vpop.permute.xlu1 %1209  ;;  %v1729_v56 = vrot.slane %v1646_v55, 5  ;;  %v1658_v55 = vld [vmem:[#allocation2 + $0x4c] sm:$0xf] }
  0xe5   : > { %1546 = vrot.lane.b32.xlu1 %v1465_v6, %s6381_s21  ;;  %1296 = vst.msk [vmem:[#allocation3 + $0x58] sm:$0xf] %vm1273_vm2, %v1210_v53  ;;  %v1723_v6 = vrot.slane %v1644_v23, 5  ;;  %v1721_v51 = vsel %vm7171_vm9, %v1719_v17, %v1720_v25  ;;  %v1726_v53 = vrot.slane %v1645_v18, 5  ;;  %v1740_v17 = vrot.slane %v1738_v20, 4 }
  0xe6   : > { %v1731_v31 = vrot.slane %v1729_v56, 4  ;;  %v1756_v18 = vrot.slane %v1655_v46, 5 }
  0xe7   : > { %v1725_v34 = vrot.slane %v1723_v6, 4  ;;  %v1728_v41 = vrot.slane %v1726_v53, 4  ;;  %v1724_v3 = vsel %vm7171_vm9, %v1722_v52, %v1723_v6 }
  0xe9   : > { %v1727_v61 = vsel %vm7171_vm9, %v1725_v34, %v1726_v53  ;;  %v1730_v57 = vsel %vm7171_vm9, %v1728_v41, %v1729_v56  ;;  %v1765_v56 = vrot.slane %v1658_v55, 5 }
  0xea   : > { %v1224_v5 = vpop.permute.xlu2 %1223 }
  0xeb   : > { %1550 = vrot.lane.b32.xlu0 %v1471_v59, %s6381_s21  ;;  %v1214_v62 = vpop.permute.xlu0 %1213  ;;  %1303 = vst.msk [vmem:[#allocation3 + $0x74] sm:$0xf] %vm1273_vm2, %v1224_v5  ;;  %1548 = vrot.lane.b32.xlu2 %v1468_v16, %s6381_s21 }
  0xec   : > { %1298 = vst.msk [vmem:[#allocation3 + $0x60] sm:$0xf] %vm1273_vm2, %v1214_v62  ;;  %v1735_v62 = vrot.slane %v1648_v39, 5 }
  0xed   : > { %1552 = vrot.lane.b32.xlu1 %v1474_v63, %s6381_s21  ;;  %v1216_v10 = vpop.permute.xlu1 %1215  ;;  %v1732_v63 = vrot.slane %v1647_v14, 5 }
  0xee   : > { %1299 = vst.msk [vmem:[#allocation3 + $0x64] sm:$0xf] %vm1273_vm2, %v1216_v10  ;;  %v1737_v12 = vrot.slane %v1735_v62, 4 }
  0xef   : > { %v1734_v10 = vrot.slane %v1732_v63, 4 }
  0xf0   : > { %v1739_v16 = vsel %vm7171_vm9, %v1737_v12, %v1738_v20 }
  0xf1   : > { %v1736_v21 = vsel %vm7171_vm9, %v1734_v10, %v1735_v62 }
  0xf2   : > { %v1230_v38 = vpop.permute.xlu2 %1229 }
  0xf3   : > { %1556 = vrot.lane.b32.xlu0 %v1480_v26, %s6381_s21  ;;  %1306 = vst.msk [vmem:[#allocation3 + $0x80] sm:$0xf] %vm1273_vm2, %v1230_v38  ;;  %1554 = vrot.lane.b32.xlu2 %v1477_v36, %s6381_s21  ;;  %v1741_v26 = vrot.slane %v1650_v4, 5  ;;  %v1733_v36 = vsel %vm7171_vm9, %v1731_v31, %v1732_v63  ;;  %v1661_v4 = vld [vmem:[#allocation2 + $0x58] sm:$0xf] }
  0xf5   : > { %1558 = vrot.lane.b32.xlu1 %v1483_v27, %s6381_s21  ;;  %v1220_v30 = vpop.permute.xlu0 %1219  ;;  %v1744_v27 = vrot.slane %v1651_v19, 5  ;;  %v1743_v58 = vrot.slane %v1741_v26, 4  ;;  %v1742_v53 = vsel %vm7171_vm9, %v1740_v17, %v1741_v26  ;;  %v1774_v26 = vrot.slane %v1661_v4, 5 }
  0xf6   : > { %1301 = vst.msk [vmem:[#allocation3 + $0x6c] sm:$0xf] %vm1273_vm2, %v1220_v30  ;;  %v1653_v30 = vld [vmem:[#allocation2 + $0x38] sm:$0xf] }
  0xf7   : > { %v1746_v13 = vrot.slane %v1744_v27, 4  ;;  %v1750_v28 = vrot.slane %v1653_v30, 5 }
  0xf9   : > { %v1222_v44 = vpop.permute.xlu1 %1221  ;;  %v1752_v15 = vrot.slane %v1750_v28, 4  ;;  %v1751_v62 = vsel %vm7171_vm9, %v1749_v48, %v1750_v28  ;;  %v1767_v28 = vrot.slane %v1765_v56, 4 }
  0xfa   : > { %1302 = vst.msk [vmem:[#allocation3 + $0x70] sm:$0xf] %vm1273_vm2, %v1222_v44  ;;  %v1745_v44 = vsel %vm7171_vm9, %v1743_v58, %v1744_v27  ;;  %v1663_v27 = vld [vmem:[#allocation2 + $0x60] sm:$0xf]  ;;  %v606_v58 = vrot.slane %v604_v7, 4 }
  0xfb   : > { %1562 = vrot.lane.b32.xlu0 %v1489_v42, %s6381_s21  ;;  %1560 = vrot.lane.b32.xlu2 %v1486_v50, %s6381_s21  ;;  %v1654_v42 = vld [vmem:[#allocation2 + $0x3c] sm:$0xf]  ;;  %v1664_v7 = vld [vmem:[#allocation2 + $0x64] sm:$0xf] }
  0xfc   : > { %v1753_v45 = vrot.slane %v1654_v42, 5 }
  0xfd   : > { %1564 = vrot.lane.b32.xlu1 %v1492_v33, %s6381_s21  ;;  %v1236_v59 = vpop.permute.xlu2 %1235  ;;  %v1748_v33 = vsel %vm7171_vm9, %v1746_v13, %v1747_v22 }
  0xfe   : > { %1309 = vst.msk [vmem:[#allocation3 + $0x8c] sm:$0xf] %vm1273_vm2, %v1236_v59  ;;  %v1755_v25 = vrot.slane %v1753_v45, 4  ;;  %v1754_v50 = vsel %vm7171_vm9, %v1752_v15, %v1753_v45  ;;  %v1666_v15 = vld [vmem:[#allocation2 + $0x6c] sm:$0xf] }
 0x100   : > { %v1757_v49 = vsel %vm7171_vm9, %v1755_v25, %v1756_v18 }
 0x101   : > { %v1226_v35 = vpop.permute.xlu0 %1225 }
 0x102   : > { %1304 = vst.msk [vmem:[#allocation3 + $0x78] sm:$0xf] %vm1273_vm2, %v1226_v35  ;;  %v1657_v35 = vld [vmem:[#allocation2 + $0x48] sm:$0xf] }
 0x103   : > { %1824 = vrot.lane.b32.xlu0 %v1718_v24, %s6382_s22  ;;  %v1228_v32 = vpop.permute.xlu1 %1227  ;;  %1566 = vrot.lane.b32.xlu2 %v1495_v40, %s6381_s21  ;;  %v1768_v40 = vrot.slane %v7442_v54, 5 }
 0x104   : > { %1305 = vst.msk [vmem:[#allocation3 + $0x7c] sm:$0xf] %vm1273_vm2, %v1228_v32  ;;  %v1762_v32 = vrot.slane %v1657_v35, 5 }
 0x105   : > { %1826 = vrot.lane.b32.xlu1 %v1721_v51, %s6382_s22  ;;  %v1501_v5 = vpop.permute.xlu2 %1500  ;;  %v1759_v51 = vrot.slane %v7427_v47, 5  ;;  %v1770_v12 = vrot.slane %v1768_v40, 4  ;;  %v1769_v17 = vsel %vm7171_vm9, %v1767_v28, %v1768_v40 }
 0x106   : > { %1607 = vst.msk [vmem:[#allocation3 + $0x8] sm:$0xf] %vm1604_vm7, %v1501_v5  ;;  %v1764_v41 = vrot.slane %v1762_v32, 4  ;;  %v7458_v5 = vld [vmem:[#allocation2 + $0x5c] sm:$0xf] }
 0x107   : > { %v1761_v34 = vrot.slane %v1759_v51, 4  ;;  %v1777_v30 = vrot.slane %v7458_v5, 5 }
 0x108   : > { %v1766_v10 = vsel %vm7171_vm9, %v1764_v41, %v1765_v56 }
 0x109   : > { %v1763_v63 = vsel %vm7171_vm9, %v1761_v34, %v1762_v32  ;;  %v1669_v34 = vld [vmem:[#allocation2 + $0x78] sm:$0xf] }
 0x10a   : > { %v1798_v56 = vrot.slane %v1669_v34, 5 }
 0x10b   : > { %1830 = vrot.lane.b32.xlu0 %v1727_v61, %s6382_s22  ;;  %1828 = vrot.lane.b32.xlu2 %v1724_v3, %s6382_s22  ;;  %v1660_v61 = vld [vmem:[#allocation2 + $0x54] sm:$0xf] }
 0x10d   : > { %1832 = vrot.lane.b32.xlu1 %v1730_v57, %s6382_s22  ;;  %v1232_v11 = vpop.permute.xlu0 %1231  ;;  %v1507_v38 = vpop.permute.xlu2 %1506  ;;  %v242_v57 = vld [vmem:[%s6445_s19 + $0x8c] sm:$0xf] }
 0x10e   : > { %1307 = vst.msk [vmem:[#allocation3 + $0x84] sm:$0xf] %vm1273_vm2, %v1232_v11  ;;  %v283_v9 = vunpack.c.l.bf16 %v242_v57  ;;  %v1771_v11 = vrot.slane %v1660_v61, 5 }
 0x10f   : > { %v1234_v60 = vpop.permute.xlu1 %1233  ;;  %1610 = vst.msk [vmem:[#allocation3 + $0x14] sm:$0xf] %vm1604_vm7, %v1507_v38  ;;  %v1780_v38 = vrot.slane %v1663_v27, 5 }
 0x110   : > { %1308 = vst.msk [vmem:[#allocation3 + $0x88] sm:$0xf] %vm1273_vm2, %v1234_v60  ;;  %v355_v52 = vmul.f32 0.100097656, %v283_v9  ;;  %vm319_vm10 = vcmp.ge.f32.partialorder %v283_v9, 0.0  ;;  %v1758_v60 = vrot.slane %v1756_v18, 4  ;;  %v1789_v18 = vrot.slane %v1666_v15, 5  ;;  %vm7974_vm2 = vmor %vm3218_vm6, %vm3219_vm8 }
 0x111   : > { %vm427_vm11 = vmpackc.low %vm319_vm10, %vm319_vm10  ;;  %vm3697_vm10 = vcmask 257248  }
 0x112   : > { %v391_v19 = vpack.c.bf16 %v355_v52, %v355_v52  ;;  %v1760_v13 = vsel %vm7171_vm9, %v1758_v60, %v1759_v51  ;;  %v1776_v51 = vrot.slane %v1774_v26, 4 }
 0x113   : > { %1836 = vrot.lane.b32.xlu0 %v1736_v21, %s6382_s22  ;;  %1834 = vrot.lane.b32.xlu2 %v1733_v36, %s6382_s22  ;;  %v1773_v21 = vrot.slane %v1771_v11, 4  ;;  %v1782_v36 = vrot.slane %v1780_v38, 4 }
 0x114   : > { %v7462_v29 = vsel %vm427_vm11, %v242_v57, %v391_v19  ;;  %v1778_v48 = vsel %vm7171_vm9, %v1776_v51, %v1777_v30  ;;  %v1800_v57 = vrot.slane %v1798_v56, 4  ;;  %v7526_v19 = vld [vmem:[#allocation2 + $0x88] sm:$0xf]  ;;  %vm4025_vm11 = vcmask 290048  }
 0x115   : > { %1838 = vrot.lane.b32.xlu1 %v1739_v16, %s6382_s22  ;;  %v1497_v1 = vpop.permute.xlu0 %1496  ;;  %v1513_v24 = vpop.permute.xlu2 %1512  ;;  %v607_v31 = vrot.slane %v7462_v29, 7  ;;  %v1775_v22 = vsel %vm7171_vm9, %v1773_v21, %v1774_v26  ;;  %v1969_v26 = vld [vmem:[#allocation2 + $0x8] sm:$0xe]  ;;  %v1970_v29 = vld [vmem:[#allocation2 + $0xc] sm:$0xf] }
 0x116   : > { %1605 = vst.msk [vmem:[#allocation3] sm:$0xf] %vm1604_vm7, %v1497_v1  ;;  %v1772_v1 = vsel %vm7171_vm9, %v1770_v12, %v1771_v11  ;;  %v1672_v11 = vld [vmem:[#allocation2 + $0x84] sm:$0xf] }
 0x117   : > { %v1499_v37 = vpop.permute.xlu1 %1498  ;;  %1613 = vst.msk [vmem:[#allocation3 + $0x20] sm:$0xf] %vm1604_vm7, %v1513_v24  ;;  %v608_v2 = vsel %vm6503_vm3, %v606_v58, %v607_v31  ;;  %v1667_v24 = vld [vmem:[#allocation2 + $0x70] sm:$0xf]  ;;  %v609_v12 = vrot.slane %v607_v31, 4  ;;  %v1807_v60 = vrot.slane %v1672_v11, 5 }
 0x118   : > { %1606 = vst.msk [vmem:[#allocation3 + $0x4] sm:$0xf] %vm1604_vm7, %v1499_v37  ;;  %v1779_v37 = vrot.slane %v1777_v30, 4 }
 0x119   : > { %683 = vst.msk [vmem:[#allocation2 + $0x94] sm:$0xf] %vm243_vm0, %v608_v2  ;;  %v1809_v58 = vrot.slane %v1807_v60, 4  ;;  %vm2006_vm0 = vsmask.f32 2304 }
 0x11a   : > { %684 = vst.msk [vmem:[#allocation2 + $0x98] sm:$0x1] %vm246_vm1, %v609_v12  ;;  %vm2007_vm1 = vsmask.f32 6416 }
 0x11b   : > { %1842 = vrot.lane.b32.xlu0 %v1745_v44, %s6382_s22  ;;  %1840 = vrot.lane.b32.xlu2 %v1742_v53, %s6382_s22  ;;  %v1665_v44 = vld [vmem:[#allocation2 + $0x68] sm:$0xf]  ;;  %v1791_v53 = vrot.slane %v1789_v18, 4  ;;  %vm7567_vm12 = vmor %vm2006_vm0, %vm2007_vm1  ;;  %vm4208_vm0 = vcmask 293888  }
 0x11c   : > { %v1786_v47 = vrot.slane %v1665_v44, 5  ;;  %v2022_v44 = vshll.u32 %v1970_v29, 16 }
 0x11d   : > { %1844 = vrot.lane.b32.xlu1 %v1748_v33, %s6382_s22  ;;  %v1503_v23 = vpop.permute.xlu0 %1502  ;;  %v1519_v59 = vpop.permute.xlu2 %1518  ;;  %v1783_v33 = vrot.slane %v1664_v7, 5 }
 0x11e   : > { %1608 = vst.msk [vmem:[#allocation3 + $0xc] sm:$0xf] %vm1604_vm7, %v1503_v23  ;;  %v1781_v23 = vsel %vm7171_vm9, %v1779_v37, %v1780_v38  ;;  %v2013_v38 = vshll.u32 %v1969_v26, 16  ;;  %v2019_v37 = vshrl.u32 %v1970_v29, 16 }
 0x11f   : > { %v1505_v6 = vpop.permute.xlu1 %1504  ;;  %1616 = vst.msk [vmem:[#allocation3 + $0x2c] sm:$0xf] %vm1604_vm7, %v1519_v59  ;;  %v1784_v25 = vsel %vm7171_vm9, %v1782_v36, %v1783_v33  ;;  %v1670_v59 = vld [vmem:[#allocation2 + $0x7c] sm:$0xf]  ;;  %v1785_v40 = vrot.slane %v1783_v33, 4 }
 0x120   : > { %1609 = vst.msk [vmem:[#allocation3 + $0x10] sm:$0xf] %vm1604_vm7, %v1505_v6  ;;  %v1788_v6 = vrot.slane %v1786_v47, 4  ;;  %v1971_v33 = vld [vmem:[#allocation2 + $0x10] sm:$0xf]  ;;  %v2015_v15 = vrot.slane %v2013_v38, 6 }
 0x123   : > { %1848 = vrot.lane.b32.xlu0 %v1754_v50, %s6382_s22  ;;  %1846 = vrot.lane.b32.xlu2 %v1751_v62, %s6382_s22  ;;  %v7495_v50 = vld [vmem:[#allocation2 + $0x74] sm:$0xf]  ;;  %v1801_v62 = vrot.slane %v1670_v59, 5 }
 0x124   : > { %v1795_v54 = vrot.slane %v7495_v50, 5 }
 0x125   : > { %1850 = vrot.lane.b32.xlu1 %v1757_v49, %s6382_s22  ;;  %v1509_v14 = vpop.permute.xlu0 %1508  ;;  %v1525_v3 = vpop.permute.xlu2 %1524  ;;  %v1792_v49 = vrot.slane %v1667_v24, 5  ;;  %v1802_v5 = vsel %vm7171_vm9, %v1800_v57, %v1801_v62  ;;  %v1803_v24 = vrot.slane %v1801_v62, 4 }
 0x126   : > { %1611 = vst.msk [vmem:[#allocation3 + $0x18] sm:$0xf] %vm1604_vm7, %v1509_v14  ;;  %v1790_v14 = vsel %vm7171_vm9, %v1788_v6, %v1789_v18  ;;  %v2024_v18 = vrot.slane %v2022_v44, 6  ;;  %v2029_v6 = vshrl.u32 %v1971_v33, 16  ;;  %v1677_v44 = vld [vmem:[#allocation2 + $0x98] sm:$0x1] }
 0x127   : > { %v1511_v39 = vpop.permute.xlu1 %1510  ;;  %1619 = vst.msk [vmem:[#allocation3 + $0x38] sm:$0xf] %vm1604_vm7, %v1525_v3  ;;  %v1793_v41 = vsel %vm7171_vm9, %v1791_v53, %v1792_v49  ;;  %v1794_v27 = vrot.slane %v1792_v49, 4 }
 0x128   : > { %1612 = vst.msk [vmem:[#allocation3 + $0x1c] sm:$0xf] %vm1604_vm7, %v1511_v39  ;;  %v1797_v39 = vrot.slane %v1795_v54, 4 }
 0x12a   : > { %v1799_v4 = vsel %vm7171_vm9, %v1797_v39, %v1798_v56  ;;  %v2031_v56 = vrot.slane %v2029_v6, 5 }
 0x12b   : > { %1854 = vrot.lane.b32.xlu0 %v1763_v63, %s6382_s22  ;;  %1852 = vrot.lane.b32.xlu2 %v1760_v13, %s6382_s22  ;;  %v7510_v63 = vld [vmem:[#allocation2 + $0x80] sm:$0xf]  ;;  %v1675_v13 = vld [vmem:[#allocation2 + $0x90] sm:$0xf] }
 0x12c   : > { %v1804_v52 = vrot.slane %v7510_v63, 5  ;;  %v1816_v36 = vrot.slane %v1675_v13, 5 }
 0x12d   : > { %1856 = vrot.lane.b32.xlu1 %v1766_v10, %s6382_s22  ;;  %v1515_v20 = vpop.permute.xlu0 %1514  ;;  %v1531_v45 = vpop.permute.xlu2 %1530 }
 0x12e   : > { %1614 = vst.msk [vmem:[#allocation3 + $0x24] sm:$0xf] %vm1604_vm7, %v1515_v20  ;;  %v1787_v20 = vsel %vm7171_vm9, %v1785_v40, %v1786_v47  ;;  %v1806_v21 = vrot.slane %v1804_v52, 4  ;;  %v2021_v47 = vrot.slane %v2019_v37, 5  ;;  %v1818_v50 = vrot.slane %v1816_v36, 4 }
 0x12f   : > { %v1517_v16 = vpop.permute.xlu1 %1516  ;;  %1622 = vst.msk [vmem:[#allocation3 + $0x44] sm:$0xf] %vm1604_vm7, %v1531_v45  ;;  %v7546_v45 = vld [vmem:[#allocation2 + $0x94] sm:$0xf] }
 0x130   : > { %1615 = vst.msk [vmem:[#allocation3 + $0x28] sm:$0xf] %vm1604_vm7, %v1517_v16  ;;  %v7532_v16 = vld [vmem:[#allocation2 + $0x8c] sm:$0xf]  ;;  %v1808_v2 = vsel %vm7171_vm9, %v1806_v21, %v1807_v60  ;;  %v1819_v51 = vrot.slane %v7546_v45, 5 }
 0x131   : > { %v1813_v7 = vrot.slane %v7532_v16, 5 }
 0x132   : > { %v1820_v39 = vsel %vm7171_vm9, %v1818_v50, %v1819_v51 }
 0x133   : > { %1860 = vrot.lane.b32.xlu0 %v1772_v1, %s6382_s22  ;;  %1858 = vrot.lane.b32.xlu2 %v1769_v17, %s6382_s22  ;;  %v1810_v1 = vrot.slane %v7526_v19, 5  ;;  %v1972_v17 = vld [vmem:[#allocation2 + $0x14] sm:$0xf] }
 0x134   : > { %v2039_v34 = vshrl.u32 %v1972_v17, 16 }
 0x135   : > { %1862 = vrot.lane.b32.xlu1 %v1775_v22, %s6382_s22  ;;  %v1521_v42 = vpop.permute.xlu0 %1520  ;;  %v1537_v32 = vpop.permute.xlu2 %1536  ;;  %v2010_v22 = vshrl.u32 %v1969_v26, 16  ;;  %v1811_v28 = vsel %vm7171_vm9, %v1809_v58, %v1810_v1  ;;  %v1812_v12 = vrot.slane %v1810_v1, 4 }
 0x136   : > { %1617 = vst.msk [vmem:[#allocation3 + $0x30] sm:$0xf] %vm1604_vm7, %v1521_v42  ;;  %v1796_v42 = vsel %vm7171_vm9, %v1794_v27, %v1795_v54  ;;  %v2041_v62 = vrot.slane %v2039_v34, 5 }
 0x137   : > { %v1523_v46 = vpop.permute.xlu1 %1522  ;;  %1625 = vst.msk [vmem:[#allocation3 + $0x50] sm:$0xf] %vm1604_vm7, %v1537_v32 }
 0x138   : > { %1618 = vst.msk [vmem:[#allocation3 + $0x34] sm:$0xf] %vm1604_vm7, %v1523_v46  ;;  %v2012_v46 = vrot.slane %v2010_v22, 5  ;;  %v1814_v22 = vsel %vm7171_vm9, %v1812_v12, %v1813_v7 }
 0x13a   : > { %v2016_v32 = vor.u32 %v2015_v15, %v2012_v46 }
 0x13b   : > { %1866 = vrot.lane.b32.xlu0 %v1781_v23, %s6382_s22  ;;  %1864 = vrot.lane.b32.xlu2 %v1778_v48, %s6382_s22  ;;  %v1815_v23 = vrot.slane %v1813_v7, 4  ;;  %v2025_v48 = vor.u32 %v2024_v18, %v2021_v47  ;;  %v1822_v47 = vrot.slane %v1677_v44, 5  ;;  %v1978_v18 = vld [vmem:[#allocation2 + $0x2c] sm:$0xf] }
 0x13c   : > { %v2017_v57 = vrot.slane %v2016_v32, 4  ;;  %v2102_v32 = vshll.u32 %v1978_v18, 16 }
 0x13d   : > { %1868 = vrot.lane.b32.xlu1 %v1784_v25, %s6382_s22  ;;  %v1527_v35 = vpop.permute.xlu0 %1526  ;;  %v1543_v9 = vpop.permute.xlu2 %1542  ;;  %v1817_v54 = vsel %vm7171_vm9, %v1815_v23, %v1816_v36  ;;  %v1821_v23 = vrot.slane %v1819_v51, 4 }
 0x13e   : > { %1620 = vst.msk [vmem:[#allocation3 + $0x3c] sm:$0xf] %vm1604_vm7, %v1527_v35  ;;  %v2032_v35 = vshll.u32 %v1971_v33, 16  ;;  %v2026_v29 = vsel %vm7567_vm12, %v2017_v57, %v2025_v48 }
 0x13f   : > { %v1529_v55 = vpop.permute.xlu1 %1528  ;;  %1628 = vst.msk [vmem:[#allocation3 + $0x5c] sm:$0xf] %vm1604_vm7, %v1543_v9  ;;  %v1823_v34 = vsel %vm7171_vm9, %v1821_v23, %v1822_v47 }
 0x140   : > { %1621 = vst.msk [vmem:[#allocation3 + $0x40] sm:$0xf] %vm1604_vm7, %v1529_v55  ;;  %v1973_v55 = vld [vmem:[#allocation2 + $0x18] sm:$0xf]  ;;  %v2034_v59 = vrot.slane %v2032_v35, 6 }
 0x141   : > { %v2052_v40 = vshll.u32 %v1973_v55, 16 }
 0x143   : > { %1872 = vrot.lane.b32.xlu0 %v1790_v14, %s6382_s22  ;;  %1870 = vrot.lane.b32.xlu2 %v1787_v20, %s6382_s22  ;;  %v2042_v14 = vshll.u32 %v1972_v17, 16  ;;  %v1975_v20 = vld [vmem:[#allocation2 + $0x20] sm:$0xf]  ;;  %v2054_v21 = vrot.slane %v2052_v40, 6  ;;  %v2104_v40 = vrot.slane %v2102_v32, 6 }
 0x144   : > { %v2069_v1 = vshrl.u32 %v1975_v20, 16 }
 0x145   : > { %1874 = vrot.lane.b32.xlu1 %v1793_v41, %s6382_s22  ;;  %v1533_v61 = vpop.permute.xlu0 %1532  ;;  %v1549_v30 = vpop.permute.xlu2 %1548  ;;  %v1805_v41 = vsel %vm7171_vm9, %v1803_v24, %v1804_v52  ;;  %v2044_v9 = vrot.slane %v2042_v14, 6  ;;  %v7573_v52 = vor.u32 %v2034_v59, %v2031_v56  ;;  %v1980_v59 = vld [vmem:[#allocation2 + $0x34] sm:$0xf]  ;;  %vm2816_vm9 = vcmask 191648  }
 0x146   : > { %1623 = vst.msk [vmem:[#allocation3 + $0x48] sm:$0xf] %vm1604_vm7, %v1533_v61  ;;  %v2049_v61 = vshrl.u32 %v1973_v55, 16  ;;  %v2071_v16 = vrot.slane %v2069_v1, 5 }
 0x147   : > { %v1535_v10 = vpop.permute.xlu1 %1534  ;;  %1631 = vst.msk [vmem:[#allocation3 + $0x68] sm:$0xf] %vm1604_vm7, %v1549_v30  ;;  %v7579_v58 = vor.u32 %v2044_v9, %v2041_v62  ;;  %v2072_v30 = vshll.u32 %v1975_v20, 16 }
 0x148   : > { %1624 = vst.msk [vmem:[#allocation3 + $0x4c] sm:$0xf] %vm1604_vm7, %v1535_v10  ;;  %v1974_v10 = vld [vmem:[#allocation2 + $0x1c] sm:$0xf]  ;;  %v2051_v19 = vrot.slane %v2049_v61, 5 }
 0x149   : > { %v2059_v26 = vshrl.u32 %v1974_v10, 16  ;;  %v2047_v36 = vrot.slane %v7579_v58, 4  ;;  %v2074_v33 = vrot.slane %v2072_v30, 6 }
 0x14b   : > { %1878 = vrot.lane.b32.xlu0 %v1799_v4, %s6382_s22  ;;  %1876 = vrot.lane.b32.xlu2 %v1796_v42, %s6382_s22  ;;  %v2027_v4 = vrot.slane %v2025_v48, 4  ;;  %v2061_v37 = vrot.slane %v2059_v26, 5  ;;  %v7602_v51 = vor.u32 %v2074_v33, %v2071_v16  ;;  %v2132_v26 = vshll.u32 %v1981_v8, 16 }
 0x14d   : > { %1880 = vrot.lane.b32.xlu1 %v1802_v5, %s6382_s22  ;;  %v1539_v3 = vpop.permute.xlu0 %1538  ;;  %v1555_v53 = vpop.permute.xlu2 %1554  ;;  %v1976_v5 = vld [vmem:[#allocation2 + $0x24] sm:$0xf]  ;;  %v2036_v38 = vsel %vm7567_vm12, %v2027_v4, %v7573_v52 }
 0x14e   : > { %1626 = vst.msk [vmem:[#allocation3 + $0x54] sm:$0xf] %vm1604_vm7, %v1539_v3  ;;  %v2062_v3 = vshll.u32 %v1974_v10, 16  ;;  %v2082_v13 = vshll.u32 %v1976_v5, 16  ;;  %v2037_v10 = vrot.slane %v7573_v52, 4 }
 0x14f   : > { %v1541_v31 = vpop.permute.xlu1 %1540  ;;  %1634 = vst.msk [vmem:[#allocation3 + $0x74] sm:$0xf] %vm1604_vm7, %v1555_v53  ;;  %v1979_v53 = vld [vmem:[#allocation2 + $0x30] sm:$0xf] }
 0x150   : > { %1627 = vst.msk [vmem:[#allocation3 + $0x58] sm:$0xf] %vm1604_vm7, %v1541_v31  ;;  %v2079_v31 = vshrl.u32 %v1976_v5, 16  ;;  %v2064_v42 = vrot.slane %v2062_v3, 6  ;;  %v2084_v7 = vrot.slane %v2082_v13, 6  ;;  %v2112_v56 = vshll.u32 %v1979_v53, 16 }
 0x151   : > { %v2119_v5 = vshrl.u32 %v1980_v59, 16 }
 0x152   : > { %v2081_v46 = vrot.slane %v2079_v31, 5  ;;  %v7596_v6 = vor.u32 %v2064_v42, %v2061_v37  ;;  %v2114_v20 = vrot.slane %v2112_v56, 6  ;;  %v2134_v37 = vrot.slane %v2132_v26, 6 }
 0x153   : > { %1884 = vrot.lane.b32.xlu0 %v1808_v2, %s6382_s22  ;;  %1882 = vrot.lane.b32.xlu2 %v1805_v41, %s6382_s22  ;;  %v2055_v2 = vor.u32 %v2054_v21, %v2051_v19  ;;  %v2109_v41 = vshrl.u32 %v1979_v53, 16  ;;  %v2129_v21 = vshrl.u32 %v1981_v8, 16  ;;  %v2121_v13 = vrot.slane %v2119_v5, 5 }
 0x154   : > { %v2085_v55 = vor.u32 %v2084_v7, %v2081_v46  ;;  %v1984_v46 = vld [vmem:[#allocation2 + $0x44] sm:$0xf] }
 0x155   : > { %1886 = vrot.lane.b32.xlu1 %v1811_v28, %s6382_s22  ;;  %v1545_v25 = vpop.permute.xlu0 %1544  ;;  %v1561_v60 = vpop.permute.xlu2 %1560  ;;  %v1977_v28 = vld [vmem:[#allocation2 + $0x28] sm:$0xf]  ;;  %v2057_v24 = vrot.slane %v2055_v2, 4  ;;  %v2056_v45 = vsel %vm7567_vm12, %v2047_v36, %v2055_v2  ;;  %v2111_v12 = vrot.slane %v2109_v41, 5  ;;  %v2131_v2 = vrot.slane %v2129_v21, 5 }
 0x156   : > { %1629 = vst.msk [vmem:[#allocation3 + $0x60] sm:$0xf] %vm1604_vm7, %v1545_v25  ;;  %v2089_v17 = vshrl.u32 %v1977_v28, 16  ;;  %v2092_v25 = vshll.u32 %v1977_v28, 16  ;;  %v2087_v62 = vrot.slane %v2085_v55, 4  ;;  %v2067_v36 = vrot.slane %v7596_v6, 4 }
 0x157   : > { %v1547_v49 = vpop.permute.xlu1 %1546  ;;  %1637 = vst.msk [vmem:[#allocation3 + $0x80] sm:$0xf] %vm1604_vm7, %v1561_v60  ;;  %v2066_v48 = vsel %vm7567_vm12, %v2057_v24, %v7596_v6  ;;  %v2122_v60 = vshll.u32 %v1980_v59, 16  ;;  %v2115_v31 = vor.u32 %v2114_v20, %v2111_v12  ;;  %v2159_v24 = vshrl.u32 %v1984_v46, 16 }
 0x158   : > { %1630 = vst.msk [vmem:[#allocation3 + $0x64] sm:$0xf] %vm1604_vm7, %v1547_v49  ;;  %v2099_v49 = vshrl.u32 %v1978_v18, 16  ;;  %v2091_v14 = vrot.slane %v2089_v17, 5  ;;  %v7638_v17 = vor.u32 %v2134_v37, %v2131_v2  ;;  %v2162_v6 = vshll.u32 %v1984_v46, 16 }
 0x159   : > { %v2117_v7 = vrot.slane %v2115_v31, 4 }
 0x15a   : > { %v2101_v61 = vrot.slane %v2099_v49, 5 }
 0x15b   : > { %1890 = vrot.lane.b32.xlu0 %v1817_v54, %s6382_s22  ;;  %1888 = vrot.lane.b32.xlu2 %v1814_v22, %s6382_s22  ;;  %v2094_v54 = vrot.slane %v2092_v25, 6  ;;  %v2124_v22 = vrot.slane %v2122_v60, 6  ;;  %v1985_v25 = vld [vmem:[#allocation2 + $0x48] sm:$0xf] }
 0x15c   : > { %v2169_v32 = vshrl.u32 %v1985_v25, 16 }
 0x15d   : > { %1892 = vrot.lane.b32.xlu1 %v1820_v39, %s6382_s22  ;;  %v1551_v11 = vpop.permute.xlu0 %1550  ;;  %v1567_v35 = vpop.permute.xlu2 %1566  ;;  %v2077_v39 = vrot.slane %v7602_v51, 4  ;;  %v7613_v9 = vor.u32 %v2094_v54, %v2091_v14  ;;  %v1986_v14 = vld [vmem:[#allocation2 + $0x4c] sm:$0xf]  ;;  %v2161_v54 = vrot.slane %v2159_v24, 5 }
 0x15e   : > { %1632 = vst.msk [vmem:[#allocation3 + $0x6c] sm:$0xf] %vm1604_vm7, %v1551_v11  ;;  %v1982_v11 = vld [vmem:[#allocation2 + $0x3c] sm:$0xf]  ;;  %v2171_v8 = vrot.slane %v2169_v32, 5 }
 0x15f   : > { %v1553_v27 = vpop.permute.xlu1 %1552  ;;  %1640 = vst.msk [vmem:[#allocation3 + $0x8c] sm:$0xf] %vm1604_vm7, %v1567_v35  ;;  %v2086_v3 = vsel %vm7567_vm12, %v2077_v39, %v2085_v55  ;;  %v2139_v52 = vshrl.u32 %v1982_v11, 16  ;;  %v2142_v1 = vshll.u32 %v1982_v11, 16  ;;  %v2096_v30 = vsel %vm7567_vm12, %v2087_v62, %v7613_v9  ;;  %v1987_v39 = vld [vmem:[#allocation2 + $0x50] sm:$0xf] }
 0x160   : > { %1633 = vst.msk [vmem:[#allocation3 + $0x70] sm:$0xf] %vm1604_vm7, %v1553_v27  ;;  %v7621_v27 = vor.u32 %v2104_v40, %v2101_v61  ;;  %v2172_v55 = vshll.u32 %v1985_v25, 16  ;;  %v2097_v59 = vrot.slane %v7613_v9, 4  ;;  %v1988_v61 = vld [vmem:[#allocation2 + $0x54] sm:$0xf] }
 0x161   : > { %v2141_v44 = vrot.slane %v2139_v52, 5  ;;  %v2144_v28 = vrot.slane %v2142_v1, 6  ;;  %v2179_v62 = vshrl.u32 %v1986_v14, 16  ;;  %v2189_v9 = vshrl.u32 %v1987_v39, 16  ;;  %v1993_v32 = vld [vmem:[#allocation2 + $0x68] sm:$0xf] }
 0x162   : > { %v2107_v42 = vrot.slane %v7621_v27, 4  ;;  %v2192_v20 = vshll.u32 %v1987_v39, 16  ;;  %v2199_v5 = vshrl.u32 %v1988_v61, 16  ;;  %v2106_v60 = vsel %vm7567_vm12, %v2097_v59, %v7621_v27 }
 0x163   : > { %2377 = vrot.lane.b32.xlu0 %v2026_v29, %s6383_s23  ;;  %1894 = vrot.lane.b32.xlu2 %v1823_v34, %s6382_s22  ;;  %v2046_v29 = vsel %vm7567_vm12, %v2037_v10, %v7579_v58  ;;  %v2145_v35 = vor.u32 %v2144_v28, %v2141_v44  ;;  %v2137_v34 = vrot.slane %v7638_v17, 4  ;;  %v2182_v10 = vshll.u32 %v1986_v14, 16 }
 0x164   : > { %v2116_v18 = vsel %vm7567_vm12, %v2107_v42, %v2115_v31  ;;  %v2194_v31 = vrot.slane %v2192_v20, 6  ;;  %v1990_v42 = vld [vmem:[#allocation2 + $0x5c] sm:$0xf] }
 0x165   : > { %2379 = vrot.lane.b32.xlu1 %v2036_v38, %s6383_s23  ;;  %v1557_v15 = vpop.permute.xlu0 %1556  ;;  %v1829_v4 = vpop.permute.xlu2 %1828  ;;  %v1983_v38 = vld [vmem:[#allocation2 + $0x40] sm:$0xf]  ;;  %v2147_v41 = vrot.slane %v2145_v35, 4  ;;  %v2184_v52 = vrot.slane %v2182_v10, 6 }
 0x166   : > { %1635 = vst.msk [vmem:[#allocation3 + $0x78] sm:$0xf] %vm1604_vm7, %v1557_v15  ;;  %v2149_v16 = vshrl.u32 %v1983_v38, 16  ;;  %v2152_v33 = vshll.u32 %v1983_v38, 16  ;;  %v7635_v15 = vor.u32 %v2124_v22, %v2121_v13  ;;  %v2201_v13 = vrot.slane %v2199_v5, 5 }
 0x167   : > { %v1559_v50 = vpop.permute.xlu1 %1558  ;;  %1935 = vst.msk [vmem:[#allocation3 + $0x8] sm:$0xf] %vm1932_vm13, %v1829_v4  ;;  %v2146_v4 = vsel %vm7567_vm12, %v2137_v34, %v2145_v35 }
 0x168   : > { %1636 = vst.msk [vmem:[#allocation3 + $0x7c] sm:$0xf] %vm1604_vm7, %v1559_v50  ;;  %v2076_v50 = vsel %vm7567_vm12, %v2067_v36, %v7602_v51  ;;  %v2151_v53 = vrot.slane %v2149_v16, 5  ;;  %v2126_v49 = vsel %vm7567_vm12, %v2117_v7, %v7635_v15  ;;  %v2127_v38 = vrot.slane %v7635_v15, 4  ;;  %v1991_v16 = vld [vmem:[#allocation2 + $0x60] sm:$0xf] }
 0x169   : > { %v2219_v7 = vshrl.u32 %v1990_v42, 16  ;;  %v2222_v15 = vshll.u32 %v1990_v42, 16  ;;  %v2232_v35 = vshll.u32 %v1991_v16, 16 }
 0x16b   : > { %2383 = vrot.lane.b32.xlu0 %v2056_v45, %s6383_s23  ;;  %2381 = vrot.lane.b32.xlu2 %v2046_v29, %s6383_s23  ;;  %v2154_v45 = vrot.slane %v2152_v33, 6  ;;  %v1989_v29 = vld [vmem:[#allocation2 + $0x58] sm:$0xf] }
 0x16c   : > { %v2209_v2 = vshrl.u32 %v1989_v29, 16  ;;  %v2212_v37 = vshll.u32 %v1989_v29, 16 }
 0x16d   : > { %2385 = vrot.lane.b32.xlu1 %v2066_v48, %s6383_s23  ;;  %v1563_v57 = vpop.permute.xlu0 %1562  ;;  %v1835_v23 = vpop.permute.xlu2 %1834  ;;  %v2164_v48 = vrot.slane %v2162_v6, 6  ;;  %v7653_v56 = vor.u32 %v2154_v45, %v2151_v53  ;;  %v2229_v6 = vshrl.u32 %v1991_v16, 16  ;;  %v2221_v45 = vrot.slane %v2219_v7, 5 }
 0x16e   : > { %1638 = vst.msk [vmem:[#allocation3 + $0x84] sm:$0xf] %vm1604_vm7, %v1563_v57  ;;  %v2174_v57 = vrot.slane %v2172_v55, 6  ;;  %v2211_v25 = vrot.slane %v2209_v2, 5 }
 0x16f   : > { %v1565_v19 = vpop.permute.xlu1 %1564  ;;  %1938 = vst.msk [vmem:[#allocation3 + $0x14] sm:$0xf] %vm1932_vm13, %v1835_v23  ;;  %v7661_v12 = vor.u32 %v2164_v48, %v2161_v54  ;;  %v2156_v21 = vsel %vm7567_vm12, %v2147_v41, %v7653_v56  ;;  %v2157_v14 = vrot.slane %v7653_v56, 4  ;;  %v1994_v54 = vld [vmem:[#allocation2 + $0x6c] sm:$0xf]  ;;  %v2234_v41 = vrot.slane %v2232_v35, 6 }
 0x170   : > { %1639 = vst.msk [vmem:[#allocation3 + $0x88] sm:$0xf] %vm1604_vm7, %v1565_v19  ;;  %v2202_v19 = vshll.u32 %v1988_v61, 16  ;;  %v2175_v26 = vor.u32 %v2174_v57, %v2171_v8  ;;  %v2252_v8 = vshll.u32 %v1993_v32, 16  ;;  %v2259_v56 = vshrl.u32 %v1994_v54, 16 }
 0x171   : > { %v2167_v1 = vrot.slane %v7661_v12, 4  ;;  %v2166_v10 = vsel %vm7567_vm12, %v2157_v14, %v7661_v12  ;;  %vm3144_vm7 = vcmask 224448  }
 0x172   : > { %v2204_v22 = vrot.slane %v2202_v19, 6  ;;  %v2177_v44 = vrot.slane %v2175_v26, 4 }
 0x173   : > { %2389 = vrot.lane.b32.xlu0 %v2086_v3, %s6383_s23  ;;  %2387 = vrot.lane.b32.xlu2 %v2076_v50, %s6383_s23  ;;  %v2181_v3 = vrot.slane %v2179_v62, 5  ;;  %v2176_v33 = vsel %vm7567_vm12, %v2167_v1, %v2175_v26  ;;  %v1992_v50 = vld [vmem:[#allocation2 + $0x64] sm:$0xf] }
 0x174   : > { %v2205_v23 = vor.u32 %v2204_v22, %v2201_v13  ;;  %v2239_v59 = vshrl.u32 %v1992_v50, 16  ;;  %v2242_v39 = vshll.u32 %v1992_v50, 16 }
 0x175   : > { %2391 = vrot.lane.b32.xlu1 %v2096_v30, %s6383_s23  ;;  %v1825_v58 = vpop.permute.xlu0 %1824  ;;  %v1841_v40 = vpop.permute.xlu2 %1840  ;;  %v2191_v30 = vrot.slane %v2189_v9, 5 }
 0x176   : > { %1933 = vst.msk [vmem:[#allocation3] sm:$0xf] %vm1932_vm13, %v1825_v58  ;;  %v7675_v58 = vor.u32 %v2184_v52, %v2181_v3  ;;  %v2207_v55 = vrot.slane %v2205_v23, 4  ;;  %v2241_v20 = vrot.slane %v2239_v59, 5  ;;  %v2244_v5 = vrot.slane %v2242_v39, 6 }
 0x177   : > { %v1827_v47 = vpop.permute.xlu1 %1826  ;;  %1941 = vst.msk [vmem:[#allocation3 + $0x20] sm:$0xf] %vm1932_vm13, %v1841_v40  ;;  %v7681_v46 = vor.u32 %v2194_v31, %v2191_v30  ;;  %v2249_v40 = vshrl.u32 %v1993_v32, 16  ;;  %v2261_v3 = vrot.slane %v2259_v56, 5  ;;  %v1996_v31 = vld [vmem:[#allocation2 + $0x74] sm:$0xf] }
 0x178   : > { %1934 = vst.msk [vmem:[#allocation3 + $0x4] sm:$0xf] %vm1932_vm13, %v1827_v47  ;;  %v2136_v47 = vsel %vm7567_vm12, %v2127_v38, %v7638_v17  ;;  %v2186_v24 = vsel %vm7567_vm12, %v2177_v44, %v7675_v58  ;;  %v2187_v29 = vrot.slane %v7675_v58, 4  ;;  %v2279_v44 = vshrl.u32 %v1996_v31, 16 }
 0x179   : > { %v2197_v53 = vrot.slane %v7681_v46, 4  ;;  %v2251_v19 = vrot.slane %v2249_v40, 5  ;;  %v2282_v58 = vshll.u32 %v1996_v31, 16 }
 0x17b   : > { %2395 = vrot.lane.b32.xlu0 %v2116_v18, %s6383_s23  ;;  %2393 = vrot.lane.b32.xlu2 %v2106_v60, %s6383_s23  ;;  %v2214_v18 = vrot.slane %v2212_v37, 6  ;;  %v2206_v57 = vsel %vm7567_vm12, %v2197_v53, %v2205_v23  ;;  %v1995_v60 = vld [vmem:[#allocation2 + $0x70] sm:$0xf]  ;;  %v1997_v37 = vld [vmem:[#allocation2 + $0x78] sm:$0xf] }
 0x17c   : > { %v2269_v1 = vshrl.u32 %v1995_v60, 16  ;;  %v2272_v30 = vshll.u32 %v1995_v60, 16  ;;  %v2292_v23 = vshll.u32 %v1997_v37, 16  ;;  %v1999_v53 = vld [vmem:[#allocation2 + $0x80] sm:$0xf] }
 0x17d   : > { %2397 = vrot.lane.b32.xlu1 %v2126_v49, %s6383_s23  ;;  %v1831_v51 = vpop.permute.xlu0 %1830  ;;  %v1847_v28 = vpop.permute.xlu2 %1846  ;;  %v2224_v49 = vrot.slane %v2222_v15, 6  ;;  %v7693_v34 = vor.u32 %v2214_v18, %v2211_v25  ;;  %v2289_v15 = vshrl.u32 %v1997_v37, 16  ;;  %v1998_v25 = vld [vmem:[#allocation2 + $0x7c] sm:$0xf]  ;;  %v2281_v18 = vrot.slane %v2279_v44, 5 }
 0x17e   : > { %1936 = vst.msk [vmem:[#allocation3 + $0xc] sm:$0xf] %vm1932_vm13, %v1831_v51  ;;  %v2231_v51 = vrot.slane %v2229_v6, 5  ;;  %v2271_v16 = vrot.slane %v2269_v1, 5  ;;  %v2302_v14 = vshll.u32 %v1998_v25, 16 }
 0x17f   : > { %v1833_v11 = vpop.permute.xlu1 %1832  ;;  %1944 = vst.msk [vmem:[#allocation3 + $0x2c] sm:$0xf] %vm1932_vm13, %v1847_v28  ;;  %v7701_v62 = vor.u32 %v2224_v49, %v2221_v45  ;;  %v2217_v50 = vrot.slane %v7693_v34, 4  ;;  %v2000_v45 = vld [vmem:[#allocation2 + $0x84] sm:$0xf]  ;;  %v2291_v32 = vrot.slane %v2289_v15, 5 }
 0x180   : > { %1937 = vst.msk [vmem:[#allocation3 + $0x10] sm:$0xf] %vm1932_vm13, %v1833_v11  ;;  %v2262_v11 = vshll.u32 %v1994_v54, 16  ;;  %v2235_v9 = vor.u32 %v2234_v41, %v2231_v51  ;;  %v2312_v41 = vshll.u32 %v1999_v53, 16  ;;  %v2319_v59 = vshrl.u32 %v2000_v45, 16 }
 0x181   : > { %v2227_v26 = vrot.slane %v7701_v62, 4  ;;  %v2226_v39 = vsel %vm7567_vm12, %v2217_v50, %v7701_v62  ;;  %v2304_v56 = vrot.slane %v2302_v14, 6  ;;  %v2003_v1 = vld [vmem:[#allocation2 + $0x90] sm:$0xf] }
 0x182   : > { %v2264_v52 = vrot.slane %v2262_v11, 6  ;;  %v2237_v13 = vrot.slane %v2235_v9, 4 }
 0x183   : > { %2401 = vrot.lane.b32.xlu0 %v2146_v4, %s6383_s23  ;;  %2399 = vrot.lane.b32.xlu2 %v2136_v47, %s6383_s23  ;;  %v2216_v4 = vsel %vm7567_vm12, %v2207_v55, %v7693_v34  ;;  %v2236_v42 = vsel %vm7567_vm12, %v2227_v26, %v2235_v9  ;;  %v2299_v55 = vshrl.u32 %v1998_v25, 16  ;;  %v2309_v34 = vshrl.u32 %v1999_v53, 16  ;;  %v2002_v26 = vld [vmem:[#allocation2 + $0x8c] sm:$0xf] }
 0x184   : > { %v2265_v28 = vor.u32 %v2264_v52, %v2261_v3  ;;  %v2314_v9 = vrot.slane %v2312_v41, 6 }
 0x185   : > { %2403 = vrot.lane.b32.xlu1 %v2156_v21, %s6383_s23  ;;  %v1837_v27 = vpop.permute.xlu0 %1836  ;;  %v1853_v48 = vpop.permute.xlu2 %1852  ;;  %v2254_v21 = vrot.slane %v2252_v8, 6 }
 0x186   : > { %1939 = vst.msk [vmem:[#allocation3 + $0x18] sm:$0xf] %vm1932_vm13, %v1837_v27  ;;  %v7715_v27 = vor.u32 %v2244_v5, %v2241_v20  ;;  %v2267_v6 = vrot.slane %v2265_v28, 4  ;;  %v2321_v20 = vrot.slane %v2319_v59, 5 }
 0x187   : > { %v1839_v36 = vpop.permute.xlu1 %1838  ;;  %1947 = vst.msk [vmem:[#allocation3 + $0x38] sm:$0xf] %vm1932_vm13, %v1853_v48  ;;  %v7718_v2 = vor.u32 %v2254_v21, %v2251_v19 }
 0x188   : > { %1940 = vst.msk [vmem:[#allocation3 + $0x1c] sm:$0xf] %vm1932_vm13, %v1839_v36  ;;  %v2196_v36 = vsel %vm7567_vm12, %v2187_v29, %v7681_v46  ;;  %v2246_v7 = vsel %vm7567_vm12, %v2237_v13, %v7715_v27  ;;  %v2247_v60 = vrot.slane %v7715_v27, 4  ;;  %v2339_v13 = vshrl.u32 %v2002_v26, 16 }
 0x189   : > { %v2257_v47 = vrot.slane %v7718_v2, 4  ;;  %v2342_v27 = vshll.u32 %v2002_v26, 16 }
 0x18b   : > { %2407 = vrot.lane.b32.xlu0 %v2176_v33, %s6383_s23  ;;  %2405 = vrot.lane.b32.xlu2 %v2166_v10, %s6383_s23  ;;  %v2274_v33 = vrot.slane %v2272_v30, 6  ;;  %v2266_v48 = vsel %vm7567_vm12, %v2257_v47, %v2265_v28  ;;  %v2001_v10 = vld [vmem:[#allocation2 + $0x88] sm:$0xf]  ;;  %v2352_v28 = vshll.u32 %v2003_v1, 16 }
 0x18c   : > { %v2329_v19 = vshrl.u32 %v2001_v10, 16  ;;  %v2332_v21 = vshll.u32 %v2001_v10, 16  ;;  %v2005_v10 = vld [vmem:[#allocation2 + $0x98] sm:$0x3] }
 0x18d   : > { %2409 = vrot.lane.b32.xlu1 %v2186_v24, %s6383_s23  ;;  %v1843_v17 = vpop.permute.xlu0 %1842  ;;  %v1859_v22 = vpop.permute.xlu2 %1858  ;;  %v2284_v24 = vrot.slane %v2282_v58, 6  ;;  %v7733_v35 = vor.u32 %v2274_v33, %v2271_v16  ;;  %v2349_v58 = vshrl.u32 %v2003_v1, 16  ;;  %v2341_v33 = vrot.slane %v2339_v13, 5 }
 0x18e   : > { %1942 = vst.msk [vmem:[#allocation3 + $0x24] sm:$0xf] %vm1932_vm13, %v1843_v17  ;;  %v2294_v17 = vrot.slane %v2292_v23, 6  ;;  %v2331_v37 = vrot.slane %v2329_v19, 5  ;;  %v2372_v19 = vshll.u32 %v2005_v10, 16 }
 0x18f   : > { %v1845_v61 = vpop.permute.xlu1 %1844  ;;  %1950 = vst.msk [vmem:[#allocation3 + $0x44] sm:$0xf] %vm1932_vm13, %v1859_v22  ;;  %v7741_v51 = vor.u32 %v2284_v24, %v2281_v18  ;;  %v2276_v40 = vsel %vm7567_vm12, %v2267_v6, %v7733_v35  ;;  %v2277_v47 = vrot.slane %v7733_v35, 4  ;;  %v2351_v18 = vrot.slane %v2349_v58, 5 }
 0x190   : > { %1943 = vst.msk [vmem:[#allocation3 + $0x28] sm:$0xf] %vm1932_vm13, %v1845_v61  ;;  %v2322_v61 = vshll.u32 %v2000_v45, 16  ;;  %v2295_v8 = vor.u32 %v2294_v17, %v2291_v32  ;;  %v2354_v24 = vrot.slane %v2352_v28, 6  ;;  %v2374_v13 = vrot.slane %v2372_v19, 6 }
 0x191   : > { %v2287_v11 = vrot.slane %v7741_v51, 4  ;;  %v2286_v35 = vsel %vm7567_vm12, %v2277_v47, %v7741_v51 }
 0x192   : > { %v2324_v5 = vrot.slane %v2322_v61, 6  ;;  %v2297_v3 = vrot.slane %v2295_v8, 4  ;;  %v2355_v32 = vor.u32 %v2354_v24, %v2351_v18  ;;  %v2530_v24 = vld [vmem:[#allocation2 + $0x28] sm:$0xf] }
 0x193   : > { %2413 = vrot.lane.b32.xlu0 %v2206_v57, %s6383_s23  ;;  %2411 = vrot.lane.b32.xlu2 %v2196_v36, %s6383_s23  ;;  %v2301_v57 = vrot.slane %v2299_v55, 5  ;;  %v2296_v30 = vsel %vm7567_vm12, %v2287_v11, %v2295_v8  ;;  %v2004_v36 = vld [vmem:[#allocation2 + $0x94] sm:$0xf]  ;;  %v2524_v11 = vld [vmem:[#allocation2 + $0x10] sm:$0xf] }
 0x194   : > { %v2325_v22 = vor.u32 %v2324_v5, %v2321_v20  ;;  %v2362_v6 = vshll.u32 %v2004_v36, 16  ;;  %v2604_v26 = vrot.slane %v2524_v11, 6 }
 0x195   : > { %2415 = vrot.lane.b32.xlu1 %v2216_v4, %s6383_s23  ;;  %v1849_v12 = vpop.permute.xlu0 %1848  ;;  %v1865_v49 = vpop.permute.xlu2 %1864  ;;  %v2311_v4 = vrot.slane %v2309_v34, 5  ;;  %v2357_v34 = vrot.slane %v2355_v32, 4 }
 0x196   : > { %1945 = vst.msk [vmem:[#allocation3 + $0x30] sm:$0xf] %vm1932_vm13, %v1849_v12  ;;  %v2305_v12 = vor.u32 %v2304_v56, %v2301_v57  ;;  %v2327_v23 = vrot.slane %v2325_v22, 4  ;;  %v2364_v55 = vrot.slane %v2362_v6, 6 }
 0x197   : > { %v1851_v38 = vpop.permute.xlu1 %1850  ;;  %1953 = vst.msk [vmem:[#allocation3 + $0x50] sm:$0xf] %vm1932_vm13, %v1865_v49  ;;  %v2315_v31 = vor.u32 %v2314_v9, %v2311_v4 }
 0x198   : > { %1946 = vst.msk [vmem:[#allocation3 + $0x34] sm:$0xf] %vm1932_vm13, %v1851_v38  ;;  %v2256_v38 = vsel %vm7567_vm12, %v2247_v60, %v7718_v2  ;;  %v2306_v44 = vsel %vm7567_vm12, %v2297_v3, %v2305_v12  ;;  %v2369_v60 = vshrl.u32 %v2005_v10, 16 }
 0x199   : > { %v2317_v16 = vrot.slane %v2315_v31, 4 }
 0x19b   : > { %2419 = vrot.lane.b32.xlu0 %v2236_v42, %s6383_s23  ;;  %2417 = vrot.lane.b32.xlu2 %v2226_v39, %s6383_s23  ;;  %v2334_v42 = vrot.slane %v2332_v21, 6  ;;  %v2326_v53 = vsel %vm7567_vm12, %v2317_v16, %v2325_v22  ;;  %v2523_v39 = vld [vmem:[#allocation2 + $0xc] sm:$0xf] }
 0x19c   : > { %v2601_v56 = vrot.slane %v2523_v39, 6 }
 0x19d   : > { %2421 = vrot.lane.b32.xlu1 %v2246_v7, %s6383_s23  ;;  %v1855_v46 = vpop.permute.xlu0 %1854  ;;  %v1871_v52 = vpop.permute.xlu2 %1870  ;;  %v2344_v7 = vrot.slane %v2342_v27, 6  ;;  %v7767_v2 = vor.u32 %v2334_v42, %v2331_v37 }
 0x19e   : > { %1948 = vst.msk [vmem:[#allocation3 + $0x3c] sm:$0xf] %vm1932_vm13, %v1855_v46  ;;  %v2359_v46 = vshrl.u32 %v2004_v36, 16  ;;  %v2603_v21 = vrot.slane %v2601_v56, 4 }
 0x19f   : > { %v1857_v54 = vpop.permute.xlu1 %1856  ;;  %1956 = vst.msk [vmem:[#allocation3 + $0x5c] sm:$0xf] %vm1932_vm13, %v1871_v52  ;;  %v2345_v45 = vor.u32 %v2344_v7, %v2341_v33  ;;  %v2336_v49 = vsel %vm7567_vm12, %v2327_v23, %v7767_v2  ;;  %v2337_v5 = vrot.slane %v7767_v2, 4  ;;  %v2526_v52 = vld [vmem:[#allocation2 + $0x18] sm:$0xf] }
 0x1a0   : > { %1949 = vst.msk [vmem:[#allocation3 + $0x40] sm:$0xf] %vm1932_vm13, %v1857_v54  ;;  %v2361_v17 = vrot.slane %v2359_v46, 5  ;;  %v2605_v27 = vsel %vm7797_vm4, %v2603_v21, %v2604_v26  ;;  %v2610_v22 = vrot.slane %v2526_v52, 6  ;;  %v2537_v21 = vld [vmem:[#allocation2 + $0x44] sm:$0xf] }
 0x1a1   : > { %v2347_v14 = vrot.slane %v2345_v45, 4 }
 0x1a2   : > { %v2365_v51 = vor.u32 %v2364_v55, %v2361_v17  ;;  %v2612_v36 = vrot.slane %v2610_v22, 4 }
 0x1a3   : > { %2425 = vrot.lane.b32.xlu0 %v2266_v48, %s6383_s23  ;;  %2423 = vrot.lane.b32.xlu2 %v2256_v38, %s6383_s23  ;;  %v2307_v48 = vrot.slane %v2305_v12, 4  ;;  %v2356_v61 = vsel %vm7567_vm12, %v2347_v14, %v2355_v32  ;;  %v2527_v38 = vld [vmem:[#allocation2 + $0x1c] sm:$0xf]  ;;  %v2532_v32 = vld [vmem:[#allocation2 + $0x30] sm:$0xf] }
 0x1a4   : > { %v2366_v57 = vsel %vm7567_vm12, %v2357_v34, %v2365_v51  ;;  %v2367_v58 = vrot.slane %v2365_v51, 4  ;;  %v2613_v16 = vrot.slane %v2527_v38, 6  ;;  %v2533_v34 = vld [vmem:[#allocation2 + $0x34] sm:$0xf]  ;;  %v2539_v38 = vld [vmem:[#allocation2 + $0x4c] sm:$0xf] }
 0x1a5   : > { %2427 = vrot.lane.b32.xlu1 %v2276_v40, %s6383_s23  ;;  %v1861_v62 = vpop.permute.xlu0 %1860  ;;  %v1877_v25 = vpop.permute.xlu2 %1876  ;;  %v2522_v40 = vld [vmem:[#allocation2 + $0x8] sm:$0xc]  ;;  %v2316_v8 = vsel %vm7567_vm12, %v2307_v48, %v2315_v31  ;;  %v2371_v31 = vrot.slane %v2369_v60, 5  ;;  %v2628_v48 = vrot.slane %v2532_v32, 6 }
 0x1a6   : > { %1951 = vst.msk [vmem:[#allocation3 + $0x48] sm:$0xf] %vm1932_vm13, %v1861_v62  ;;  %v6151_v4 = vrot.slane %v2522_v40, 10  ;;  %v7801_v62 = vld [vmem:[#allocation2 + $0x14] sm:$0xf]  ;;  %v2615_v39 = vrot.slane %v2613_v16, 4 }
 0x1a7   : > { %v1863_v29 = vpop.permute.xlu1 %1862  ;;  %1959 = vst.msk [vmem:[#allocation3 + $0x68] sm:$0xf] %vm1932_vm13, %v1877_v25  ;;  %v2607_v1 = vrot.slane %v7801_v62, 6  ;;  %v2375_v28 = vor.u32 %v2374_v13, %v2371_v31  ;;  %v2614_v25 = vsel %vm7797_vm4, %v2612_v36, %v2613_v16  ;;  %v2631_v40 = vrot.slane %v2533_v34, 6 }
 0x1a8   : > { %1952 = vst.msk [vmem:[#allocation3 + $0x4c] sm:$0xf] %vm1932_vm13, %v1863_v29  ;;  %v2602_v29 = vsel %vm7797_vm4, %v6151_v4, %v2601_v56  ;;  %v2535_v56 = vld [vmem:[#allocation2 + $0x3c] sm:$0xf]  ;;  %v2643_v31 = vrot.slane %v2537_v21, 6  ;;  %v2649_v36 = vrot.slane %v2539_v38, 6 }
 0x1a9   : > { %v2609_v37 = vrot.slane %v2607_v1, 4  ;;  %v2376_v47 = vsel %vm7567_vm12, %v2367_v58, %v2375_v28  ;;  %v2637_v62 = vrot.slane %v2535_v56, 6  ;;  %v2633_v58 = vrot.slane %v2631_v40, 4 }
 0x1ab   : > { %2431 = vrot.lane.b32.xlu0 %v2296_v30, %s6383_s23  ;;  %2429 = vrot.lane.b32.xlu2 %v2286_v35, %s6383_s23  ;;  %v2346_v30 = vsel %vm7567_vm12, %v2337_v5, %v2345_v45  ;;  %v2611_v23 = vsel %vm7797_vm4, %v2609_v37, %v2610_v22  ;;  %v2622_v45 = vrot.slane %v2530_v24, 6  ;;  %v2536_v5 = vld [vmem:[#allocation2 + $0x40] sm:$0xf]  ;;  %v2645_v37 = vrot.slane %v2643_v31, 4 }
 0x1ad   : > { %2433 = vrot.lane.b32.xlu1 %v2306_v44, %s6383_s23  ;;  %v1867_v15 = vpop.permute.xlu0 %1866  ;;  %v1883_v41 = vpop.permute.xlu2 %1882  ;;  %v2528_v44 = vld [vmem:[#allocation2 + $0x20] sm:$0xf] }
 0x1ae   : > { %1954 = vst.msk [vmem:[#allocation3 + $0x54] sm:$0xf] %vm1932_vm13, %v1867_v15  ;;  %v2529_v15 = vld [vmem:[#allocation2 + $0x24] sm:$0xf]  ;;  %v2616_v2 = vrot.slane %v2528_v44, 6 }
 0x1af   : > { %v1869_v50 = vpop.permute.xlu1 %1868  ;;  %1962 = vst.msk [vmem:[#allocation3 + $0x74] sm:$0xf] %vm1932_vm13, %v1883_v41  ;;  %v2619_v18 = vrot.slane %v2529_v15, 6  ;;  %v2540_v44 = vld [vmem:[#allocation2 + $0x50] sm:$0xf] }
 0x1b0   : > { %1955 = vst.msk [vmem:[#allocation3 + $0x58] sm:$0xf] %vm1932_vm13, %v1869_v50  ;;  %v2618_v46 = vrot.slane %v2616_v2, 4  ;;  %v2531_v50 = vld [vmem:[#allocation2 + $0x2c] sm:$0xf]  ;;  %v2617_v4 = vsel %vm7797_vm4, %v2615_v39, %v2616_v2 }
 0x1b1   : > { %v2621_v63 = vrot.slane %v2619_v18, 4  ;;  %v2625_v55 = vrot.slane %v2531_v50, 6 }
 0x1b2   : > { %v2620_v17 = vsel %vm7797_vm4, %v2618_v46, %v2619_v18  ;;  %v2542_v18 = vld [vmem:[#allocation2 + $0x58] sm:$0xf] }
 0x1b3   : > { %2437 = vrot.lane.b32.xlu0 %v2326_v53, %s6383_s23  ;;  %2435 = vrot.lane.b32.xlu2 %v2316_v8, %s6383_s23  ;;  %v2606_v53 = vrot.slane %v2604_v26, 4  ;;  %v2627_v51 = vrot.slane %v2625_v55, 4  ;;  %v2624_v26 = vrot.slane %v2622_v45, 4 }
 0x1b5   : > { %2439 = vrot.lane.b32.xlu1 %v2336_v49, %s6383_s23  ;;  %v1873_v54 = vpop.permute.xlu0 %1872  ;;  %v1889_v3 = vpop.permute.xlu2 %1888  ;;  %v2608_v14 = vsel %vm7797_vm4, %v2606_v53, %v2607_v1  ;;  %v2629_v10 = vsel %vm7797_vm4, %v2627_v51, %v2628_v48  ;;  %v2538_v1 = vld [vmem:[#allocation2 + $0x48] sm:$0xf]  ;;  %v2626_v13 = vsel %vm7797_vm4, %v2624_v26, %v2625_v55 }
 0x1b6   : > { %1957 = vst.msk [vmem:[#allocation3 + $0x60] sm:$0xf] %vm1932_vm13, %v1873_v54  ;;  %v2623_v54 = vsel %vm7797_vm4, %v2621_v63, %v2622_v45  ;;  %v2646_v22 = vrot.slane %v2538_v1, 6  ;;  %v2658_v63 = vrot.slane %v2542_v18, 6 }
 0x1b7   : > { %v1875_v59 = vpop.permute.xlu1 %1874  ;;  %1965 = vst.msk [vmem:[#allocation3 + $0x80] sm:$0xf] %vm1932_vm13, %v1889_v3  ;;  %v2639_v3 = vrot.slane %v2637_v62, 4 }
 0x1b8   : > { %1958 = vst.msk [vmem:[#allocation3 + $0x64] sm:$0xf] %vm1932_vm13, %v1875_v59  ;;  %v2534_v59 = vld [vmem:[#allocation2 + $0x38] sm:$0xf]  ;;  %v2648_v28 = vrot.slane %v2646_v22, 4  ;;  %v2647_v15 = vsel %vm7797_vm4, %v2645_v37, %v2646_v22  ;;  %v2660_v21 = vrot.slane %v2658_v63, 4 }
 0x1b9   : > { %v2634_v11 = vrot.slane %v2534_v59, 6  ;;  %v2651_v59 = vrot.slane %v2649_v36, 4  ;;  %v2551_v22 = vld [vmem:[#allocation2 + $0x7c] sm:$0xf] }
 0x1bb   : > { %2443 = vrot.lane.b32.xlu0 %v2356_v61, %s6383_s23  ;;  %2441 = vrot.lane.b32.xlu2 %v2346_v30, %s6383_s23  ;;  %v2630_v61 = vrot.slane %v2628_v48, 4  ;;  %v2636_v60 = vrot.slane %v2634_v11, 4  ;;  %v2635_v2 = vsel %vm7797_vm4, %v2633_v58, %v2634_v11  ;;  %v2545_v48 = vld [vmem:[#allocation2 + $0x64] sm:$0xf] }
 0x1bd   : > { %2445 = vrot.lane.b32.xlu1 %v2366_v57, %s6383_s23  ;;  %v1879_v9 = vpop.permute.xlu0 %1878  ;;  %v1895_v33 = vpop.permute.xlu2 %1894  ;;  %v2638_v30 = vsel %vm7797_vm4, %v2636_v60, %v2637_v62  ;;  %v2548_v62 = vld [vmem:[#allocation2 + $0x70] sm:$0xf] }
 0x1be   : > { %1960 = vst.msk [vmem:[#allocation3 + $0x6c] sm:$0xf] %vm1932_vm13, %v1879_v9  ;;  %v2632_v9 = vsel %vm7797_vm4, %v2630_v61, %v2631_v40  ;;  %v2667_v61 = vrot.slane %v2545_v48, 6 }
 0x1bf   : > { %v1881_v12 = vpop.permute.xlu1 %1880  ;;  %1968 = vst.msk [vmem:[#allocation3 + $0x8c] sm:$0xf] %vm1932_vm13, %v1895_v33 }
 0x1c0   : > { %1961 = vst.msk [vmem:[#allocation3 + $0x70] sm:$0xf] %vm1932_vm13, %v1881_v12  ;;  %v2640_v12 = vrot.slane %v2536_v5, 6 }
 0x1c2   : > { %v2642_v50 = vrot.slane %v2640_v12, 4 }
 0x1c3   : > { %2708 = vrot.lane.b32.xlu0 %v2602_v29, %s6384_s24  ;;  %2447 = vrot.lane.b32.xlu2 %v2376_v47, %s6383_s23  ;;  %v2650_v47 = vsel %vm7797_vm4, %v2648_v28, %v2649_v36  ;;  %v2685_v28 = vrot.slane %v2551_v22, 6 }
 0x1c4   : > { %v2644_v55 = vsel %vm7797_vm4, %v2642_v50, %v2643_v31 }
 0x1c5   : > { %2710 = vrot.lane.b32.xlu1 %v2605_v27, %s6384_s24  ;;  %v1885_v42 = vpop.permute.xlu0 %1884  ;;  %v2382_v35 = vpop.permute.xlu2 %2381  ;;  %v2641_v27 = vsel %vm7797_vm4, %v2639_v3, %v2640_v12  ;;  %v2676_v3 = vrot.slane %v2548_v62, 6 }
 0x1c6   : > { %1963 = vst.msk [vmem:[#allocation3 + $0x78] sm:$0xf] %vm1932_vm13, %v1885_v42 }
 0x1c7   : > { %v1887_v7 = vpop.permute.xlu1 %1886  ;;  %2488 = vst.msk [vmem:[#allocation3 + $0x8] sm:$0xf] %vm2485_vm5, %v2382_v35 }
 0x1c8   : > { %1964 = vst.msk [vmem:[#allocation3 + $0x7c] sm:$0xf] %vm1932_vm13, %v1887_v7  ;;  %v2541_v7 = vld [vmem:[#allocation2 + $0x54] sm:$0xf] }
 0x1cb   : > { %2714 = vrot.lane.b32.xlu0 %v2611_v23, %s6384_s24  ;;  %2712 = vrot.lane.b32.xlu2 %v2608_v14, %s6384_s24  ;;  %v2652_v23 = vrot.slane %v2540_v44, 6  ;;  %v2669_v44 = vrot.slane %v2667_v61, 4 }
 0x1cd   : > { %2716 = vrot.lane.b32.xlu1 %v2614_v25, %s6384_s24  ;;  %v1891_v6 = vpop.permute.xlu0 %1890  ;;  %v2388_v8 = vpop.permute.xlu2 %2387  ;;  %v2655_v25 = vrot.slane %v2541_v7, 6  ;;  %v2654_v24 = vrot.slane %v2652_v23, 4  ;;  %v2653_v11 = vsel %vm7797_vm4, %v2651_v59, %v2652_v23 }
 0x1ce   : > { %1966 = vst.msk [vmem:[#allocation3 + $0x84] sm:$0xf] %vm1932_vm13, %v1891_v6  ;;  %v2543_v6 = vld [vmem:[#allocation2 + $0x5c] sm:$0xf] }
 0x1cf   : > { %v1893_v49 = vpop.permute.xlu1 %1892  ;;  %2491 = vst.msk [vmem:[#allocation3 + $0x14] sm:$0xf] %vm2485_vm5, %v2388_v8  ;;  %v2657_v53 = vrot.slane %v2655_v25, 4  ;;  %v2656_v32 = vsel %vm7797_vm4, %v2654_v24, %v2655_v25  ;;  %v2554_v25 = vld [vmem:[#allocation2 + $0x88] sm:$0xf] }
 0x1d0   : > { %1967 = vst.msk [vmem:[#allocation3 + $0x88] sm:$0xf] %vm1932_vm13, %v1893_v49  ;;  %v2544_v49 = vld [vmem:[#allocation2 + $0x60] sm:$0xf] }
 0x1d1   : > { %v2659_v14 = vsel %vm7797_vm4, %v2657_v53, %v2658_v63  ;;  %v2694_v53 = vrot.slane %v2554_v25, 6 }
 0x1d3   : > { %2720 = vrot.lane.b32.xlu0 %v2620_v17, %s6384_s24  ;;  %2718 = vrot.lane.b32.xlu2 %v2617_v4, %s6384_s24  ;;  %v2661_v17 = vrot.slane %v2543_v6, 6  ;;  %v2678_v6 = vrot.slane %v2676_v3, 4 }
 0x1d5   : > { %2722 = vrot.lane.b32.xlu1 %v2623_v54, %s6384_s24  ;;  %v2378_v41 = vpop.permute.xlu0 %2377  ;;  %v2394_v52 = vpop.permute.xlu2 %2393  ;;  %v2664_v54 = vrot.slane %v2544_v49, 6  ;;  %v2663_v34 = vrot.slane %v2661_v17, 4  ;;  %v2662_v31 = vsel %vm7797_vm4, %v2660_v21, %v2661_v17 }
 0x1d6   : > { %2486 = vst.msk [vmem:[#allocation3] sm:$0xf] %vm2485_vm5, %v2378_v41  ;;  %v2546_v41 = vld [vmem:[#allocation2 + $0x68] sm:$0xf] }
 0x1d7   : > { %v2380_v57 = vpop.permute.xlu1 %2379  ;;  %2494 = vst.msk [vmem:[#allocation3 + $0x20] sm:$0xf] %vm2485_vm5, %v2394_v52  ;;  %v2666_v39 = vrot.slane %v2664_v54, 4  ;;  %v2665_v56 = vsel %vm7797_vm4, %v2663_v34, %v2664_v54  ;;  %v7938_v54 = vld [vmem:[#allocation2 + $0x94] sm:$0xf] }
 0x1d8   : > { %2487 = vst.msk [vmem:[#allocation3 + $0x4] sm:$0xf] %vm2485_vm5, %v2380_v57  ;;  %v2547_v57 = vld [vmem:[#allocation2 + $0x6c] sm:$0xf] }
 0x1d9   : > { %v2668_v4 = vsel %vm7797_vm4, %v2666_v39, %v2667_v61  ;;  %v2703_v39 = vrot.slane %v7938_v54, 6 }
 0x1db   : > { %2726 = vrot.lane.b32.xlu0 %v2629_v10, %s6384_s24  ;;  %2724 = vrot.lane.b32.xlu2 %v2626_v13, %s6384_s24  ;;  %v2670_v10 = vrot.slane %v2546_v41, 6  ;;  %v3182_v41 = vld [vmem:[#allocation2 + $0x14] sm:$0xf]  ;;  %v2705_v25 = vrot.slane %v2703_v39, 4 }
 0x1dd   : > { %2728 = vrot.lane.b32.xlu1 %v2632_v9, %s6384_s24  ;;  %v2384_v19 = vpop.permute.xlu0 %2383  ;;  %v2400_v16 = vpop.permute.xlu2 %2399  ;;  %v2673_v9 = vrot.slane %v2547_v57, 6  ;;  %v2672_v5 = vrot.slane %v2670_v10, 4  ;;  %v2671_v23 = vsel %vm7797_vm4, %v2669_v44, %v2670_v10  ;;  %v3231_v10 = vshrl.u32 %v3182_v41, 16 }
 0x1de   : > { %2489 = vst.msk [vmem:[#allocation3 + $0xc] sm:$0xf] %vm2485_vm5, %v2384_v19  ;;  %v2549_v19 = vld [vmem:[#allocation2 + $0x74] sm:$0xf] }
 0x1df   : > { %v2386_v29 = vpop.permute.xlu1 %2385  ;;  %2497 = vst.msk [vmem:[#allocation3 + $0x2c] sm:$0xf] %vm2485_vm5, %v2400_v16  ;;  %v2675_v26 = vrot.slane %v2673_v9, 4  ;;  %v2674_v1 = vsel %vm7797_vm4, %v2672_v5, %v2673_v9  ;;  %v3183_v9 = vld [vmem:[#allocation2 + $0x18] sm:$0xf]  ;;  %v3233_v21 = vrot.slane %v3231_v10, 6 }
 0x1e0   : > { %2490 = vst.msk [vmem:[#allocation3 + $0x10] sm:$0xf] %vm2485_vm5, %v2386_v29  ;;  %v2550_v29 = vld [vmem:[#allocation2 + $0x78] sm:$0xf] }
 0x1e1   : > { %v2677_v13 = vsel %vm7797_vm4, %v2675_v26, %v2676_v3  ;;  %v3241_v3 = vshrl.u32 %v3183_v9, 16 }
 0x1e3   : > { %2732 = vrot.lane.b32.xlu0 %v2638_v30, %s6384_s24  ;;  %2730 = vrot.lane.b32.xlu2 %v2635_v2, %s6384_s24  ;;  %v2679_v30 = vrot.slane %v2549_v19, 6  ;;  %v2855_v19 = vld [vmem:[#allocation2 + $0x18] sm:$0xf] }
 0x1e5   : > { %2734 = vrot.lane.b32.xlu1 %v2641_v27, %s6384_s24  ;;  %v2390_v42 = vpop.permute.xlu0 %2389  ;;  %v2406_v45 = vpop.permute.xlu2 %2405  ;;  %v2682_v27 = vrot.slane %v2550_v29, 6  ;;  %v2681_v38 = vrot.slane %v2679_v30, 4  ;;  %v2680_v17 = vsel %vm7797_vm4, %v2678_v6, %v2679_v30  ;;  %v2696_v29 = vrot.slane %v2694_v53, 4 }
 0x1e6   : > { %2492 = vst.msk [vmem:[#allocation3 + $0x18] sm:$0xf] %vm2485_vm5, %v2390_v42  ;;  %v2552_v42 = vld [vmem:[#allocation2 + $0x80] sm:$0xf]  ;;  %v2932_v30 = vrot.slane %v2855_v19, 6 }
 0x1e7   : > { %v2392_v33 = vpop.permute.xlu1 %2391  ;;  %2500 = vst.msk [vmem:[#allocation3 + $0x38] sm:$0xf] %vm2485_vm5, %v2406_v45  ;;  %v2684_v58 = vrot.slane %v2682_v27, 4  ;;  %v2683_v7 = vsel %vm7797_vm4, %v2681_v38, %v2682_v27 }
 0x1e8   : > { %2493 = vst.msk [vmem:[#allocation3 + $0x1c] sm:$0xf] %vm2485_vm5, %v2392_v33  ;;  %v2553_v33 = vld [vmem:[#allocation2 + $0x84] sm:$0xf] }
 0x1e9   : > { %v2686_v2 = vsel %vm7797_vm4, %v2684_v58, %v2685_v28 }
 0x1eb   : > { %2738 = vrot.lane.b32.xlu0 %v2647_v15, %s6384_s24  ;;  %2736 = vrot.lane.b32.xlu2 %v2644_v55, %s6384_s24  ;;  %v2688_v15 = vrot.slane %v2552_v42, 6 }
 0x1ed   : > { %2740 = vrot.lane.b32.xlu1 %v2650_v47, %s6384_s24  ;;  %v2396_v46 = vpop.permute.xlu0 %2395  ;;  %v2412_v40 = vpop.permute.xlu2 %2411  ;;  %v2691_v47 = vrot.slane %v2553_v33, 6  ;;  %v2690_v18 = vrot.slane %v2688_v15, 4  ;;  %v3734_v33 = vld [vmem:[#allocation2 + $0x10] sm:$0x8] }
 0x1ee   : > { %2495 = vst.msk [vmem:[#allocation3 + $0x24] sm:$0xf] %vm2485_vm5, %v2396_v46  ;;  %v7925_v46 = vld [vmem:[#allocation2 + $0x8c] sm:$0xf] }
 0x1ef   : > { %v2398_v35 = vpop.permute.xlu1 %2397  ;;  %2503 = vst.msk [vmem:[#allocation3 + $0x44] sm:$0xf] %vm2485_vm5, %v2412_v40  ;;  %v2693_v50 = vrot.slane %v2691_v47, 4  ;;  %v2692_v49 = vsel %vm7797_vm4, %v2690_v18, %v2691_v47 }
 0x1f0   : > { %2496 = vst.msk [vmem:[#allocation3 + $0x28] sm:$0xf] %vm2485_vm5, %v2398_v35  ;;  %v2556_v35 = vld [vmem:[#allocation2 + $0x90] sm:$0xf] }
 0x1f1   : > { %v2695_v55 = vsel %vm7797_vm4, %v2693_v50, %v2694_v53  ;;  %v6153_v50 = vrot.slane %v3734_v33, 11  ;;  %v3193_v33 = vld [vmem:[#allocation2 + $0x40] sm:$0xf] }
 0x1f3   : > { %2744 = vrot.lane.b32.xlu0 %v2656_v32, %s6384_s24  ;;  %2742 = vrot.lane.b32.xlu2 %v2653_v11, %s6384_s24  ;;  %v2697_v32 = vrot.slane %v7925_v46, 6  ;;  %v3234_v11 = vshll.u32 %v3182_v41, 16  ;;  %v7990_v41 = vld [vmem:[#allocation2 + $0x20] sm:$0xf] }
 0x1f4   : > { %v2938_v10 = vrot.slane %v7990_v41, 6 }
 0x1f5   : > { %2746 = vrot.lane.b32.xlu1 %v2659_v14, %s6384_s24  ;;  %v2402_v51 = vpop.permute.xlu0 %2401  ;;  %v2418_v12 = vpop.permute.xlu2 %2417  ;;  %v2700_v14 = vrot.slane %v2556_v35, 6  ;;  %v2699_v48 = vrot.slane %v2697_v32, 4  ;;  %v3236_v26 = vrot.slane %v3234_v11, 7  ;;  %v2698_v44 = vsel %vm7797_vm4, %v2696_v29, %v2697_v32  ;;  %v2856_v35 = vld [vmem:[#allocation2 + $0x1c] sm:$0xf] }
 0x1f6   : > { %2498 = vst.msk [vmem:[#allocation3 + $0x30] sm:$0xf] %vm2485_vm5, %v2402_v51  ;;  %v2687_v51 = vrot.slane %v2685_v28, 4 }
 0x1f7   : > { %v2404_v8 = vpop.permute.xlu1 %2403  ;;  %2506 = vst.msk [vmem:[#allocation3 + $0x50] sm:$0xf] %vm2485_vm5, %v2418_v12  ;;  %v2702_v59 = vrot.slane %v2700_v14, 4  ;;  %v2701_v57 = vsel %vm7797_vm4, %v2699_v48, %v2700_v14  ;;  %v3244_v12 = vshll.u32 %v3183_v9, 16  ;;  %v7960_v38 = vor.u32 %v3236_v26, %v3233_v21  ;;  %v3185_v14 = vld [vmem:[#allocation2 + $0x20] sm:$0xf] }
 0x1f8   : > { %2499 = vst.msk [vmem:[#allocation3 + $0x34] sm:$0xf] %vm2485_vm5, %v2404_v8  ;;  %v2854_v8 = vld [vmem:[#allocation2 + $0x14] sm:$0xf]  ;;  %v3736_v9 = vld [vmem:[#allocation2 + $0x18] sm:$0xf] }
 0x1f9   : > { %v2704_v62 = vsel %vm7797_vm4, %v2702_v59, %v2703_v39  ;;  %v2929_v5 = vrot.slane %v2854_v8, 6  ;;  %v3246_v42 = vrot.slane %v3244_v12, 7  ;;  %v3737_v12 = vld [vmem:[#allocation2 + $0x1c] sm:$0xf] }
 0x1fb   : > { %2750 = vrot.lane.b32.xlu0 %v2665_v56, %s6384_s24  ;;  %2748 = vrot.lane.b32.xlu2 %v2662_v31, %s6384_s24  ;;  %v2853_v56 = vld [vmem:[#allocation2 + $0x10] sm:$0xc] }
 0x1fd   : > { %2752 = vrot.lane.b32.xlu1 %v2668_v4, %s6384_s24  ;;  %v2408_v60 = vpop.permute.xlu0 %2407  ;;  %v2424_v36 = vpop.permute.xlu2 %2423  ;;  %v2689_v4 = vsel %vm7797_vm4, %v2687_v51, %v2688_v15  ;;  %v3239_v15 = vrot.slane %v7960_v38, 4  ;;  %v2934_v51 = vrot.slane %v2932_v30, 4 }
 0x1fe   : > { %2501 = vst.msk [vmem:[#allocation3 + $0x3c] sm:$0xf] %vm2485_vm5, %v2408_v60  ;;  %v6152_v60 = vrot.slane %v2853_v56, 10 }
 0x1ff   : > { %v2410_v52 = vpop.permute.xlu1 %2409  ;;  %2509 = vst.msk [vmem:[#allocation3 + $0x5c] sm:$0xf] %vm2485_vm5, %v2424_v36 }
 0x200   : > { %2502 = vst.msk [vmem:[#allocation3 + $0x40] sm:$0xf] %vm2485_vm5, %v2410_v52  ;;  %v2930_v22 = vsel %vm7797_vm4, %v6152_v60, %v2929_v5 }
 0x203   : > { %2756 = vrot.lane.b32.xlu0 %v2674_v1, %s6384_s24  ;;  %2754 = vrot.lane.b32.xlu2 %v2671_v23, %s6384_s24  ;;  %v2931_v1 = vrot.slane %v2929_v5, 4 }
 0x205   : > { %2758 = vrot.lane.b32.xlu1 %v2677_v13, %s6384_s24  ;;  %v2414_v37 = vpop.permute.xlu0 %2413  ;;  %v2430_v63 = vpop.permute.xlu2 %2429  ;;  %v3181_v13 = vld [vmem:[#allocation2 + $0x10] sm:$0xc]  ;;  %v2933_v36 = vsel %vm7797_vm4, %v2931_v1, %v2932_v30  ;;  %v8011_v1 = vld [vmem:[#allocation2 + $0x38] sm:$0xf] }
 0x206   : > { %2504 = vst.msk [vmem:[#allocation3 + $0x48] sm:$0xf] %vm2485_vm5, %v2414_v37  ;;  %v3243_v37 = vrot.slane %v3241_v3, 6  ;;  %v3222_v58 = vshrl.u32 %v3181_v13, 16  ;;  %v3225_v28 = vshll.u32 %v3181_v13, 16  ;;  %v3813_v3 = vrot.slane %v3736_v9, 7 }
 0x207   : > { %v2416_v16 = vpop.permute.xlu1 %2415  ;;  %2512 = vst.msk [vmem:[#allocation3 + $0x68] sm:$0xf] %vm2485_vm5, %v2430_v63  ;;  %v3192_v13 = vld [vmem:[#allocation2 + $0x3c] sm:$0xf]  ;;  %v3186_v9 = vld [vmem:[#allocation2 + $0x24] sm:$0xf] }
 0x208   : > { %2505 = vst.msk [vmem:[#allocation3 + $0x4c] sm:$0xf] %vm2485_vm5, %v2416_v16  ;;  %v2558_v16 = vld [vmem:[#allocation2 + $0x98] sm:$0x3]  ;;  %v7970_v23 = vor.u32 %v3246_v42, %v3243_v37  ;;  %v3224_v46 = vrot.slane %v3222_v58, 6  ;;  %v3227_v6 = vrot.slane %v3225_v28, 7 }
 0x209   : > { %v2706_v18 = vrot.slane %v2558_v16, 6  ;;  %v2864_v42 = vld [vmem:[#allocation2 + $0x3c] sm:$0xf]  ;;  %v3331_v28 = vshrl.u32 %v3192_v13, 16 }
 0x20a   : > { %v3228_v54 = vor.u32 %v3227_v6, %v3224_v46  ;;  %v3341_v46 = vshrl.u32 %v3193_v33, 16  ;;  %v3344_v6 = vshll.u32 %v3193_v33, 16 }
 0x20b   : > { %2762 = vrot.lane.b32.xlu0 %v2683_v7, %s6384_s24  ;;  %2760 = vrot.lane.b32.xlu2 %v2680_v17, %s6384_s24  ;;  %v7967_v7 = vld [vmem:[#allocation2 + $0x14] sm:$0xf] }
 0x20c   : > { %v3810_v53 = vrot.slane %v7967_v7, 7 }
 0x20d   : > { %2764 = vrot.lane.b32.xlu1 %v2686_v2, %s6384_s24  ;;  %v2420_v24 = vpop.permute.xlu0 %2419  ;;  %v2436_v61 = vpop.permute.xlu2 %2435 }
 0x20e   : > { %2507 = vst.msk [vmem:[#allocation3 + $0x54] sm:$0xf] %vm2485_vm5, %v2420_v24  ;;  %v3184_v24 = vld [vmem:[#allocation2 + $0x1c] sm:$0xf]  ;;  %v3811_v48 = vsel %vm6503_vm3, %v6153_v50, %v3810_v53 }
 0x20f   : > { %v2422_v45 = vpop.permute.xlu1 %2421  ;;  %2515 = vst.msk [vmem:[#allocation3 + $0x74] sm:$0xf] %vm2485_vm5, %v2436_v61  ;;  %v3251_v32 = vshrl.u32 %v3184_v24, 16  ;;  %v3254_v17 = vshll.u32 %v3184_v24, 16  ;;  %v3261_v61 = vshrl.u32 %v3185_v14, 16 }
 0x210   : > { %2508 = vst.msk [vmem:[#allocation3 + $0x58] sm:$0xf] %vm2485_vm5, %v2422_v45 }
 0x211   : > { %v3253_v59 = vrot.slane %v3251_v32, 6  ;;  %v3256_v39 = vrot.slane %v3254_v17, 7  ;;  %v3263_v60 = vrot.slane %v3261_v61, 6  ;;  %v8036_v17 = vld [vmem:[#allocation2 + $0x38] sm:$0xf] }
 0x212   : > { %v8048_v61 = vld [vmem:[#allocation2 + $0x20] sm:$0xf] }
 0x213   : > { %2768 = vrot.lane.b32.xlu0 %v2692_v49, %s6384_s24  ;;  %2766 = vrot.lane.b32.xlu2 %v2689_v4, %s6384_s24  ;;  %v3248_v49 = vsel %vm7974_vm2, %v3239_v15, %v7970_v23  ;;  %v3257_v5 = vor.u32 %v3256_v39, %v3253_v59  ;;  %v2959_v15 = vrot.slane %v2864_v42, 6  ;;  %v3837_v39 = vrot.slane %v8036_v17, 7  ;;  %v8075_v42 = vld [vmem:[#allocation2 + $0x28] sm:$0xf]  ;;  %v3198_v17 = vld [vmem:[#allocation2 + $0x54] sm:$0xf] }
 0x215   : > { %2770 = vrot.lane.b32.xlu1 %v2695_v55, %s6384_s24  ;;  %v2426_v34 = vpop.permute.xlu0 %2425  ;;  %v2442_v31 = vpop.permute.xlu2 %2441  ;;  %v2707_v55 = vsel %vm7797_vm4, %v2705_v25, %v2706_v18  ;;  %v8028_v25 = vld [vmem:[#allocation2 + $0x40] sm:$0xf]  ;;  %v3333_v18 = vrot.slane %v3331_v28, 6 }
 0x216   : > { %2510 = vst.msk [vmem:[#allocation3 + $0x60] sm:$0xf] %vm2485_vm5, %v2426_v34  ;;  %v2935_v34 = vrot.slane %v2856_v35, 6 }
 0x217   : > { %v2428_v40 = vpop.permute.xlu1 %2427  ;;  %2518 = vst.msk [vmem:[#allocation3 + $0x80] sm:$0xf] %vm2485_vm5, %v2442_v31  ;;  %v3812_v31 = vrot.slane %v3810_v53, 4  ;;  %v3249_v53 = vrot.slane %v7970_v23, 4  ;;  %v3346_v23 = vrot.slane %v3344_v6, 7 }
 0x218   : > { %2511 = vst.msk [vmem:[#allocation3 + $0x64] sm:$0xf] %vm2485_vm5, %v2428_v40  ;;  %v3264_v40 = vshll.u32 %v3185_v14, 16  ;;  %v2937_v56 = vrot.slane %v2935_v34, 4 }
 0x219   : > { %v3814_v16 = vsel %vm6503_vm3, %v3812_v31, %v3813_v3 }
 0x21a   : > { %v3266_v19 = vrot.slane %v3264_v40, 7  ;;  %v2939_v26 = vsel %vm7797_vm4, %v2937_v56, %v2938_v10  ;;  %v3745_v40 = vld [vmem:[#allocation2 + $0x3c] sm:$0xf] }
 0x21b   : > { %2774 = vrot.lane.b32.xlu0 %v2701_v57, %s6384_s24  ;;  %2772 = vrot.lane.b32.xlu2 %v2698_v44, %s6384_s24  ;;  %v3229_v57 = vrot.slane %v3228_v54, 4  ;;  %v2956_v44 = vrot.slane %v8011_v1, 6  ;;  %v3343_v54 = vrot.slane %v3341_v46, 6 }
 0x21c   : > { %v8008_v29 = vor.u32 %v3266_v19, %v3263_v60  ;;  %v3839_v60 = vrot.slane %v3837_v39, 4  ;;  %v3840_v19 = vrot.slane %v3745_v40, 7 }
 0x21d   : > { %2776 = vrot.lane.b32.xlu1 %v2704_v62, %s6384_s24  ;;  %v2432_v52 = vpop.permute.xlu0 %2431  ;;  %v2448_v63 = vpop.permute.xlu2 %2447  ;;  %v2936_v62 = vsel %vm7797_vm4, %v2934_v51, %v2935_v34  ;;  %v3238_v21 = vsel %vm7974_vm2, %v3229_v57, %v7960_v38  ;;  %v8051_v57 = vor.u32 %v3346_v23, %v3343_v54 }
 0x21e   : > { %2513 = vst.msk [vmem:[#allocation3 + $0x6c] sm:$0xf] %vm2485_vm5, %v2432_v52  ;;  %v3259_v52 = vrot.slane %v3257_v5, 4  ;;  %v3842_v23 = vrot.slane %v3840_v19, 4 }
 0x21f   : > { %v2434_v27 = vpop.permute.xlu1 %2433  ;;  %2521 = vst.msk [vmem:[#allocation3 + $0x8c] sm:$0xf] %vm2485_vm5, %v2448_v63  ;;  %v2961_v63 = vrot.slane %v2959_v15, 4 }
 0x220   : > { %2514 = vst.msk [vmem:[#allocation3 + $0x70] sm:$0xf] %vm2485_vm5, %v2434_v27  ;;  %v3815_v27 = vrot.slane %v3813_v3, 4  ;;  %v3268_v58 = vsel %vm7974_vm2, %v3259_v52, %v8008_v29  ;;  %v2858_v3 = vld [vmem:[#allocation2 + $0x24] sm:$0xf]  ;;  %v3271_v52 = vshrl.u32 %v3186_v9, 16 }
 0x223   : > { %3036 = vrot.lane.b32.xlu0 %v2930_v22, %s6385_s25  ;;  %2778 = vrot.lane.b32.xlu2 %v2707_v55, %s6384_s24  ;;  %v3816_v22 = vrot.slane %v3737_v12, 7 }
 0x225   : > { %3038 = vrot.lane.b32.xlu1 %v2933_v36, %s6385_s25  ;;  %v2438_v2 = vpop.permute.xlu0 %2437  ;;  %v2713_v11 = vpop.permute.xlu2 %2712  ;;  %v3334_v36 = vshll.u32 %v3192_v13, 16  ;;  %v3817_v7 = vsel %vm6503_vm3, %v3815_v27, %v3816_v22  ;;  %v3187_v13 = vld [vmem:[#allocation2 + $0x28] sm:$0xf] }
 0x226   : > { %2516 = vst.msk [vmem:[#allocation3 + $0x78] sm:$0xf] %vm2485_vm5, %v2438_v2  ;;  %v2958_v2 = vrot.slane %v2956_v44, 4 }
 0x227   : > { %v2440_v45 = vpop.permute.xlu1 %2439  ;;  %2819 = vst.msk [vmem:[#allocation3 + $0x8] sm:$0xf] %vm2816_vm9, %v2713_v11  ;;  %v3336_v24 = vrot.slane %v3334_v36, 7  ;;  %v3818_v11 = vrot.slane %v3816_v22, 4  ;;  %v3841_v22 = vsel %vm6503_vm3, %v3839_v60, %v3840_v19  ;;  %v3281_v36 = vshrl.u32 %v3187_v13, 16 }
 0x228   : > { %2517 = vst.msk [vmem:[#allocation3 + $0x7c] sm:$0xf] %vm2485_vm5, %v2440_v45  ;;  %v2962_v45 = vrot.slane %v8028_v25, 6  ;;  %v2960_v55 = vsel %vm7797_vm4, %v2958_v2, %v2959_v15  ;;  %v2944_v2 = vrot.slane %v8075_v42, 6  ;;  %v3203_v60 = vld [vmem:[#allocation2 + $0x68] sm:$0xf] }
 0x229   : > { %v3337_v14 = vor.u32 %v3336_v24, %v3333_v18  ;;  %v8083_v18 = vld [vmem:[#allocation2 + $0x60] sm:$0xf]  ;;  %v3283_v6 = vrot.slane %v3281_v36, 6 }
 0x22a   : > { %v2963_v59 = vsel %vm7797_vm4, %v2961_v63, %v2962_v45 }
 0x22b   : > { %3591 = vrot.lane.b32.xlu0 %v3248_v49, %s6386_s26  ;;  %3589 = vrot.lane.b32.xlu2 %v3238_v21, %s6386_s26  ;;  %v3191_v49 = vld [vmem:[#allocation2 + $0x38] sm:$0xf] }
 0x22c   : > { %v3321_v34 = vshrl.u32 %v3191_v49, 16  ;;  %v3324_v51 = vshll.u32 %v3191_v49, 16  ;;  %v8095_v49 = vld [vmem:[#allocation2 + $0x40] sm:$0xf] }
 0x22d   : > { %3917 = vrot.lane.b32.xlu1 %v3811_v48, %s6387_s27  ;;  %v2444_v8 = vpop.permute.xlu0 %2443  ;;  %v2719_v38 = vpop.permute.xlu2 %2718  ;;  %v3258_v48 = vsel %vm7974_vm2, %v3249_v53, %v3257_v5 }
 0x22e   : > { %2519 = vst.msk [vmem:[#allocation3 + $0x84] sm:$0xf] %vm2485_vm5, %v2444_v8  ;;  %v3339_v8 = vrot.slane %v3337_v14, 4  ;;  %v3326_v5 = vrot.slane %v3324_v51, 7 }
 0x22f   : > { %v2446_v4 = vpop.permute.xlu1 %2445  ;;  %2822 = vst.msk [vmem:[#allocation3 + $0x14] sm:$0xf] %vm2816_vm9, %v2719_v38  ;;  %v2941_v38 = vrot.slane %v2858_v3, 6  ;;  %v8120_v3 = vld [vmem:[#allocation2 + $0x28] sm:$0xf] }
 0x230   : > { %2520 = vst.msk [vmem:[#allocation3 + $0x88] sm:$0xf] %vm2485_vm5, %v2446_v4  ;;  %v3819_v4 = vrot.slane %v8048_v61, 7  ;;  %v3348_v12 = vsel %vm7974_vm2, %v3339_v8, %v8051_v57  ;;  %vm687_vm5 = vcmask 26624  }
 0x231   : > { %v2943_v15 = vrot.slane %v2941_v38, 4  ;;  %688 = vst.msk [vmem:[#allocation2 + $0xa0] sm:$0x7] %vm687_vm5, %v6379_v0 }
 0x232   : > { %v3820_v31 = vsel %vm6503_vm3, %v3818_v11, %v3819_v4 }
 0x233   : > { %3040 = vrot.lane.b32.xlu0 %v2936_v62, %s6385_s25  ;;  %3919 = vrot.lane.b32.xlu2 %v3814_v16, %s6387_s27  ;;  %v3323_v62 = vrot.slane %v3321_v34, 6  ;;  %v3284_v16 = vshll.u32 %v3187_v13, 16  ;;  %v2945_v63 = vsel %vm7797_vm4, %v2943_v15, %v2944_v2  ;;  %v3202_v34 = vld [vmem:[#allocation2 + $0x64] sm:$0xf] }
 0x235   : > { %3042 = vrot.lane.b32.xlu1 %v2939_v26, %s6385_s25  ;;  %v2709_v30 = vpop.permute.xlu0 %2708  ;;  %v2725_v35 = vpop.permute.xlu2 %2724  ;;  %v8068_v27 = vor.u32 %v3326_v5, %v3323_v62  ;;  %v3434_v62 = vshll.u32 %v3202_v34, 16 }
 0x236   : > { %2817 = vst.msk [vmem:[#allocation3] sm:$0xf] %vm2816_vm9, %v2709_v30  ;;  %v3274_v30 = vshll.u32 %v3186_v9, 16  ;;  %v3431_v9 = vshrl.u32 %v3202_v34, 16  ;;  %v2964_v34 = vrot.slane %v2962_v45, 4 }
 0x237   : > { %v2711_v37 = vpop.permute.xlu1 %2710  ;;  %2825 = vst.msk [vmem:[#allocation3 + $0x20] sm:$0xf] %vm2816_vm9, %v2725_v35  ;;  %v2986_v35 = vrot.slane %v8083_v18, 6  ;;  %v3195_v45 = vld [vmem:[#allocation2 + $0x48] sm:$0xf] }
 0x238   : > { %2818 = vst.msk [vmem:[#allocation3 + $0x4] sm:$0xf] %vm2816_vm9, %v2711_v37  ;;  %v2940_v37 = vrot.slane %v2938_v10, 4  ;;  %v3276_v28 = vrot.slane %v3274_v30, 7  ;;  %v3441_v30 = vshrl.u32 %v3203_v60, 16 }
 0x239   : > { %v2988_v51 = vrot.slane %v2986_v35, 4 }
 0x23a   : > { %v2942_v24 = vsel %vm7797_vm4, %v2940_v37, %v2941_v38  ;;  %v3825_v37 = vrot.slane %v8120_v3, 7 }
 0x23b   : > { %3595 = vrot.lane.b32.xlu0 %v3268_v58, %s6386_s26  ;;  %3593 = vrot.lane.b32.xlu2 %v3258_v48, %s6386_s26  ;;  %v3273_v58 = vrot.slane %v3271_v52, 6  ;;  %v3843_v48 = vrot.slane %v8095_v49, 7  ;;  %v3436_v52 = vrot.slane %v3434_v62, 7  ;;  %v4102_v49 = vld [vmem:[%s10418_s1 + $0x10] sm:$0x3] }
 0x23d   : > { %3921 = vrot.lane.b32.xlu1 %v3817_v7, %s6387_s27  ;;  %v2715_v50 = vpop.permute.xlu0 %2714  ;;  %v2731_v21 = vpop.permute.xlu2 %2730  ;;  %v3329_v7 = vrot.slane %v8068_v27, 4  ;;  %v3277_v46 = vor.u32 %v3276_v28, %v3273_v58  ;;  %v3844_v5 = vsel %vm6503_vm3, %v3842_v23, %v3843_v48 }
 0x23e   : > { %2820 = vst.msk [vmem:[#allocation3 + $0xc] sm:$0xf] %vm2816_vm9, %v2715_v50  ;;  %v3286_v50 = vrot.slane %v3284_v16, 7  ;;  %v3443_v16 = vrot.slane %v3441_v30, 6  ;;  %v3361_v30 = vshrl.u32 %v3195_v45, 16 }
 0x23f   : > { %v2717_v32 = vpop.permute.xlu1 %2716  ;;  %2828 = vst.msk [vmem:[#allocation3 + $0x2c] sm:$0xf] %vm2816_vm9, %v2731_v21  ;;  %v3338_v53 = vsel %vm7974_vm2, %v3329_v7, %v3337_v14 }
 0x240   : > { %2821 = vst.msk [vmem:[#allocation3 + $0x10] sm:$0xf] %vm2816_vm9, %v2717_v32  ;;  %v2874_v32 = vld [vmem:[#allocation2 + $0x64] sm:$0xf]  ;;  %v8098_v54 = vor.u32 %v3286_v50, %v3283_v6 }
 0x243   : > { %3056 = vrot.lane.b32.xlu0 %v2960_v55, %s6385_s25  ;;  %3923 = vrot.lane.b32.xlu2 %v3820_v31, %s6387_s27  ;;  %v3279_v55 = vrot.slane %v3277_v46, 4  ;;  %v3444_v31 = vshll.u32 %v3203_v60, 16 }
 0x245   : > { %3058 = vrot.lane.b32.xlu1 %v2963_v59, %s6385_s25  ;;  %v2721_v56 = vpop.permute.xlu0 %2720  ;;  %v2737_v41 = vpop.permute.xlu2 %2736  ;;  %v2989_v59 = vrot.slane %v2874_v32, 6  ;;  %v3288_v11 = vsel %vm7974_vm2, %v3279_v55, %v8098_v54  ;;  %v3194_v55 = vld [vmem:[#allocation2 + $0x44] sm:$0xf] }
 0x246   : > { %2823 = vst.msk [vmem:[#allocation3 + $0x18] sm:$0xf] %vm2816_vm9, %v2721_v56  ;;  %v3739_v56 = vld [vmem:[#allocation2 + $0x24] sm:$0xf]  ;;  %v3354_v62 = vshll.u32 %v3194_v55, 16 }
 0x247   : > { %v2723_v26 = vpop.permute.xlu1 %2722  ;;  %2831 = vst.msk [vmem:[#allocation3 + $0x38] sm:$0xf] %vm2816_vm9, %v2737_v41  ;;  %v2990_v19 = vsel %vm7797_vm4, %v2988_v51, %v2989_v59  ;;  %v3822_v21 = vrot.slane %v3739_v56, 7  ;;  %v3755_v56 = vld [vmem:[#allocation2 + $0x64] sm:$0xf] }
 0x248   : > { %2824 = vst.msk [vmem:[#allocation3 + $0x1c] sm:$0xf] %vm2816_vm9, %v2723_v26  ;;  %v3821_v26 = vrot.slane %v3819_v4, 4  ;;  %v3201_v4 = vld [vmem:[#allocation2 + $0x60] sm:$0xf] }
 0x249   : > { %v3824_v38 = vrot.slane %v3822_v21, 4  ;;  %v3421_v7 = vshrl.u32 %v3201_v4, 16  ;;  %v3424_v15 = vshll.u32 %v3201_v4, 16 }
 0x24a   : > { %v3823_v28 = vsel %vm6503_vm3, %v3821_v26, %v3822_v21  ;;  %v8167_v26 = vld [vmem:[#allocation2 + $0x68] sm:$0xf] }
 0x24b   : > { %3611 = vrot.lane.b32.xlu0 %v3348_v12, %s6386_s26  ;;  %3609 = vrot.lane.b32.xlu2 %v3338_v53, %s6386_s26  ;;  %v3433_v12 = vrot.slane %v3431_v9, 6  ;;  %v3826_v41 = vsel %vm6503_vm3, %v3824_v38, %v3825_v37  ;;  %v8143_v53 = vld [vmem:[#allocation2 + $0x60] sm:$0xf]  ;;  %v3426_v23 = vrot.slane %v3424_v15, 7  ;;  %v3351_v9 = vshrl.u32 %v3194_v55, 16 }
 0x24d   : > { %3937 = vrot.lane.b32.xlu1 %v3841_v22, %s6387_s27  ;;  %v2727_v33 = vpop.permute.xlu0 %2726  ;;  %v2743_v40 = vpop.permute.xlu2 %2742  ;;  %v3269_v22 = vrot.slane %v8008_v29, 4  ;;  %v3437_v36 = vor.u32 %v3436_v52, %v3433_v12  ;;  %v3353_v12 = vrot.slane %v3351_v9, 6  ;;  %v3356_v52 = vrot.slane %v3354_v62, 7  ;;  %v3189_v62 = vld [vmem:[#allocation2 + $0x30] sm:$0xf] }
 0x24e   : > { %2826 = vst.msk [vmem:[#allocation3 + $0x24] sm:$0xf] %vm2816_vm9, %v2727_v33  ;;  %v3446_v33 = vrot.slane %v3444_v31, 7  ;;  %v3364_v31 = vshll.u32 %v3195_v45, 16 }
 0x24f   : > { %v2729_v10 = vpop.permute.xlu1 %2728  ;;  %2834 = vst.msk [vmem:[#allocation3 + $0x44] sm:$0xf] %vm2816_vm9, %v2743_v40  ;;  %v3278_v29 = vsel %vm7974_vm2, %v3269_v22, %v3277_v46  ;;  %v3439_v6 = vrot.slane %v3437_v36, 4 }
 0x250   : > { %2827 = vst.msk [vmem:[#allocation3 + $0x28] sm:$0xf] %vm2816_vm9, %v2729_v10  ;;  %v8137_v10 = vld [vmem:[#allocation2 + $0x68] sm:$0xf]  ;;  %v8140_v50 = vor.u32 %v3446_v33, %v3443_v16  ;;  %v8178_v16 = vor.u32 %v3356_v52, %v3353_v12  ;;  %v3363_v33 = vrot.slane %v3361_v30, 6 }
 0x251   : > { %v2992_v32 = vrot.slane %v8137_v10, 6 }
 0x253   : > { %3044 = vrot.lane.b32.xlu0 %v2942_v24, %s6385_s25  ;;  %3939 = vrot.lane.b32.xlu2 %v3844_v5, %s6387_s27  ;;  %v2866_v24 = vld [vmem:[#allocation2 + $0x44] sm:$0xf] }
 0x254   : > { %v2965_v51 = vrot.slane %v2866_v24, 6  ;;  %v8189_v24 = vld [vmem:[#allocation2 + $0x44] sm:$0xf] }
 0x255   : > { %3046 = vrot.lane.b32.xlu1 %v2945_v63, %s6385_s25  ;;  %v2733_v14 = vpop.permute.xlu0 %2732  ;;  %v2749_v61 = vpop.permute.xlu2 %2748  ;;  %v2991_v63 = vrot.slane %v2989_v59, 4  ;;  %v3448_v59 = vsel %vm7974_vm2, %v3439_v6, %v8140_v50  ;;  %v3359_v6 = vrot.slane %v8178_v16, 4 }
 0x256   : > { %2829 = vst.msk [vmem:[#allocation3 + $0x30] sm:$0xf] %vm2816_vm9, %v2733_v14  ;;  %v3423_v14 = vrot.slane %v3421_v7, 6  ;;  %v2966_v60 = vsel %vm7797_vm4, %v2964_v34, %v2965_v51  ;;  %v3846_v34 = vrot.slane %v8189_v24, 7 }
 0x257   : > { %v2735_v8 = vpop.permute.xlu1 %2734  ;;  %2837 = vst.msk [vmem:[#allocation3 + $0x50] sm:$0xf] %vm2816_vm9, %v2749_v61  ;;  %v2993_v25 = vsel %vm7797_vm4, %v2991_v63, %v2992_v32  ;;  %v3873_v61 = vrot.slane %v8167_v26, 7  ;;  %v2967_v63 = vrot.slane %v2965_v51, 4 }
 0x258   : > { %2830 = vst.msk [vmem:[#allocation3 + $0x34] sm:$0xf] %vm2816_vm9, %v2735_v8  ;;  %v8160_v5 = vor.u32 %v3426_v23, %v3423_v14  ;;  %v3188_v14 = vld [vmem:[#allocation2 + $0x2c] sm:$0xf]  ;;  %v3845_v23 = vrot.slane %v3843_v48, 4 }
 0x259   : > { %v3294_v9 = vshll.u32 %v3188_v14, 16 }
 0x25a   : > { %v3429_v22 = vrot.slane %v8160_v5, 4  ;;  %v3847_v45 = vsel %vm6503_vm3, %v3845_v23, %v3846_v34 }
 0x25b   : > { %3599 = vrot.lane.b32.xlu0 %v3288_v11, %s6386_s26  ;;  %3597 = vrot.lane.b32.xlu2 %v3278_v29, %s6386_s26  ;;  %v3867_v11 = vrot.slane %v8143_v53, 7  ;;  %v3366_v29 = vrot.slane %v3364_v31, 7  ;;  %v3296_v30 = vrot.slane %v3294_v9, 7  ;;  %v3301_v31 = vshrl.u32 %v3189_v62, 16 }
 0x25c   : > { %v3438_v7 = vsel %vm7974_vm2, %v3429_v22, %v3437_v36 }
 0x25d   : > { %3076 = vrot.lane.b32.xlu1 %v2990_v19, %s6385_s25  ;;  %v2739_v13 = vpop.permute.xlu0 %2738  ;;  %v2755_v40 = vpop.permute.xlu2 %2754  ;;  %v3870_v19 = vrot.slane %v3755_v56, 7  ;;  %v3869_v21 = vrot.slane %v3867_v11, 4  ;;  %v2860_v56 = vld [vmem:[#allocation2 + $0x2c] sm:$0xf] }
 0x25e   : > { %2832 = vst.msk [vmem:[#allocation3 + $0x3c] sm:$0xf] %vm2816_vm9, %v2739_v13 }
 0x25f   : > { %v2741_v58 = vpop.permute.xlu1 %2740  ;;  %2840 = vst.msk [vmem:[#allocation3 + $0x5c] sm:$0xf] %vm2816_vm9, %v2755_v40  ;;  %v3872_v38 = vrot.slane %v3870_v19, 4 }
 0x260   : > { %2833 = vst.msk [vmem:[#allocation3 + $0x40] sm:$0xf] %vm2816_vm9, %v2741_v58 }
 0x261   : > { %v3874_v15 = vsel %vm6503_vm3, %v3872_v38, %v3873_v61  ;;  %v3349_v38 = vrot.slane %v8051_v57, 4 }
 0x263   : > { %3925 = vrot.lane.b32.xlu0 %v3823_v28, %s6387_s27  ;;  %3078 = vrot.lane.b32.xlu2 %v2993_v25, %s6385_s25  ;;  %v3871_v28 = vsel %vm6503_vm3, %v3869_v21, %v3870_v19  ;;  %v4202_v25 = vunpack.c.l.b16 %v4102_v49  ;;  %v2946_v19 = vrot.slane %v2944_v2, 4  ;;  %v8218_v21 = vld [vmem:[#allocation2 + $0x30] sm:$0xf]  ;;  %v3358_v24 = vsel %vm7974_vm2, %v3349_v38, %v8178_v16  ;;  %v6308_v16 = vld [vmem:[%s10418_s1] sm:$0xff] }
 0x264   : > { %v2950_v2 = vrot.slane %v8218_v21, 6 }
 0x265   : > { %3927 = vrot.lane.b32.xlu1 %v3826_v41, %s6387_s27  ;;  %v2745_v46 = vpop.permute.xlu0 %2744  ;;  %v2761_v4 = vpop.permute.xlu2 %2760  ;;  %v8186_v41 = vld [vmem:[#allocation2 + $0x48] sm:$0xf]  ;;  %v4205_v12 = vpack.c.b16 %v4202_v25, %v4202_v25 }
 0x266   : > { %2835 = vst.msk [vmem:[#allocation3 + $0x48] sm:$0xf] %vm2816_vm9, %v2745_v46  ;;  %v8192_v46 = vor.u32 %v3366_v29, %v3363_v33  ;;  %v2968_v55 = vrot.slane %v8186_v41, 6  ;;  %v3303_v29 = vrot.slane %v3301_v31, 6 }
 0x267   : > { %v2747_v8 = vpop.permute.xlu1 %2746  ;;  %2843 = vst.msk [vmem:[#allocation3 + $0x68] sm:$0xf] %vm2816_vm9, %v2761_v4  ;;  %v4265_v4 = vsel %vm2596_vm14, %v4205_v12, 0  ;;  %v3827_v12 = vrot.slane %v3825_v37, 4 }
 0x268   : > { %2836 = vst.msk [vmem:[#allocation3 + $0x4c] sm:$0xf] %vm2816_vm9, %v2747_v8  ;;  %v3368_v51 = vsel %vm7974_vm2, %v3359_v6, %v8192_v46  ;;  %v2969_v48 = vsel %vm7797_vm4, %v2967_v63, %v2968_v55  ;;  %4272 = vmatpush.bf16.msra.mxu0 %v4265_v4  ;;  %6310 = vmatpush.bf16.msra.mxu1 %v4265_v4  ;;  %v8245_v63 = vld [vmem:[#allocation2 + $0x6c] sm:$0xf] }
 0x269   : > { %6311 = vmatpush.bf16.msra.mxu2 %v4265_v4  ;;  %6312 = vmatpush.bf16.msra.mxu3 %v4265_v4  ;;  %v2995_v9 = vrot.slane %v8245_v63, 6  ;;  %v3289_v4 = vrot.slane %v8098_v54, 4 }
 0x26b   : > { %3631 = vrot.lane.b32.xlu0 %v3448_v59, %s6386_s26  ;;  %3629 = vrot.lane.b32.xlu2 %v3438_v7, %s6386_s26  ;;  %v3291_v59 = vshrl.u32 %v3188_v14, 16 }
 0x26d   : > { %3060 = vrot.lane.b32.xlu1 %v2966_v60, %s6385_s25  ;;  %v2751_v13 = vpop.permute.xlu0 %2750  ;;  %v2767_v40 = vpop.permute.xlu2 %2766  ;;  %v2947_v60 = vrot.slane %v2860_v56, 6  ;;  %v3293_v52 = vrot.slane %v3291_v59, 6  ;;  %v2994_v59 = vrot.slane %v2992_v32, 4  ;;  %v3205_v32 = vld [vmem:[#allocation2 + $0x70] sm:$0xf] }
 0x26e   : > { %2838 = vst.msk [vmem:[#allocation3 + $0x54] sm:$0xf] %vm2816_vm9, %v2751_v13  ;;  %v3304_v13 = vshll.u32 %v3189_v62, 16  ;;  %v3741_v62 = vld [vmem:[#allocation2 + $0x2c] sm:$0xf] }
 0x26f   : > { %v2753_v58 = vpop.permute.xlu1 %2752  ;;  %2846 = vst.msk [vmem:[#allocation3 + $0x74] sm:$0xf] %vm2816_vm9, %v2767_v40  ;;  %v2949_v42 = vrot.slane %v2947_v60, 4  ;;  %v2948_v57 = vsel %vm7797_vm4, %v2946_v19, %v2947_v60  ;;  %v8230_v33 = vor.u32 %v3296_v30, %v3293_v52  ;;  %v2996_v60 = vsel %vm7797_vm4, %v2994_v59, %v2995_v9  ;;  %v8274_v52 = vld [vmem:[#allocation2 + $0x30] sm:$0xf] }
 0x270   : > { %2839 = vst.msk [vmem:[#allocation3 + $0x58] sm:$0xf] %vm2816_vm9, %v2753_v58  ;;  %v3306_v7 = vrot.slane %v3304_v13, 7  ;;  %v3828_v19 = vrot.slane %v3741_v62, 7  ;;  %v3461_v13 = vshrl.u32 %v3205_v32, 16 }
 0x271   : > { %v2951_v6 = vsel %vm7797_vm4, %v2949_v42, %v2950_v2  ;;  %v3299_v14 = vrot.slane %v8230_v33, 4  ;;  %v3757_v62 = vld [vmem:[#allocation2 + $0x6c] sm:$0xf] }
 0x272   : > { %v8248_v23 = vor.u32 %v3306_v7, %v3303_v29  ;;  %v3830_v42 = vrot.slane %v3828_v19, 4  ;;  %v3463_v29 = vrot.slane %v3461_v13, 6 }
 0x273   : > { %3957 = vrot.lane.b32.xlu0 %v3871_v28, %s6387_s27  ;;  %3062 = vrot.lane.b32.xlu2 %v2969_v48, %s6385_s25 }
 0x275   : > { %3959 = vrot.lane.b32.xlu1 %v3874_v15, %s6387_s27  ;;  %v2757_v36 = vpop.permute.xlu0 %2756  ;;  %v2773_v58 = vpop.permute.xlu2 %2772  ;;  %v6309_v15 = vld [vmem:[%s10418_s1 + $0x8] sm:$0xff] }
 0x276   : > { %2841 = vst.msk [vmem:[#allocation3 + $0x60] sm:$0xf] %vm2816_vm9, %v2757_v36  ;;  %v8242_v36 = vld [vmem:[#allocation2 + $0x48] sm:$0xf]  ;;  %4273 = vmatpush.bf16.msra.mxu0 %v6309_v15  ;;  %6313 = vmatpush.bf16.msra.mxu1 %v6309_v15 }
 0x277   : > { %v2759_v8 = vpop.permute.xlu1 %2758  ;;  %2849 = vst.msk [vmem:[#allocation3 + $0x80] sm:$0xf] %vm2816_vm9, %v2773_v58  ;;  %6314 = vmatpush.bf16.msra.mxu2 %v6309_v15  ;;  %6315 = vmatpush.bf16.msra.mxu3 %v6309_v15  ;;  %v3849_v56 = vrot.slane %v8242_v36, 7  ;;  %v3831_v58 = vrot.slane %v8274_v52, 7  ;;  %v3298_v15 = vsel %vm7974_vm2, %v3289_v4, %v8230_v33 }
 0x278   : > { %2842 = vst.msk [vmem:[#allocation3 + $0x64] sm:$0xf] %vm2816_vm9, %v2759_v8  ;;  %v3848_v8 = vrot.slane %v3846_v34, 4  ;;  %v3308_v34 = vsel %vm7974_vm2, %v3299_v14, %v8248_v23 }
 0x279   : > { %v3832_v54 = vsel %vm6503_vm3, %v3830_v42, %v3831_v58 }
 0x27a   : > { %4274 = vmatpush.bf16.msra.mxu0 %v6308_v16  ;;  %6316 = vmatpush.bf16.msra.mxu1 %v6308_v16  ;;  %v3850_v10 = vsel %vm6503_vm3, %v3848_v8, %v3849_v56  ;;  %v3196_v8 = vld [vmem:[#allocation2 + $0x4c] sm:$0xf] }
 0x27b   : > { %3615 = vrot.lane.b32.xlu0 %v3368_v51, %s6386_s26  ;;  %3613 = vrot.lane.b32.xlu2 %v3358_v24, %s6386_s26  ;;  %v3204_v51 = vld [vmem:[#allocation2 + $0x6c] sm:$0xf]  ;;  %v8291_v24 = vld [vmem:[#allocation2 + $0x70] sm:$0xf] }
 0x27c   : > { %6317 = vmatpush.bf16.msra.mxu2 %v6308_v16  ;;  %v3451_v25 = vshrl.u32 %v3204_v51, 16  ;;  %6318 = vmatpush.bf16.msra.mxu3 %v6308_v16  ;;  %v2997_v16 = vrot.slane %v2995_v9, 4 }
 0x27d   : > { %3941 = vrot.lane.b32.xlu1 %v3847_v45, %s6387_s27  ;;  %v2763_v22 = vpop.permute.xlu0 %2762  ;;  %v2779_v49 = vpop.permute.xlu2 %2778  ;;  %v3454_v45 = vshll.u32 %v3204_v51, 16  ;;  %v2970_v51 = vrot.slane %v2968_v55, 4  ;;  %v3197_v55 = vld [vmem:[#allocation2 + $0x50] sm:$0xf] }
 0x27e   : > { %2844 = vst.msk [vmem:[#allocation3 + $0x6c] sm:$0xf] %vm2816_vm9, %v2763_v22  ;;  %v3453_v30 = vrot.slane %v3451_v25, 6  ;;  %v3464_v22 = vshll.u32 %v3205_v32, 16  ;;  %v3374_v25 = vshll.u32 %v3196_v8, 16  ;;  %v3875_v32 = vrot.slane %v3873_v61, 4 }
 0x27f   : > { %v2765_v28 = vpop.permute.xlu1 %2764  ;;  %2852 = vst.msk [vmem:[#allocation3 + $0x8c] sm:$0xf] %vm2816_vm9, %v2779_v49  ;;  %v3456_v31 = vrot.slane %v3454_v45, 7 }
 0x280   : > { %2845 = vst.msk [vmem:[#allocation3 + $0x70] sm:$0xf] %vm2816_vm9, %v2765_v28  ;;  %v3829_v28 = vsel %vm6503_vm3, %v3827_v12, %v3828_v19  ;;  %v3466_v7 = vrot.slane %v3464_v22, 7  ;;  %v3376_v12 = vrot.slane %v3374_v25, 7  ;;  %v3449_v22 = vrot.slane %v8140_v50, 4 }
 0x282   : > { %v8294_v14 = vor.u32 %v3466_v7, %v3463_v29  ;;  %v8333_v7 = vld [vmem:[#allocation2 + $0x50] sm:$0xf] }
 0x283   : > { %3048 = vrot.lane.b32.xlu0 %v2948_v57, %s6385_s25  ;;  %3943 = vrot.lane.b32.xlu2 %v3850_v10, %s6387_s27  ;;  %v3457_v57 = vor.u32 %v3456_v31, %v3453_v30  ;;  %v3876_v10 = vrot.slane %v3757_v62, 7  ;;  %v3381_v30 = vshrl.u32 %v3197_v55, 16  ;;  %v3384_v31 = vshll.u32 %v3197_v55, 16 }
 0x284   : > { %v2952_v55 = vrot.slane %v2950_v2, 4 }
 0x285   : > { %3050 = vrot.lane.b32.xlu1 %v2951_v6, %s6385_s25  ;;  %v2769_v40 = vpop.permute.xlu0 %2768  ;;  %v3590_v3 = vpop.permute.xlu2 %3589  ;;  %v2868_v6 = vld [vmem:[#allocation2 + $0x4c] sm:$0xf]  ;;  %v3459_v63 = vrot.slane %v3457_v57, 4  ;;  %v3877_v42 = vsel %vm6503_vm3, %v3875_v32, %v3876_v10  ;;  %v3458_v50 = vsel %vm7974_vm2, %v3449_v22, %v3457_v57  ;;  %v2974_v57 = vrot.slane %v8333_v7, 6  ;;  %v8373_v22 = vld [vmem:[#allocation2 + $0x50] sm:$0xf] }
 0x286   : > { %2847 = vst.msk [vmem:[#allocation3 + $0x78] sm:$0xf] %vm2816_vm9, %v2769_v40  ;;  %v2998_v40 = vrot.slane %v8291_v24, 6  ;;  %v2971_v59 = vrot.slane %v2868_v6, 6 }
 0x287   : > { %v2771_v48 = vpop.permute.xlu1 %2770  ;;  %v3468_v9 = vsel %vm7974_vm2, %v3459_v63, %v8294_v14 }
 0x288   : > { %2848 = vst.msk [vmem:[#allocation3 + $0x7c] sm:$0xf] %vm2816_vm9, %v2771_v48  ;;  %v2999_v41 = vsel %vm7797_vm4, %v2997_v16, %v2998_v40  ;;  %v2972_v45 = vsel %vm7797_vm4, %v2970_v51, %v2971_v59  ;;  %v3190_v16 = vld [vmem:[#allocation2 + $0x34] sm:$0xf]  ;;  %v3000_v1 = vrot.slane %v2998_v40, 4 }
 0x289   : > { %v3314_v25 = vshll.u32 %v3190_v16, 16  ;;  %v3207_v40 = vld [vmem:[#allocation2 + $0x78] sm:$0xf] }
 0x28b   : > { %3603 = vrot.lane.b32.xlu0 %v3308_v34, %s6386_s26  ;;  %3601 = vrot.lane.b32.xlu2 %v3298_v15, %s6386_s26  ;;  %v3371_v34 = vshrl.u32 %v3196_v8, 16  ;;  %v3749_v15 = vld [vmem:[#allocation2 + $0x4c] sm:$0xf]  ;;  %v3851_v8 = vrot.slane %v3849_v56, 4 }
 0x28c   : > { %v3852_v51 = vrot.slane %v3749_v15, 7  ;;  %v3743_v15 = vld [vmem:[#allocation2 + $0x34] sm:$0xf] }
 0x28d   : > { %3080 = vrot.lane.b32.xlu1 %v2996_v60, %s6385_s25  ;;  %v2775_v38 = vpop.permute.xlu0 %2774  ;;  %v3920_v49 = vpop.permute.xlu2 %3919  ;;  %v8316_v60 = vld [vmem:[#allocation2 + $0x70] sm:$0xf]  ;;  %v3373_v19 = vrot.slane %v3371_v34, 6  ;;  %v3311_v34 = vshrl.u32 %v3190_v16, 16 }
 0x28e   : > { %2850 = vst.msk [vmem:[#allocation3 + $0x84] sm:$0xf] %vm2816_vm9, %v2775_v38  ;;  %v3878_v38 = vrot.slane %v3876_v10, 4  ;;  %v3879_v4 = vrot.slane %v8316_v60, 7  ;;  %v3853_v56 = vsel %vm6503_vm3, %v3851_v8, %v3852_v51  ;;  %v3316_v10 = vrot.slane %v3314_v25, 7 }
 0x28f   : > { %v2777_v37 = vpop.permute.xlu1 %2776  ;;  %v3834_v8 = vrot.slane %v3743_v15, 7 }
 0x290   : > { %2851 = vst.msk [vmem:[#allocation3 + $0x88] sm:$0xf] %vm2816_vm9, %v2777_v37  ;;  %v3383_v37 = vrot.slane %v3381_v30, 6  ;;  %v3880_v29 = vsel %vm6503_vm3, %v3878_v38, %v3879_v4  ;;  %v2878_v38 = vld [vmem:[#allocation2 + $0x74] sm:$0xf] }
 0x293   : > { %3929 = vrot.lane.b32.xlu0 %v3829_v28, %s6387_s27  ;;  %3082 = vrot.lane.b32.xlu2 %v2999_v41, %s6385_s25  ;;  %v3386_v28 = vrot.slane %v3384_v31, 7 }
 0x295   : > { %3931 = vrot.lane.b32.xlu1 %v3832_v54, %s6387_s27  ;;  %v3037_v33 = vpop.permute.xlu0 %3036  ;;  %v3594_v26 = vpop.permute.xlu2 %3593  ;;  %v8336_v6 = vor.u32 %v3386_v28, %v3383_v37  ;;  %v3855_v37 = vrot.slane %v8373_v22, 7 }
 0x296   : > { %3145 = vst.msk [vmem:[#allocation3] sm:$0xf] %vm3144_vm7, %v3037_v33  ;;  %v2973_v33 = vrot.slane %v2971_v59, 4 }
 0x297   : > { %3698 = vst.msk [vmem:[#allocation3] sm:$0xf] %vm3697_vm10, %v3590_v3  ;;  %v3039_v48 = vpop.permute.xlu1 %3038  ;;  %v3377_v3 = vor.u32 %v3376_v12, %v3373_v19  ;;  %v3369_v19 = vrot.slane %v8192_v46, 4 }
 0x298   : > { %3146 = vst.msk [vmem:[#allocation3 + $0x4] sm:$0xf] %vm3144_vm7, %v3039_v48  ;;  %v2975_v36 = vsel %vm7797_vm4, %v2973_v33, %v2974_v57 }
 0x299   : > { %v3379_v54 = vrot.slane %v3377_v3, 4 }
 0x29b   : > { %3635 = vrot.lane.b32.xlu0 %v3468_v9, %s6386_s26  ;;  %3633 = vrot.lane.b32.xlu2 %v3458_v50, %s6386_s26  ;;  %v2862_v9 = vld [vmem:[#allocation2 + $0x34] sm:$0xf]  ;;  %v3388_v59 = vsel %vm7974_vm2, %v3379_v54, %v8336_v6 }
 0x29c   : > { %v2953_v41 = vrot.slane %v2862_v9, 6 }
 0x29d   : > { %3064 = vrot.lane.b32.xlu1 %v2972_v45, %s6385_s25  ;;  %v3592_v13 = vpop.permute.xlu0 %3591  ;;  %v3313_v45 = vrot.slane %v3311_v34, 6  ;;  %v3836_v34 = vrot.slane %v3834_v8, 4 }
 0x29e   : > { %3699 = vst.msk [vmem:[#allocation3 + $0x4] sm:$0xf] %vm3697_vm10, %v3592_v13  ;;  %v2955_v12 = vrot.slane %v2953_v41, 4  ;;  %v2954_v21 = vsel %vm7797_vm4, %v2952_v55, %v2953_v41  ;;  %v3378_v13 = vsel %vm7974_vm2, %v3369_v19, %v3377_v3  ;;  %v3206_v3 = vld [vmem:[#allocation2 + $0x74] sm:$0xf] }
 0x29f   : > { %4027 = vst.msk [vmem:[#allocation3 + $0x4] sm:$0xf] %vm4025_vm11, %v3920_v49  ;;  %v3918_v61 = vpop.permute.xlu1 %3917  ;;  %v3924_v49 = vpop.permute.xlu2 %3923  ;;  %v3317_v2 = vor.u32 %v3316_v10, %v3313_v45  ;;  %v3474_v33 = vshll.u32 %v3206_v3, 16  ;;  %v8411_v45 = vld [vmem:[#allocation2 + $0x78] sm:$0xf] }
 0x2a0   : > { %4026 = vst.msk [vmem:[#allocation3] sm:$0xf] %vm4025_vm11, %v3918_v61  ;;  %v2957_v46 = vsel %vm7797_vm4, %v2955_v12, %v2956_v44  ;;  %v3001_v44 = vrot.slane %v2878_v38, 6  ;;  %v2870_v10 = vld [vmem:[#allocation2 + $0x54] sm:$0xf] }
 0x2a1   : > { %v3759_v38 = vld [vmem:[#allocation2 + $0x74] sm:$0xf] }
 0x2a2   : > { %v3002_v16 = vsel %vm7797_vm4, %v3000_v1, %v3001_v44  ;;  %v3882_v1 = vrot.slane %v3759_v38, 7 }
 0x2a3   : > { %3961 = vrot.lane.b32.xlu0 %v3877_v42, %s6387_s27  ;;  %3066 = vrot.lane.b32.xlu2 %v2975_v36, %s6385_s25  ;;  %v3854_v42 = vrot.slane %v3852_v51, 4  ;;  %v3833_v51 = vrot.slane %v3831_v58, 4 }
 0x2a5   : > { %3963 = vrot.lane.b32.xlu1 %v3880_v29, %s6387_s27  ;;  %v3041_v63 = vpop.permute.xlu0 %3040  ;;  %v3856_v24 = vsel %vm6503_vm3, %v3854_v42, %v3855_v37  ;;  %v3835_v52 = vsel %vm6503_vm3, %v3833_v51, %v3834_v8  ;;  %v3394_v42 = vshll.u32 %v3198_v17, 16 }
 0x2a6   : > { %3147 = vst.msk [vmem:[#allocation3 + $0x8] sm:$0xf] %vm3144_vm7, %v3041_v63  ;;  %v3471_v63 = vshrl.u32 %v3206_v3, 16 }
 0x2a7   : > { %3700 = vst.msk [vmem:[#allocation3 + $0x8] sm:$0xf] %vm3697_vm10, %v3594_v26  ;;  %v3043_v48 = vpop.permute.xlu1 %3042  ;;  %v6290_v62 = vld [vmem:[#allocation3] sm:$0xff]  ;;  %v3610_v30 = vpop.permute.xlu2 %3609  ;;  %v3319_v26 = vrot.slane %v3317_v2, 4 }
 0x2a8   : > { %3148 = vst.msk [vmem:[#allocation3 + $0xc] sm:$0xf] %vm3144_vm7, %v3043_v48  ;;  %6234 = vmatmul.msk.bf16.vlgmr.msra.gmra.mxu0 %vm4208_vm0, %v6290_v62  ;;  %v3481_v48 = vshrl.u32 %v3207_v40, 16  ;;  %v3484_v62 = vshll.u32 %v3207_v40, 16 }
 0x2a9   : > { %v3328_v54 = vsel %vm7974_vm2, %v3319_v26, %v8068_v27  ;;  %v3473_v27 = vrot.slane %v3471_v63, 6 }
 0x2aa   : > { %v3486_v41 = vrot.slane %v3484_v62, 7  ;;  %v8458_v62 = vld [vmem:[#allocation2 + $0x54] sm:$0xf] }
 0x2ab   : > { %3619 = vrot.lane.b32.xlu0 %v3388_v59, %s6386_s26  ;;  %3617 = vrot.lane.b32.xlu2 %v3378_v13, %s6386_s26  ;;  %v3309_v59 = vrot.slane %v8248_v23, 4  ;;  %v3838_v23 = vsel %vm6503_vm3, %v3836_v34, %v3837_v39  ;;  %v2976_v39 = vrot.slane %v2974_v57, 4  ;;  %v3199_v57 = vld [vmem:[#allocation2 + $0x58] sm:$0xf]  ;;  %v8463_v34 = vld [vmem:[#allocation2 + $0x88] sm:$0xf] }
 0x2ac   : > { %v3401_v15 = vshrl.u32 %v3199_v57, 16 }
 0x2ad   : > { %3945 = vrot.lane.b32.xlu1 %v3853_v56, %s6387_s27  ;;  %v3596_v32 = vpop.permute.xlu0 %3595  ;;  %v3483_v56 = vrot.slane %v3481_v48, 6  ;;  %v3318_v55 = vsel %vm7974_vm2, %v3309_v59, %v3317_v2  ;;  %v8455_v48 = vld [vmem:[#allocation2 + $0x58] sm:$0xf] }
 0x2ae   : > { %3701 = vst.msk [vmem:[#allocation3 + $0xc] sm:$0xf] %vm3697_vm10, %v3596_v32  ;;  %v3403_v51 = vrot.slane %v3401_v15, 6  ;;  %v8493_v15 = vld [vmem:[#allocation2 + $0x88] sm:$0xf] }
 0x2af   : > { %4029 = vst.msk [vmem:[#allocation3 + $0xc] sm:$0xf] %vm4025_vm11, %v3924_v49  ;;  %v3922_v31 = vpop.permute.xlu1 %3921  ;;  %v3940_v28 = vpop.permute.xlu2 %3939  ;;  %v3476_v49 = vrot.slane %v3474_v33, 7  ;;  %v8414_v19 = vor.u32 %v3486_v41, %v3483_v56  ;;  %v3469_v33 = vrot.slane %v8294_v14, 4  ;;  %v3857_v56 = vrot.slane %v3855_v37, 4 }
 0x2b0   : > { %4028 = vst.msk [vmem:[#allocation3 + $0x8] sm:$0xf] %vm4025_vm11, %v3922_v31  ;;  %v3004_v31 = vrot.slane %v8411_v45, 6  ;;  %v3858_v41 = vrot.slane %v8458_v62, 7  ;;  %v3213_v37 = vld [vmem:[#allocation2 + $0x90] sm:$0xf] }
 0x2b1   : > { %v3477_v58 = vor.u32 %v3476_v49, %v3473_v27 }
 0x2b3   : > { %3052 = vrot.lane.b32.xlu0 %v2954_v21, %s6385_s25  ;;  %3947 = vrot.lane.b32.xlu2 %v3856_v24, %s6387_s27  ;;  %v3479_v32 = vrot.slane %v3477_v58, 4  ;;  %v2977_v21 = vrot.slane %v2870_v10, 6  ;;  %v3884_v24 = vrot.slane %v3882_v1, 4  ;;  %v3478_v14 = vsel %vm7974_vm2, %v3469_v33, %v3477_v58  ;;  %v3212_v58 = vld [vmem:[#allocation2 + $0x8c] sm:$0xf] }
 0x2b4   : > { %v2884_v10 = vld [vmem:[#allocation2 + $0x8c] sm:$0xf] }
 0x2b5   : > { %3054 = vrot.lane.b32.xlu1 %v2957_v46, %s6385_s25  ;;  %v3057_v61 = vpop.permute.xlu0 %3056  ;;  %v3488_v26 = vsel %vm7974_vm2, %v3479_v32, %v8414_v19  ;;  %v2978_v3 = vsel %vm7797_vm4, %v2976_v39, %v2977_v21  ;;  %v3016_v32 = vrot.slane %v8463_v34, 6  ;;  %v3859_v39 = vsel %vm6503_vm3, %v3857_v56, %v3858_v41 }
 0x2b6   : > { %3155 = vst.msk [vmem:[#allocation3 + $0x28] sm:$0xf] %vm3144_vm7, %v3057_v61  ;;  %v3391_v61 = vshrl.u32 %v3198_v17, 16  ;;  %v3534_v17 = vshll.u32 %v3212_v58, 16 }
 0x2b7   : > { %3708 = vst.msk [vmem:[#allocation3 + $0x28] sm:$0xf] %vm3697_vm10, %v3610_v30  ;;  %v3059_v50 = vpop.permute.xlu1 %3058  ;;  %v6291_v29 = vld [vmem:[#allocation3 + $0x8] sm:$0xff]  ;;  %v3598_v25 = vpop.permute.xlu2 %3597  ;;  %v3003_v30 = vrot.slane %v3001_v44, 4  ;;  %v3881_v44 = vrot.slane %v3879_v4, 4 }
 0x2b8   : > { %3156 = vst.msk [vmem:[#allocation3 + $0x2c] sm:$0xf] %vm3144_vm7, %v3059_v50  ;;  %6235 = vmatmul.msk.bf16.gmra.mxu0 %vm4208_vm0, %v6291_v29  ;;  %v3393_v50 = vrot.slane %v3391_v61, 6  ;;  %v3396_v29 = vrot.slane %v3394_v42, 7  ;;  %v3536_v38 = vrot.slane %v3534_v17, 7  ;;  %v3544_v61 = vshll.u32 %v3213_v37, 16 }
 0x2b9   : > { %v3005_v7 = vsel %vm7797_vm4, %v3003_v30, %v3004_v31  ;;  %v3531_v30 = vshrl.u32 %v3212_v58, 16  ;;  %v3209_v17 = vld [vmem:[#allocation2 + $0x80] sm:$0xf] }
 0x2ba   : > { %v3397_v8 = vor.u32 %v3396_v29, %v3393_v50 }
 0x2bb   : > { %3607 = vrot.lane.b32.xlu0 %v3328_v54, %s6386_s26  ;;  %3605 = vrot.lane.b32.xlu2 %v3318_v55, %s6386_s26  ;;  %v3404_v54 = vshll.u32 %v3199_v57, 16 }
 0x2bd   : > { %3084 = vrot.lane.b32.xlu1 %v3002_v16, %s6385_s25  ;;  %v3612_v9 = vpop.permute.xlu0 %3611  ;;  %v3883_v16 = vsel %vm6503_vm3, %v3881_v44, %v3882_v1  ;;  %v3406_v27 = vrot.slane %v3404_v54, 7  ;;  %v3211_v44 = vld [vmem:[#allocation2 + $0x88] sm:$0xf] }
 0x2be   : > { %3709 = vst.msk [vmem:[#allocation3 + $0x2c] sm:$0xf] %vm3697_vm10, %v3612_v9  ;;  %v3399_v9 = vrot.slane %v3397_v8, 4 }
 0x2bf   : > { %4037 = vst.msk [vmem:[#allocation3 + $0x2c] sm:$0xf] %vm4025_vm11, %v3940_v28  ;;  %v3938_v36 = vpop.permute.xlu1 %3937  ;;  %v3079_v2 = vpop.permute.xlu2 %3078  ;;  %v8438_v28 = vld [vmem:[#allocation2 + $0x78] sm:$0xf]  ;;  %v8460_v59 = vor.u32 %v3406_v27, %v3403_v51  ;;  %v3897_v51 = vrot.slane %v8493_v15, 7 }
 0x2c0   : > { %4036 = vst.msk [vmem:[#allocation3 + $0x28] sm:$0xf] %vm4025_vm11, %v3938_v36  ;;  %v3885_v40 = vrot.slane %v8438_v28, 7  ;;  %v2979_v36 = vrot.slane %v2977_v21, 4  ;;  %v3019_v21 = vrot.slane %v2884_v10, 6 }
 0x2c1   : > { %3166 = vst.msk [vmem:[#allocation3 + $0x54] sm:$0xf] %vm3144_vm7, %v3079_v2  ;;  %v3018_v2 = vrot.slane %v3016_v32, 4  ;;  %v8509_v27 = vld [vmem:[#allocation2 + $0x58] sm:$0xf] }
 0x2c2   : > { %v3886_v49 = vsel %vm6503_vm3, %v3884_v24, %v3885_v40  ;;  %v3021_v57 = vrot.slane %v3019_v21, 4 }
 0x2c3   : > { %3933 = vrot.lane.b32.xlu0 %v3835_v52, %s6387_s27  ;;  %3086 = vrot.lane.b32.xlu2 %v3005_v7, %s6385_s25  ;;  %v2980_v52 = vrot.slane %v8455_v48, 6  ;;  %v3389_v7 = vrot.slane %v8336_v6, 4  ;;  %v3020_v54 = vsel %vm7797_vm4, %v3018_v2, %v3019_v21  ;;  %v3546_v6 = vrot.slane %v3544_v61, 7  ;;  %v8537_v61 = vld [vmem:[#allocation2 + $0x80] sm:$0xf] }
 0x2c4   : > { %v4402_v2 = vlaneseq }
 0x2c5   : > { %3935 = vrot.lane.b32.xlu1 %v3838_v23, %s6387_s27  ;;  %v3045_v12 = vpop.permute.xlu0 %3044  ;;  %v2981_v22 = vsel %vm7797_vm4, %v2979_v36, %v2980_v52  ;;  %v3398_v24 = vsel %vm7974_vm2, %v3389_v7, %v3397_v8  ;;  %v3208_v8 = vld [vmem:[#allocation2 + $0x7c] sm:$0xf]  ;;  %v3861_v36 = vrot.slane %v8509_v27, 7 }
 0x2c6   : > { %3149 = vst.msk [vmem:[#allocation3 + $0x10] sm:$0xf] %vm3144_vm7, %v3045_v12  ;;  %v3408_v12 = vsel %vm7974_vm2, %v3399_v9, %v8460_v59 }
 0x2c7   : > { %3702 = vst.msk [vmem:[#allocation3 + $0x10] sm:$0xf] %vm3697_vm10, %v3598_v25  ;;  %v3047_v13 = vpop.permute.xlu1 %3046  ;;  %v6295_v46 = vld [vmem:[#allocation3 + $0x28] sm:$0xff]  ;;  %v3630_v60 = vpop.permute.xlu2 %3629 }
 0x2c8   : > { %3150 = vst.msk [vmem:[#allocation3 + $0x14] sm:$0xf] %vm3144_vm7, %v3047_v13  ;;  %6239 = vmatmul.msk.bf16.vlgmr.msra.gmra.mxu1 %vm4208_vm0, %v6295_v46  ;;  %v8486_v13 = vld [vmem:[#allocation2 + $0x90] sm:$0xf]  ;;  %v3533_v46 = vrot.slane %v3531_v30, 6 }
 0x2c9   : > { %v2880_v30 = vld [vmem:[#allocation2 + $0x7c] sm:$0xf] }
 0x2cb   : > { %3639 = vrot.lane.b32.xlu0 %v3488_v26, %s6386_s26  ;;  %3637 = vrot.lane.b32.xlu2 %v3478_v14, %s6386_s26  ;;  %v3541_v26 = vshrl.u32 %v3213_v37, 16  ;;  %v8512_v14 = vld [vmem:[#allocation2 + $0x8c] sm:$0xf]  ;;  %v3494_v37 = vshll.u32 %v3208_v8, 16 }
 0x2cd   : > { %3068 = vrot.lane.b32.xlu1 %v2978_v3, %s6385_s25  ;;  %v3600_v63 = vpop.permute.xlu0 %3599  ;;  %v3022_v3 = vrot.slane %v8486_v13, 6  ;;  %v3543_v33 = vrot.slane %v3541_v26, 6  ;;  %v3501_v26 = vshrl.u32 %v3209_v17, 16  ;;  %v3496_v7 = vrot.slane %v3494_v37, 7 }
 0x2ce   : > { %3703 = vst.msk [vmem:[#allocation3 + $0x14] sm:$0xf] %vm3697_vm10, %v3600_v63  ;;  %v8498_v63 = vor.u32 %v3536_v38, %v3533_v46  ;;  %v3007_v38 = vrot.slane %v2880_v30, 6 }
 0x2cf   : > { %v3077_v4 = vpop.permute.xlu1 %3076  ;;  %v3063_v55 = vpop.permute.xlu2 %3062  ;;  %v8515_v62 = vor.u32 %v3546_v6, %v3543_v33  ;;  %v3010_v6 = vrot.slane %v8537_v61, 6 }
 0x2d0   : > { %3165 = vst.msk [vmem:[#allocation3 + $0x50] sm:$0xf] %vm3144_vm7, %v3077_v4  ;;  %v3524_v4 = vshll.u32 %v3211_v44, 16  ;;  %v3009_v33 = vrot.slane %v3007_v38, 4 }
 0x2d1   : > { %3718 = vst.msk [vmem:[#allocation3 + $0x50] sm:$0xf] %vm3697_vm10, %v3630_v60  ;;  %v3521_v60 = vshrl.u32 %v3211_v44, 16  ;;  %v3006_v44 = vrot.slane %v3004_v31, 4 }
 0x2d2   : > { %3158 = vst.msk [vmem:[#allocation3 + $0x34] sm:$0xf] %vm3144_vm7, %v3063_v55  ;;  %v3526_v56 = vrot.slane %v3524_v4, 7  ;;  %v3899_v55 = vrot.slane %v3897_v51, 4  ;;  %v3503_v4 = vrot.slane %v3501_v26, 6 }
 0x2d3   : > { %3965 = vrot.lane.b32.xlu0 %v3883_v16, %s6387_s27  ;;  %3070 = vrot.lane.b32.xlu2 %v2981_v22, %s6385_s25  ;;  %v3023_v16 = vsel %vm7797_vm4, %v3021_v57, %v3022_v3  ;;  %v3523_v58 = vrot.slane %v3521_v60, 6  ;;  %v3491_v22 = vshrl.u32 %v3208_v8, 16  ;;  %v3504_v57 = vshll.u32 %v3209_v17, 16  ;;  %v3200_v8 = vld [vmem:[#allocation2 + $0x5c] sm:$0xf] }
 0x2d4   : > { %v3414_v37 = vshll.u32 %v3200_v8, 16 }
 0x2d5   : > { %3967 = vrot.lane.b32.xlu1 %v3886_v49, %s6387_s27  ;;  %v3926_v25 = vpop.permute.xlu0 %3925  ;;  %v3539_v49 = vrot.slane %v8498_v63, 4  ;;  %v8532_v21 = vor.u32 %v3526_v56, %v3523_v58 }
 0x2d6   : > { %4030 = vst.msk [vmem:[#allocation3 + $0x10] sm:$0xf] %vm4025_vm11, %v3926_v25  ;;  %v3860_v25 = vrot.slane %v3858_v41, 4 }
 0x2d7   : > { %v3928_v23 = vpop.permute.xlu1 %3927  ;;  %v3614_v1 = vpop.permute.xlu2 %3613  ;;  %v3548_v41 = vsel %vm7974_vm2, %v3539_v49, %v8515_v62  ;;  %v3008_v49 = vsel %vm7797_vm4, %v3006_v44, %v3007_v38  ;;  %v2982_v38 = vrot.slane %v2980_v52, 4 }
 0x2d8   : > { %4031 = vst.msk [vmem:[#allocation3 + $0x14] sm:$0xf] %vm4025_vm11, %v3928_v23  ;;  %v3900_v23 = vrot.slane %v8512_v14, 7 }
 0x2da   : > { %v3901_v46 = vsel %vm6503_vm3, %v3899_v55, %v3900_v23  ;;  %v3011_v55 = vsel %vm7797_vm4, %v3009_v33, %v3010_v6  ;;  %v3902_v26 = vrot.slane %v3900_v23, 4 }
 0x2db   : > { %3623 = vrot.lane.b32.xlu0 %v3408_v12, %s6386_s26  ;;  %3621 = vrot.lane.b32.xlu2 %v3398_v24, %s6386_s26 }
 0x2dd   : > { %3949 = vrot.lane.b32.xlu1 %v3859_v39, %s6387_s27  ;;  %v3632_v42 = vpop.permute.xlu0 %3631  ;;  %v3862_v39 = vsel %vm6503_vm3, %v3860_v25, %v3861_v36 }
 0x2de   : > { %3719 = vst.msk [vmem:[#allocation3 + $0x54] sm:$0xf] %vm3697_vm10, %v3632_v42  ;;  %v3493_v42 = vrot.slane %v3491_v22, 6  ;;  %v8575_v22 = vld [vmem:[#allocation2 + $0x5c] sm:$0xf] }
 0x2df   : > { %v3061_v50 = vpop.permute.xlu1 %3060  ;;  %v6292_v29 = vld [vmem:[#allocation3 + $0x10] sm:$0xff]  ;;  %v3944_v10 = vpop.permute.xlu2 %3943 }
 0x2e0   : > { %3157 = vst.msk [vmem:[#allocation3 + $0x30] sm:$0xf] %vm3144_vm7, %v3061_v50  ;;  %6236 = vmatmul.msk.bf16.gmra.mxu0 %vm4208_vm0, %v6292_v29  ;;  %v3529_v29 = vrot.slane %v8532_v21, 4  ;;  %v8550_v31 = vor.u32 %v3496_v7, %v3493_v42  ;;  %v2983_v7 = vrot.slane %v8575_v22, 6 }
 0x2e1   : > { %3710 = vst.msk [vmem:[#allocation3 + $0x30] sm:$0xf] %vm3697_vm10, %v3614_v1  ;;  %v8539_v1 = vshrl.u32 %v4402_v2, 7 }
 0x2e2   : > { %v3538_v25 = vsel %vm7974_vm2, %v3529_v29, %v8498_v63  ;;  %v3499_v30 = vrot.slane %v8550_v31, 4  ;;  %v3411_v63 = vshrl.u32 %v3200_v8, 16  ;;  %v2984_v8 = vsel %vm7797_vm4, %v2982_v38, %v2983_v7 }
 0x2e3   : > { %3096 = vrot.lane.b32.xlu0 %v3020_v54, %s6385_s25  ;;  %3951 = vrot.lane.b32.xlu2 %v3862_v39, %s6387_s27  ;;  %v4442_v54 = vand.u32 65535, %v8539_v1  ;;  %v4443_v14 = vshrl.u32 %v8539_v1, 16  ;;  %v8589_v29 = vadd.s32 8, %v8539_v1 }
 0x2e4   : > { %v3413_v23 = vrot.slane %v3411_v63, 6 }
 0x2e5   : > { %3098 = vrot.lane.b32.xlu1 %v3023_v16, %s6385_s25  ;;  %v3958_v9 = vpop.permute.xlu0 %3957  ;;  %v3506_v16 = vrot.slane %v3504_v57, 7  ;;  %v4445_v58 = vmul.u32 14564, %v4442_v54  ;;  %v8562_v56 = vmul.u32 14564, %v4443_v14  ;;  %v4448_v39 = vmul.u32 58254, %v4443_v14  ;;  %v8605_v14 = vld [vmem:[#allocation2 + $0x80] sm:$0xf] }
 0x2e6   : > { %4046 = vst.msk [vmem:[#allocation3 + $0x50] sm:$0xf] %vm4025_vm11, %v3958_v9  ;;  %v8556_v9 = vmul.u32 58254, %v4442_v54 }
 0x2e7   : > { %v3960_v12 = vpop.permute.xlu1 %3959  ;;  %v3602_v24 = vpop.permute.xlu2 %3601  ;;  %v8573_v17 = vor.u32 %v3506_v16, %v3503_v4  ;;  %v4451_v2 = vshll.u32 %v8562_v56, 16  ;;  %v4471_v4 = vand.u32 65535, %v8589_v29  ;;  %v4472_v16 = vshrl.u32 %v8589_v29, 16 }
 0x2e8   : > { %4047 = vst.msk [vmem:[#allocation3 + $0x54] sm:$0xf] %vm4025_vm11, %v3960_v12  ;;  %v4449_v12 = vshll.u32 %v8556_v9, 16 }
 0x2e9   : > { %v3508_v48 = vsel %vm7974_vm2, %v3499_v30, %v8573_v17  ;;  %v4474_v30 = vmul.u32 14564, %v4471_v4  ;;  %v8617_v63 = vmul.u32 58254, %v4471_v4 }
 0x2ea   : > { %vm4453_vm1 = vc.u32 %v4445_v58, %v4449_v12 }
 0x2eb   : > { %3651 = vrot.lane.b32.xlu0 %v3548_v41, %s6386_s26  ;;  %3649 = vrot.lane.b32.xlu2 %v3538_v25, %s6386_s26  ;;  %v8578_v41 = vld [vmem:[#allocation2 + $0x7c] sm:$0xf]  ;;  %v4454_v44 = vsel %vm4453_vm1, 1, %v6379_v0  ;;  %v3887_v25 = vrot.slane %v3885_v40, 4  ;;  %v3489_v40 = vrot.slane %v8414_v19, 4 }
 0x2ec   : > { %v3888_v52 = vrot.slane %v8578_v41, 7 }
 0x2ed   : > { %3977 = vrot.lane.b32.xlu1 %v3901_v46, %s6387_s27  ;;  %v3616_v50 = vpop.permute.xlu0 %3615 }
 0x2ee   : > { %3711 = vst.msk [vmem:[#allocation3 + $0x34] sm:$0xf] %vm3697_vm10, %v3616_v50  ;;  %v4455_v50 = vadd.s32 %v4449_v12, %v4445_v58  ;;  %v3889_v19 = vsel %vm6503_vm3, %v3887_v25, %v3888_v52 }
 0x2ef   : > { %4039 = vst.msk [vmem:[#allocation3 + $0x34] sm:$0xf] %vm4025_vm11, %v3944_v10  ;;  %v3942_v60 = vpop.permute.xlu1 %3941  ;;  %v6300_v45 = vld [vmem:[#allocation3 + $0x50] sm:$0xff]  ;;  %v8568_v10 = vld [vmem:[#allocation2 + $0x90] sm:$0xf]  ;;  %v3083_v57 = vpop.permute.xlu2 %3082 }
 0x2f0   : > { %4038 = vst.msk [vmem:[#allocation3 + $0x30] sm:$0xf] %vm4025_vm11, %v3942_v60  ;;  %6244 = vmatmul.msk.bf16.vlgmr.msra.gmra.mxu2 %vm4208_vm0, %v6300_v45  ;;  %v3903_v42 = vrot.slane %v8568_v10, 7  ;;  %v3416_v60 = vrot.slane %v3414_v37, 7  ;;  %v4456_v45 = vadd.s32 %v4454_v44, %v4448_v39  ;;  %vm4457_vm12 = vc.u32 %v4455_v50, %v4451_v2  ;;  %v8633_v50 = vld [vmem:[#allocation2 + $0x5c] sm:$0xf] }
 0x2f1   : > { %3168 = vst.msk [vmem:[#allocation3 + $0x5c] sm:$0xf] %vm3144_vm7, %v3083_v57  ;;  %v4458_v58 = vsel %vm4457_vm12, 1, %v6379_v0  ;;  %v3891_v37 = vrot.slane %v8605_v14, 7  ;;  %v8623_v39 = vmul.u32 14564, %v4472_v16 }
 0x2f2   : > { %v4460_v12 = vadd.s32 %v4458_v58, %v4456_v45  ;;  %v8621_v41 = vor.u32 %v3416_v60, %v3413_v23 }
 0x2f3   : > { %3088 = vrot.lane.b32.xlu0 %v3008_v49, %s6385_s25  ;;  %v4450_v49 = vshrl.u32 %v8556_v9, 16  ;;  %v3890_v9 = vrot.slane %v3888_v52, 4  ;;  %v4480_v57 = vshll.u32 %v8623_v39, 16  ;;  %v3863_v52 = vrot.slane %v3861_v36, 4 }
 0x2f4   : > { %v3419_v4 = vrot.slane %v8621_v41, 4 }
 0x2f5   : > { %3090 = vrot.lane.b32.xlu1 %v3011_v55, %s6385_s25  ;;  %v3049_v46 = vpop.permute.xlu0 %3048  ;;  %v4452_v55 = vshrl.u32 %v8562_v56, 16  ;;  %v4461_v2 = vadd.s32 %v4460_v12, %v4450_v49  ;;  %v4478_v56 = vshll.u32 %v8617_v63, 16  ;;  %v3892_v23 = vsel %vm6503_vm3, %v3890_v9, %v3891_v37 }
 0x2f6   : > { %3151 = vst.msk [vmem:[#allocation3 + $0x18] sm:$0xf] %vm3144_vm7, %v3049_v46  ;;  %v8629_v46 = vadd.s32 16, %v8539_v1  ;;  %v3864_v49 = vrot.slane %v8633_v50, 7  ;;  %v3428_v9 = vsel %vm7974_vm2, %v3419_v4, %v8160_v5  ;;  %v3012_v50 = vrot.slane %v3010_v6, 4 }
 0x2f7   : > { %3704 = vst.msk [vmem:[#allocation3 + $0x18] sm:$0xf] %vm3697_vm10, %v3602_v24  ;;  %v3051_v54 = vpop.permute.xlu1 %3050  ;;  %v6296_v33 = vld [vmem:[#allocation3 + $0x30] sm:$0xff]  ;;  %v3904_v24 = vsel %vm6503_vm3, %v3902_v26, %v3903_v42  ;;  %v3634_v38 = vpop.permute.xlu2 %3633  ;;  %v4477_v26 = vmul.u32 58254, %v4472_v16  ;;  %vm4482_vm13 = vc.u32 %v4474_v30, %v4478_v56  ;;  %v3498_v16 = vsel %vm7974_vm2, %v3489_v40, %v8550_v31  ;;  %v8773_v6 = vld [vmem:[#allocation2 + $0x84] sm:$0xf] }
 0x2f8   : > { %3152 = vst.msk [vmem:[#allocation3 + $0x1c] sm:$0xf] %vm3144_vm7, %v3051_v54  ;;  %6240 = vmatmul.msk.bf16.gmra.mxu1 %vm4208_vm0, %v6296_v33  ;;  %3979 = vrot.lane.b32.xlu2 %v3904_v24, %s6387_s27  ;;  %v3214_v54 = vld [vmem:[#allocation2 + $0x94] sm:$0xf]  ;;  %v4462_v33 = vadd.s32 %v4461_v2, %v4452_v55  ;;  %v4483_v60 = vsel %vm4482_vm13, 1, %v6379_v0  ;;  %v4500_v45 = vand.u32 65535, %v8629_v46 }
 0x2f9   : > { %v4501_v24 = vshrl.u32 %v8629_v46, 16  ;;  %v4485_v25 = vadd.s32 %v4483_v60, %v4477_v26  ;;  %v3554_v58 = vshll.u32 %v3214_v54, 16  ;;  %v8658_v31 = vld [vmem:[#allocation2 + $0x94] sm:$0xf]  ;;  %v3215_v40 = vld [vmem:[#allocation2 + $0x98] sm:$0xf] }
 0x2fa   : > { %v4463_v55 = vshrl.u32 %v4462_v33, 4  ;;  %v4503_v27 = vmul.u32 14564, %v4500_v45  ;;  %v8673_v26 = vld [vmem:[#allocation2 + $0x98] sm:$0xf]  ;;  %v3564_v4 = vshll.u32 %v3215_v40, 16 }
 0x2fb   : > { %3643 = vrot.lane.b32.xlu0 %v3508_v48, %s6386_s26  ;;  %v4484_v48 = vadd.s32 %v4478_v56, %v4474_v30  ;;  %v8655_v30 = vmul.u32 58254, %v4500_v45  ;;  %v8666_v2 = vmul.u32 14564, %v4501_v24  ;;  %v3865_v56 = vsel %vm6503_vm3, %v3863_v52, %v3864_v49 }
 0x2fc   : > { %v3556_v33 = vrot.slane %v3554_v58, 7  ;;  %v4481_v52 = vshrl.u32 %v8623_v39, 16  ;;  %v3028_v58 = vrot.slane %v8673_v26, 6 }
 0x2fd   : > { %3072 = vrot.lane.b32.xlu1 %v2984_v8, %s6385_s25  ;;  %v3604_v28 = vpop.permute.xlu0 %3603  ;;  %v3551_v8 = vshrl.u32 %v3214_v54, 16  ;;  %vm4486_vm14 = vc.u32 %v4484_v48, %v4480_v57  ;;  %v4479_v57 = vshrl.u32 %v8617_v63, 16  ;;  %v4507_v5 = vshll.u32 %v8655_v30, 16 }
 0x2fe   : > { %3705 = vst.msk [vmem:[#allocation3 + $0x1c] sm:$0xf] %vm3697_vm10, %v3604_v28  ;;  %v4487_v12 = vsel %vm4486_vm14, 1, %v6379_v0  ;;  %v2985_v28 = vrot.slane %v2983_v7, 4  ;;  %v3025_v7 = vrot.slane %v8658_v31, 6  ;;  %v4464_v48 = vmul.u32 18, %v4463_v55 }
 0x2ff   : > { %v3081_v44 = vpop.permute.xlu1 %3080  ;;  %v3553_v54 = vrot.slane %v3551_v8, 6  ;;  %v4509_v60 = vshll.u32 %v8666_v2, 16  ;;  %vm4511_vm15 = vc.u32 %v4503_v27, %v4507_v5  ;;  %v3024_v63 = vrot.slane %v3022_v3, 4  ;;  %v3210_v3 = vld [vmem:[#allocation2 + $0x84] sm:$0xf] }
 0x300   : > { %3167 = vst.msk [vmem:[#allocation3 + $0x58] sm:$0xf] %vm3144_vm7, %v3081_v44  ;;  %3641 = vrot.lane.b32.xlu2 %v3498_v16, %s6386_s26  ;;  %v4489_v44 = vadd.s32 %v4487_v12, %v4485_v25  ;;  %v2987_v45 = vsel %vm7797_vm4, %v2985_v28, %v2986_v35  ;;  %v4512_v16 = vsel %vm4511_vm15, 1, %v6379_v0  ;;  %v4513_v25 = vadd.s32 %v4507_v5, %v4503_v27 }
 0x301   : > { %3720 = vst.msk [vmem:[#allocation3 + $0x58] sm:$0xf] %vm3697_vm10, %v3634_v38  ;;  %v3067_v38 = vpop.permute.xlu2 %3066  ;;  %v8691_v13 = vor.u32 %v3556_v33, %v3553_v54  ;;  %v8694_v18 = vsub.s32 %v8539_v1, %v4464_v48  ;;  %v4508_v39 = vshrl.u32 %v8655_v30, 16  ;;  %v3566_v31 = vrot.slane %v3564_v4, 7  ;;  %v8718_v48 = vld [vmem:[#allocation2 + $0x94] sm:$0xf] }
 0x302   : > { %3160 = vst.msk [vmem:[#allocation3 + $0x3c] sm:$0xf] %vm3144_vm7, %v3067_v38  ;;  %v4490_v8 = vadd.s32 %v4489_v44, %v4479_v57  ;;  %vm4515_vm6 = vc.u32 %v4513_v25, %v4509_v60  ;;  %v3409_v27 = vrot.slane %v8460_v59, 4  ;;  %v3514_v38 = vshll.u32 %v3210_v3, 16 }
 0x303   : > { %3969 = vrot.lane.b32.xlu0 %v3889_v19, %s6387_s27  ;;  %v3561_v19 = vshrl.u32 %v3215_v40, 16  ;;  %v3511_v40 = vshrl.u32 %v3210_v3, 16  ;;  %vm5483_vm8 = vcmp.ne.s32.totalorder %v8694_v18, 0  ;;  %vm5519_vm9 = vcmp.lt.s32.totalorder %v8694_v18, 0 }
 0x304   : > { %v4491_v57 = vadd.s32 %v4490_v8, %v4481_v52  ;;  %v4510_v59 = vshrl.u32 %v8666_v2, 16  ;;  %v3418_v33 = vsel %vm7974_vm2, %v3409_v27, %v8621_v41  ;;  %v5591_v2 = vadd.s32 18, %v8694_v18  ;;  %vm8733_vm1 = vmand %vm5519_vm9, %vm5483_vm8 }
 0x305   : > { %3971 = vrot.lane.b32.xlu1 %v3892_v23, %s6387_s27  ;;  %v3930_v36 = vpop.permute.xlu0 %3929  ;;  %v4506_v23 = vmul.u32 58254, %v4501_v24  ;;  %v3027_v24 = vrot.slane %v3025_v7, 4  ;;  %v3563_v35 = vrot.slane %v3561_v19, 6  ;;  %v3513_v4 = vrot.slane %v3511_v40, 6 }
 0x306   : > { %4032 = vst.msk [vmem:[#allocation3 + $0x18] sm:$0xf] %vm4025_vm11, %v3930_v36  ;;  %v4516_v36 = vsel %vm4515_vm6, 1, %v6379_v0  ;;  %v3905_v25 = vrot.slane %v3903_v42, 4 }
 0x307   : > { %v3932_v22 = vpop.permute.xlu1 %3931  ;;  %v4514_v55 = vadd.s32 %v4512_v16, %v4506_v23  ;;  %v3559_v23 = vrot.slane %v8691_v13, 4  ;;  %v8727_v60 = vor.u32 %v3566_v31, %v3563_v35  ;;  %v3516_v16 = vrot.slane %v3514_v38, 7 }
 0x308   : > { %4033 = vst.msk [vmem:[#allocation3 + $0x1c] sm:$0xf] %vm4025_vm11, %v3932_v22  ;;  %3074 = vrot.lane.b32.xlu2 %v2987_v45, %s6385_s25  ;;  %v3026_v22 = vsel %vm7797_vm4, %v3024_v63, %v3025_v7  ;;  %v3029_v7 = vsel %vm7797_vm4, %v3027_v24, %v3028_v58  ;;  %v4492_v63 = vshrl.u32 %v4491_v57, 4  ;;  %v2882_v45 = vld [vmem:[#allocation2 + $0x84] sm:$0xf]  ;;  %v3906_v24 = vrot.slane %v8718_v48, 7 }
 0x309   : > { %v3618_v28 = vpop.permute.xlu2 %3617  ;;  %v4518_v30 = vadd.s32 %v4516_v36, %v4514_v55  ;;  %v3866_v35 = vrot.slane %v3864_v49, 4  ;;  %v3568_v10 = vsel %vm7974_vm2, %v3559_v23, %v8727_v60  ;;  %v3013_v31 = vrot.slane %v2882_v45, 6  ;;  %v3217_v45 = vld [vmem:[#allocation2 + $0xa0] sm:$0x7] }
 0x30a   : > { %v4493_v27 = vmul.u32 18, %v4492_v63  ;;  %v8758_v49 = vor.u32 %v3516_v16, %v3513_v4  ;;  %v3907_v40 = vsel %vm6503_vm3, %v3905_v25, %v3906_v24  ;;  %v8767_v38 = vadd.s32 80, %v8539_v1  ;;  %v8796_v63 = vld [vmem:[#allocation2 + $0x9c] sm:$0xf] }
 0x30b   : > { %3627 = vrot.lane.b32.xlu0 %v3428_v9, %s6386_s26  ;;  %v8703_v9 = vadd.s32 24, %v8539_v1  ;;  %v4519_v54 = vadd.s32 %v4518_v30, %v4508_v39  ;;  %v5627_v39 = vsel %vm8733_vm1, %v5591_v2, %v8694_v18  ;;  %v3868_v61 = vsel %vm6503_vm3, %v3866_v35, %v3867_v11 }
 0x30c   : > { %vm5663_vm12 = vcmp.lt.s32.totalorder %v5627_v39, 16  ;;  %v3014_v53 = vsel %vm7797_vm4, %v3012_v50, %v3013_v31  ;;  %v10421_v11 = vmov 0.0   ;;  %v4732_v23 = vand.u32 65535, %v8767_v38 }
 0x30d   : > { %3953 = vrot.lane.b32.xlu1 %v3865_v56, %s6387_s27  ;;  %v3636_v12 = vpop.permute.xlu0 %3635  ;;  %v4529_v56 = vand.u32 65535, %v8703_v9  ;;  %v4530_v19 = vshrl.u32 %v8703_v9, 16  ;;  %v4520_v52 = vadd.s32 %v4519_v54, %v4510_v59  ;;  %v3216_v59 = vld [vmem:[#allocation2 + $0x9c] sm:$0xf]  ;;  %v8784_v54 = vsel %vm5663_vm12, 1.0, %v10421_v11 }
 0x30e   : > { %3721 = vst.msk [vmem:[#allocation3 + $0x5c] sm:$0xf] %vm3697_vm10, %v3636_v12  ;;  %v3571_v4 = vshrl.u32 %v3216_v59, 16  ;;  %v3574_v16 = vshll.u32 %v3216_v59, 16  ;;  %v4733_v50 = vshrl.u32 %v8767_v38, 16 }
 0x30f   : > { %v3065_v44 = vpop.permute.xlu1 %3064  ;;  %v6293_v5 = vld [vmem:[#allocation3 + $0x18] sm:$0xff]  ;;  %v8738_v8 = vmul.u32 58254, %v4529_v56  ;;  %v4532_v55 = vmul.u32 14564, %v4529_v56  ;;  %v8750_v12 = vmul.u32 14564, %v4530_v19  ;;  %v4535_v57 = vmul.u32 58254, %v4530_v19 }
 0x310   : > { %3159 = vst.msk [vmem:[#allocation3 + $0x38] sm:$0xf] %vm3144_vm7, %v3065_v44  ;;  %6237 = vmatmul.msk.bf16.gmra.mxu0 %vm4208_vm0, %v6293_v5  ;;  %3625 = vrot.lane.b32.xlu2 %v3418_v33, %s6386_s26  ;;  %v3015_v44 = vrot.slane %v3013_v31, 4  ;;  %v8777_v5 = vsub.s32 %v8589_v29, %v4493_v27  ;;  %v3519_v33 = vrot.slane %v8758_v49, 4  ;;  %v3549_v29 = vrot.slane %v8515_v62, 4 }
 0x311   : > { %3712 = vst.msk [vmem:[#allocation3 + $0x38] sm:$0xf] %vm3697_vm10, %v3618_v28  ;;  %v3948_v42 = vpop.permute.xlu2 %3947  ;;  %v4521_v28 = vshrl.u32 %v4520_v52, 4  ;;  %v4536_v18 = vshll.u32 %v8738_v8, 16  ;;  %v4538_v30 = vshll.u32 %v8750_v12, 16  ;;  %v8791_v19 = vrot.slane %v3891_v37, 4 }
 0x312   : > { %vm5484_vm15 = vcmp.ne.s32.totalorder %v8777_v5, 0  ;;  %vm5520_vm5 = vcmp.lt.s32.totalorder %v8777_v5, 0  ;;  %v5592_v14 = vadd.s32 18, %v8777_v5  ;;  %v4537_v37 = vshrl.u32 %v8738_v8, 16 }
 0x313   : > { %3100 = vrot.lane.b32.xlu0 %v3026_v22, %s6385_s25  ;;  %vm4540_vm13 = vc.u32 %v4532_v55, %v4536_v18  ;;  %v4542_v22 = vadd.s32 %v4536_v18, %v4532_v55  ;;  %v4522_v2 = vmul.u32 18, %v4521_v28  ;;  %v3017_v35 = vsel %vm7797_vm4, %v3015_v44, %v3016_v32  ;;  %v8813_v55 = vld [vmem:[#allocation2 + $0x98] sm:$0xf]  ;;  %vm8829_vm6 = vmand %vm5520_vm5, %vm5484_vm15 }
 0x314   : > { %v4541_v56 = vsel %vm4540_vm13, 1, %v6379_v0  ;;  %v8811_v39 = vsel %vm7974_vm2, %v3519_v33, %v8532_v21  ;;  %v3584_v31 = vshll.u32 %v3217_v45, 16  ;;  %v4539_v34 = vshrl.u32 %v8750_v12, 16 }
 0x315   : > { %3102 = vrot.lane.b32.xlu1 %v3029_v7, %s6385_s25  ;;  %v3962_v3 = vpop.permute.xlu0 %3961  ;;  %v3894_v7 = vrot.slane %v8773_v6, 7  ;;  %v4543_v52 = vadd.s32 %v4541_v56, %v4535_v57  ;;  %vm4544_vm14 = vc.u32 %v4542_v22, %v4538_v30  ;;  %v3558_v32 = vsel %vm7974_vm2, %v3549_v29, %v8691_v13 }
 0x316   : > { %4048 = vst.msk [vmem:[#allocation3 + $0x58] sm:$0xf] %vm4025_vm11, %v3962_v3  ;;  %v4545_v8 = vsel %vm4544_vm14, 1, %v6379_v0  ;;  %v3030_v12 = vrot.slane %v3028_v58, 4  ;;  %v3031_v28 = vrot.slane %v8796_v63, 6  ;;  %v3908_v13 = vrot.slane %v3906_v24, 4 }
 0x317   : > { %v3964_v36 = vpop.permute.xlu1 %3963  ;;  %v4547_v27 = vadd.s32 %v4545_v8, %v4543_v52  ;;  %v5628_v26 = vsel %vm8829_vm6, %v5592_v14, %v8777_v5  ;;  %v2889_v58 = vld [vmem:[#allocation2 + $0xa0] sm:$0x3]  ;;  %v3586_v30 = vrot.slane %v3584_v31, 7  ;;  %v4735_v56 = vmul.u32 14564, %v4732_v23 }
 0x318   : > { %4049 = vst.msk [vmem:[#allocation3 + $0x5c] sm:$0xf] %vm4025_vm11, %v3964_v36  ;;  %3955 = vrot.lane.b32.xlu2 %v3868_v61, %s6387_s27  ;;  %v3576_v36 = vrot.slane %v3574_v16, 7  ;;  %v3909_v61 = vrot.slane %v8813_v55, 7  ;;  %v8854_v22 = vadd.s32 32, %v8539_v1  ;;  %v8867_v29 = vmul.u32 14564, %v4733_v50 }
 0x319   : > { %v3606_v62 = vpop.permute.xlu2 %3605  ;;  %v4548_v18 = vadd.s32 %v4547_v27, %v4537_v37  ;;  %v8881_v16 = vsel %vm7797_vm4, %v3030_v12, %v3031_v28  ;;  %v3033_v52 = vrot.slane %v3031_v28, 4  ;;  %v3034_v14 = vrot.slane %v2889_v58, 6 }
 0x31a   : > { %vm8883_vm12 = vcmp.lt.s32.totalorder %v5628_v26, 16  ;;  %v3509_v8 = vrot.slane %v8573_v17, 4  ;;  %v4741_v31 = vshll.u32 %v8867_v29, 16  ;;  %v3911_v12 = vrot.slane %v3909_v61, 4 }
 0x31b   : > { %3655 = vrot.lane.b32.xlu0 %v3568_v10, %s6386_s26  ;;  %v8816_v10 = vsub.s32 %v8629_v46, %v4522_v2  ;;  %v3573_v46 = vrot.slane %v3571_v4, 6  ;;  %v4549_v44 = vadd.s32 %v4548_v18, %v4539_v34  ;;  %v3895_v4 = vsel %vm6503_vm3, %v8791_v19, %v3894_v7 }
 0x31c   : > { %v6253_v17 = vsel %vm8883_vm12, 1.0, %v10421_v11 }
 0x31d   : > { %3981 = vrot.lane.b32.xlu1 %v3907_v40, %s6387_s27  ;;  %v3620_v41 = vpop.permute.xlu0 %3619  ;;  %v8837_v40 = vmul.u32 58254, %v4732_v23  ;;  %vm5485_vm8 = vcmp.ne.s32.totalorder %v8816_v10, 0  ;;  %vm5521_vm9 = vcmp.lt.s32.totalorder %v8816_v10, 0  ;;  %v5593_v24 = vadd.s32 18, %v8816_v10 }
 0x31e   : > { %3713 = vst.msk [vmem:[#allocation3 + $0x3c] sm:$0xf] %vm3697_vm10, %v3620_v41  ;;  %v8851_v59 = vor.u32 %v3576_v36, %v3573_v46  ;;  %vm8861_vm1 = vmand %vm5521_vm9, %vm5485_vm8  ;;  %v4550_v2 = vshrl.u32 %v4549_v44, 4  ;;  %v8871_v41 = vadd.s32 88, %v8539_v1 }
 0x31f   : > { %4041 = vst.msk [vmem:[#allocation3 + $0x3c] sm:$0xf] %vm4025_vm11, %v3948_v42  ;;  %v3946_v25 = vpop.permute.xlu1 %3945  ;;  %v6301_v3 = vld [vmem:[#allocation3 + $0x58] sm:$0xff]  ;;  %v3581_v42 = vshrl.u32 %v3217_v45, 16  ;;  %v4739_v23 = vshll.u32 %v8837_v40, 16  ;;  %v5629_v19 = vsel %vm8861_vm1, %v5593_v24, %v8816_v10  ;;  %v3035_v10 = vsel %vm7797_vm4, %v3033_v52, %v3034_v14 }
 0x320   : > { %4040 = vst.msk [vmem:[#allocation3 + $0x38] sm:$0xf] %vm4025_vm11, %v3946_v25  ;;  %6245 = vmatmul.msk.bf16.gmra.mxu2 %vm4208_vm0, %v6301_v3  ;;  %3653 = vrot.lane.b32.xlu2 %v3558_v32, %s6386_s26  ;;  %v8889_v3 = vld [vmem:[#allocation2 + $0x9c] sm:$0xf]  ;;  %v3579_v55 = vrot.slane %v8851_v59, 4  ;;  %v4761_v27 = vand.u32 65535, %v8871_v41 }
 0x321   : > { %v3583_v57 = vrot.slane %v3581_v42, 6  ;;  %v3087_v33 = vpop.permute.xlu2 %3086  ;;  %v4558_v42 = vand.u32 65535, %v8854_v22  ;;  %v4745_v34 = vadd.s32 %v4739_v23, %v4735_v56  ;;  %v4559_v32 = vshrl.u32 %v8854_v22, 16 }
 0x322   : > { %3170 = vst.msk [vmem:[#allocation3 + $0x64] sm:$0xf] %vm3144_vm7, %v3087_v33  ;;  %v4762_v46 = vshrl.u32 %v8871_v41, 16  ;;  %vm8913_vm13 = vcmp.lt.s32.totalorder %v5629_v19, 16  ;;  %vm8934_vm4 = vc.u32 %v4735_v56, %v4739_v23  ;;  %v8942_v44 = vmul.u32 58254, %v4761_v27 }
 0x323   : > { %3092 = vrot.lane.b32.xlu0 %v3014_v53, %s6385_s25  ;;  %v3587_v25 = vor.u32 %v3586_v30, %v3583_v57  ;;  %v4561_v18 = vmul.u32 14564, %v4558_v42  ;;  %v8928_v26 = vmul.u32 14564, %v4559_v32  ;;  %vm8938_vm14 = vc.u32 %v4745_v34, %v4741_v31 }
 0x324   : > { %v8946_v33 = vmul.u32 14564, %v4762_v46  ;;  %v4564_v56 = vmul.u32 58254, %v4559_v32  ;;  %v3896_v52 = vrot.slane %v3894_v7, 4  ;;  %v4738_v14 = vmul.u32 58254, %v4733_v50 }
 0x325   : > { %3094 = vrot.lane.b32.xlu1 %v3017_v35, %s6385_s25  ;;  %v3053_v48 = vpop.permute.xlu0 %3052  ;;  %v4276_v53 = vpop.f32.mrf.mxu0  ;;  %v4551_v35 = vmul.u32 18, %v4550_v2  ;;  %v8924_v20 = vsel %vm7974_vm2, %v3579_v55, %v3587_v25  ;;  %v4567_v5 = vshll.u32 %v8928_v26, 16  ;;  %v4744_v25 = vsel %vm8934_vm4, 1, %v6379_v0 }
 0x326   : > { %3153 = vst.msk [vmem:[#allocation3 + $0x20] sm:$0xf] %vm3144_vm7, %v3053_v48  ;;  %v5771_v21 = vmul.f32 %v8784_v54, %v4276_v53  ;;  %v3912_v54 = vrot.slane %v8889_v3, 7  ;;  %v4764_v6 = vmul.u32 14564, %v4761_v27  ;;  %v4768_v7 = vshll.u32 %v8942_v44, 16 }
 0x327   : > { %3706 = vst.msk [vmem:[#allocation3 + $0x20] sm:$0xf] %vm3697_vm10, %v3606_v62  ;;  %v3055_v63 = vpop.permute.xlu1 %3054  ;;  %v6297_v45 = vld [vmem:[#allocation3 + $0x38] sm:$0xff]  ;;  %v3910_v62 = vsel %vm6503_vm3, %v3908_v13, %v3909_v61  ;;  %v8926_v13 = vmul.u32 58254, %v4558_v42  ;;  %v4748_v50 = vsel %vm8938_vm14, 1, %v6379_v0  ;;  %v4770_v55 = vshll.u32 %v8946_v33, 16 }
 0x328   : > { %4366 = vst [vmem:[#allocation4] sm:$0xff] %v4276_v53  ;;  %6241 = vmatmul.msk.bf16.gmra.mxu1 %vm4208_vm0, %v6297_v45  ;;  %3983 = vrot.lane.b32.xlu2 %v3910_v62, %s6387_s27  ;;  %v5857_v48 = vmul.f32 %v5771_v21, %v5771_v21  ;;  %v6254_v45 = vsel %vm8913_vm13, 1.0, %v10421_v11  ;;  %v3898_v36 = vsel %vm6503_vm3, %v3896_v52, %v3897_v51 }
 0x329   : > { %3154 = vst.msk [vmem:[#allocation3 + $0x24] sm:$0xf] %vm3144_vm7, %v3055_v63  ;;  %v3638_v58 = vpop.permute.xlu2 %3637  ;;  %vm9005_vm1 = vc.u32 %v4764_v6, %v4768_v7 }
 0x32b   : > { %3647 = vrot.lane.b32.xlu0 %v8811_v39, %s6386_s26  ;;  %v8919_v39 = vsub.s32 %v8703_v9, %v4551_v35  ;;  %v3518_v9 = vsel %vm7974_vm2, %v3509_v8, %v8758_v49  ;;  %v4565_v49 = vshll.u32 %v8926_v13, 16  ;;  %v8980_v35 = vadd.s32 40, %v8539_v1 }
 0x32c   : > { %v4566_v8 = vshrl.u32 %v8926_v13, 16 }
 0x32d   : > { %3973 = vrot.lane.b32.xlu1 %v3895_v4, %s6387_s27  ;;  %v3608_v28 = vpop.permute.xlu0 %3607  ;;  %v4278_v61 = vpop.f32.mrf.mxu0  ;;  %vm5486_vm15 = vcmp.ne.s32.totalorder %v8919_v39, 0  ;;  %vm5522_vm5 = vcmp.lt.s32.totalorder %v8919_v39, 0  ;;  %vm4569_vm6 = vc.u32 %v4561_v18, %v4565_v49  ;;  %v4571_v63 = vadd.s32 %v4565_v49, %v4561_v18 }
 0x32e   : > { %3707 = vst.msk [vmem:[#allocation3 + $0x24] sm:$0xf] %vm3697_vm10, %v3608_v28  ;;  %v5772_v24 = vmul.f32 %v6253_v17, %v4278_v61  ;;  %v5594_v4 = vadd.s32 18, %v8919_v39  ;;  %vm8966_vm8 = vmand %vm5522_vm5, %vm5486_vm15  ;;  %v4746_v28 = vadd.s32 %v4744_v25, %v4738_v14  ;;  %v4587_v15 = vand.u32 65535, %v8980_v35 }
 0x32f   : > { %4367 = vst [vmem:[#allocation4 + $0x8] sm:$0xff] %v4278_v61  ;;  %v3085_v53 = vpop.permute.xlu1 %3084  ;;  %vm4573_vm9 = vc.u32 %v4571_v63, %v4567_v5  ;;  %v4588_v57 = vshrl.u32 %v8980_v35, 16  ;;  %v9035_v14 = vadd.s32 160, %v8539_v1 }
 0x330   : > { %3169 = vst.msk [vmem:[#allocation3 + $0x60] sm:$0xf] %vm3144_vm7, %v3085_v53  ;;  %v5813_v2 = vadd.f32 %v5772_v24, %v5771_v21  ;;  %v5858_v23 = vmul.f32 %v5772_v24, %v5772_v24  ;;  %3645 = vrot.lane.b32.xlu2 %v3518_v9, %s6386_s26  ;;  %v4574_v31 = vsel %vm4573_vm9, 1, %v6379_v0  ;;  %v3913_v21 = vsel %vm6503_vm3, %v3911_v12, %v3912_v54 }
 0x331   : > { %3722 = vst.msk [vmem:[#allocation3 + $0x60] sm:$0xf] %vm3697_vm10, %v3638_v58  ;;  %v3071_v17 = vpop.permute.xlu2 %3070  ;;  %v4774_v12 = vadd.s32 %v4768_v7, %v4764_v6  ;;  %v4568_v9 = vshrl.u32 %v8928_v26, 16  ;;  %v4590_v53 = vmul.u32 14564, %v4587_v15  ;;  %v4591_v49 = vmul.u32 58254, %v4587_v15 }
 0x332   : > { %v5893_v37 = vadd.f32 %v5858_v23, %v5857_v48  ;;  %v3569_v48 = vrot.slane %v8727_v60, 4  ;;  %3162 = vst.msk [vmem:[#allocation3 + $0x44] sm:$0xf] %vm3144_vm7, %v3071_v17  ;;  %v4767_v26 = vmul.u32 58254, %v4762_v46  ;;  %v4740_v46 = vshrl.u32 %v8837_v40, 16 }
 0x333   : > { %3104 = vrot.lane.b32.xlu0 %v8881_v16, %s6385_s25  ;;  %v4570_v16 = vsel %vm4569_vm6, 1, %v6379_v0  ;;  %vm9025_vm13 = vc.u32 %v4774_v12, %v4770_v55  ;;  %v4750_v25 = vadd.s32 %v4748_v50, %v4746_v28  ;;  %v4742_v28 = vshrl.u32 %v8867_v29, 16 }
 0x334   : > { %v4572_v42 = vadd.s32 %v4570_v16, %v4564_v56  ;;  %v9016_v56 = vmul.u32 14564, %v4588_v57  ;;  %v3578_v6 = vsel %vm7974_vm2, %v3569_v48, %v8851_v59  ;;  %v3914_v12 = vrot.slane %v3912_v54, 4 }
 0x335   : > { %3106 = vrot.lane.b32.xlu1 %v3035_v10, %s6385_s25  ;;  %v3934_v19 = vpop.permute.xlu0 %3933  ;;  %v4281_v32 = vpop.f32.mrf.mxu0  ;;  %v5630_v10 = vsel %vm8966_vm8, %v5594_v4, %v8919_v39  ;;  %v4594_v4 = vshll.u32 %v4591_v49, 16 }
 0x336   : > { %v5936_v34 = vld [vmem:[#allocation4] ss:$2 sm:$0xff]  ;;  %v5972_v27 = vld [vmem:[#allocation4 + $0x1] ss:$2 sm:$0xff]  ;;  %4034 = vst.msk [vmem:[#allocation3 + $0x20] sm:$0xf] %vm4025_vm11, %v3934_v19  ;;  %v5773_v61 = vmul.f32 %v6254_v45, %v4281_v32  ;;  %v4576_v39 = vadd.s32 %v4574_v31, %v4572_v42 }
 0x337   : > { %v6007_v18 = vadd.f32 %v5972_v27, %v5936_v34  ;;  %v3936_v13 = vpop.permute.xlu1 %3935  ;;  %4368 = vst [vmem:[#allocation4 + $0x10] sm:$0xff] %v4281_v32  ;;  %vm5666_vm12 = vcmp.lt.s32.totalorder %v5630_v10, 16  ;;  %v4593_v45 = vmul.u32 58254, %v4588_v57  ;;  %v4596_v52 = vshll.u32 %v9016_v56, 16 }
 0x338   : > { %4035 = vst.msk [vmem:[#allocation3 + $0x24] sm:$0xf] %vm4025_vm11, %v3936_v13  ;;  %v5814_v51 = vadd.f32 %v5813_v2, %v5773_v61  ;;  %v5859_v30 = vmul.f32 %v5773_v61, %v5773_v61  ;;  %v4577_v24 = vadd.s32 %v4576_v39, %v4566_v8  ;;  %v4773_v2 = vsel %vm9005_vm1, 1, %v6379_v0  ;;  %3975 = vrot.lane.b32.xlu2 %v3898_v36, %s6387_s27 }
 0x339   : > { %6025 = vst [vmem:[%s8991_s9] sm:$0xff] %v6007_v18  ;;  %v6255_v23 = vsel %vm5666_vm12, 1.0, %v10421_v11  ;;  %v3622_v62 = vpop.permute.xlu2 %3621  ;;  %vm4598_vm4 = vc.u32 %v4590_v53, %v4594_v4  ;;  %v4600_v7 = vadd.s32 %v4594_v4, %v4590_v53  ;;  %v4775_v55 = vadd.s32 %v4773_v2, %v4767_v26 }
 0x33a   : > { %v5894_v5 = vadd.f32 %v5893_v37, %v5859_v30  ;;  %v4578_v63 = vadd.s32 %v4577_v24, %v4568_v9  ;;  %v4777_v8 = vsel %vm9025_vm13, 1, %v6379_v0  ;;  %v4599_v42 = vsel %vm4598_vm4, 1, %v6379_v0 }
 0x33b   : > { %3659 = vrot.lane.b32.xlu0 %v8924_v20, %s6386_s26  ;;  %v4595_v31 = vshrl.u32 %v4591_v49, 16  ;;  %v4601_v34 = vadd.s32 %v4599_v42, %v4593_v45  ;;  %vm4602_vm14 = vc.u32 %v4600_v7, %v4596_v52  ;;  %v5022_v32 = vand.u32 65535, %v9035_v14 }
 0x33c   : > { %v4579_v50 = vshrl.u32 %v4578_v63, 4  ;;  %v4603_v27 = vsel %vm4602_vm14, 1, %v6379_v0  ;;  %v4597_v17 = vshrl.u32 %v9016_v56, 16  ;;  %v4769_v18 = vshrl.u32 %v8942_v44, 16 }
 0x33d   : > { %3985 = vrot.lane.b32.xlu1 %v3913_v21, %s6387_s27  ;;  %v3640_v20 = vpop.permute.xlu0 %3639  ;;  %v4283_v37 = vpop.f32.mrf.mxu0  ;;  %v3770_v21 = vld [vmem:[#allocation2 + $0xa0] sm:$0x7]  ;;  %v4605_v10 = vadd.s32 %v4603_v27, %v4601_v34  ;;  %v9058_v13 = vadd.s32 96, %v8539_v1  ;;  %v4751_v61 = vadd.s32 %v4750_v25, %v4740_v46  ;;  %v4779_v58 = vadd.s32 %v4777_v8, %v4775_v55 }
 0x33e   : > { %3723 = vst.msk [vmem:[#allocation3 + $0x64] sm:$0xf] %vm3697_vm10, %v3640_v20  ;;  %v5774_v19 = vmul.f32 %v6255_v23, %v4283_v37  ;;  %v3915_v15 = vrot.slane %v3770_v21, 7  ;;  %v4580_v57 = vmul.u32 18, %v4579_v50  ;;  %v9064_v30 = vmul.u32 58254, %v5022_v32 }
 0x33f   : > { %v3069_v16 = vpop.permute.xlu1 %3068  ;;  %4369 = vst [vmem:[#allocation4 + $0x18] sm:$0xff] %v4283_v37  ;;  %v6294_v40 = vld [vmem:[#allocation3 + $0x20] sm:$0xff]  ;;  %v4606_v9 = vadd.s32 %v4605_v10, %v4595_v31  ;;  %v4790_v54 = vand.u32 65535, %v9058_v13  ;;  %v4752_v56 = vadd.s32 %v4751_v61, %v4742_v28  ;;  %v4780_v26 = vadd.s32 %v4779_v58, %v4769_v18 }
 0x340   : > { %3161 = vst.msk [vmem:[#allocation3 + $0x40] sm:$0xf] %vm3144_vm7, %v3069_v16  ;;  %v9046_v47 = vadd.f32 %v5814_v51, %v5774_v19  ;;  %v5860_v59 = vmul.f32 %v5774_v19, %v5774_v19  ;;  %6238 = vmatmul.msk.bf16.gmra.mxu0 %vm4208_vm0, %v6294_v40  ;;  %3657 = vrot.lane.b32.xlu2 %v3578_v6, %s6386_s26  ;;  %v5023_v51 = vshrl.u32 %v9035_v14, 16  ;;  %v5025_v23 = vmul.u32 14564, %v5022_v32 }
 0x341   : > { %3714 = vst.msk [vmem:[#allocation3 + $0x40] sm:$0xf] %vm3697_vm10, %v3622_v62  ;;  %v3952_v24 = vpop.permute.xlu2 %3951  ;;  %v4607_v53 = vadd.s32 %v4606_v9, %v4597_v17  ;;  %v3916_v60 = vsel %vm6503_vm3, %v3914_v12, %v3915_v15  ;;  %v5029_v45 = vshll.u32 %v9064_v30, 16  ;;  %v9080_v4 = vsub.s32 %v8854_v22, %v4580_v57 }
 0x342   : > { %v9053_v36 = vadd.f32 %v5894_v5, %v5860_v59  ;;  %v4771_v5 = vshrl.u32 %v8946_v33, 16  ;;  %v9076_v63 = vmul.u32 14564, %v5023_v51  ;;  %v4791_v20 = vshrl.u32 %v9058_v13, 16 }
 0x343   : > { %v4608_v2 = vshrl.u32 %v4607_v53, 4  ;;  %v9083_v46 = vmul.u32 58254, %v4790_v54  ;;  %v4753_v52 = vshrl.u32 %v4752_v56, 4  ;;  %vm9087_vm3 = vc.u32 %v5025_v23, %v5029_v45 }
 0x344   : > { %v4781_v62 = vadd.s32 %v4780_v26, %v4771_v5  ;;  %v5031_v43 = vshll.u32 %v9076_v63, 16  ;;  %v5035_v6 = vadd.s32 %v5029_v45, %v5025_v23  ;;  %vm5487_vm2 = vcmp.ne.s32.totalorder %v9080_v4, 0 }
 0x345   : > { %v3966_v39 = vpop.permute.xlu0 %3965  ;;  %v9067_v48 = vpop.f32.mrf.mxu1  ;;  %v4609_v33 = vmul.u32 18, %v4608_v2  ;;  %vm5523_vm15 = vcmp.lt.s32.totalorder %v9080_v4, 0  ;;  %v5028_v16 = vmul.u32 58254, %v5023_v51  ;;  %v9097_v19 = vadd.s32 168, %v8539_v1 }
 0x346   : > { %v5938_v29 = vld [vmem:[#allocation4 + $0x10] ss:$2 sm:$0xff]  ;;  %v5974_v44 = vld [vmem:[#allocation4 + $0x11] ss:$2 sm:$0xff]  ;;  %4050 = vst.msk [vmem:[#allocation3 + $0x60] sm:$0xf] %vm4025_vm11, %v3966_v39  ;;  %vm5037_vm5 = vc.u32 %v5035_v6, %v5031_v43  ;;  %vm9115_vm6 = vmand %vm5523_vm15, %vm5487_vm2 }
 0x347   : > { %v6008_v49 = vadd.f32 %v5974_v44, %v5938_v29  ;;  %4376 = vst [vmem:[#allocation4 + $0x50] sm:$0xff] %v9067_v48  ;;  %v3968_v3 = vpop.permute.xlu1 %3967  ;;  %v4793_v8 = vmul.u32 14564, %v4790_v54  ;;  %v9100_v42 = vmul.u32 14564, %v4791_v20  ;;  %v4797_v50 = vshll.u32 %v9083_v46, 16 }
 0x348   : > { %4051 = vst.msk [vmem:[#allocation3 + $0x64] sm:$0xf] %vm4025_vm11, %v3968_v3  ;;  %3987 = vrot.lane.b32.xlu2 %v3916_v60, %s6387_s27  ;;  %v4610_v31 = vsub.s32 %v8980_v35, %v4609_v33  ;;  %v5034_v34 = vsel %vm9087_vm3, 1, %v6379_v0  ;;  %v5595_v59 = vadd.s32 18, %v9080_v4  ;;  %v4754_v27 = vmul.u32 18, %v4753_v52 }
 0x349   : > { %6026 = vst [vmem:[%s8991_s9 + $0x8] sm:$0xff] %v6008_v49  ;;  %v3650_v7 = vpop.permute.xlu2 %3649  ;;  %v4782_v32 = vshrl.u32 %v4781_v62, 4  ;;  %v5051_v35 = vand.u32 65535, %v9097_v19  ;;  %v5036_v17 = vadd.s32 %v5034_v34, %v5028_v16  ;;  %v4799_v10 = vshll.u32 %v9100_v42, 16 }
 0x34a   : > { %vm4801_vm8 = vc.u32 %v4793_v8, %v4797_v50  ;;  %v4803_v28 = vadd.s32 %v4797_v50, %v4793_v8  ;;  %vm5488_vm9 = vcmp.ne.s32.totalorder %v4610_v31, 0  ;;  %vm5524_vm1 = vcmp.lt.s32.totalorder %v4610_v31, 0 }
 0x34b   : > { %v5038_v18 = vsel %vm5037_vm5, 1, %v6379_v0  ;;  %v9123_v61 = vadd.s32 104, %v8539_v1  ;;  %v5631_v12 = vsel %vm9115_vm6, %v5595_v59, %v9080_v4  ;;  %v5030_v9 = vshrl.u32 %v9064_v30, 16  ;;  %vm9138_vm12 = vmand %vm5524_vm1, %vm5488_vm9 }
 0x34c   : > { %v4796_v39 = vmul.u32 58254, %v4791_v20  ;;  %v5052_v15 = vshrl.u32 %v9097_v19, 16  ;;  %v5596_v51 = vadd.s32 18, %v4610_v31  ;;  %v4802_v29 = vsel %vm4801_vm8, 1, %v6379_v0 }
 0x34d   : > { %v3624_v37 = vpop.permute.xlu0 %3623  ;;  %v9092_v22 = vpop.f32.mrf.mxu1  ;;  %v9132_v44 = vmul.u32 58254, %v5051_v35  ;;  %v5040_v54 = vadd.s32 %v5038_v18, %v5036_v17  ;;  %vm4805_vm13 = vc.u32 %v4803_v28, %v4799_v10  ;;  %v9143_v56 = vsub.s32 %v8767_v38, %v4754_v27 }
 0x34e   : > { %3715 = vst.msk [vmem:[#allocation3 + $0x44] sm:$0xf] %vm3697_vm10, %v3624_v37  ;;  %v4783_v5 = vmul.u32 18, %v4782_v32  ;;  %v9147_v60 = vadd.s32 48, %v8539_v1  ;;  %vm5667_vm4 = vcmp.lt.s32.totalorder %v5631_v12, 16  ;;  %v5032_v23 = vshrl.u32 %v9076_v63, 16 }
 0x34f   : > { %4043 = vst.msk [vmem:[#allocation3 + $0x44] sm:$0xf] %vm4025_vm11, %v3952_v24  ;;  %v3950_v40 = vpop.permute.xlu1 %3949  ;;  %v6302_v55 = vld [vmem:[#allocation3 + $0x60] sm:$0xff]  ;;  %v4819_v24 = vand.u32 65535, %v9123_v61  ;;  %v4804_v45 = vadd.s32 %v4802_v29, %v4796_v39  ;;  %v5632_v4 = vsel %vm9138_vm12, %v5596_v51, %v4610_v31  ;;  %v4806_v38 = vsel %vm4805_vm13, 1, %v6379_v0 }
 0x350   : > { %4377 = vst [vmem:[#allocation4 + $0x58] sm:$0xff] %v9092_v22  ;;  %6246 = vmatmul.msk.bf16.gmra.mxu2 %vm4208_vm0, %v6302_v55  ;;  %v4820_v20 = vshrl.u32 %v9123_v61, 16  ;;  %v5041_v33 = vadd.s32 %v5040_v54, %v5030_v9  ;;  %v5054_v37 = vmul.u32 14564, %v5051_v35  ;;  %v9158_v62 = vmul.u32 14564, %v5052_v15 }
 0x351   : > { %4042 = vst.msk [vmem:[#allocation3 + $0x40] sm:$0xf] %vm4025_vm11, %v3950_v40  ;;  %v9156_v52 = vmul.u32 58254, %v4819_v24  ;;  %v5058_v43 = vshll.u32 %v9132_v44, 16  ;;  %v9162_v63 = vadd.s32 18, %v9143_v56  ;;  %v9165_v25 = vsub.s32 %v8871_v41, %v4783_v5 }
 0x352   : > { %v3980_v57 = vpop.permute.xlu2 %3979  ;;  %v6256_v6 = vsel %vm5667_vm4, 1.0, %v10421_v11  ;;  %vm9169_vm14 = vcmp.lt.s32.totalorder %v5632_v4, 16  ;;  %v4798_v55 = vshrl.u32 %v9083_v46, 16  ;;  %v4800_v8 = vshrl.u32 %v9100_v42, 16 }
 0x353   : > { %v4808_v50 = vadd.s32 %v4806_v38, %v4804_v45  ;;  %v4822_v41 = vmul.u32 14564, %v4819_v24  ;;  %v9176_v59 = vmul.u32 14564, %v4820_v20  ;;  %v4826_v27 = vshll.u32 %v9156_v52, 16 }
 0x354   : > { %v4617_v32 = vshrl.u32 %v9147_v60, 16  ;;  %v9181_v17 = vadd.s32 %v5041_v33, %v5032_v23  ;;  %v5060_v46 = vshll.u32 %v9158_v62, 16  ;;  %v5064_v42 = vadd.s32 %v5058_v43, %v5054_v37 }
 0x355   : > { %v3097_v58 = vpop.permute.xlu0 %3096  ;;  %v6257_v10 = vsel %vm9169_vm14, 1.0, %v10421_v11  ;;  %v5057_v28 = vmul.u32 58254, %v5052_v15  ;;  %vm5062_vm3 = vc.u32 %v5054_v37, %v5058_v43  ;;  %v4809_v9 = vadd.s32 %v4808_v50, %v4798_v55 }
 0x356   : > { %3175 = vst.msk [vmem:[#allocation3 + $0x78] sm:$0xf] %vm3144_vm7, %v3097_v58  ;;  %vm4830_vm2 = vc.u32 %v4822_v41, %v4826_v27  ;;  %v4832_v51 = vadd.s32 %v4826_v27, %v4822_v41  ;;  %v9192_v29 = vmul.u32 14564, %v4617_v32  ;;  %vm9196_vm15 = vc.u32 %v5064_v42, %v5060_v46 }
 0x357   : > { %v5946_v53 = vld [vmem:[#allocation4 + $0x50] ss:$2 sm:$0xff]  ;;  %v5982_v49 = vld [vmem:[#allocation4 + $0x51] ss:$2 sm:$0xff]  ;;  %3728 = vst.msk [vmem:[#allocation3 + $0x78] sm:$0xf] %vm3697_vm10, %v3650_v7  ;;  %v3099_v3 = vpop.permute.xlu1 %3098  ;;  %v4810_v4 = vadd.s32 %v4809_v9, %v4800_v8 }
 0x358   : > { %v6012_v26 = vadd.f32 %v5982_v49, %v5946_v53  ;;  %3176 = vst.msk [vmem:[#allocation3 + $0x7c] sm:$0xf] %vm3144_vm7, %v3099_v3  ;;  %v6298_v2 = vld [vmem:[#allocation3 + $0x40] sm:$0xff]  ;;  %v4616_v7 = vand.u32 65535, %v9147_v60  ;;  %v5063_v53 = vsel %vm5062_vm3, 1, %v6379_v0  ;;  %v4825_v3 = vmul.u32 58254, %v4820_v20 }
 0x359   : > { %6242 = vmatmul.msk.bf16.gmra.mxu1 %vm4208_vm0, %v6298_v2  ;;  %v4622_v30 = vmul.u32 58254, %v4617_v32  ;;  %v4625_v54 = vshll.u32 %v9192_v29, 16  ;;  %vm5493_vm5 = vcmp.ne.s32.totalorder %v9143_v56, 0  ;;  %vm5529_vm6 = vcmp.lt.s32.totalorder %v9143_v56, 0 }
 0x35a   : > { %6030 = vst [vmem:[%s8991_s9 + $0x28] sm:$0xff] %v6012_v26  ;;  %v3642_v34 = vpop.permute.xlu2 %3641  ;;  %v9188_v18 = vmul.u32 58254, %v4616_v7  ;;  %v4619_v39 = vmul.u32 14564, %v4616_v7  ;;  %v9207_v2 = vadd.s32 56, %v8539_v1  ;;  %v5065_v38 = vadd.s32 %v5063_v53, %v5057_v28  ;;  %vm9251_vm14 = vmand %vm5529_vm6, %vm5493_vm5 }
 0x35b   : > { %v5067_v20 = vsel %vm9196_vm15, 1, %v6379_v0  ;;  %vm5494_vm12 = vcmp.ne.s32.totalorder %v9165_v25, 0  ;;  %v5059_v32 = vshrl.u32 %v9132_v44, 16  ;;  %vm5530_vm13 = vcmp.lt.s32.totalorder %v9165_v25, 0 }
 0x35c   : > { %v4623_v49 = vshll.u32 %v9188_v18, 16  ;;  %v4624_v55 = vshrl.u32 %v9188_v18, 16  ;;  %v4646_v27 = vshrl.u32 %v9207_v2, 16  ;;  %v4827_v18 = vshrl.u32 %v9156_v52, 16 }
 0x35d   : > { %v3652_v16 = vpop.permute.xlu0 %3651  ;;  %v4286_v31 = vpop.f32.mrf.mxu0  ;;  %v5061_v44 = vshrl.u32 %v9158_v62, 16  ;;  %v5637_v33 = vsel %vm9251_vm14, %v9162_v63, %v9143_v56 }
 0x35e   : > { %3729 = vst.msk [vmem:[#allocation3 + $0x7c] sm:$0xf] %vm3697_vm10, %v3652_v16  ;;  %v5775_v35 = vmul.f32 %v6256_v6, %v4286_v31  ;;  %vm4627_vm8 = vc.u32 %v4619_v39, %v4623_v49  ;;  %v4629_v26 = vadd.s32 %v4623_v49, %v4619_v39  ;;  %v4645_v16 = vand.u32 65535, %v9207_v2 }
 0x35f   : > { %4057 = vst.msk [vmem:[#allocation3 + $0x7c] sm:$0xf] %vm4025_vm11, %v3980_v57  ;;  %v3978_v21 = vpop.permute.xlu1 %3977  ;;  %v4828_v57 = vshll.u32 %v9176_v59, 16  ;;  %v4628_v7 = vsel %vm4627_vm8, 1, %v6379_v0  ;;  %v9236_v28 = vmul.u32 14564, %v4646_v27  ;;  %v4651_v53 = vmul.u32 58254, %v4646_v27 }
 0x360   : > { %4056 = vst.msk [vmem:[#allocation3 + $0x78] sm:$0xf] %vm4025_vm11, %v3978_v21  ;;  %v5816_v58 = vadd.f32 %v9046_v47, %v5775_v35  ;;  %v5861_v12 = vmul.f32 %v5775_v35, %v5775_v35  ;;  %v5043_v47 = vshrl.u32 %v9181_v17, 4  ;;  %vm4631_vm1 = vc.u32 %v4629_v26, %v4625_v54 }
 0x361   : > { %4370 = vst [vmem:[#allocation4 + $0x20] sm:$0xff] %v4286_v31  ;;  %vm9213_vm9 = vc.u32 %v4832_v51, %v4828_v57  ;;  %v4630_v8 = vadd.s32 %v4628_v7, %v4622_v30  ;;  %v4632_v50 = vsel %vm4631_vm1, 1, %v6379_v0  ;;  %v5069_v21 = vadd.s32 %v5067_v20, %v5065_v38 }
 0x362   : > { %v5896_v24 = vadd.f32 %v9053_v36, %v5861_v12  ;;  %v4831_v36 = vsel %vm4830_vm2, 1, %v6379_v0  ;;  %v3075_v45 = vpop.permute.xlu2 %3074  ;;  %v4835_v41 = vsel %vm9213_vm9, 1, %v6379_v0  ;;  %v4626_v35 = vshrl.u32 %v9192_v29, 16  ;;  %vm9270_vm2 = vmand %vm5530_vm13, %vm5494_vm12 }
 0x363   : > { %v4833_v40 = vadd.s32 %v4831_v36, %v4825_v3  ;;  %3164 = vst.msk [vmem:[#allocation3 + $0x4c] sm:$0xf] %vm3144_vm7, %v3075_v45  ;;  %v4634_v17 = vadd.s32 %v4632_v50, %v4630_v8  ;;  %v4648_v42 = vmul.u32 14564, %v4645_v16  ;;  %v5044_v39 = vmul.u32 18, %v5043_v47 }
 0x364   : > { %v4811_v57 = vshrl.u32 %v4810_v4, 4  ;;  %v4654_v15 = vshll.u32 %v9236_v28, 16  ;;  %v9244_v49 = vadd.s32 176, %v8539_v1  ;;  %v5070_v52 = vadd.s32 %v5069_v21, %v5059_v32 }
 0x365   : > { %v3089_v5 = vpop.permute.xlu0 %3088  ;;  %v4288_v23 = vpop.f32.mrf.mxu0  ;;  %v4635_v12 = vadd.s32 %v4634_v17, %v4624_v55  ;;  %v4829_v30 = vshrl.u32 %v9176_v59, 16  ;;  %v4655_v63 = vshrl.u32 %v9236_v28, 16  ;;  %v9286_v27 = vadd.s32 112, %v8539_v1 }
 0x366   : > { %3171 = vst.msk [vmem:[#allocation3 + $0x68] sm:$0xf] %vm3144_vm7, %v3089_v5  ;;  %v5776_v43 = vmul.f32 %v6257_v10, %v4288_v23  ;;  %v4649_v10 = vmul.u32 58254, %v4645_v16  ;;  %v4812_v59 = vmul.u32 18, %v4811_v57  ;;  %v5080_v20 = vand.u32 65535, %v9244_v49 }
 0x367   : > { %3724 = vst.msk [vmem:[#allocation3 + $0x68] sm:$0xf] %vm3697_vm10, %v3642_v34  ;;  %v3091_v37 = vpop.permute.xlu1 %3090  ;;  %v6305_v6 = vld [vmem:[#allocation3 + $0x78] sm:$0xff]  ;;  %vm9293_vm15 = vcmp.lt.s32.totalorder %v5637_v33, 16 }
 0x368   : > { %3172 = vst.msk [vmem:[#allocation3 + $0x6c] sm:$0xf] %vm3144_vm7, %v3091_v37  ;;  %v9224_v31 = vadd.f32 %v5816_v58, %v5776_v43  ;;  %v5862_v34 = vmul.f32 %v5776_v43, %v5776_v43  ;;  %6249 = vmatmul.msk.bf16.vlgmr.msra.gmra.mxu3 %vm4208_vm0, %v6305_v6  ;;  %v4837_v58 = vadd.s32 %v4835_v41, %v4833_v40  ;;  %v4652_v51 = vshll.u32 %v4649_v10, 16 }
 0x369   : > { %4371 = vst [vmem:[#allocation4 + $0x28] sm:$0xff] %v4288_v23  ;;  %v4653_v4 = vshrl.u32 %v4649_v10, 16  ;;  %v5602_v37 = vadd.s32 18, %v9165_v25  ;;  %v5071_v43 = vadd.s32 %v5070_v52, %v5061_v44  ;;  %v9277_v40 = vsub.s32 %v9035_v14, %v5044_v39 }
 0x36a   : > { %v9234_v46 = vadd.f32 %v5896_v24, %v5862_v34  ;;  %v3626_v29 = vpop.permute.xlu2 %3625  ;;  %v4636_v24 = vadd.s32 %v4635_v12, %v4626_v35  ;;  %vm4656_vm4 = vc.u32 %v4648_v42, %v4652_v51  ;;  %v4658_v47 = vadd.s32 %v4652_v51, %v4648_v42 }
 0x36b   : > { %v4838_v36 = vadd.s32 %v4837_v58, %v4827_v18  ;;  %v4657_v45 = vsel %vm4656_vm4, 1, %v6379_v0  ;;  %v9282_v50 = vsub.s32 %v9058_v13, %v4812_v59  ;;  %v5081_v41 = vshrl.u32 %v9244_v49, 16 }
 0x36c   : > { %v4637_v23 = vshrl.u32 %v4636_v24, 4  ;;  %v4659_v38 = vadd.s32 %v4657_v45, %v4651_v53  ;;  %vm4660_vm3 = vc.u32 %v4658_v47, %v4654_v15  ;;  %v9291_v35 = vmul.u32 58254, %v5080_v20 }
 0x36d   : > { %v3644_v9 = vpop.permute.xlu0 %3643  ;;  %v4661_v6 = vsel %vm4660_vm3, 1, %v6379_v0  ;;  %v4839_v56 = vadd.s32 %v4838_v36, %v4829_v30  ;;  %v5638_v13 = vsel %vm9270_vm2, %v5602_v37, %v9165_v25  ;;  %v5072_v10 = vshrl.u32 %v5071_v43, 4 }
 0x36e   : > { %3725 = vst.msk [vmem:[#allocation3 + $0x6c] sm:$0xf] %vm3697_vm10, %v3644_v9  ;;  %v4663_v55 = vadd.s32 %v4661_v6, %v4659_v38  ;;  %v4638_v34 = vmul.u32 18, %v4637_v23  ;;  %vm5503_vm5 = vcmp.ne.s32.totalorder %v9277_v40, 0  ;;  %vm5539_vm6 = vcmp.lt.s32.totalorder %v9277_v40, 0 }
 0x36f   : > { %v3073_v3 = vpop.permute.xlu1 %3072  ;;  %v4840_v28 = vshrl.u32 %v4839_v56, 4  ;;  %vm5495_vm8 = vcmp.ne.s32.totalorder %v9282_v50, 0  ;;  %v9308_v12 = vmul.u32 14564, %v5081_v41  ;;  %v4848_v25 = vand.u32 65535, %v9286_v27  ;;  %vm9325_vm12 = vmand %vm5539_vm6, %vm5503_vm5 }
 0x370   : > { %v5940_v54 = vld [vmem:[#allocation4 + $0x20] ss:$2 sm:$0xff]  ;;  %v5976_v5 = vld [vmem:[#allocation4 + $0x21] ss:$2 sm:$0xff]  ;;  %3163 = vst.msk [vmem:[#allocation3 + $0x48] sm:$0xf] %vm3144_vm7, %v3073_v3  ;;  %v4664_v21 = vadd.s32 %v4663_v55, %v4653_v4  ;;  %v9306_v58 = vsub.s32 %v9147_v60, %v4638_v34 }
 0x371   : > { %v6009_v26 = vadd.f32 %v5976_v5, %v5940_v54  ;;  %3716 = vst.msk [vmem:[#allocation3 + $0x48] sm:$0xf] %vm3697_vm10, %v3626_v29  ;;  %vm5531_vm9 = vcmp.lt.s32.totalorder %v9282_v50, 0  ;;  %v5083_v39 = vmul.u32 14564, %v5080_v20  ;;  %v5087_v57 = vshll.u32 %v9291_v35, 16 }
 0x372   : > { %v3956_v32 = vpop.permute.xlu2 %3955  ;;  %v4665_v18 = vadd.s32 %v4664_v21, %v4655_v63  ;;  %v6262_v44 = vsel %vm9293_vm15, 1.0, %v10421_v11  ;;  %v5611_v51 = vadd.s32 18, %v9277_v40  ;;  %v5073_v29 = vmul.u32 18, %v5072_v10  ;;  %vm9335_vm13 = vmand %vm5531_vm9, %vm5495_vm8 }
 0x373   : > { %6027 = vst [vmem:[%s8991_s9 + $0x10] sm:$0xff] %v6009_v26  ;;  %v9274_v16 = vpop.f32.mrf.mxu2  ;;  %vm9317_vm1 = vcmp.lt.s32.totalorder %v5638_v13, 16  ;;  %v5603_v53 = vadd.s32 18, %v9282_v50  ;;  %v4841_v3 = vmul.u32 18, %v4840_v28  ;;  %v4849_v52 = vshrl.u32 %v9286_v27, 16 }
 0x374   : > { %4386 = vst [vmem:[#allocation4 + $0xa0] sm:$0xff] %v9274_v16  ;;  %v4666_v9 = vshrl.u32 %v4665_v18, 4  ;;  %vm5489_vm4 = vcmp.ne.s32.totalorder %v9306_v58, 0  ;;  %vm5525_vm14 = vcmp.lt.s32.totalorder %v9306_v58, 0  ;;  %v5089_v62 = vshll.u32 %v9308_v12, 16 }
 0x375   : > { %v3970_v8 = vpop.permute.xlu0 %3969  ;;  %v9289_v14 = vpop.f32.mrf.mxu1  ;;  %v9343_v54 = vmul.u32 58254, %v4848_v25  ;;  %vm9348_vm3 = vc.u32 %v5083_v39, %v5087_v57  ;;  %v5093_v23 = vadd.s32 %v5087_v57, %v5083_v39  ;;  %v9353_v45 = vadd.s32 184, %v8539_v1  ;;  %vm9384_vm2 = vmand %vm5525_vm14, %vm5489_vm4 }
 0x376   : > { %4052 = vst.msk [vmem:[#allocation3 + $0x68] sm:$0xf] %vm4025_vm11, %v3970_v8  ;;  %v4667_v26 = vmul.u32 18, %v4666_v9  ;;  %v9356_v4 = vmul.f32 %v6262_v44, %v9067_v48  ;;  %v9361_v38 = vsel %vm9317_vm1, 1.0, %v10421_v11  ;;  %v5647_v20 = vsel %vm9325_vm12, %v5611_v51, %v9277_v40 }
 0x377   : > { %4378 = vst [vmem:[#allocation4 + $0x60] sm:$0xff] %v9289_v14  ;;  %v3972_v42 = vpop.permute.xlu1 %3971  ;;  %v9367_v33 = vsub.s32 %v9097_v19, %v5073_v29  ;;  %v5639_v48 = vsel %vm9335_vm13, %v5603_v53, %v9282_v50  ;;  %v9375_v6 = vsub.s32 %v9123_v61, %v4841_v3  ;;  %v5597_v7 = vadd.s32 18, %v9306_v58 }
 0x378   : > { %4053 = vst.msk [vmem:[#allocation3 + $0x6c] sm:$0xf] %vm4025_vm11, %v3972_v42  ;;  %v5086_v56 = vmul.u32 58254, %v5081_v41  ;;  %v5092_v61 = vsel %vm9348_vm3, 1, %v6379_v0  ;;  %v4851_v40 = vmul.u32 14564, %v4848_v25  ;;  %v9393_v63 = vmul.u32 14564, %v4849_v52 }
 0x379   : > { %v4855_v55 = vshll.u32 %v9343_v54, 16  ;;  %vm9396_vm15 = vcmp.lt.s32.totalorder %v5647_v20, 16  ;;  %v9401_v50 = vsub.s32 %v9207_v2, %v4667_v26  ;;  %vm5095_vm5 = vc.u32 %v5093_v23, %v5089_v62 }
 0x37a   : > { %v3654_v36 = vpop.permute.xlu2 %3653  ;;  %v5109_v34 = vand.u32 65535, %v9353_v45  ;;  %vm9404_vm6 = vcmp.lt.s32.totalorder %v5639_v48, 16  ;;  %vm5504_vm8 = vcmp.ne.s32.totalorder %v9367_v33, 0  ;;  %vm5540_vm9 = vcmp.lt.s32.totalorder %v9367_v33, 0 }
 0x37b   : > { %v9330_v15 = vpop.f32.mrf.mxu2  ;;  %vm5496_vm1 = vcmp.ne.s32.totalorder %v9375_v6, 0  ;;  %vm5532_vm12 = vcmp.lt.s32.totalorder %v9375_v6, 0  ;;  %v5633_v2 = vsel %vm9384_vm2, %v5597_v7, %v9306_v58  ;;  %v5094_v13 = vadd.s32 %v5092_v61, %v5086_v56  ;;  %vm9445_vm3 = vmand %vm5540_vm9, %vm5504_vm8 }
 0x37c   : > { %4387 = vst [vmem:[#allocation4 + $0xa8] sm:$0xff] %v9330_v15  ;;  %v5096_v28 = vsel %vm5095_vm5, 1, %v6379_v0  ;;  %v4857_v18 = vshll.u32 %v9393_v63, 16  ;;  %vm9420_vm13 = vc.u32 %v4851_v40, %v4855_v55  ;;  %vm5490_vm4 = vcmp.ne.s32.totalorder %v9401_v50, 0  ;;  %vm9491_vm9 = vmand %vm5532_vm12, %vm5496_vm1 }
 0x37d   : > { %v3628_v47 = vpop.permute.xlu0 %3627  ;;  %v9346_v5 = vpop.f32.mrf.mxu1  ;;  %vm5526_vm14 = vcmp.lt.s32.totalorder %v9401_v50, 0  ;;  %v4861_v39 = vadd.s32 %v4855_v55, %v4851_v40  ;;  %v9427_v58 = vmul.u32 58254, %v5109_v34  ;;  %v9431_v57 = vmul.f32 %v9356_v4, %v9356_v4 }
 0x37e   : > { %3717 = vst.msk [vmem:[#allocation3 + $0x4c] sm:$0xf] %vm3697_vm10, %v3628_v47  ;;  %v9435_v60 = vadd.s32 120, %v8539_v1  ;;  %v5088_v3 = vshrl.u32 %v9291_v35, 16  ;;  %v5098_v30 = vadd.s32 %v5096_v28, %v5094_v13  ;;  %v4854_v47 = vmul.u32 58254, %v4849_v52  ;;  %vm9468_vm5 = vmand %vm5526_vm14, %vm5490_vm4 }
 0x37f   : > { %4045 = vst.msk [vmem:[#allocation3 + $0x4c] sm:$0xf] %vm4025_vm11, %v3956_v32  ;;  %v3954_v37 = vpop.permute.xlu1 %3953  ;;  %v6303_v43 = vld [vmem:[#allocation3 + $0x68] sm:$0xff]  ;;  %v9411_v32 = vadd.s32 18, %v9367_v33  ;;  %vm9450_vm2 = vcmp.lt.s32.totalorder %v5633_v2, 16  ;;  %v5598_v35 = vadd.s32 18, %v9401_v50  ;;  %vm4863_vm8 = vc.u32 %v4861_v39, %v4857_v18 }
 0x380   : > { %4379 = vst [vmem:[#allocation4 + $0x68] sm:$0xff] %v9346_v5  ;;  %6247 = vmatmul.msk.bf16.gmra.mxu2 %vm4208_vm0, %v6303_v43  ;;  %v4860_v52 = vsel %vm9420_vm13, 1, %v6379_v0  ;;  %v9460_v59 = vadd.s32 18, %v9375_v6  ;;  %v5112_v20 = vmul.u32 14564, %v5109_v34  ;;  %v9475_v43 = vmul.f32 %v9361_v38, %v9092_v22 }
 0x381   : > { %4044 = vst.msk [vmem:[#allocation3 + $0x48] sm:$0xf] %vm4025_vm11, %v3954_v37  ;;  %v5116_v37 = vshll.u32 %v9427_v58, 16  ;;  %v9480_v48 = vsel %vm9396_vm15, 1.0, %v10421_v11  ;;  %v9485_v7 = vsel %vm9404_vm6, 1.0, %v10421_v11  ;;  %v4877_v22 = vand.u32 65535, %v9435_v60 }
 0x382   : > { %v3984_v9 = vpop.permute.xlu2 %3983  ;;  %v6258_v38 = vsel %vm9450_vm2, 1.0, %v10421_v11  ;;  %v5090_v19 = vshrl.u32 %v9308_v12, 16  ;;  %v5099_v61 = vadd.s32 %v5098_v30, %v5088_v3  ;;  %v4862_v40 = vadd.s32 %v4860_v52, %v4854_v47 }
 0x383   : > { %v5956_v21 = vld [vmem:[#allocation4 + $0xa0] ss:$2 sm:$0xff]  ;;  %v5992_v17 = vld [vmem:[#allocation4 + $0xa1] ss:$2 sm:$0xff]  ;;  %v5648_v55 = vsel %vm9445_vm3, %v9411_v32, %v9367_v33  ;;  %v5634_v34 = vsel %vm9468_vm5, %v5598_v35, %v9401_v50  ;;  %v4864_v41 = vsel %vm4863_vm8, 1, %v6379_v0  ;;  %v5640_v12 = vsel %vm9491_vm9, %v9460_v59, %v9375_v6 }
 0x384   : > { %v6017_v42 = vadd.f32 %v5992_v17, %v5956_v21  ;;  %v4856_v13 = vshrl.u32 %v9343_v54, 16  ;;  %vm9517_vm15 = vc.u32 %v5112_v20, %v5116_v37  ;;  %v4878_v18 = vshrl.u32 %v9435_v60, 16 }
 0x385   : > { %v3101_v10 = vpop.permute.xlu0 %3100  ;;  %v9523_v25 = vmul.u32 58254, %v4877_v22  ;;  %v9526_v39 = vadd.s32 64, %v8539_v1  ;;  %vm9529_vm6 = vcmp.lt.s32.totalorder %v5634_v34, 16  ;;  %v5122_v3 = vadd.s32 %v5116_v37, %v5112_v20 }
 0x386   : > { %3177 = vst.msk [vmem:[#allocation3 + $0x80] sm:$0xf] %vm3144_vm7, %v3101_v10  ;;  %v5121_v47 = vsel %vm9517_vm15, 1, %v6379_v0  ;;  %v4880_v26 = vmul.u32 14564, %v4877_v22  ;;  %v9545_v23 = vmul.u32 14564, %v4878_v18  ;;  %v6259_v20 = vsel %vm9529_vm6, 1.0, %v10421_v11 }
 0x387   : > { %6035 = vst [vmem:[%s8991_s9 + $0x50] sm:$0xff] %v6017_v42  ;;  %v5948_v44 = vld [vmem:[#allocation4 + $0x60] ss:$2 sm:$0xff]  ;;  %v5984_v51 = vld [vmem:[#allocation4 + $0x61] ss:$2 sm:$0xff]  ;;  %v3103_v29 = vpop.permute.xlu1 %3102  ;;  %v4858_v42 = vshrl.u32 %v9393_v63, 16 }
 0x388   : > { %v6013_v24 = vadd.f32 %v5984_v51, %v5948_v44  ;;  %3730 = vst.msk [vmem:[#allocation3 + $0x80] sm:$0xf] %vm3697_vm10, %v3654_v36  ;;  %v6299_v53 = vld [vmem:[#allocation3 + $0x48] sm:$0xff]  ;;  %v5110_v36 = vshrl.u32 %v9353_v45, 16  ;;  %v9533_v44 = vadd.s32 %v5099_v61, %v5090_v19  ;;  %v4866_v51 = vadd.s32 %v4864_v41, %v4862_v40 }
 0x389   : > { %3178 = vst.msk [vmem:[#allocation3 + $0x84] sm:$0xf] %vm3144_vm7, %v3103_v29  ;;  %6243 = vmatmul.msk.bf16.gmra.mxu1 %vm4208_vm0, %v6299_v53  ;;  %v4674_v35 = vand.u32 65535, %v9526_v39  ;;  %vm9595_vm2 = vcmp.lt.s32.totalorder %v5648_v55, 16  ;;  %vm9607_vm5 = vcmp.lt.s32.totalorder %v5640_v12, 16  ;;  %v9619_v59 = vadd.s32 192, %v8539_v1 }
 0x38a   : > { %6031 = vst [vmem:[%s8991_s9 + $0x30] sm:$0xff] %v6013_v24  ;;  %v9508_v21 = vmul.u32 14564, %v5110_v36  ;;  %v3646_v2 = vpop.permute.xlu2 %3645  ;;  %v5115_v30 = vmul.u32 58254, %v5110_v36  ;;  %v5101_v36 = vshrl.u32 %v9533_v44, 4  ;;  %v4867_v41 = vadd.s32 %v4866_v51, %v4856_v13 }
 0x38b   : > { %v9553_v37 = vmul.u32 58254, %v4674_v35 }
 0x38c   : > { %v5118_v53 = vshll.u32 %v9508_v21, 16  ;;  %v5123_v10 = vadd.s32 %v5121_v47, %v5115_v30 }
 0x38d   : > { %v3656_v8 = vpop.permute.xlu0 %3655  ;;  %v4291_v17 = vpop.f32.mrf.mxu0 }
 0x38e   : > { %3731 = vst.msk [vmem:[#allocation3 + $0x84] sm:$0xf] %vm3697_vm10, %v3656_v8  ;;  %v5777_v28 = vmul.f32 %v6258_v38, %v4291_v17  ;;  %v4884_v38 = vshll.u32 %v9523_v25, 16  ;;  %vm9556_vm1 = vc.u32 %v5122_v3, %v5118_v53  ;;  %v4886_v53 = vshll.u32 %v9545_v23, 16 }
 0x38f   : > { %4059 = vst.msk [vmem:[#allocation3 + $0x84] sm:$0xf] %vm4025_vm11, %v3984_v9  ;;  %v3982_v50 = vpop.permute.xlu1 %3981  ;;  %v9536_v9 = vadd.s32 72, %v8539_v1  ;;  %v5125_v13 = vsel %vm9556_vm1, 1, %v6379_v0 }
 0x390   : > { %4058 = vst.msk [vmem:[#allocation3 + $0x80] sm:$0xf] %vm4025_vm11, %v3982_v50  ;;  %v5818_v29 = vadd.f32 %v9224_v31, %v5777_v28  ;;  %v5863_v24 = vmul.f32 %v5777_v28, %v5777_v28  ;;  %v4675_v31 = vshrl.u32 %v9526_v39, 16  ;;  %v4681_v50 = vshll.u32 %v9553_v37, 16 }
 0x391   : > { %4372 = vst [vmem:[#allocation4 + $0x30] sm:$0xff] %v4291_v17  ;;  %v4703_v22 = vand.u32 65535, %v9536_v9  ;;  %v4704_v8 = vshrl.u32 %v9536_v9, 16  ;;  %v5117_v17 = vshrl.u32 %v9427_v58, 16  ;;  %v4890_v3 = vadd.s32 %v4884_v38, %v4880_v26 }
 0x392   : > { %v5898_v52 = vadd.f32 %v9234_v46, %v5863_v24  ;;  %v4677_v46 = vmul.u32 14564, %v4674_v35  ;;  %v9560_v40 = vmul.u32 14564, %v4675_v31  ;;  %v4680_v35 = vmul.u32 58254, %v4675_v31  ;;  %v3976_v11 = vpop.permute.xlu2 %3975 }
 0x393   : > { %vm4888_vm12 = vc.u32 %v4880_v26, %v4884_v38  ;;  %v9573_v51 = vmul.u32 58254, %v4703_v22  ;;  %v9578_v47 = vmul.u32 14564, %v4704_v8  ;;  %v4883_v31 = vmul.u32 58254, %v4878_v18 }
 0x394   : > { %v4683_v58 = vshll.u32 %v9560_v40, 16  ;;  %vm4685_vm13 = vc.u32 %v4677_v46, %v4681_v50  ;;  %v4706_v61 = vmul.u32 14564, %v4703_v22  ;;  %v4889_v26 = vsel %vm4888_vm12, 1, %v6379_v0 }
 0x395   : > { %v3093_v19 = vpop.permute.xlu0 %3092  ;;  %v4293_v34 = vpop.f32.mrf.mxu0  ;;  %vm9584_vm4 = vc.u32 %v4890_v3, %v4886_v53  ;;  %v5119_v22 = vshrl.u32 %v9508_v21, 16  ;;  %v4684_v33 = vshrl.u32 %v9560_v40, 16  ;;  %v4868_v40 = vadd.s32 %v4867_v41, %v4858_v42 }
 0x396   : > { %3173 = vst.msk [vmem:[#allocation3 + $0x70] sm:$0xf] %vm3144_vm7, %v3093_v19  ;;  %v5778_v54 = vmul.f32 %v6259_v20, %v4293_v34  ;;  %v4686_v20 = vsel %vm4685_vm13, 1, %v6379_v0  ;;  %v4687_v19 = vadd.s32 %v4681_v50, %v4677_v46  ;;  %v5127_v46 = vadd.s32 %v5125_v13, %v5123_v10 }
 0x397   : > { %3726 = vst.msk [vmem:[#allocation3 + $0x70] sm:$0xf] %vm3697_vm10, %v3646_v2  ;;  %v3095_v28 = vpop.permute.xlu1 %3094  ;;  %v6306_v24 = vld [vmem:[#allocation3 + $0x80] sm:$0xff]  ;;  %v4893_v56 = vsel %vm9584_vm4, 1, %v6379_v0  ;;  %v4885_v13 = vshrl.u32 %v9523_v25, 16  ;;  %v4713_v42 = vshrl.u32 %v9578_v47, 16 }
 0x398   : > { %3174 = vst.msk [vmem:[#allocation3 + $0x74] sm:$0xf] %vm3144_vm7, %v3095_v28  ;;  %v9575_v2 = vadd.f32 %v5818_v29, %v5778_v54  ;;  %v5864_v30 = vmul.f32 %v5778_v54, %v5778_v54  ;;  %6250 = vmatmul.msk.bf16.gmra.mxu3 %vm4208_vm0, %v6306_v24  ;;  %v4688_v29 = vadd.s32 %v4686_v20, %v4680_v35  ;;  %v4709_v54 = vmul.u32 58254, %v4704_v8 }
 0x399   : > { %4373 = vst [vmem:[#allocation4 + $0x38] sm:$0xff] %v4293_v34  ;;  %v4682_v34 = vshrl.u32 %v9553_v37, 16  ;;  %vm4689_vm14 = vc.u32 %v4687_v19, %v4683_v58  ;;  %v4710_v24 = vshll.u32 %v9573_v51, 16  ;;  %v4712_v37 = vshll.u32 %v9578_v47, 16 }
 0x39a   : > { %v9581_v28 = vadd.f32 %v5898_v52, %v5864_v30  ;;  %v4690_v50 = vsel %vm4689_vm14, 1, %v6379_v0  ;;  %v4891_v8 = vadd.s32 %v4889_v26, %v4883_v31  ;;  %v5128_v35 = vadd.s32 %v5127_v46, %v5117_v17  ;;  %v3658_v30 = vpop.permute.xlu2 %3657 }
 0x39b   : > { %v4692_v32 = vadd.s32 %v4690_v50, %v4688_v29  ;;  %vm4714_vm3 = vc.u32 %v4706_v61, %v4710_v24  ;;  %v4716_v55 = vadd.s32 %v4710_v24, %v4706_v61  ;;  %v4711_v58 = vshrl.u32 %v9573_v51, 16 }
 0x39c   : > { %v4715_v6 = vsel %vm4714_vm3, 1, %v6379_v0  ;;  %v5138_v19 = vand.u32 65535, %v9619_v59  ;;  %v5139_v61 = vshrl.u32 %v9619_v59, 16  ;;  %v4895_v63 = vadd.s32 %v4893_v56, %v4891_v8 }
 0x39d   : > { %v3648_v52 = vpop.permute.xlu0 %3647  ;;  %v4717_v53 = vadd.s32 %v4715_v6, %v4709_v54  ;;  %vm4718_vm8 = vc.u32 %v4716_v55, %v4712_v37  ;;  %v9632_v26 = vadd.s32 128, %v8539_v1  ;;  %v5102_v25 = vmul.u32 18, %v5101_v36 }
 0x39e   : > { %3727 = vst.msk [vmem:[#allocation3 + $0x74] sm:$0xf] %vm3697_vm10, %v3648_v52  ;;  %v4719_v20 = vsel %vm4718_vm8, 1, %v6379_v0  ;;  %v4869_v51 = vshrl.u32 %v4868_v40, 4  ;;  %v9638_v29 = vmul.u32 58254, %v5138_v19  ;;  %v5141_v24 = vmul.u32 14564, %v5138_v19 }
 0x39f   : > { %4055 = vst.msk [vmem:[#allocation3 + $0x74] sm:$0xf] %vm4025_vm11, %v3976_v11  ;;  %v3974_v21 = vpop.permute.xlu1 %3973  ;;  %v4693_v11 = vadd.s32 %v4692_v32, %v4682_v34  ;;  %v4721_v41 = vadd.s32 %v4719_v20, %v4717_v53  ;;  %v9642_v34 = vmul.f32 %v9480_v48, %v9274_v16  ;;  %v9645_v52 = vmul.u32 14564, %v5139_v61 }
 0x3a0   : > { %v5942_v12 = vld [vmem:[#allocation4 + $0x30] ss:$2 sm:$0xff]  ;;  %v5978_v10 = vld [vmem:[#allocation4 + $0x31] ss:$2 sm:$0xff]  ;;  %4054 = vst.msk [vmem:[#allocation3 + $0x70] sm:$0xf] %vm4025_vm11, %v3974_v21  ;;  %v5129_v44 = vadd.s32 %v5128_v35, %v5119_v22  ;;  %v9657_v8 = vmul.f32 %v9475_v43, %v9475_v43  ;;  %v9665_v56 = vsub.s32 %v9244_v49, %v5102_v25 }
 0x3a1   : > { %v6010_v3 = vadd.f32 %v5978_v10, %v5942_v12  ;;  %v4694_v31 = vadd.s32 %v4693_v11, %v4684_v33  ;;  %v4722_v54 = vadd.s32 %v4721_v41, %v4711_v58  ;;  %v4887_v36 = vshrl.u32 %v9545_v23, 16 }
 0x3a2   : > { %v5145_v37 = vshll.u32 %v9638_v29, 16  ;;  %v4896_v33 = vadd.s32 %v4895_v63, %v4885_v13  ;;  %v4906_v55 = vand.u32 65535, %v9632_v26  ;;  %v4907_v21 = vshrl.u32 %v9632_v26, 16 }
 0x3a3   : > { %6028 = vst [vmem:[%s8991_s9 + $0x18] sm:$0xff] %v6010_v3  ;;  %v9634_v17 = vpop.f32.mrf.mxu2  ;;  %v4695_v38 = vshrl.u32 %v4694_v31, 4  ;;  %v4723_v32 = vadd.s32 %v4722_v54, %v4713_v42  ;;  %v10579_v22 = vmov 0.0   ;;  %v4870_v6 = vmul.u32 18, %v4869_v51  ;;  %v3988_v31 = vpop.permute.xlu2 %3987 }
 0x3a4   : > { %4388 = vst [vmem:[#allocation4 + $0xb0] sm:$0xff] %v9634_v17  ;;  %v9662_v23 = vsel %vm9595_vm2, 1.0, %v10579_v22  ;;  %v9671_v12 = vsel %vm9607_vm5, 1.0, %v10579_v22  ;;  %v5147_v18 = vshll.u32 %v9645_v52, 16  ;;  %v5151_v40 = vadd.s32 %v5145_v37, %v5141_v24 }
 0x3a5   : > { %v3105_v47 = vpop.permute.xlu0 %3104  ;;  %v9648_v46 = vpop.f32.mrf.mxu1  ;;  %v4696_v50 = vmul.u32 18, %v4695_v38  ;;  %v4724_v10 = vshrl.u32 %v4723_v32, 4  ;;  %v9678_v49 = vmul.f32 %v9642_v34, %v9642_v34  ;;  %v9682_v11 = vmul.f32 %v9485_v7, %v9289_v14  ;;  %5811 = vst [vmem:[%s9861_s17] sm:$0xff] %v10579_v22 }
 0x3a6   : > { %3179 = vst.msk [vmem:[#allocation3 + $0x88] sm:$0xf] %vm3144_vm7, %v3105_v47  ;;  %vm5149_vm9 = vc.u32 %v5141_v24, %v5145_v37  ;;  %v5130_v53 = vshrl.u32 %v5129_v44, 4  ;;  %v4897_v3 = vadd.s32 %v4896_v33, %v4887_v36  ;;  %v9687_v35 = vmul.u32 58254, %v4906_v55 }
 0x3a7   : > { %3732 = vst.msk [vmem:[#allocation3 + $0x88] sm:$0xf] %vm3697_vm10, %v3658_v30  ;;  %v3107_v16 = vpop.permute.xlu1 %3106  ;;  %v6304_v48 = vld [vmem:[#allocation3 + $0x70] sm:$0xff]  ;;  %v9685_v62 = vsub.s32 %v9526_v39, %v4696_v50  ;;  %v9689_v13 = vmul.u32 14564, %v4907_v21  ;;  %v9693_v58 = vsub.s32 %v9286_v27, %v4870_v6  ;;  %v5144_v14 = vmul.u32 58254, %v5139_v61 }
 0x3a8   : > { %4380 = vst [vmem:[#allocation4 + $0x70] sm:$0xff] %v9648_v46  ;;  %6248 = vmatmul.msk.bf16.gmra.mxu2 %vm4208_vm0, %v6304_v48  ;;  %v4909_v7 = vmul.u32 14564, %v4906_v55  ;;  %v4725_v20 = vmul.u32 18, %v4724_v10  ;;  %v5150_v19 = vsel %vm5149_vm9, 1, %v6379_v0  ;;  %vm9699_vm15 = vc.u32 %v5151_v40, %v5147_v18 }
 0x3a9   : > { %3180 = vst.msk [vmem:[#allocation3 + $0x8c] sm:$0xf] %vm3144_vm7, %v3107_v16  ;;  %vm5505_vm7 = vcmp.ne.s32.totalorder %v9665_v56, 0  ;;  %v9704_v42 = vadd.s32 200, %v8539_v1  ;;  %vm5491_vm6 = vcmp.ne.s32.totalorder %v9685_v62, 0  ;;  %vm5527_vm1 = vcmp.lt.s32.totalorder %v9685_v62, 0 }
 0x3aa   : > { %v4912_v61 = vmul.u32 58254, %v4907_v21  ;;  %v4913_v41 = vshll.u32 %v9687_v35, 16  ;;  %vm5541_vm12 = vcmp.lt.s32.totalorder %v9665_v56, 0  ;;  %v5131_v25 = vmul.u32 18, %v5130_v53  ;;  %vm9725_vm13 = vmand %vm5527_vm1, %vm5491_vm6 }
 0x3ab   : > { %v9695_v30 = vpop.f32.mrf.mxu2  ;;  %v4898_v51 = vshrl.u32 %v4897_v3, 4  ;;  %v4915_v47 = vshll.u32 %v9689_v13, 16  ;;  %v5599_v54 = vadd.s32 18, %v9685_v62  ;;  %v5152_v24 = vadd.s32 %v5150_v19, %v5144_v14  ;;  %vm9745_vm2 = vmand %vm5541_vm12, %vm5505_vm7 }
 0x3ac   : > { %4389 = vst [vmem:[#allocation4 + $0xb8] sm:$0xff] %v9695_v30  ;;  %v5154_v44 = vsel %vm9699_vm15, 1, %v6379_v0  ;;  %v9730_v50 = vsub.s32 %v9536_v9, %v4725_v20  ;;  %v4919_v16 = vadd.s32 %v4913_v41, %v4909_v7  ;;  %v5167_v48 = vand.u32 65535, %v9704_v42 }
 0x3ad   : > { %v3660_v39 = vpop.permute.xlu0 %3659  ;;  %v9707_v27 = vpop.f32.mrf.mxu1  ;;  %v5613_v33 = vadd.s32 18, %v9665_v56  ;;  %vm5533_vm4 = vcmp.lt.s32.totalorder %v9693_v58, 0  ;;  %v5605_v55 = vadd.s32 18, %v9693_v58  ;;  %v9739_v21 = vsub.s32 %v9353_v45, %v5131_v25 }
 0x3ae   : > { %3733 = vst.msk [vmem:[#allocation3 + $0x8c] sm:$0xf] %vm3697_vm10, %v3660_v39  ;;  %vm4917_vm10 = vc.u32 %v4909_v7, %v4913_v41  ;;  %v4899_v6 = vmul.u32 18, %v4898_v51  ;;  %vm4921_vm14 = vc.u32 %v4919_v16, %v4915_v47  ;;  %v5635_v40 = vsel %vm9725_vm13, %v5599_v54, %v9685_v62 }
 0x3af   : > { %4061 = vst.msk [vmem:[#allocation3 + $0x8c] sm:$0xf] %vm4025_vm11, %v3988_v31  ;;  %v3986_v38 = vpop.permute.xlu1 %3985  ;;  %v4918_v37 = vsel %vm4917_vm10, 1, %v6379_v0  ;;  %v5146_v45 = vshrl.u32 %v9638_v29, 16  ;;  %v5156_v53 = vadd.s32 %v5154_v44, %v5152_v24  ;;  %v4914_v3 = vshrl.u32 %v9687_v35, 16 }
 0x3b0   : > { %4381 = vst [vmem:[#allocation4 + $0x78] sm:$0xff] %v9707_v27  ;;  %v4920_v32 = vadd.s32 %v4918_v37, %v4912_v61  ;;  %vm5492_vm3 = vcmp.ne.s32.totalorder %v9730_v50, 0  ;;  %v4922_v7 = vsel %vm4921_vm14, 1, %v6379_v0  ;;  %v9760_v39 = vmul.u32 58254, %v5167_v48 }
 0x3b1   : > { %4060 = vst.msk [vmem:[#allocation3 + $0x88] sm:$0xf] %vm4025_vm11, %v3986_v38  ;;  %vm5497_vm11 = vcmp.ne.s32.totalorder %v9693_v58, 0  ;;  %vm5528_vm8 = vcmp.lt.s32.totalorder %v9730_v50, 0  ;;  %v4916_v62 = vshrl.u32 %v9689_v13, 16  ;;  %v5168_v29 = vshrl.u32 %v9704_v42, 16 }
 0x3b2   : > { %vm9754_vm5 = vmand %vm5533_vm4, %vm5497_vm11  ;;  %v4924_v20 = vadd.s32 %v4922_v7, %v4920_v32  ;;  %v9767_v35 = vmul.f32 %v9662_v23, %v9330_v15  ;;  %v9771_v19 = vmul.f32 %v9671_v12, %v9346_v5  ;;  %v5649_v63 = vsel %vm9745_vm2, %v5613_v33, %v9665_v56 }
 0x3b3   : > { %v5958_v10 = vld [vmem:[#allocation4 + $0xb0] ss:$2 sm:$0xff]  ;;  %v5994_v18 = vld [vmem:[#allocation4 + $0xb1] ss:$2 sm:$0xff]  ;;  %v9778_v61 = vsub.s32 %v9435_v60, %v4899_v6  ;;  %v5641_v15 = vsel %vm9754_vm5, %v5605_v55, %v9693_v58  ;;  %v5600_v5 = vadd.s32 18, %v9730_v50  ;;  %vm5506_vm9 = vcmp.ne.s32.totalorder %v9739_v21, 0  ;;  %vm9793_vm15 = vmand %vm5528_vm8, %vm5492_vm3 }
 0x3b4   : > { %v6018_v14 = vadd.f32 %v5994_v18, %v5958_v10  ;;  %v4925_v12 = vadd.s32 %v4924_v20, %v4914_v3  ;;  %vm9785_vm7 = vcmp.lt.s32.totalorder %v5635_v40, 16  ;;  %v5170_v58 = vmul.u32 14564, %v5167_v48 }
 0x3b5   : > { %v5174_v51 = vshll.u32 %v9760_v39, 16  ;;  %v9799_v38 = vadd.s32 136, %v8539_v1  ;;  %v5148_v47 = vshrl.u32 %v9645_v52, 16  ;;  %v5157_v54 = vadd.s32 %v5156_v53, %v5146_v45 }
 0x3b6   : > { %6036 = vst [vmem:[%s8991_s9 + $0x58] sm:$0xff] %v6018_v14  ;;  %v4926_v24 = vadd.s32 %v4925_v12, %v4916_v62  ;;  %v9804_v44 = vmul.u32 14564, %v5168_v29  ;;  %vm9806_vm6 = vcmp.lt.s32.totalorder %v5649_v63, 16  ;;  %vm5542_vm1 = vcmp.lt.s32.totalorder %v9739_v21, 0 }
 0x3b7   : > { %v5950_v13 = vld [vmem:[#allocation4 + $0x70] ss:$2 sm:$0xff]  ;;  %v5986_v41 = vld [vmem:[#allocation4 + $0x71] ss:$2 sm:$0xff]  ;;  %vm5498_vm12 = vcmp.ne.s32.totalorder %v9778_v61, 0  ;;  %v4935_v37 = vand.u32 65535, %v9799_v38  ;;  %v5636_v33 = vsel %vm9793_vm15, %v5600_v5, %v9730_v50  ;;  %vm9825_vm13 = vc.u32 %v5170_v58, %v5174_v51  ;;  %vm9853_vm3 = vmand %vm5542_vm1, %vm5506_vm9 }
 0x3b8   : > { %v6014_v23 = vadd.f32 %v5986_v41, %v5950_v13  ;;  %v6307_v25 = vld [vmem:[#allocation3 + $0x88] sm:$0xff]  ;;  %v4936_v16 = vshrl.u32 %v9799_v38, 16  ;;  %vm9814_vm10 = vcmp.lt.s32.totalorder %v5641_v15, 16  ;;  %v6260_v52 = vsel %vm9785_vm7, 1.0, %v10579_v22 }
 0x3b9   : > { %6251 = vmatmul.msk.bf16.gmra.mxu3 %vm4208_vm0, %v6307_v25  ;;  %vm5534_vm0 = vcmp.lt.s32.totalorder %v9778_v61, 0  ;;  %v4927_v32 = vshrl.u32 %v4926_v24, 4  ;;  %v4938_v6 = vmul.u32 14564, %v4935_v37  ;;  %v4939_v9 = vmul.u32 58254, %v4935_v37 }
 0x3ba   : > { %6032 = vst [vmem:[%s8991_s9 + $0x38] sm:$0xff] %v6014_v23  ;;  %v4940_v10 = vmul.u32 14564, %v4936_v16  ;;  %v5606_v18 = vadd.s32 18, %v9778_v61  ;;  %v5158_v45 = vadd.s32 %v5157_v54, %v5148_v47  ;;  %v5176_v53 = vshll.u32 %v9804_v44, 16  ;;  %vm9833_vm11 = vmand %vm5534_vm0, %vm5498_vm12 }
 0x3bb   : > { %v5180_v3 = vadd.s32 %v5174_v51, %v5170_v58  ;;  %vm5672_vm4 = vcmp.lt.s32.totalorder %v5636_v33, 16  ;;  %v4942_v14 = vshll.u32 %v4939_v9, 16  ;;  %v4928_v62 = vmul.u32 18, %v4927_v32 }
 0x3bc   : > { %v4944_v7 = vshll.u32 %v4940_v10, 16  ;;  %v5173_v20 = vmul.u32 58254, %v5168_v29  ;;  %v5179_v63 = vsel %vm9825_vm13, 1, %v6379_v0  ;;  %v4941_v13 = vmul.u32 58254, %v4936_v16 }
 0x3bd   : > { %v4296_v40 = vpop.f32.mrf.mxu0  ;;  %vm4946_vm14 = vc.u32 %v4938_v6, %v4942_v14  ;;  %v4948_v23 = vadd.s32 %v4942_v14, %v4938_v6  ;;  %v5614_v25 = vadd.s32 18, %v9739_v21  ;;  %v5642_v5 = vsel %vm9833_vm11, %v5606_v18, %v9778_v61 }
 0x3be   : > { %4374 = vst [vmem:[#allocation4 + $0x40] sm:$0xff] %v4296_v40  ;;  %v5779_v50 = vmul.f32 %v6260_v52, %v4296_v40  ;;  %v6261_v12 = vsel %vm5672_vm4, 1.0, %v10579_v22  ;;  %vm5182_vm2 = vc.u32 %v5180_v3, %v5176_v53  ;;  %v5159_v56 = vshrl.u32 %v5158_v45, 4 }
 0x3bf   : > { %v4947_v60 = vsel %vm4946_vm14, 1, %v6379_v0  ;;  %vm4950_vm5 = vc.u32 %v4948_v23, %v4944_v7  ;;  %v5181_v58 = vadd.s32 %v5179_v63, %v5173_v20  ;;  %v4943_v61 = vshrl.u32 %v4939_v9, 16 }
 0x3c0   : > { %v5820_v41 = vadd.f32 %v9575_v2, %v5779_v50  ;;  %v5865_v15 = vmul.f32 %v5779_v50, %v5779_v50  ;;  %v4949_v51 = vadd.s32 %v4947_v60, %v4941_v13  ;;  %v4951_v47 = vsel %vm4950_vm5, 1, %v6379_v0 }
 0x3c1   : > { %v9867_v54 = vmul.f32 %v9767_v35, %v9767_v35  ;;  %v4929_v24 = vsub.s32 %v9632_v26, %v4928_v62  ;;  %v5183_v37 = vsel %vm5182_vm2, 1, %v6379_v0  ;;  %v5870_v16 = vmul.f32 %v9771_v19, %v9771_v19 }
 0x3c2   : > { %v5900_v29 = vadd.f32 %v9581_v28, %v5865_v15  ;;  %v5869_v28 = vmul.f32 %v9682_v11, %v9682_v11  ;;  %v6274_v52 = vsel %vm9806_vm6, 1.0, %v10579_v22  ;;  %v4945_v32 = vshrl.u32 %v4940_v10, 16 }
 0x3c3   : > { %v4953_v55 = vadd.s32 %v4951_v47, %v4949_v51  ;;  %v6266_v6 = vsel %vm9814_vm10, 1.0, %v10579_v22  ;;  %v5650_v26 = vsel %vm9853_vm3, %v5614_v25, %v9739_v21  ;;  %vm5678_vm8 = vcmp.lt.s32.totalorder %v5642_v5, 16 }
 0x3c4   : > { %v5160_v18 = vmul.u32 18, %v5159_v56  ;;  %v5175_v40 = vshrl.u32 %v9760_v39, 16  ;;  %v5185_v45 = vadd.s32 %v5183_v37, %v5181_v58  ;;  %vm5499_vm9 = vcmp.ne.s32.totalorder %v4929_v24, 0 }
 0x3c5   : > { %v4298_v33 = vpop.f32.mrf.mxu0  ;;  %v4954_v36 = vadd.s32 %v4953_v55, %v4943_v61  ;;  %vm5535_vm7 = vcmp.lt.s32.totalorder %v4929_v24, 0  ;;  %v5785_v10 = vmul.f32 %v6266_v6, %v9648_v46  ;;  %vm9886_vm15 = vcmp.lt.s32.totalorder %v5650_v26, 16 }
 0x3c6   : > { %4375 = vst [vmem:[#allocation4 + $0x48] sm:$0xff] %v4298_v33  ;;  %v5780_v9 = vmul.f32 %v6261_v12, %v4298_v33  ;;  %v9891_v21 = vadd.s32 240, %v8539_v1  ;;  %v6267_v50 = vsel %vm5678_vm8, 1.0, %v10579_v22  ;;  %v5607_v7 = vadd.s32 18, %v4929_v24  ;;  %vm9898_vm6 = vmand %vm5535_vm7, %vm5499_vm9 }
 0x3c7   : > { %v4955_v31 = vadd.s32 %v4954_v36, %v4945_v32  ;;  %v9896_v62 = vsub.s32 %v9619_v59, %v5160_v18  ;;  %v5177_v46 = vshrl.u32 %v9804_v44, 16  ;;  %v5186_v63 = vadd.s32 %v5185_v45, %v5175_v40 }
 0x3c8   : > { %v5821_v53 = vadd.f32 %v5820_v41, %v5780_v9  ;;  %v5866_v3 = vmul.f32 %v5780_v9, %v5780_v9  ;;  %v9904_v41 = vmul.f32 %v6274_v52, %v9634_v17  ;;  %v9909_v23 = vadd.s32 248, %v8539_v1 }
 0x3c9   : > { %v4956_v13 = vshrl.u32 %v4955_v31, 4  ;;  %v5871_v59 = vmul.f32 %v5785_v10, %v5785_v10  ;;  %v5786_v25 = vmul.f32 %v6267_v50, %v9707_v27  ;;  %v5312_v44 = vand.u32 65535, %v9891_v21 }
 0x3ca   : > { %v5822_v39 = vadd.f32 %v5821_v53, %v9356_v4  ;;  %v5901_v14 = vadd.f32 %v5900_v29, %v5866_v3  ;;  %vm5507_vm1 = vcmp.ne.s32.totalorder %v9896_v62, 0  ;;  %vm5543_vm12 = vcmp.lt.s32.totalorder %v9896_v62, 0 }
 0x3cb   : > { %v4957_v29 = vmul.u32 18, %v4956_v13  ;;  %v9922_v58 = vadd.s32 18, %v9896_v62  ;;  %v5313_v51 = vshrl.u32 %v9891_v21, 16  ;;  %vm9931_vm11 = vmand %vm5543_vm12, %vm5507_vm1  ;;  %v9935_v37 = vmul.u32 58254, %v5312_v44 }
 0x3cc   : > { %v5823_v15 = vadd.f32 %v5822_v39, %v9475_v43  ;;  %v5902_v4 = vadd.f32 %v5901_v14, %v9431_v57  ;;  %v5643_v57 = vsel %vm9898_vm6, %v5607_v7, %v4929_v24  ;;  %v5187_v43 = vadd.s32 %v5186_v63, %v5177_v46 }
 0x3cd   : > { %v5944_v5 = vld [vmem:[#allocation4 + $0x40] ss:$2 sm:$0xff]  ;;  %v5980_v12 = vld [vmem:[#allocation4 + $0x41] ss:$2 sm:$0xff]  ;;  %v4958_v27 = vsub.s32 %v9799_v38, %v4957_v29  ;;  %vm9926_vm10 = vcmp.lt.s32.totalorder %v5643_v57, 16  ;;  %v5872_v52 = vmul.f32 %v5786_v25, %v5786_v25  ;;  %v5342_v6 = vshrl.u32 %v9909_v23, 16 }
 0x3ce   : > { %v5824_v56 = vadd.f32 %v5823_v15, %v9682_v11  ;;  %v5903_v17 = vadd.f32 %v5902_v4, %v9657_v8  ;;  %v6011_v60 = vadd.f32 %v5980_v12, %v5944_v5  ;;  %v5341_v8 = vand.u32 65535, %v9909_v23 }
 0x3cf   : > { %vm5500_vm0 = vcmp.ne.s32.totalorder %v4958_v27, 0  ;;  %vm5536_vm13 = vcmp.lt.s32.totalorder %v4958_v27, 0  ;;  %v5608_v24 = vadd.s32 18, %v4958_v27  ;;  %v5188_v32 = vshrl.u32 %v5187_v43, 4 }
 0x3d0   : > { %v5904_v2 = vadd.f32 %v5903_v17, %v5869_v28  ;;  %6029 = vst [vmem:[%s8991_s9 + $0x20] sm:$0xff] %v6011_v60  ;;  %v5825_v11 = vadd.f32 %v5824_v56, %v9771_v19  ;;  %v9940_v19 = vsel %vm9886_vm15, 1.0, %v10579_v22  ;;  %vm9944_vm4 = vmand %vm5536_vm13, %vm5500_vm0  ;;  %v9953_v18 = vmul.u32 58254, %v5341_v8 }
 0x3d1   : > { %v9957_v40 = vmul.f32 %v9904_v41, %v9904_v41  ;;  %v5651_v45 = vsel %vm9931_vm11, %v9922_v58, %v9896_v62  ;;  %v5315_v36 = vmul.u32 14564, %v5312_v44  ;;  %v9963_v53 = vmul.u32 14564, %v5313_v51 }
 0x3d2   : > { %v5826_v38 = vadd.f32 %v5825_v11, %v5785_v10  ;;  %v5905_v28 = vadd.f32 %v5904_v2, %v5870_v16  ;;  %v6268_v16 = vsel %vm9926_vm10, 1.0, %v10579_v22  ;;  %v5644_v48 = vsel %vm9944_vm4, %v5608_v24, %v4958_v27 }
 0x3d3   : > { %v9942_v33 = vpop.f32.mrf.mxu2  ;;  %v5319_v31 = vshll.u32 %v9935_v37, 16  ;;  %v9969_v50 = vadd.s32 208, %v8539_v1  ;;  %v9971_v14 = vmul.u32 18, %v5188_v32  ;;  %v5344_v7 = vmul.u32 14564, %v5341_v8 }
 0x3d4   : > { %4390 = vst [vmem:[#allocation4 + $0xc0] sm:$0xff] %v9942_v33  ;;  %v5827_v26 = vadd.f32 %v5826_v38, %v5786_v25  ;;  %v5906_v9 = vadd.f32 %v5905_v28, %v5871_v59  ;;  %v9973_v20 = vmul.u32 14564, %v5342_v6  ;;  %v5348_v46 = vshll.u32 %v9953_v18, 16 }
 0x3d5   : > { %v5196_v63 = vand.u32 65535, %v9969_v50  ;;  %v5197_v13 = vshrl.u32 %v9969_v50, 16  ;;  %v9979_v15 = vadd.s32 144, %v8539_v1  ;;  %vm5680_vm14 = vcmp.lt.s32.totalorder %v5644_v48, 16 }
 0x3d6   : > { %v4316_v3 = vpop.f32.mrf.mxu1  ;;  %v5907_v10 = vadd.f32 %v5906_v9, %v5872_v52  ;;  %v5321_v25 = vshll.u32 %v9963_v53, 16  ;;  %vm5323_vm2 = vc.u32 %v5315_v36, %v5319_v31  ;;  %v5325_v5 = vadd.s32 %v5319_v31, %v5315_v36 }
 0x3d7   : > { %4382 = vst [vmem:[#allocation4 + $0x80] sm:$0xff] %v4316_v3  ;;  %v5787_v39 = vmul.f32 %v6268_v16, %v4316_v3  ;;  %v5199_v12 = vmul.u32 14564, %v5196_v63  ;;  %v9982_v29 = vmul.u32 58254, %v5196_v63  ;;  %v5318_v17 = vmul.u32 58254, %v5313_v51 }
 0x3d8   : > { %v5350_v60 = vshll.u32 %v9973_v20, 16  ;;  %v9987_v57 = vmul.u32 14564, %v5197_v13  ;;  %v6269_v43 = vsel %vm5680_vm14, 1.0, %v10579_v22  ;;  %v5354_v27 = vadd.s32 %v5348_v46, %v5344_v7 }
 0x3d9   : > { %v5828_v4 = vadd.f32 %v5827_v26, %v5787_v39  ;;  %v5873_v59 = vmul.f32 %v5787_v39, %v5787_v39  ;;  %v5203_v2 = vshll.u32 %v9982_v29, 16  ;;  %v4964_v11 = vand.u32 65535, %v9979_v15 }
 0x3da   : > { %v5320_v8 = vshrl.u32 %v9935_v37, 16  ;;  %v5324_v61 = vsel %vm5323_vm2, 1, %v6379_v0  ;;  %vm5352_vm5 = vc.u32 %v5344_v7, %v5348_v46  ;;  %v5205_v51 = vshll.u32 %v9987_v57, 16 }
 0x3db   : > { %v5908_v44 = vadd.f32 %v5907_v10, %v5873_v59  ;;  %v9984_v56 = vpop.f32.mrf.mxu2  ;;  %vm9996_vm3 = vc.u32 %v5325_v5, %v5321_v25  ;;  %v5347_v24 = vmul.u32 58254, %v5342_v6  ;;  %v5202_v52 = vmul.u32 58254, %v5197_v13 }
 0x3dc   : > { %4391 = vst [vmem:[#allocation4 + $0xc8] sm:$0xff] %v9984_v56  ;;  %vm5207_vm8 = vc.u32 %v5199_v12, %v5203_v2  ;;  %v5209_v16 = vadd.s32 %v5203_v2, %v5199_v12  ;;  %v4965_v26 = vshrl.u32 %v9979_v15, 16  ;;  %v5353_v9 = vsel %vm5352_vm5, 1, %v6379_v0 }
 0x3dd   : > { %v5208_v55 = vsel %vm5207_vm8, 1, %v6379_v0  ;;  %vm10003_vm9 = vc.u32 %v5354_v27, %v5350_v60  ;;  %v4967_v3 = vmul.u32 14564, %v4964_v11  ;;  %v4968_v10 = vmul.u32 58254, %v4964_v11 }
 0x3de   : > { %v4318_v38 = vpop.f32.mrf.mxu1  ;;  %vm5211_vm7 = vc.u32 %v5209_v16, %v5205_v51  ;;  %v4969_v31 = vmul.u32 14564, %v4965_v26  ;;  %v5326_v39 = vadd.s32 %v5324_v61, %v5318_v17  ;;  %v5210_v7 = vadd.s32 %v5208_v55, %v5202_v52 }
 0x3df   : > { %4383 = vst [vmem:[#allocation4 + $0x88] sm:$0xff] %v4318_v38  ;;  %v5788_v32 = vmul.f32 %v6269_v43, %v4318_v38  ;;  %v4970_v46 = vmul.u32 58254, %v4965_v26  ;;  %v4971_v63 = vshll.u32 %v4968_v10, 16  ;;  %v5328_v5 = vsel %vm9996_vm3, 1, %v6379_v0 }
 0x3e0   : > { %v5355_v12 = vadd.s32 %v5353_v9, %v5347_v24  ;;  %v5357_v17 = vsel %vm10003_vm9, 1, %v6379_v0  ;;  %v4973_v43 = vshll.u32 %v4969_v31, 16  ;;  %v5322_v27 = vshrl.u32 %v9963_v53, 16 }
 0x3e1   : > { %v10007_v48 = vadd.f32 %v5828_v4, %v5788_v32  ;;  %v5874_v6 = vmul.f32 %v5788_v32, %v5788_v32  ;;  %v5212_v4 = vsel %vm5211_vm7, 1, %v6379_v0  ;;  %vm4975_vm15 = vc.u32 %v4967_v3, %v4971_v63 }
 0x3e2   : > { %v4976_v2 = vsel %vm4975_vm15, 1, %v6379_v0  ;;  %v10021_v11 = vadd.s32 216, %v8539_v1  ;;  %v10025_v61 = vsub.s32 %v9704_v42, %v9971_v14  ;;  %v5204_v28 = vshrl.u32 %v9982_v29, 16 }
 0x3e3   : > { %v5960_v13 = vld [vmem:[#allocation4 + $0xc0] ss:$2 sm:$0xff]  ;;  %v5996_v59 = vld [vmem:[#allocation4 + $0xc1] ss:$2 sm:$0xff]  ;;  %v10009_v25 = vadd.f32 %v5908_v44, %v5874_v6  ;;  %v4977_v44 = vadd.s32 %v4971_v63, %v4967_v3  ;;  %v5214_v24 = vadd.s32 %v5212_v4, %v5210_v7  ;;  %v4978_v52 = vadd.s32 %v4976_v2, %v4970_v46 }
 0x3e4   : > { %v6019_v60 = vadd.f32 %v5996_v59, %v5960_v13  ;;  %v5330_v53 = vadd.s32 %v5328_v5, %v5326_v39  ;;  %v5349_v55 = vshrl.u32 %v9953_v18, 16  ;;  %v5359_v16 = vadd.s32 %v5357_v17, %v5355_v12 }
 0x3e5   : > { %vm10035_vm6 = vcmp.lt.s32.totalorder %v5651_v45, 16  ;;  %v4972_v14 = vshrl.u32 %v4968_v10, 16  ;;  %vm4979_vm1 = vc.u32 %v4977_v44, %v4973_v43  ;;  %v5225_v29 = vand.u32 65535, %v10021_v11 }
 0x3e6   : > { %6037 = vst [vmem:[%s8991_s9 + $0x60] sm:$0xff] %v6019_v60  ;;  %v5952_v51 = vld [vmem:[#allocation4 + $0x80] ss:$2 sm:$0xff]  ;;  %v5988_v38 = vld [vmem:[#allocation4 + $0x81] ss:$2 sm:$0xff]  ;;  %v5226_v26 = vshrl.u32 %v10021_v11, 16  ;;  %v5215_v62 = vadd.s32 %v5214_v24, %v5204_v28  ;;  %v5331_v10 = vadd.s32 %v5330_v53, %v5320_v8  ;;  %v5360_v7 = vadd.s32 %v5359_v16, %v5349_v55 }
 0x3e7   : > { %v6015_v32 = vadd.f32 %v5988_v38, %v5952_v51  ;;  %v5206_v9 = vshrl.u32 %v9987_v57, 16  ;;  %v4974_v18 = vshrl.u32 %v4969_v31, 16  ;;  %v4980_v36 = vsel %vm4979_vm1, 1, %v6379_v0 }
 0x3e8   : > { %v10045_v47 = vadd.s32 152, %v8539_v1  ;;  %v4982_v58 = vadd.s32 %v4980_v36, %v4978_v52  ;;  %v5228_v45 = vmul.u32 14564, %v5225_v29  ;;  %v5229_v3 = vmul.u32 58254, %v5225_v29 }
 0x3e9   : > { %6033 = vst [vmem:[%s8991_s9 + $0x40] sm:$0xff] %v6015_v32  ;;  %v5351_v39 = vshrl.u32 %v9973_v20, 16  ;;  %v5230_v46 = vmul.u32 14564, %v5226_v26  ;;  %vm5508_vm12 = vcmp.ne.s32.totalorder %v10025_v61, 0  ;;  %v5231_v31 = vmul.u32 58254, %v5226_v26 }
 0x3ea   : > { %v4983_v57 = vadd.s32 %v4982_v58, %v4972_v14  ;;  %v5232_v63 = vshll.u32 %v5229_v3, 16  ;;  %vm5544_vm10 = vcmp.lt.s32.totalorder %v10025_v61, 0  ;;  %v5616_v13 = vadd.s32 18, %v10025_v61 }
 0x3eb   : > { %v10047_v6 = vpop.f32.mrf.mxu3  ;;  %v5234_v59 = vshll.u32 %v5230_v46, 16  ;;  %v4993_v5 = vand.u32 65535, %v10045_v47  ;;  %v5216_v37 = vadd.s32 %v5215_v62, %v5206_v9  ;;  %v5332_v12 = vadd.s32 %v5331_v10, %v5322_v27  ;;  %vm10063_vm13 = vmand %vm5544_vm10, %vm5508_vm12 }
 0x3ec   : > { %4396 = vst [vmem:[#allocation4 + $0xf0] sm:$0xff] %v10047_v6  ;;  %v4984_v8 = vadd.s32 %v4983_v57, %v4974_v18  ;;  %vm5236_vm0 = vc.u32 %v5228_v45, %v5232_v63  ;;  %v5238_v20 = vadd.s32 %v5232_v63, %v5228_v45  ;;  %v5361_v4 = vadd.s32 %v5360_v7, %v5351_v39 }
 0x3ed   : > { %v5237_v60 = vsel %vm5236_vm0, 1, %v6379_v0  ;;  %v10059_v17 = vadd.s32 256, %v8539_v1  ;;  %v4994_v51 = vshrl.u32 %v10045_v47, 16  ;;  %v5233_v38 = vshrl.u32 %v5229_v3, 16 }
 0x3ee   : > { %v4985_v2 = vshrl.u32 %v4984_v8, 4  ;;  %v5239_v44 = vadd.s32 %v5237_v60, %v5231_v31  ;;  %vm5240_vm11 = vc.u32 %v5238_v20, %v5234_v59  ;;  %v4996_v28 = vmul.u32 14564, %v4993_v5 }
 0x3ef   : > { %v5241_v27 = vsel %vm5240_vm11, 1, %v6379_v0  ;;  %v4997_v24 = vmul.u32 58254, %v4993_v5  ;;  %v5217_v52 = vshrl.u32 %v5216_v37, 4  ;;  %v4998_v55 = vmul.u32 14564, %v4994_v51 }
 0x3f0   : > { %v4986_v32 = vmul.u32 18, %v4985_v2  ;;  %v5243_v53 = vadd.s32 %v5241_v27, %v5239_v44  ;;  %v10071_v16 = vmul.f32 %v9940_v19, %v9695_v30  ;;  %v10076_v14 = vsel %vm10035_vm6, 1.0, %v10579_v22 }
 0x3f1   : > { %v5652_v29 = vsel %vm10063_vm13, %v5616_v13, %v10025_v61  ;;  %v5000_v9 = vshll.u32 %v4997_v24, 16  ;;  %v5235_v36 = vshrl.u32 %v5230_v46, 16  ;;  %v4999_v62 = vmul.u32 58254, %v4994_v51 }
 0x3f2   : > { %v4987_v18 = vsub.s32 %v9979_v15, %v4986_v32  ;;  %v5002_v30 = vshll.u32 %v4998_v55, 16  ;;  %v5244_v19 = vadd.s32 %v5243_v53, %v5233_v38  ;;  %v5370_v42 = vand.u32 65535, %v10059_v17 }
 0x3f3   : > { %v10081_v26 = vpop.f32.mrf.mxu3  ;;  %vm5004_vm4 = vc.u32 %v4996_v28, %v5000_v9  ;;  %v5006_v58 = vadd.s32 %v5000_v9, %v4996_v28  ;;  %v5333_v45 = vshrl.u32 %v5332_v12, 4  ;;  %v5362_v3 = vshrl.u32 %v5361_v4, 4 }
 0x3f4   : > { %4397 = vst [vmem:[#allocation4 + $0xf8] sm:$0xff] %v10081_v26  ;;  %v5218_v10 = vmul.u32 18, %v5217_v52  ;;  %vm5501_vm14 = vcmp.ne.s32.totalorder %v4987_v18, 0  ;;  %vm10086_vm2 = vcmp.lt.s32.totalorder %v5652_v29, 16  ;;  %vm5537_vm5 = vcmp.lt.s32.totalorder %v4987_v18, 0 }
 0x3f5   : > { %v5005_v39 = vsel %vm5004_vm4, 1, %v6379_v0  ;;  %vm5008_vm3 = vc.u32 %v5006_v58, %v5002_v30  ;;  %v5371_v15 = vshrl.u32 %v10059_v17, 16  ;;  %v5609_v7 = vadd.s32 18, %v4987_v18  ;;  %vm10098_vm8 = vmand %vm5537_vm5, %vm5501_vm14 }
 0x3f6   : > { %v5001_v46 = vshrl.u32 %v4997_v24, 16  ;;  %v5007_v57 = vadd.s32 %v5005_v39, %v4999_v62  ;;  %v5009_v31 = vsel %vm5008_vm3, 1, %v6379_v0  ;;  %v5245_v63 = vadd.s32 %v5244_v19, %v5235_v36 }
 0x3f7   : > { %v5373_v13 = vmul.u32 14564, %v5370_v42  ;;  %v10093_v59 = vmul.u32 58254, %v5370_v42  ;;  %v10095_v5 = vmul.u32 14564, %v5371_v15  ;;  %v5334_v37 = vmul.u32 18, %v5333_v45 }
 0x3f8   : > { %v5003_v20 = vshrl.u32 %v4998_v55, 16  ;;  %v5011_v12 = vadd.s32 %v5009_v31, %v5007_v57  ;;  %v10103_v4 = vadd.s32 264, %v8539_v1  ;;  %v10107_v60 = vmul.f32 %v10071_v16, %v10071_v16 }
 0x3f9   : > { %v10110_v44 = vsub.s32 %v9969_v50, %v5218_v10  ;;  %v5376_v51 = vmul.u32 58254, %v5371_v15  ;;  %v5377_v38 = vshll.u32 %v10093_v59, 16  ;;  %v5363_v27 = vmul.u32 18, %v5362_v3 }
 0x3fa   : > { %v5012_v24 = vadd.s32 %v5011_v12, %v5001_v46  ;;  %v5379_v52 = vshll.u32 %v10095_v5, 16  ;;  %v5645_v32 = vsel %vm10098_vm8, %v5609_v7, %v4987_v18  ;;  %v5246_v53 = vshrl.u32 %v5245_v63, 4 }
 0x3fb   : > { %v5966_v43 = vld [vmem:[#allocation4 + $0xf0] ss:$2 sm:$0xff]  ;;  %v6002_v2 = vld [vmem:[#allocation4 + $0xf1] ss:$2 sm:$0xff]  ;;  %vm5381_vm9 = vc.u32 %v5373_v13, %v5377_v38  ;;  %v5383_v55 = vadd.s32 %v5377_v38, %v5373_v13  ;;  %v5399_v50 = vand.u32 65535, %v10103_v4  ;;  %v5400_v36 = vshrl.u32 %v10103_v4, 16 }
 0x3fc   : > { %v6022_v28 = vadd.f32 %v6002_v2, %v5966_v43  ;;  %v5013_v29 = vadd.s32 %v5012_v24, %v5003_v20  ;;  %v5382_v9 = vsel %vm5381_vm9, 1, %v6379_v0  ;;  %vm5509_vm7 = vcmp.ne.s32.totalorder %v10110_v44, 0 }
 0x3fd   : > { %vm5545_vm15 = vcmp.lt.s32.totalorder %v10110_v44, 0  ;;  %v5617_v62 = vadd.s32 18, %v10110_v44  ;;  %v5384_v30 = vadd.s32 %v5382_v9, %v5376_v51  ;;  %vm5385_vm6 = vc.u32 %v5383_v55, %v5379_v52 }
 0x3fe   : > { %6040 = vst [vmem:[%s8991_s9 + $0x78] sm:$0xff] %v6022_v28  ;;  %v5014_v19 = vshrl.u32 %v5013_v29, 4  ;;  %v5402_v18 = vmul.u32 14564, %v5399_v50  ;;  %v10123_v58 = vmul.u32 58254, %v5399_v50  ;;  %vm5681_vm1 = vcmp.lt.s32.totalorder %v5645_v32, 16  ;;  %vm10135_vm12 = vmand %vm5545_vm15, %vm5509_vm7 }
 0x3ff   : > { %v5247_v42 = vmul.u32 18, %v5246_v53  ;;  %v5386_v45 = vsel %vm5385_vm6, 1, %v6379_v0  ;;  %v10126_v3 = vmul.u32 14564, %v5400_v36  ;;  %v10130_v10 = vmul.f32 %v10076_v14, %v9942_v33 }
 0x400   : > { %v6277_v39 = vsel %vm10086_vm2, 1.0, %v10579_v22  ;;  %v5015_v7 = vmul.u32 18, %v5014_v19  ;;  %v5406_v46 = vshll.u32 %v10123_v58, 16  ;;  %v10141_v57 = vsub.s32 %v9891_v21, %v5334_v37 }
 0x401   : > { %v10144_v31 = vsub.s32 %v9909_v23, %v5363_v27  ;;  %v5378_v33 = vshrl.u32 %v10093_v59, 16  ;;  %v5388_v14 = vadd.s32 %v5386_v45, %v5384_v30  ;;  %v6270_v61 = vsel %vm5681_vm1, 1.0, %v10579_v22 }
 0x402   : > { %v5016_v13 = vsub.s32 %v10045_v47, %v5015_v7  ;;  %v5408_v8 = vshll.u32 %v10126_v3, 16  ;;  %vm5410_vm10 = vc.u32 %v5402_v18, %v5406_v46  ;;  %v5653_v21 = vsel %vm10135_vm12, %v5617_v62, %v10110_v44 }
 0x403   : > { %v10146_v63 = vpop.f32.mrf.mxu2  ;;  %v10157_v23 = vsub.s32 %v10021_v11, %v5247_v42  ;;  %v5412_v37 = vadd.s32 %v5406_v46, %v5402_v18  ;;  %v10160_v59 = vadd.s32 224, %v8539_v1  ;;  %v5405_v43 = vmul.u32 58254, %v5400_v36 }
 0x404   : > { %4392 = vst [vmem:[#allocation4 + $0xd0] sm:$0xff] %v10146_v63  ;;  %vm5502_vm0 = vcmp.ne.s32.totalorder %v5016_v13, 0  ;;  %vm5538_vm13 = vcmp.lt.s32.totalorder %v5016_v13, 0  ;;  %v5610_v12 = vadd.s32 18, %v5016_v13  ;;  %v5380_v2 = vshrl.u32 %v10095_v5, 16 }
 0x405   : > { %vm5574_vm11 = vmand %vm5538_vm13, %vm5502_vm0  ;;  %v5389_v51 = vadd.s32 %v5388_v14, %v5378_v33  ;;  %v5411_v44 = vsel %vm5410_vm10, 1, %v6379_v0  ;;  %vm5414_vm4 = vc.u32 %v5412_v37, %v5408_v8  ;;  %v5254_v11 = vand.u32 65535, %v10160_v59 }
 0x406   : > { %v4321_v20 = vpop.f32.mrf.mxu1  ;;  %v5646_v38 = vsel %vm5574_vm11, %v5610_v12, %v5016_v13  ;;  %v5255_v27 = vshrl.u32 %v10160_v59, 16  ;;  %v10167_v28 = vmul.f32 %v6277_v39, %v9984_v56  ;;  %v10170_v24 = vadd.s32 18, %v10141_v57 }
 0x407   : > { %4384 = vst [vmem:[#allocation4 + $0x90] sm:$0xff] %v4321_v20  ;;  %v5789_v47 = vmul.f32 %v6270_v61, %v4321_v20  ;;  %v10173_v52 = vadd.s32 18, %v10144_v31  ;;  %vm5682_vm14 = vcmp.lt.s32.totalorder %v5646_v38, 16  ;;  %vm10175_vm2 = vcmp.lt.s32.totalorder %v5653_v21, 16 }
 0x408   : > { %v5413_v32 = vadd.s32 %v5411_v44, %v5405_v43  ;;  %v5257_v53 = vmul.u32 14564, %v5254_v11  ;;  %v5258_v55 = vmul.u32 58254, %v5254_v11  ;;  %v5390_v50 = vadd.s32 %v5389_v51, %v5380_v2 }
 0x409   : > { %v5875_v29 = vmul.f32 %v5789_v47, %v5789_v47  ;;  %v5415_v56 = vsel %vm5414_vm4, 1, %v6379_v0  ;;  %v10182_v36 = vmul.u32 14564, %v5255_v27  ;;  %vm5510_vm5 = vcmp.ne.s32.totalorder %v10157_v23, 0 }
 0x40a   : > { %v6271_v62 = vsel %vm5682_vm14, 1.0, %v10579_v22  ;;  %v5261_v30 = vshll.u32 %v5258_v55, 16  ;;  %v10188_v19 = vadd.s32 232, %v8539_v1  ;;  %vm5546_vm3 = vcmp.lt.s32.totalorder %v10157_v23, 0 }
 0x40b   : > { %v10179_v9 = vpop.f32.mrf.mxu2  ;;  %v5618_v18 = vadd.s32 18, %v10157_v23  ;;  %v5260_v42 = vmul.u32 58254, %v5255_v27  ;;  %v5263_v45 = vshll.u32 %v10182_v36, 16  ;;  %v5407_v15 = vshrl.u32 %v10123_v58, 16  ;;  %vm10202_vm7 = vmand %vm5546_vm3, %vm5510_vm5 }
 0x40c   : > { %4393 = vst [vmem:[#allocation4 + $0xd8] sm:$0xff] %v10179_v9  ;;  %v5417_v7 = vadd.s32 %v5415_v56, %v5413_v32  ;;  %vm5265_vm8 = vc.u32 %v5257_v53, %v5261_v30  ;;  %v5267_v46 = vadd.s32 %v5261_v30, %v5257_v53  ;;  %v5830_v33 = vadd.f32 %v10007_v48, %v5789_v47 }
 0x40d   : > { %v5910_v14 = vadd.f32 %v10009_v25, %v5875_v29  ;;  %v5391_v13 = vshrl.u32 %v5390_v50, 4  ;;  %v5262_v8 = vshrl.u32 %v5258_v55, 16  ;;  %v5266_v21 = vsel %vm5265_vm8, 1, %v6379_v0 }
 0x40e   : > { %v4323_v39 = vpop.f32.mrf.mxu1  ;;  %vm5269_vm9 = vc.u32 %v5267_v46, %v5263_v45  ;;  %v5283_v37 = vand.u32 65535, %v10188_v19  ;;  %v5268_v25 = vadd.s32 %v5266_v21, %v5260_v42  ;;  %v5284_v12 = vshrl.u32 %v10188_v19, 16 }
 0x40f   : > { %4385 = vst [vmem:[#allocation4 + $0x98] sm:$0xff] %v4323_v39  ;;  %v5790_v61 = vmul.f32 %v6271_v62, %v4323_v39  ;;  %v6278_v43 = vsel %vm10175_vm2, 1.0, %v10579_v22  ;;  %v5409_v47 = vshrl.u32 %v10126_v3, 16  ;;  %v5418_v2 = vadd.s32 %v5417_v7, %v5407_v15 }
 0x410   : > { %v5270_v51 = vsel %vm5269_vm9, 1, %v6379_v0  ;;  %vm5513_vm15 = vcmp.ne.s32.totalorder %v10141_v57, 0  ;;  %vm5549_vm6 = vcmp.lt.s32.totalorder %v10141_v57, 0  ;;  %v5392_v32 = vmul.u32 18, %v5391_v13 }
 0x411   : > { %v5831_v48 = vadd.f32 %v5830_v33, %v5790_v61  ;;  %v5876_v20 = vmul.f32 %v5790_v61, %v5790_v61  ;;  %v5272_v53 = vadd.s32 %v5270_v51, %v5268_v25  ;;  %vm5514_vm1 = vcmp.ne.s32.totalorder %v10144_v31, 0  ;;  %vm10264_vm14 = vmand %vm5549_vm6, %vm5513_vm15 }
 0x412   : > { %vm5550_vm12 = vcmp.lt.s32.totalorder %v10144_v31, 0  ;;  %v5654_v3 = vsel %vm10202_vm7, %v5618_v18, %v10157_v23  ;;  %v5264_v55 = vshrl.u32 %v10182_v36, 16  ;;  %v5287_v29 = vmul.u32 58254, %v5283_v37 }
 0x413   : > { %v5962_v44 = vld [vmem:[#allocation4 + $0xd0] ss:$2 sm:$0xff]  ;;  %v5998_v38 = vld [vmem:[#allocation4 + $0xd1] ss:$2 sm:$0xff]  ;;  %v5832_v11 = vadd.f32 %v5831_v48, %v9642_v34  ;;  %v5911_v27 = vadd.f32 %v5910_v14, %v5876_v20  ;;  %v5273_v56 = vadd.s32 %v5272_v53, %v5262_v8  ;;  %v10223_v62 = vmul.u32 14564, %v5284_v12  ;;  %vm10275_vm2 = vmand %vm5550_vm12, %vm5514_vm1 }
 0x414   : > { %v6020_v5 = vadd.f32 %v5998_v38, %v5962_v44  ;;  %v5881_v30 = vmul.f32 %v10130_v10, %v10130_v10  ;;  %v5882_v42 = vmul.f32 %v10167_v28, %v10167_v28  ;;  %v5419_v45 = vadd.s32 %v5418_v2, %v5409_v47 }
 0x415   : > { %v5833_v50 = vadd.f32 %v5832_v11, %v9767_v35  ;;  %v5912_v34 = vadd.f32 %v5911_v27, %v9678_v49  ;;  %v5286_v36 = vmul.u32 14564, %v5283_v37  ;;  %v10233_v15 = vsub.s32 %v10059_v17, %v5392_v32 }
 0x416   : > { %6038 = vst [vmem:[%s8991_s9 + $0x68] sm:$0xff] %v6020_v5  ;;  %v5954_v23 = vld [vmem:[#allocation4 + $0x90] ss:$2 sm:$0xff]  ;;  %v5990_v18 = vld [vmem:[#allocation4 + $0x91] ss:$2 sm:$0xff]  ;;  %vm10235_vm10 = vcmp.lt.s32.totalorder %v5654_v3, 16  ;;  %v5274_v46 = vadd.s32 %v5273_v56, %v5264_v55  ;;  %v10240_v61 = vmul.f32 %v6278_v43, %v10146_v63  ;;  %v5657_v53 = vsel %vm10264_vm14, %v10170_v24, %v10141_v57 }
 0x417   : > { %v5834_v39 = vadd.f32 %v5833_v50, %v9904_v41  ;;  %v5913_v35 = vadd.f32 %v5912_v34, %v9867_v54  ;;  %v6016_v49 = vadd.f32 %v5990_v18, %v5954_v23  ;;  %v5289_v33 = vmul.u32 58254, %v5284_v12 }
 0x418   : > { %v5290_v14 = vshll.u32 %v5287_v29, 16  ;;  %v5292_v54 = vshll.u32 %v10223_v62, 16  ;;  %v5420_v8 = vshrl.u32 %v5419_v45, 4  ;;  %v5275_v17 = vshrl.u32 %v5274_v46, 4 }
 0x419   : > { %v5835_v13 = vadd.f32 %v5834_v39, %v10071_v16  ;;  %v5914_v41 = vadd.f32 %v5913_v35, %v9957_v40  ;;  %6034 = vst [vmem:[%s8991_s9 + $0x48] sm:$0xff] %v6016_v49  ;;  %vm5515_vm13 = vcmp.ne.s32.totalorder %v10233_v15, 0  ;;  %vm5551_vm11 = vcmp.lt.s32.totalorder %v10233_v15, 0 }
 0x41a   : > { %vm5294_vm0 = vc.u32 %v5286_v36, %v5290_v14  ;;  %v5296_v21 = vadd.s32 %v5290_v14, %v5286_v36  ;;  %v5276_v40 = vmul.u32 18, %v5275_v17  ;;  %v5291_v16 = vshrl.u32 %v5287_v29, 16  ;;  %vm10308_vm9 = vmand %vm5551_vm11, %vm5515_vm13 }
 0x41b   : > { %v5915_v37 = vadd.f32 %v5914_v41, %v10107_v60  ;;  %v10247_v58 = vpop.f32.mrf.mxu3  ;;  %v5836_v63 = vadd.f32 %v5835_v13, %v10130_v10  ;;  %v5295_v48 = vsel %vm5294_vm0, 1, %v6379_v0  ;;  %v10258_v60 = vadd.s32 272, %v8539_v1 }
 0x41c   : > { %4398 = vst [vmem:[#allocation4 + $0x100] sm:$0xff] %v10247_v58  ;;  %v5297_v20 = vadd.s32 %v5295_v48, %v5289_v33  ;;  %vm5298_vm4 = vc.u32 %v5296_v21, %v5292_v54  ;;  %v5421_v43 = vmul.u32 18, %v5420_v8  ;;  %v5277_v47 = vsub.s32 %v10160_v59, %v5276_v40 }
 0x41d   : > { %v10255_v25 = vadd.f32 %v5836_v63, %v10167_v28  ;;  %v5916_v12 = vadd.f32 %v5915_v37, %v5881_v30  ;;  %v5293_v2 = vshrl.u32 %v10223_v62, 16  ;;  %v5299_v28 = vsel %vm5298_vm4, 1, %v6379_v0 }
 0x41e   : > { %v5301_v38 = vadd.s32 %v5299_v28, %v5297_v20  ;;  %v5428_v11 = vand.u32 65535, %v10258_v60  ;;  %v10283_v27 = vadd.s32 280, %v8539_v1  ;;  %vm5511_vm5 = vcmp.ne.s32.totalorder %v5277_v47, 0 }
 0x41f   : > { %v10279_v44 = vadd.f32 %v5916_v12, %v5882_v42  ;;  %vm5547_vm3 = vcmp.lt.s32.totalorder %v5277_v47, 0  ;;  %v5619_v59 = vadd.s32 18, %v5277_v47  ;;  %v5429_v32 = vshrl.u32 %v10258_v60, 16 }
 0x420   : > { %v6279_v3 = vsel %vm10235_vm10, 1.0, %v10579_v22  ;;  %v10294_v5 = vadd.s32 18, %v10233_v15  ;;  %vm10296_vm8 = vmand %vm5547_vm3, %vm5511_vm5  ;;  %v5302_v55 = vadd.s32 %v5301_v38, %v5291_v16  ;;  %v5658_v29 = vsel %vm10275_vm2, %v10173_v52, %v10144_v31 }
 0x421   : > { %v5431_v24 = vmul.u32 14564, %v5428_v11  ;;  %v5432_v50 = vmul.u32 58254, %v5428_v11  ;;  %v5433_v34 = vmul.u32 14564, %v5429_v32  ;;  %v5883_v56 = vmul.f32 %v10240_v61, %v10240_v61 }
 0x422   : > { %v5655_v30 = vsel %vm10296_vm8, %v5619_v59, %v5277_v47  ;;  %v5303_v31 = vadd.s32 %v5302_v55, %v5293_v2  ;;  %v5457_v52 = vand.u32 65535, %v10283_v27  ;;  %v10320_v42 = vmul.f32 %v6279_v3, %v10179_v9 }
 0x423   : > { %v10314_v62 = vpop.f32.mrf.mxu3  ;;  %v10324_v23 = vsub.s32 %v10103_v4, %v5421_v43  ;;  %v5434_v18 = vmul.u32 58254, %v5429_v32  ;;  %v5435_v45 = vshll.u32 %v5432_v50, 16  ;;  %vm10326_vm7 = vcmp.lt.s32.totalorder %v5657_v53, 16 }
 0x424   : > { %4399 = vst [vmem:[#allocation4 + $0x108] sm:$0xff] %v10314_v62  ;;  %vm10330_vm15 = vcmp.lt.s32.totalorder %v5658_v29, 16  ;;  %v5659_v9 = vsel %vm10308_vm9, %v10294_v5, %v10233_v15  ;;  %v5304_v35 = vshrl.u32 %v5303_v31, 4  ;;  %v5437_v49 = vshll.u32 %v5433_v34, 16 }
 0x425   : > { %v5458_v4 = vshrl.u32 %v10283_v27, 16  ;;  %vm5691_vm6 = vcmp.lt.s32.totalorder %v5655_v30, 16  ;;  %vm5439_vm1 = vc.u32 %v5431_v24, %v5435_v45  ;;  %v5441_v7 = vadd.s32 %v5435_v45, %v5431_v24 }
 0x426   : > { %v5460_v46 = vmul.u32 14564, %v5457_v52  ;;  %v5305_v33 = vmul.u32 18, %v5304_v35  ;;  %v5440_v14 = vsel %vm5439_vm1, 1, %v6379_v0  ;;  %v5461_v13 = vmul.u32 58254, %v5457_v52 }
 0x427   : > { %v10340_v41 = vmul.u32 14564, %v5458_v4  ;;  %vm5516_vm12 = vcmp.ne.s32.totalorder %v10324_v23, 0  ;;  %v5436_v54 = vshrl.u32 %v5432_v50, 16  ;;  %v5442_v8 = vadd.s32 %v5440_v14, %v5434_v18 }
 0x428   : > { %vm5443_vm10 = vc.u32 %v5441_v7, %v5437_v49  ;;  %v6280_v15 = vsel %vm5691_vm6, 1.0, %v10579_v22  ;;  %v5306_v17 = vsub.s32 %v10188_v19, %v5305_v33  ;;  %v5464_v37 = vshll.u32 %v5461_v13, 16  ;;  %v6354_v49 = vld [vmem:[%s9861_s17] sm:$0xff] }
 0x429   : > { %v5444_v21 = vsel %vm5443_vm10, 1, %v6379_v0  ;;  %v5438_v63 = vshrl.u32 %v5433_v34, 16  ;;  %v5463_v40 = vmul.u32 58254, %v5458_v4  ;;  %v5466_v16 = vshll.u32 %v10340_v41, 16 }
 0x42a   : > { %v5446_v48 = vadd.s32 %v5444_v21, %v5442_v8  ;;  %vm5512_vm0 = vcmp.ne.s32.totalorder %v5306_v17, 0  ;;  %vm5548_vm13 = vcmp.lt.s32.totalorder %v5306_v17, 0  ;;  %vm5468_vm11 = vc.u32 %v5460_v46, %v5464_v37 }
 0x42b   : > { %v5968_v20 = vld [vmem:[#allocation4 + $0x100] ss:$2 sm:$0xff]  ;;  %v6004_v12 = vld [vmem:[#allocation4 + $0x101] ss:$2 sm:$0xff]  ;;  %v4346_v10 = vpop.f32.mrf.mxu2  ;;  %v5470_v43 = vadd.s32 %v5464_v37, %v5460_v46  ;;  %vm5552_vm4 = vcmp.lt.s32.totalorder %v10324_v23, 0  ;;  %vm5584_vm14 = vmand %vm5548_vm13, %vm5512_vm0  ;;  %v5620_v19 = vadd.s32 18, %v5306_v17  ;;  %v5838_v11 = vadd.f32 %v10255_v25, %v10240_v61 }
 0x42c   : > { %v6023_v47 = vadd.f32 %v6004_v12, %v5968_v20  ;;  %4394 = vst [vmem:[#allocation4 + $0xe0] sm:$0xff] %v4346_v10  ;;  %v5447_v2 = vadd.s32 %v5446_v48, %v5436_v54  ;;  %v5624_v28 = vadd.s32 18, %v10324_v23  ;;  %v5799_v51 = vmul.f32 %v6280_v15, %v4346_v10  ;;  %vm10358_vm5 = vmand %vm5552_vm4, %vm5516_vm12 }
 0x42d   : > { %v5469_v38 = vsel %vm5468_vm11, 1, %v6379_v0  ;;  %vm5472_vm2 = vc.u32 %v5470_v43, %v5466_v16  ;;  %v5918_v59 = vadd.f32 %v10279_v44, %v5883_v56  ;;  %v5656_v32 = vsel %vm5584_vm14, %v5620_v19, %v5306_v17 }
 0x42e   : > { %6041 = vst [vmem:[%s8991_s9 + $0x80] sm:$0xff] %v6023_v47  ;;  %v5448_v53 = vadd.s32 %v5447_v2, %v5438_v63  ;;  %vm5692_vm3 = vcmp.lt.s32.totalorder %v5656_v32, 16  ;;  %v5465_v5 = vshrl.u32 %v5461_v13, 16  ;;  %v5471_v1 = vadd.s32 %v5469_v38, %v5463_v40 }
 0x42f   : > { %v5473_v55 = vsel %vm5472_vm2, 1, %v6379_v0  ;;  %v6282_v61 = vsel %vm10326_vm7, 1.0, %v10579_v22  ;;  %v6283_v25 = vsel %vm10330_vm15, 1.0, %v10579_v22  ;;  %v5884_v44 = vmul.f32 %v10320_v42, %v10320_v42 }
 0x430   : > { %v5449_v29 = vshrl.u32 %v5448_v53, 4  ;;  %v5885_v57 = vmul.f32 %v5799_v51, %v5799_v51  ;;  %v6281_v24 = vsel %vm5692_vm3, 1.0, %v10579_v22  ;;  %v5467_v50 = vshrl.u32 %v10340_v41, 16 }
 0x431   : > { %v5475_v34 = vadd.s32 %v5473_v55, %v5471_v1  ;;  %vm10373_vm8 = vcmp.lt.s32.totalorder %v5659_v9, 16  ;;  %v5660_v56 = vsel %vm10358_vm5, %v5624_v28, %v10324_v23  ;;  %v5839_v30 = vadd.f32 %v5838_v11, %v10320_v42 }
 0x432   : > { %v5450_v31 = vmul.u32 18, %v5449_v29  ;;  %v5801_v52 = vmul.f32 %v6282_v61, %v10047_v6  ;;  %v5919_v18 = vadd.f32 %v5918_v59, %v5884_v44  ;;  %v5802_v36 = vmul.f32 %v6283_v25, %v10081_v26 }
 0x433   : > { %v4348_v45 = vpop.f32.mrf.mxu2  ;;  %v5476_v22 = vadd.s32 %v5475_v34, %v5465_v5  ;;  %v5840_v39 = vadd.f32 %v5839_v30, %v5799_v51  ;;  %v6284_v4 = vsel %vm10373_vm8, 1.0, %v6354_v49  ;;  %vm10387_vm9 = vcmp.lt.s32.totalorder %v5660_v56, 16 }
 0x434   : > { %4395 = vst [vmem:[#allocation4 + $0xe8] sm:$0xff] %v4348_v45  ;;  %v5800_v9 = vmul.f32 %v6281_v24, %v4348_v45  ;;  %v5451_v35 = vsub.s32 %v10258_v60, %v5450_v31  ;;  %v5920_v42 = vadd.f32 %v5919_v18, %v5885_v57  ;;  %v5887_v14 = vmul.f32 %v5801_v52, %v5801_v52  ;;  %v5812_v45 = vld [vmem:[%s9861_s17] sm:$0x1] }
 0x435   : > { %v5477_v6 = vadd.s32 %v5476_v22, %v5467_v50  ;;  %v5803_v60 = vmul.f32 %v6284_v4, %v10247_v58  ;;  %v6285_v54 = vsel %vm10387_vm9, 1.0, %v6354_v49  ;;  %v5888_v17 = vmul.f32 %v5802_v36, %v5802_v36 }
 0x436   : > { %v5841_v7 = vadd.f32 %v5840_v39, %v5800_v9  ;;  %v5886_v46 = vmul.f32 %v5800_v9, %v5800_v9  ;;  %vm5517_vm7 = vcmp.ne.s32.totalorder %v5451_v35, 0  ;;  %vm5553_vm15 = vcmp.lt.s32.totalorder %v5451_v35, 0  ;;  %v5856_v39 = vld [vmem:[%s9861_s17 + $0x1] sm:$0x1] }
 0x437   : > { %vm5589_vm6 = vmand %vm5553_vm15, %vm5517_vm7  ;;  %v5625_v26 = vadd.s32 18, %v5451_v35  ;;  %v5478_v33 = vshrl.u32 %v5477_v6, 4  ;;  %v5889_v58 = vmul.f32 %v5803_v60, %v5803_v60  ;;  %v5804_v20 = vmul.f32 %v6285_v54, %v10314_v62 }
 0x438   : > { %v5842_v13 = vadd.f32 %v5841_v7, %v5801_v52  ;;  %v5921_v41 = vadd.f32 %v5920_v42, %v5886_v46 }
 0x439   : > { %v5661_v8 = vsel %vm5589_vm6, %v5625_v26, %v5451_v35  ;;  %v5479_v15 = vmul.u32 18, %v5478_v33 }
 0x43a   : > { %v5843_v21 = vadd.f32 %v5842_v13, %v5802_v36  ;;  %v5922_v37 = vadd.f32 %v5921_v41, %v5887_v14  ;;  %vm10394_vm1 = vcmp.lt.s32.totalorder %v5661_v8, 16 }
 0x43b   : > { %v5964_v63 = vld [vmem:[#allocation4 + $0xe0] ss:$2 sm:$0xff]  ;;  %v6000_v48 = vld [vmem:[#allocation4 + $0xe1] ss:$2 sm:$0xff]  ;;  %v5480_v16 = vsub.s32 %v10283_v27, %v5479_v15  ;;  %v6286_v2 = vsel %vm10394_vm1, 1.0, %v6354_v49  ;;  %v5890_v27 = vmul.f32 %v5804_v20, %v5804_v20 }
 0x43c   : > { %v5923_v12 = vadd.f32 %v5922_v37, %v5888_v17  ;;  %v6021_v10 = vadd.f32 %v6000_v48, %v5964_v63  ;;  %v4361_v43 = vpop.f32.mrf.mxu3  ;;  %v5844_v47 = vadd.f32 %v5843_v21, %v5803_v60 }
 0x43d   : > { %4400 = vst [vmem:[#allocation4 + $0x110] sm:$0xff] %v4361_v43  ;;  %vm5518_vm12 = vcmp.ne.s32.totalorder %v5480_v16, 0  ;;  %vm5554_vm10 = vcmp.lt.s32.totalorder %v5480_v16, 0  ;;  %v5626_v19 = vadd.s32 18, %v5480_v16  ;;  %v5805_v38 = vmul.f32 %v6286_v2, %v4361_v43 }
 0x43e   : > { %6039 = vst [vmem:[%s8991_s9 + $0x70] sm:$0xff] %v6021_v10  ;;  %vm5590_vm0 = vmand %vm5554_vm10, %vm5518_vm12  ;;  %v5924_v28 = vadd.f32 %v5923_v12, %v5889_v58  ;;  %v5845_v11 = vadd.f32 %v5844_v47, %v5804_v20 }
 0x43f   : > { %v5662_v51 = vsel %vm5590_vm0, %v5626_v19, %v5480_v16  ;;  %v5891_v3 = vmul.f32 %v5805_v38, %v5805_v38 }
 0x440   : > { %vm5698_vm13 = vcmp.lt.s32.totalorder %v5662_v51, 16  ;;  %v5925_v59 = vadd.f32 %v5924_v28, %v5890_v27  ;;  %v5846_v53 = vadd.f32 %v5845_v11, %v5805_v38 }
 0x441   : > { %v6287_v62 = vsel %vm5698_vm13, 1.0, %v6354_v49 }
 0x442   : > { %v5926_v1 = vadd.f32 %v5925_v59, %v5891_v3 }
 0x444   : > { %v4363_v32 = vpop.f32.mrf.mxu3 }
 0x445   : > { %4401 = vst [vmem:[#allocation4 + $0x118] sm:$0xff] %v4363_v32  ;;  %v5806_v5 = vmul.f32 %v6287_v62, %v4363_v32 }
 0x447   : > { %v5847_v55 = vadd.f32 %v5846_v53, %v5806_v5  ;;  %v5892_v61 = vmul.f32 %v5806_v5, %v5806_v5 }
 0x449   : > { %v5848_v25 = vrot.slane %v5847_v55, 4  ;;  %v5927_v44 = vadd.f32 %v5926_v1, %v5892_v61 }
 0x44b   : > { %v5849_v29 = vadd.f32 %v5848_v25, %v5847_v55  ;;  %v5928_v57 = vrot.slane %v5927_v44, 4 }
 0x44c   : > { %v5970_v24 = vld [vmem:[#allocation4 + $0x110] ss:$2 sm:$0xff]  ;;  %v6006_v50 = vld [vmem:[#allocation4 + $0x111] ss:$2 sm:$0xff] }
 0x44d   : > { %v5850_v34 = vrot.slane %v5849_v29, 2  ;;  %v5929_v0 = vadd.f32 %v5928_v57, %v5927_v44  ;;  %v6024_v56 = vadd.f32 %v6006_v50, %v5970_v24 }
 0x44f   : > { %v5851_v30 = vadd.f32 %v5850_v34, %v5849_v29  ;;  %v5930_v31 = vrot.slane %v5929_v0, 2  ;;  %6042 = vst [vmem:[%s8991_s9 + $0x88] sm:$0xff] %v6024_v56 }
 0x451   : > { %v5852_v52 = vrot.slane %v5851_v30, 1  ;;  %v5931_v18 = vadd.f32 %v5930_v31, %v5929_v0 }
 0x453   : > { %v5853_v22 = vadd.f32 %v5852_v52, %v5851_v30  ;;  %v5932_v36 = vrot.slane %v5931_v18, 1 }
 0x455   : > { %v5854_v9 = vadd.f32 %v5853_v22, %v5812_v45  ;;  %v5933_v35 = vadd.f32 %v5932_v36, %v5931_v18 }
 0x457   : > { %5855 = vst [vmem:[%s9861_s17] sm:$0x1] %v5854_v9  ;;  %v5934_v49 = vadd.f32 %v5933_v35, %v5856_v39 }
 0x459   : > { %5935 = vst [vmem:[%s9861_s17 + $0x1] sm:$0x1] %v5934_v49 }
 0x45a PF: > { %s14_s14 = sadd.s32 1, %s6377_s14   ;;  %s10652_s12 = smov %s6373_s13 }
 0x45b   : > { %p11_p5 = scmp.ge.s32.totalorder %s14_s14, 4   ;;  %s10653_s13 = smov %s10655_s15 }
 0x45d   :  { %13 = sbr.rel (!%p11_p5) target bundleno = 2 (0x2), region = 109 }

</bundles_post_ra>
